<compile_context>
chip_gen: v6e
topology: v6e:2x2x1
jax: 0.10.0
libtpu: 0.0.40
codegen_flags: <defaults>
</compile_context>

<pallas_src>
import functools

import jax
import jax.numpy as jnp
import numpy as np
from jax.experimental import pallas as pl
from jax.experimental.pallas import tpu as pltpu

_LANE = 128   # channel padding target (lane width)
_COL0 = 8     # sublane-aligned column offset of real data inside the scratch


def _zero_halo(buf, H, W, Wp):
    """Zero only the 'same'-padding halo of an (H+2, Wp, C) activation buffer.

    Only columns _COL0-1 / _COL0+W and rows 0 / H+1 strictly need zeros; an
    aligned 8-wide strip store costs the same vst slots as a masked single-column
    store, so zero the aligned strips (rows 1..H interiors are never touched).
    """
    C = buf.shape[-1]
    zrow = jnp.zeros((1, Wp, C), dtype=buf.dtype)
    buf[0:1, :, :] = zrow                      # top halo row
    buf[H + 1:H + 2, :, :] = zrow              # bottom halo row
    zcol = jnp.zeros((H + 2, _COL0, C), dtype=buf.dtype)
    buf[:, 0:_COL0, :] = zcol                  # left strip (contains halo col _COL0-1)
    buf[:, _COL0 + W:Wp, :] = zcol             # right strip (contains halo col _COL0+W)


# ---------------------------------------------------------------------------
# Fused kernel: n_layers x (conv3x3 'same' + bias + ReLU) -> 2x2/2 max pool
# ---------------------------------------------------------------------------
def _conv_block_fused_kernel(x_ref, w_ref, b_ref, o_ref,
                             act_a, act_b, acc_ref, pool_ref):
    """One batch element.

    x_ref   : (1, H, W, cin)       input at its real channel count (no lane pad)
    w_ref   : (L*9, C, C) bf16     per-layer 3x3 taps, HWIO order, channel-padded
    b_ref   : (L, 1, C)   f32      per-layer bias, channel-padded
    o_ref   : (1, Ho*Wo, C)        pooled output, flattened spatial, lane-dense
    act_a/b : (H+2, Wp, C) f32     VMEM ping/pong activation buffers (with halo)
    acc_ref : (H*Wp, C)   f32      VMEM conv accumulator
    pool_ref: (Ho*W, C)   f32      VMEM staging for the pool column step
    """
    H, W, cin = x_ref.shape[1], x_ref.shape[2], x_ref.shape[3]
    Wp = act_a.shape[1]
    C = act_a.shape[2]
    L = b_ref.shape[0]
    Ho, Wo = H // 2, W // 2
    M = H * Wp

    # ---- per-step scratch init (halo only; interiors get overwritten) --------
    if cin < C:
        # Input fills only cin of C lanes; padding lanes of the interior must be
        # zero (stale NaN/Inf times the zero-padded weight rows would still give
        # NaN), so clear the whole input buffer -- a few dozen aligned vst only.
        act_a[...] = jnp.zeros_like(act_a)
    else:
        _zero_halo(act_a, H, W, Wp)
    if L > 1:
        _zero_halo(act_b, H, W, Wp)
    # NOTE: do NOT gate this on pl.program_id(0)==0 -- under megacore 'parallel'
    # the second core's scratch would never be initialized.

    # Real-cin input -> interior of buffer A (sublane-aligned, masked lane store).
    act_a[1:H + 1, _COL0:_COL0 + W, :cin] = x_ref[0].astype(act_a.dtype)

    bufs = (act_a, act_b)
    a = None
    for layer in range(L):                         # static unroll (L is small)
        src = bufs[layer % 2]
        # 3x3 'same' conv as 9 full-width matmuls over contiguous row bands; the
        # per-tap column shift is applied to the result with an XLU roll and
        # accumulated in a VMEM f32 accumulator (no gather copies, no vreg spill).
        for kh in range(3):
            lhs = src[kh:kh + H].reshape(M, C).astype(jnp.bfloat16)  # free view + cast
            for kw in range(3):
                r = jnp.dot(lhs, w_ref[layer * 9 + kh * 3 + kw],
                            preferred_element_type=jnp.float32)      # (M, C) f32
                shift = (1 - kw) % M            # flat roll by (1 - kw) columns
                if shift:
                    r = pltpu.roll(r, shift, 0)
                if kh == 0 and kw == 0:
                    acc_ref[...] = r
                else:
                    acc_ref[...] += r

        # Bias + ReLU on the interior columns only (f32 epilogue).
        a = acc_ref[...].reshape(H, Wp, C)[:, _COL0:_COL0 + W, :]
        a = jnp.maximum(a + b_ref[layer].reshape(1, 1, C), 0.0)

        if layer + 1 < L:
            # Aligned lane-dense interior store; halo stays zero.
            bufs[(layer + 1) % 2][1:H + 1, _COL0:_COL0 + W, :] = a
        else:
            # ---- fused 2x2 / stride-2 max-pool epilogue -----------------------
            ar = a.reshape(Ho, 2, W, C)                  # leading-dim split (free)
            rmax = jnp.maximum(ar[:, 0], ar[:, 1])       # (Ho, W, C) row-pair max
            pool_ref[...] = rmax.reshape(Ho * W, C)      # free merge (W % 8 == 0)
            even = pool_ref[pl.ds(0, Ho * Wo, 2), :]     # columns 0, 2, 4, ...
            odd = pool_ref[pl.ds(1, Ho * Wo, 2), :]      # columns 1, 3, 5, ...
            o_ref[0] = jnp.maximum(even, odd).astype(o_ref.dtype)


# ---------------------------------------------------------------------------
# One-time parameter packing (hoisted out of the forward path)
# ---------------------------------------------------------------------------
def prepare_params(weights, biases, cpad=_LANE):
    """PyTorch (Cout, Cin, 3, 3)/(Cout,) -> (L*9, C, C) bf16, (L, 1, C) f32."""
    ws, bs = [], []
    for w, b in zip(weights, biases):
        cout, cin = w.shape[0], w.shape[1]
        w_hwio = jnp.transpose(w, (2, 3, 1, 0))                    # (3,3,Cin,Cout)
        w_pad = jnp.zeros((3, 3, cpad, cpad), jnp.float32)
        w_pad = w_pad.at[:, :, :cin, :cout].set(w_hwio)
        ws.append(w_pad.reshape(9, cpad, cpad).astype(jnp.bfloat16))   # bf16 MXU operands
        b_pad = jnp.zeros((1, cpad), jnp.float32).at[0, :cout].set(b)
        bs.append(b_pad)
    return jnp.concatenate(ws, axis=0), jnp.stack(bs, axis=0)


# ---------------------------------------------------------------------------
# Forward wrapper
# ---------------------------------------------------------------------------
@functools.partial(jax.jit, static_argnames=("out_channels",))
def conv_block_forward(x_nchw, w_packed, b_packed, out_channels):
    """x_nchw: (N, Cin, H, W) -> (N, out_channels, H//2, W//2)."""
    N, cin, H, W = x_nchw.shape
    C = w_packed.shape[-1]
    L = b_packed.shape[0]
    assert L >= 1, "need at least one conv layer"
    assert H % 2 == 0 and W % 2 == 0, "2x2/2 max pool needs even H and W"
    assert W % 8 == 0, "sublane-aligned interior layout requires W % 8 == 0"
    assert cin <= C and out_channels <= C
    Ho, Wo = H // 2, W // 2
    Wp = W + 2 * _COL0                       # scratch width (aligned halo trick)

    x = jnp.transpose(x_nchw, (0, 2, 3, 1))  # NCHW -> NHWC, real cin (no lane pad)

    # NOTE(scaling): at realistic H/W/C tile H into row bands with an L-row halo
    # (grid=(N, H_tiles), both axes "parallel" so a v7x chip's 2 TCs are fed even
    # for N==1) and set vmem_limit_bytes explicitly for v7x's 64 MiB VMEM; on
    # v6e fold several images / row bands into M per weight push for the 256-wide
    # MXU.  The constant weight/bias blocks could be single-buffered
    # (pipeline_mode=pl.Buffered(1)) to reclaim ~0.6 MiB; left default here since
    # total VMEM use is ~2.7 MiB.
    out = pl.pallas_call(
        _conv_block_fused_kernel,
        out_shape=jax.ShapeDtypeStruct((N, Ho * Wo, C), x_nchw.dtype),
        grid_spec=pltpu.PrefetchScalarGridSpec(
            num_scalar_prefetch=0,
            grid=(N,),
            in_specs=[
                pl.BlockSpec((1, H, W, cin), lambda n: (n, 0, 0, 0)),
                pl.BlockSpec((9 * L, C, C), lambda n: (0, 0, 0)),
                pl.BlockSpec((L, 1, C), lambda n: (0, 0, 0)),
            ],
            out_specs=pl.BlockSpec((1, Ho * Wo, C), lambda n: (n, 0, 0)),
            scratch_shapes=[
                pltpu.VMEM((H + 2, Wp, C), jnp.float32),   # act_a (ping)
                pltpu.VMEM((H + 2, Wp, C), jnp.float32),   # act_b (pong)
                pltpu.VMEM((H * Wp, C), jnp.float32),      # conv accumulator
                pltpu.VMEM((Ho * W, C), jnp.float32),      # pool staging
            ],
        ),
        compiler_params=pltpu.CompilerParams(
            dimension_semantics=("parallel",)),
    )(x, w_packed, b_packed)

    out = out.reshape(N, Ho, Wo, C)[..., :out_channels]     # drop lane padding
    return jnp.transpose(out, (0, 3, 1, 2))                 # NHWC -> NCHW


# ---------------------------------------------------------------------------
# Pure-JAX f32 reference (correctness check)
# ---------------------------------------------------------------------------
def conv_block_ref(x_nchw, weights, biases):
    x = x_nchw
    for w, b in zip(weights, biases):
        x = jax.lax.conv_general_dilated(
            x, w, window_strides=(1, 1), padding="SAME",
            dimension_numbers=("NCHW", "OIHW", "NCHW"))
        x = x + b.reshape(1, -1, 1, 1)
        x = jnp.maximum(x, 0.0)
    x = jax.lax.reduce_window(
        x, -jnp.inf, jax.lax.max,
        window_dimensions=(1, 1, 2, 2),
        window_strides=(1, 1, 2, 2),
        padding="VALID")
    return x


# ---------------------------------------------------------------------------
# Main
# ---------------------------------------------------------------------------
if __name__ == "__main__":
    N, in_channels, H, W = 2, 4, 16, 16
    out_channels = 8
    n_layers = 2

    key = jax.random.PRNGKey(0)
    kx, *kws = jax.random.split(key, 1 + 2 * n_layers)

    x = jax.random.normal(kx, (N, in_channels, H, W), dtype=jnp.float32)

    weights, biases = [], []
    cin = in_channels
    for li in range(n_layers):
        kw_, kb_ = kws[2 * li], kws[2 * li + 1]
        weights.append(0.1 * jax.random.normal(
            kw_, (out_channels, cin, 3, 3), dtype=jnp.float32))
        biases.append(0.1 * jax.random.normal(
            kb_, (out_channels,), dtype=jnp.float32))
        cin = out_channels

    # One-time packing (done at model-load time for inference).
    w_packed, b_packed = prepare_params(weights, biases)

    out = conv_block_forward(x, w_packed, b_packed, out_channels)
    out = jax.block_until_ready(out)

    ref = conv_block_ref(x, weights, biases)
    assert out.shape == (N, out_channels, H // 2, W // 2), out.shape
    # bf16 MXU operands (f32 accumulation): tolerance loosened from 1e-5 per the
    # performance review; layout/indexing bugs would show errors >> 5e-2.
    np.testing.assert_allclose(np.asarray(out), np.asarray(ref),
                               rtol=5e-2, atol=5e-2)

    print("KERNEL_OK")
</pallas_src>

<mosaic_0001>
module attributes {stable_mosaic.version = 11 : i64} {
  func.func @_conv_block_fused_kernel(%arg0: i32, %arg1: memref<1x16x16x4xf32, #tpu.memory_space<vmem>>, %arg2: memref<18x128x128xbf16, #tpu.memory_space<vmem>>, %arg3: memref<2x1x128xf32, #tpu.memory_space<vmem>>, %arg4: memref<1x64x128xf32, #tpu.memory_space<vmem>>, %arg5: memref<18x32x128xf32, #tpu.memory_space<vmem>>, %arg6: memref<18x32x128xf32, #tpu.memory_space<vmem>>, %arg7: memref<512x128xf32, #tpu.memory_space<vmem>>, %arg8: memref<128x128xf32, #tpu.memory_space<vmem>>) attributes {dimension_semantics = [#tpu.dimension_semantics<parallel>], iteration_bounds = array<i64: 2>, scalar_prefetch = 0 : i64, scratch_operands = 4 : i64, tpu.core_type = #tpu.core_type<tc>, window_params = [{transform_indices = @transform_0, window_bounds = array<i64: 1, 16, 16, 4>}, {pipeline_mode = #tpu.pipeline_mode<synchronous>, transform_indices = @transform_1, window_bounds = array<i64: 18, 128, 128>}, {pipeline_mode = #tpu.pipeline_mode<synchronous>, transform_indices = @transform_2, window_bounds = array<i64: 2, 1, 128>}, {transform_indices = @transform_3, window_bounds = array<i64: 1, 64, 128>}]} {
    %cst = arith.constant 0.000000e+00 : f32
    %0 = vector.broadcast %cst : f32 to vector<18x32x128xf32>
    %c0 = arith.constant 0 : index
    %c0_0 = arith.constant 0 : index
    %c0_1 = arith.constant 0 : index
    %1 = vector.load %arg5[%c0, %c0_0, %c0_1] : memref<18x32x128xf32, #tpu.memory_space<vmem>>, vector<18x32x128xf32>
    tpu.vector_store %arg5[%c0, %c0_0, %c0_1], %0 {strides = array<i32>} : memref<18x32x128xf32, #tpu.memory_space<vmem>>, vector<18x32x128xf32>,
    %cst_2 = arith.constant 0.000000e+00 : f32
    %2 = vector.broadcast %cst_2 : f32 to vector<1x32x128xf32>
    %c0_3 = arith.constant 0 : index
    %c0_4 = arith.constant 0 : index
    %c0_5 = arith.constant 0 : index
    %3 = vector.load %arg6[%c0_3, %c0_4, %c0_5] : memref<18x32x128xf32, #tpu.memory_space<vmem>>, vector<1x32x128xf32>
    tpu.vector_store %arg6[%c0_3, %c0_4, %c0_5], %2 {strides = array<i32>} : memref<18x32x128xf32, #tpu.memory_space<vmem>>, vector<1x32x128xf32>,
    %c17 = arith.constant 17 : index
    %c0_6 = arith.constant 0 : index
    %c0_7 = arith.constant 0 : index
    %4 = vector.load %arg6[%c17, %c0_6, %c0_7] : memref<18x32x128xf32, #tpu.memory_space<vmem>>, vector<1x32x128xf32>
    tpu.vector_store %arg6[%c17, %c0_6, %c0_7], %2 {strides = array<i32>} : memref<18x32x128xf32, #tpu.memory_space<vmem>>, vector<1x32x128xf32>,
    %cst_8 = arith.constant 0.000000e+00 : f32
    %5 = vector.broadcast %cst_8 : f32 to vector<18x8x128xf32>
    %c0_9 = arith.constant 0 : index
    %c0_10 = arith.constant 0 : index
    %c0_11 = arith.constant 0 : index
    %6 = vector.load %arg6[%c0_9, %c0_10, %c0_11] : memref<18x32x128xf32, #tpu.memory_space<vmem>>, vector<18x8x128xf32>
    tpu.vector_store %arg6[%c0_9, %c0_10, %c0_11], %5 {strides = array<i32>} : memref<18x32x128xf32, #tpu.memory_space<vmem>>, vector<18x8x128xf32>,
    %c0_12 = arith.constant 0 : index
    %c24 = arith.constant 24 : index
    %c0_13 = arith.constant 0 : index
    %7 = vector.load %arg6[%c0_12, %c24, %c0_13] : memref<18x32x128xf32, #tpu.memory_space<vmem>>, vector<18x8x128xf32>
    tpu.vector_store %arg6[%c0_12, %c24, %c0_13], %5 {strides = array<i32>} : memref<18x32x128xf32, #tpu.memory_space<vmem>>, vector<18x8x128xf32>,
    %c0_14 = arith.constant 0 : index
    %c0_15 = arith.constant 0 : index
    %c0_16 = arith.constant 0 : index
    %c0_17 = arith.constant 0 : index
    %8 = vector.load %arg1[%c0_14, %c0_15, %c0_16, %c0_17] : memref<1x16x16x4xf32, #tpu.memory_space<vmem>>, vector<1x16x16x4xf32>
    %9 = vector.shape_cast %8 : vector<1x16x16x4xf32> to vector<16x16x4xf32>
    %c1 = arith.constant 1 : index
    %c8 = arith.constant 8 : index
    %c0_18 = arith.constant 0 : index
    %10 = vector.load %arg5[%c1, %c8, %c0_18] : memref<18x32x128xf32, #tpu.memory_space<vmem>>, vector<16x16x4xf32>
    tpu.vector_store %arg5[%c1, %c8, %c0_18], %9 {strides = array<i32>} : memref<18x32x128xf32, #tpu.memory_space<vmem>>, vector<16x16x4xf32>,
    %c0_19 = arith.constant 0 : index
    %c0_20 = arith.constant 0 : index
    %c0_21 = arith.constant 0 : index
    %11 = vector.load %arg5[%c0_19, %c0_20, %c0_21] : memref<18x32x128xf32, #tpu.memory_space<vmem>>, vector<16x32x128xf32>
    %12 = vector.shape_cast %11 : vector<16x32x128xf32> to vector<512x128xf32>
    %13 = arith.truncf %12 : vector<512x128xf32> to vector<512x128xbf16>
    %c0_22 = arith.constant 0 : index
    %c0_23 = arith.constant 0 : index
    %c0_24 = arith.constant 0 : index
    %14 = vector.load %arg2[%c0_22, %c0_23, %c0_24] : memref<18x128x128xbf16, #tpu.memory_space<vmem>>, vector<1x128x128xbf16>
    %15 = vector.shape_cast %14 : vector<1x128x128xbf16> to vector<128x128xbf16>
    %cst_25 = arith.constant dense<0.000000e+00> : vector<512x128xf32>
    %16 = tpu.matmul %13, %15, %cst_25 {dimension_numbers = #tpu.dot_dimension_numbers<[1], [0], [0], [1], [0, 0, 1, 1], [], []>} : vector<512x128xbf16>, vector<128x128xbf16>, vector<512x128xf32> -> vector<512x128xf32>
    %c1_i32 = arith.constant 1 : i32
    %17 = tpu.dynamic_rotate %16 by %c1_i32 dim 0 : vector<512x128xf32>, i32 -> vector<512x128xf32>
    %c0_26 = arith.constant 0 : index
    %c0_27 = arith.constant 0 : index
    %18 = vector.load %arg7[%c0_26, %c0_27] : memref<512x128xf32, #tpu.memory_space<vmem>>, vector<512x128xf32>
    tpu.vector_store %arg7[%c0_26, %c0_27], %17 {strides = array<i32>} : memref<512x128xf32, #tpu.memory_space<vmem>>, vector<512x128xf32>,
    %c1_28 = arith.constant 1 : index
    %c0_29 = arith.constant 0 : index
    %c0_30 = arith.constant 0 : index
    %19 = vector.load %arg2[%c1_28, %c0_29, %c0_30] : memref<18x128x128xbf16, #tpu.memory_space<vmem>>, vector<1x128x128xbf16>
    %20 = vector.shape_cast %19 : vector<1x128x128xbf16> to vector<128x128xbf16>
    %cst_31 = arith.constant dense<0.000000e+00> : vector<512x128xf32>
    %21 = tpu.matmul %13, %20, %cst_31 {dimension_numbers = #tpu.dot_dimension_numbers<[1], [0], [0], [1], [0, 0, 1, 1], [], []>} : vector<512x128xbf16>, vector<128x128xbf16>, vector<512x128xf32> -> vector<512x128xf32>
    %c0_32 = arith.constant 0 : index
    %c0_33 = arith.constant 0 : index
    %22 = vector.load %arg7[%c0_32, %c0_33] : memref<512x128xf32, #tpu.memory_space<vmem>>, vector<512x128xf32>
    %23 = arith.addf %22, %21 : vector<512x128xf32>
    %c0_34 = arith.constant 0 : index
    %c0_35 = arith.constant 0 : index
    %24 = vector.load %arg7[%c0_34, %c0_35] : memref<512x128xf32, #tpu.memory_space<vmem>>, vector<512x128xf32>
    tpu.vector_store %arg7[%c0_34, %c0_35], %23 {strides = array<i32>} : memref<512x128xf32, #tpu.memory_space<vmem>>, vector<512x128xf32>,
    %c2 = arith.constant 2 : index
    %c0_36 = arith.constant 0 : index
    %c0_37 = arith.constant 0 : index
    %25 = vector.load %arg2[%c2, %c0_36, %c0_37] : memref<18x128x128xbf16, #tpu.memory_space<vmem>>, vector<1x128x128xbf16>
    %26 = vector.shape_cast %25 : vector<1x128x128xbf16> to vector<128x128xbf16>
    %cst_38 = arith.constant dense<0.000000e+00> : vector<512x128xf32>
    %27 = tpu.matmul %13, %26, %cst_38 {dimension_numbers = #tpu.dot_dimension_numbers<[1], [0], [0], [1], [0, 0, 1, 1], [], []>} : vector<512x128xbf16>, vector<128x128xbf16>, vector<512x128xf32> -> vector<512x128xf32>
    %c511_i32 = arith.constant 511 : i32
    %28 = tpu.dynamic_rotate %27 by %c511_i32 dim 0 : vector<512x128xf32>, i32 -> vector<512x128xf32>
    %c0_39 = arith.constant 0 : index
    %c0_40 = arith.constant 0 : index
    %29 = vector.load %arg7[%c0_39, %c0_40] : memref<512x128xf32, #tpu.memory_space<vmem>>, vector<512x128xf32>
    %30 = arith.addf %29, %28 : vector<512x128xf32>
    %c0_41 = arith.constant 0 : index
    %c0_42 = arith.constant 0 : index
    %31 = vector.load %arg7[%c0_41, %c0_42] : memref<512x128xf32, #tpu.memory_space<vmem>>, vector<512x128xf32>
    tpu.vector_store %arg7[%c0_41, %c0_42], %30 {strides = array<i32>} : memref<512x128xf32, #tpu.memory_space<vmem>>, vector<512x128xf32>,
    %c1_43 = arith.constant 1 : index
    %c0_44 = arith.constant 0 : index
    %c0_45 = arith.constant 0 : index
    %32 = vector.load %arg5[%c1_43, %c0_44, %c0_45] : memref<18x32x128xf32, #tpu.memory_space<vmem>>, vector<16x32x128xf32>
    %33 = vector.shape_cast %32 : vector<16x32x128xf32> to vector<512x128xf32>
    %34 = arith.truncf %33 : vector<512x128xf32> to vector<512x128xbf16>
    %c3 = arith.constant 3 : index
    %c0_46 = arith.constant 0 : index
    %c0_47 = arith.constant 0 : index
    %35 = vector.load %arg2[%c3, %c0_46, %c0_47] : memref<18x128x128xbf16, #tpu.memory_space<vmem>>, vector<1x128x128xbf16>
    %36 = vector.shape_cast %35 : vector<1x128x128xbf16> to vector<128x128xbf16>
    %cst_48 = arith.constant dense<0.000000e+00> : vector<512x128xf32>
    %37 = tpu.matmul %34, %36, %cst_48 {dimension_numbers = #tpu.dot_dimension_numbers<[1], [0], [0], [1], [0, 0, 1, 1], [], []>} : vector<512x128xbf16>, vector<128x128xbf16>, vector<512x128xf32> -> vector<512x128xf32>
    %c1_i32_49 = arith.constant 1 : i32
    %38 = tpu.dynamic_rotate %37 by %c1_i32_49 dim 0 : vector<512x128xf32>, i32 -> vector<512x128xf32>
    %c0_50 = arith.constant 0 : index
    %c0_51 = arith.constant 0 : index
    %39 = vector.load %arg7[%c0_50, %c0_51] : memref<512x128xf32, #tpu.memory_space<vmem>>, vector<512x128xf32>
    %40 = arith.addf %39, %38 : vector<512x128xf32>
    %c0_52 = arith.constant 0 : index
    %c0_53 = arith.constant 0 : index
    %41 = vector.load %arg7[%c0_52, %c0_53] : memref<512x128xf32, #tpu.memory_space<vmem>>, vector<512x128xf32>
    tpu.vector_store %arg7[%c0_52, %c0_53], %40 {strides = array<i32>} : memref<512x128xf32, #tpu.memory_space<vmem>>, vector<512x128xf32>,
    %c4 = arith.constant 4 : index
    %c0_54 = arith.constant 0 : index
    %c0_55 = arith.constant 0 : index
    %42 = vector.load %arg2[%c4, %c0_54, %c0_55] : memref<18x128x128xbf16, #tpu.memory_space<vmem>>, vector<1x128x128xbf16>
    %43 = vector.shape_cast %42 : vector<1x128x128xbf16> to vector<128x128xbf16>
    %cst_56 = arith.constant dense<0.000000e+00> : vector<512x128xf32>
    %44 = tpu.matmul %34, %43, %cst_56 {dimension_numbers = #tpu.dot_dimension_numbers<[1], [0], [0], [1], [0, 0, 1, 1], [], []>} : vector<512x128xbf16>, vector<128x128xbf16>, vector<512x128xf32> -> vector<512x128xf32>
    %c0_57 = arith.constant 0 : index
    %c0_58 = arith.constant 0 : index
    %45 = vector.load %arg7[%c0_57, %c0_58] : memref<512x128xf32, #tpu.memory_space<vmem>>, vector<512x128xf32>
    %46 = arith.addf %45, %44 : vector<512x128xf32>
    %c0_59 = arith.constant 0 : index
    %c0_60 = arith.constant 0 : index
    %47 = vector.load %arg7[%c0_59, %c0_60] : memref<512x128xf32, #tpu.memory_space<vmem>>, vector<512x128xf32>
    tpu.vector_store %arg7[%c0_59, %c0_60], %46 {strides = array<i32>} : memref<512x128xf32, #tpu.memory_space<vmem>>, vector<512x128xf32>,
    %c5 = arith.constant 5 : index
    %c0_61 = arith.constant 0 : index
    %c0_62 = arith.constant 0 : index
    %48 = vector.load %arg2[%c5, %c0_61, %c0_62] : memref<18x128x128xbf16, #tpu.memory_space<vmem>>, vector<1x128x128xbf16>
    %49 = vector.shape_cast %48 : vector<1x128x128xbf16> to vector<128x128xbf16>
    %cst_63 = arith.constant dense<0.000000e+00> : vector<512x128xf32>
    %50 = tpu.matmul %34, %49, %cst_63 {dimension_numbers = #tpu.dot_dimension_numbers<[1], [0], [0], [1], [0, 0, 1, 1], [], []>} : vector<512x128xbf16>, vector<128x128xbf16>, vector<512x128xf32> -> vector<512x128xf32>
    %c511_i32_64 = arith.constant 511 : i32
    %51 = tpu.dynamic_rotate %50 by %c511_i32_64 dim 0 : vector<512x128xf32>, i32 -> vector<512x128xf32>
    %c0_65 = arith.constant 0 : index
    %c0_66 = arith.constant 0 : index
    %52 = vector.load %arg7[%c0_65, %c0_66] : memref<512x128xf32, #tpu.memory_space<vmem>>, vector<512x128xf32>
    %53 = arith.addf %52, %51 : vector<512x128xf32>
    %c0_67 = arith.constant 0 : index
    %c0_68 = arith.constant 0 : index
    %54 = vector.load %arg7[%c0_67, %c0_68] : memref<512x128xf32, #tpu.memory_space<vmem>>, vector<512x128xf32>
    tpu.vector_store %arg7[%c0_67, %c0_68], %53 {strides = array<i32>} : memref<512x128xf32, #tpu.memory_space<vmem>>, vector<512x128xf32>,
    %c2_69 = arith.constant 2 : index
    %c0_70 = arith.constant 0 : index
    %c0_71 = arith.constant 0 : index
    %55 = vector.load %arg5[%c2_69, %c0_70, %c0_71] : memref<18x32x128xf32, #tpu.memory_space<vmem>>, vector<16x32x128xf32>
    %56 = vector.shape_cast %55 : vector<16x32x128xf32> to vector<512x128xf32>
    %57 = arith.truncf %56 : vector<512x128xf32> to vector<512x128xbf16>
    %c6 = arith.constant 6 : index
    %c0_72 = arith.constant 0 : index
    %c0_73 = arith.constant 0 : index
    %58 = vector.load %arg2[%c6, %c0_72, %c0_73] : memref<18x128x128xbf16, #tpu.memory_space<vmem>>, vector<1x128x128xbf16>
    %59 = vector.shape_cast %58 : vector<1x128x128xbf16> to vector<128x128xbf16>
    %cst_74 = arith.constant dense<0.000000e+00> : vector<512x128xf32>
    %60 = tpu.matmul %57, %59, %cst_74 {dimension_numbers = #tpu.dot_dimension_numbers<[1], [0], [0], [1], [0, 0, 1, 1], [], []>} : vector<512x128xbf16>, vector<128x128xbf16>, vector<512x128xf32> -> vector<512x128xf32>
    %c1_i32_75 = arith.constant 1 : i32
    %61 = tpu.dynamic_rotate %60 by %c1_i32_75 dim 0 : vector<512x128xf32>, i32 -> vector<512x128xf32>
    %c0_76 = arith.constant 0 : index
    %c0_77 = arith.constant 0 : index
    %62 = vector.load %arg7[%c0_76, %c0_77] : memref<512x128xf32, #tpu.memory_space<vmem>>, vector<512x128xf32>
    %63 = arith.addf %62, %61 : vector<512x128xf32>
    %c0_78 = arith.constant 0 : index
    %c0_79 = arith.constant 0 : index
    %64 = vector.load %arg7[%c0_78, %c0_79] : memref<512x128xf32, #tpu.memory_space<vmem>>, vector<512x128xf32>
    tpu.vector_store %arg7[%c0_78, %c0_79], %63 {strides = array<i32>} : memref<512x128xf32, #tpu.memory_space<vmem>>, vector<512x128xf32>,
    %c7 = arith.constant 7 : index
    %c0_80 = arith.constant 0 : index
    %c0_81 = arith.constant 0 : index
    %65 = vector.load %arg2[%c7, %c0_80, %c0_81] : memref<18x128x128xbf16, #tpu.memory_space<vmem>>, vector<1x128x128xbf16>
    %66 = vector.shape_cast %65 : vector<1x128x128xbf16> to vector<128x128xbf16>
    %cst_82 = arith.constant dense<0.000000e+00> : vector<512x128xf32>
    %67 = tpu.matmul %57, %66, %cst_82 {dimension_numbers = #tpu.dot_dimension_numbers<[1], [0], [0], [1], [0, 0, 1, 1], [], []>} : vector<512x128xbf16>, vector<128x128xbf16>, vector<512x128xf32> -> vector<512x128xf32>
    %c0_83 = arith.constant 0 : index
    %c0_84 = arith.constant 0 : index
    %68 = vector.load %arg7[%c0_83, %c0_84] : memref<512x128xf32, #tpu.memory_space<vmem>>, vector<512x128xf32>
    %69 = arith.addf %68, %67 : vector<512x128xf32>
    %c0_85 = arith.constant 0 : index
    %c0_86 = arith.constant 0 : index
    %70 = vector.load %arg7[%c0_85, %c0_86] : memref<512x128xf32, #tpu.memory_space<vmem>>, vector<512x128xf32>
    tpu.vector_store %arg7[%c0_85, %c0_86], %69 {strides = array<i32>} : memref<512x128xf32, #tpu.memory_space<vmem>>, vector<512x128xf32>,
    %c8_87 = arith.constant 8 : index
    %c0_88 = arith.constant 0 : index
    %c0_89 = arith.constant 0 : index
    %71 = vector.load %arg2[%c8_87, %c0_88, %c0_89] : memref<18x128x128xbf16, #tpu.memory_space<vmem>>, vector<1x128x128xbf16>
    %72 = vector.shape_cast %71 : vector<1x128x128xbf16> to vector<128x128xbf16>
    %cst_90 = arith.constant dense<0.000000e+00> : vector<512x128xf32>
    %73 = tpu.matmul %57, %72, %cst_90 {dimension_numbers = #tpu.dot_dimension_numbers<[1], [0], [0], [1], [0, 0, 1, 1], [], []>} : vector<512x128xbf16>, vector<128x128xbf16>, vector<512x128xf32> -> vector<512x128xf32>
    %c511_i32_91 = arith.constant 511 : i32
    %74 = tpu.dynamic_rotate %73 by %c511_i32_91 dim 0 : vector<512x128xf32>, i32 -> vector<512x128xf32>
    %c0_92 = arith.constant 0 : index
    %c0_93 = arith.constant 0 : index
    %75 = vector.load %arg7[%c0_92, %c0_93] : memref<512x128xf32, #tpu.memory_space<vmem>>, vector<512x128xf32>
    %76 = arith.addf %75, %74 : vector<512x128xf32>
    %c0_94 = arith.constant 0 : index
    %c0_95 = arith.constant 0 : index
    %77 = vector.load %arg7[%c0_94, %c0_95] : memref<512x128xf32, #tpu.memory_space<vmem>>, vector<512x128xf32>
    tpu.vector_store %arg7[%c0_94, %c0_95], %76 {strides = array<i32>} : memref<512x128xf32, #tpu.memory_space<vmem>>, vector<512x128xf32>,
    %c0_96 = arith.constant 0 : index
    %c0_97 = arith.constant 0 : index
    %78 = vector.load %arg7[%c0_96, %c0_97] : memref<512x128xf32, #tpu.memory_space<vmem>>, vector<512x128xf32>
    %79 = vector.shape_cast %78 : vector<512x128xf32> to vector<16x32x128xf32>
    %80 = vector.extract_strided_slice %79 {offsets = [0, 8, 0], sizes = [16, 16, 128], strides = [1, 1, 1]} : vector<16x32x128xf32> to vector<16x16x128xf32>
    %c0_98 = arith.constant 0 : index
    %c0_99 = arith.constant 0 : index
    %c0_100 = arith.constant 0 : index
    %81 = vector.load %arg3[%c0_98, %c0_99, %c0_100] : memref<2x1x128xf32, #tpu.memory_space<vmem>>, vector<1x1x128xf32>
    %82 = vector.shape_cast %81 : vector<1x1x128xf32> to vector<1x128xf32>
    %83 = vector.shape_cast %82 : vector<1x128xf32> to vector<1x1x128xf32>
    %84 = vector.broadcast %83 : vector<1x1x128xf32> to vector<16x16x128xf32>
    %85 = arith.addf %80, %84 : vector<16x16x128xf32>
    %cst_101 = arith.constant 0.000000e+00 : f32
    %86 = vector.broadcast %cst_101 : f32 to vector<16x16x128xf32>
    %87 = arith.maximumf %85, %86 : vector<16x16x128xf32>
    %c1_102 = arith.constant 1 : index
    %c8_103 = arith.constant 8 : index
    %c0_104 = arith.constant 0 : index
    %88 = vector.load %arg6[%c1_102, %c8_103, %c0_104] : memref<18x32x128xf32, #tpu.memory_space<vmem>>, vector<16x16x128xf32>
    tpu.vector_store %arg6[%c1_102, %c8_103, %c0_104], %87 {strides = array<i32>} : memref<18x32x128xf32, #tpu.memory_space<vmem>>, vector<16x16x128xf32>,
    %c0_105 = arith.constant 0 : index
    %c0_106 = arith.constant 0 : index
    %c0_107 = arith.constant 0 : index
    %89 = vector.load %arg6[%c0_105, %c0_106, %c0_107] : memref<18x32x128xf32, #tpu.memory_space<vmem>>, vector<16x32x128xf32>
    %90 = vector.shape_cast %89 : vector<16x32x128xf32> to vector<512x128xf32>
    %91 = arith.truncf %90 : vector<512x128xf32> to vector<512x128xbf16>
    %c9 = arith.constant 9 : index
    %c0_108 = arith.constant 0 : index
    %c0_109 = arith.constant 0 : index
    %92 = vector.load %arg2[%c9, %c0_108, %c0_109] : memref<18x128x128xbf16, #tpu.memory_space<vmem>>, vector<1x128x128xbf16>
    %93 = vector.shape_cast %92 : vector<1x128x128xbf16> to vector<128x128xbf16>
    %cst_110 = arith.constant dense<0.000000e+00> : vector<512x128xf32>
    %94 = tpu.matmul %91, %93, %cst_110 {dimension_numbers = #tpu.dot_dimension_numbers<[1], [0], [0], [1], [0, 0, 1, 1], [], []>} : vector<512x128xbf16>, vector<128x128xbf16>, vector<512x128xf32> -> vector<512x128xf32>
    %c1_i32_111 = arith.constant 1 : i32
    %95 = tpu.dynamic_rotate %94 by %c1_i32_111 dim 0 : vector<512x128xf32>, i32 -> vector<512x128xf32>
    %c0_112 = arith.constant 0 : index
    %c0_113 = arith.constant 0 : index
    %96 = vector.load %arg7[%c0_112, %c0_113] : memref<512x128xf32, #tpu.memory_space<vmem>>, vector<512x128xf32>
    tpu.vector_store %arg7[%c0_112, %c0_113], %95 {strides = array<i32>} : memref<512x128xf32, #tpu.memory_space<vmem>>, vector<512x128xf32>,
    %c10 = arith.constant 10 : index
    %c0_114 = arith.constant 0 : index
    %c0_115 = arith.constant 0 : index
    %97 = vector.load %arg2[%c10, %c0_114, %c0_115] : memref<18x128x128xbf16, #tpu.memory_space<vmem>>, vector<1x128x128xbf16>
    %98 = vector.shape_cast %97 : vector<1x128x128xbf16> to vector<128x128xbf16>
    %cst_116 = arith.constant dense<0.000000e+00> : vector<512x128xf32>
    %99 = tpu.matmul %91, %98, %cst_116 {dimension_numbers = #tpu.dot_dimension_numbers<[1], [0], [0], [1], [0, 0, 1, 1], [], []>} : vector<512x128xbf16>, vector<128x128xbf16>, vector<512x128xf32> -> vector<512x128xf32>
    %c0_117 = arith.constant 0 : index
    %c0_118 = arith.constant 0 : index
    %100 = vector.load %arg7[%c0_117, %c0_118] : memref<512x128xf32, #tpu.memory_space<vmem>>, vector<512x128xf32>
    %101 = arith.addf %100, %99 : vector<512x128xf32>
    %c0_119 = arith.constant 0 : index
    %c0_120 = arith.constant 0 : index
    %102 = vector.load %arg7[%c0_119, %c0_120] : memref<512x128xf32, #tpu.memory_space<vmem>>, vector<512x128xf32>
    tpu.vector_store %arg7[%c0_119, %c0_120], %101 {strides = array<i32>} : memref<512x128xf32, #tpu.memory_space<vmem>>, vector<512x128xf32>,
    %c11 = arith.constant 11 : index
    %c0_121 = arith.constant 0 : index
    %c0_122 = arith.constant 0 : index
    %103 = vector.load %arg2[%c11, %c0_121, %c0_122] : memref<18x128x128xbf16, #tpu.memory_space<vmem>>, vector<1x128x128xbf16>
    %104 = vector.shape_cast %103 : vector<1x128x128xbf16> to vector<128x128xbf16>
    %cst_123 = arith.constant dense<0.000000e+00> : vector<512x128xf32>
    %105 = tpu.matmul %91, %104, %cst_123 {dimension_numbers = #tpu.dot_dimension_numbers<[1], [0], [0], [1], [0, 0, 1, 1], [], []>} : vector<512x128xbf16>, vector<128x128xbf16>, vector<512x128xf32> -> vector<512x128xf32>
    %c511_i32_124 = arith.constant 511 : i32
    %106 = tpu.dynamic_rotate %105 by %c511_i32_124 dim 0 : vector<512x128xf32>, i32 -> vector<512x128xf32>
    %c0_125 = arith.constant 0 : index
    %c0_126 = arith.constant 0 : index
    %107 = vector.load %arg7[%c0_125, %c0_126] : memref<512x128xf32, #tpu.memory_space<vmem>>, vector<512x128xf32>
    %108 = arith.addf %107, %106 : vector<512x128xf32>
    %c0_127 = arith.constant 0 : index
    %c0_128 = arith.constant 0 : index
    %109 = vector.load %arg7[%c0_127, %c0_128] : memref<512x128xf32, #tpu.memory_space<vmem>>, vector<512x128xf32>
    tpu.vector_store %arg7[%c0_127, %c0_128], %108 {strides = array<i32>} : memref<512x128xf32, #tpu.memory_space<vmem>>, vector<512x128xf32>,
    %c1_129 = arith.constant 1 : index
    %c0_130 = arith.constant 0 : index
    %c0_131 = arith.constant 0 : index
    %110 = vector.load %arg6[%c1_129, %c0_130, %c0_131] : memref<18x32x128xf32, #tpu.memory_space<vmem>>, vector<16x32x128xf32>
    %111 = vector.shape_cast %110 : vector<16x32x128xf32> to vector<512x128xf32>
    %112 = arith.truncf %111 : vector<512x128xf32> to vector<512x128xbf16>
    %c12 = arith.constant 12 : index
    %c0_132 = arith.constant 0 : index
    %c0_133 = arith.constant 0 : index
    %113 = vector.load %arg2[%c12, %c0_132, %c0_133] : memref<18x128x128xbf16, #tpu.memory_space<vmem>>, vector<1x128x128xbf16>
    %114 = vector.shape_cast %113 : vector<1x128x128xbf16> to vector<128x128xbf16>
    %cst_134 = arith.constant dense<0.000000e+00> : vector<512x128xf32>
    %115 = tpu.matmul %112, %114, %cst_134 {dimension_numbers = #tpu.dot_dimension_numbers<[1], [0], [0], [1], [0, 0, 1, 1], [], []>} : vector<512x128xbf16>, vector<128x128xbf16>, vector<512x128xf32> -> vector<512x128xf32>
    %c1_i32_135 = arith.constant 1 : i32
    %116 = tpu.dynamic_rotate %115 by %c1_i32_135 dim 0 : vector<512x128xf32>, i32 -> vector<512x128xf32>
    %c0_136 = arith.constant 0 : index
    %c0_137 = arith.constant 0 : index
    %117 = vector.load %arg7[%c0_136, %c0_137] : memref<512x128xf32, #tpu.memory_space<vmem>>, vector<512x128xf32>
    %118 = arith.addf %117, %116 : vector<512x128xf32>
    %c0_138 = arith.constant 0 : index
    %c0_139 = arith.constant 0 : index
    %119 = vector.load %arg7[%c0_138, %c0_139] : memref<512x128xf32, #tpu.memory_space<vmem>>, vector<512x128xf32>
    tpu.vector_store %arg7[%c0_138, %c0_139], %118 {strides = array<i32>} : memref<512x128xf32, #tpu.memory_space<vmem>>, vector<512x128xf32>,
    %c13 = arith.constant 13 : index
    %c0_140 = arith.constant 0 : index
    %c0_141 = arith.constant 0 : index
    %120 = vector.load %arg2[%c13, %c0_140, %c0_141] : memref<18x128x128xbf16, #tpu.memory_space<vmem>>, vector<1x128x128xbf16>
    %121 = vector.shape_cast %120 : vector<1x128x128xbf16> to vector<128x128xbf16>
    %cst_142 = arith.constant dense<0.000000e+00> : vector<512x128xf32>
    %122 = tpu.matmul %112, %121, %cst_142 {dimension_numbers = #tpu.dot_dimension_numbers<[1], [0], [0], [1], [0, 0, 1, 1], [], []>} : vector<512x128xbf16>, vector<128x128xbf16>, vector<512x128xf32> -> vector<512x128xf32>
    %c0_143 = arith.constant 0 : index
    %c0_144 = arith.constant 0 : index
    %123 = vector.load %arg7[%c0_143, %c0_144] : memref<512x128xf32, #tpu.memory_space<vmem>>, vector<512x128xf32>
    %124 = arith.addf %123, %122 : vector<512x128xf32>
    %c0_145 = arith.constant 0 : index
    %c0_146 = arith.constant 0 : index
    %125 = vector.load %arg7[%c0_145, %c0_146] : memref<512x128xf32, #tpu.memory_space<vmem>>, vector<512x128xf32>
    tpu.vector_store %arg7[%c0_145, %c0_146], %124 {strides = array<i32>} : memref<512x128xf32, #tpu.memory_space<vmem>>, vector<512x128xf32>,
    %c14 = arith.constant 14 : index
    %c0_147 = arith.constant 0 : index
    %c0_148 = arith.constant 0 : index
    %126 = vector.load %arg2[%c14, %c0_147, %c0_148] : memref<18x128x128xbf16, #tpu.memory_space<vmem>>, vector<1x128x128xbf16>
    %127 = vector.shape_cast %126 : vector<1x128x128xbf16> to vector<128x128xbf16>
    %cst_149 = arith.constant dense<0.000000e+00> : vector<512x128xf32>
    %128 = tpu.matmul %112, %127, %cst_149 {dimension_numbers = #tpu.dot_dimension_numbers<[1], [0], [0], [1], [0, 0, 1, 1], [], []>} : vector<512x128xbf16>, vector<128x128xbf16>, vector<512x128xf32> -> vector<512x128xf32>
    %c511_i32_150 = arith.constant 511 : i32
    %129 = tpu.dynamic_rotate %128 by %c511_i32_150 dim 0 : vector<512x128xf32>, i32 -> vector<512x128xf32>
    %c0_151 = arith.constant 0 : index
    %c0_152 = arith.constant 0 : index
    %130 = vector.load %arg7[%c0_151, %c0_152] : memref<512x128xf32, #tpu.memory_space<vmem>>, vector<512x128xf32>
    %131 = arith.addf %130, %129 : vector<512x128xf32>
    %c0_153 = arith.constant 0 : index
    %c0_154 = arith.constant 0 : index
    %132 = vector.load %arg7[%c0_153, %c0_154] : memref<512x128xf32, #tpu.memory_space<vmem>>, vector<512x128xf32>
    tpu.vector_store %arg7[%c0_153, %c0_154], %131 {strides = array<i32>} : memref<512x128xf32, #tpu.memory_space<vmem>>, vector<512x128xf32>,
    %c2_155 = arith.constant 2 : index
    %c0_156 = arith.constant 0 : index
    %c0_157 = arith.constant 0 : index
    %133 = vector.load %arg6[%c2_155, %c0_156, %c0_157] : memref<18x32x128xf32, #tpu.memory_space<vmem>>, vector<16x32x128xf32>
    %134 = vector.shape_cast %133 : vector<16x32x128xf32> to vector<512x128xf32>
    %135 = arith.truncf %134 : vector<512x128xf32> to vector<512x128xbf16>
    %c15 = arith.constant 15 : index
    %c0_158 = arith.constant 0 : index
    %c0_159 = arith.constant 0 : index
    %136 = vector.load %arg2[%c15, %c0_158, %c0_159] : memref<18x128x128xbf16, #tpu.memory_space<vmem>>, vector<1x128x128xbf16>
    %137 = vector.shape_cast %136 : vector<1x128x128xbf16> to vector<128x128xbf16>
    %cst_160 = arith.constant dense<0.000000e+00> : vector<512x128xf32>
    %138 = tpu.matmul %135, %137, %cst_160 {dimension_numbers = #tpu.dot_dimension_numbers<[1], [0], [0], [1], [0, 0, 1, 1], [], []>} : vector<512x128xbf16>, vector<128x128xbf16>, vector<512x128xf32> -> vector<512x128xf32>
    %c1_i32_161 = arith.constant 1 : i32
    %139 = tpu.dynamic_rotate %138 by %c1_i32_161 dim 0 : vector<512x128xf32>, i32 -> vector<512x128xf32>
    %c0_162 = arith.constant 0 : index
    %c0_163 = arith.constant 0 : index
    %140 = vector.load %arg7[%c0_162, %c0_163] : memref<512x128xf32, #tpu.memory_space<vmem>>, vector<512x128xf32>
    %141 = arith.addf %140, %139 : vector<512x128xf32>
    %c0_164 = arith.constant 0 : index
    %c0_165 = arith.constant 0 : index
    %142 = vector.load %arg7[%c0_164, %c0_165] : memref<512x128xf32, #tpu.memory_space<vmem>>, vector<512x128xf32>
    tpu.vector_store %arg7[%c0_164, %c0_165], %141 {strides = array<i32>} : memref<512x128xf32, #tpu.memory_space<vmem>>, vector<512x128xf32>,
    %c16 = arith.constant 16 : index
    %c0_166 = arith.constant 0 : index
    %c0_167 = arith.constant 0 : index
    %143 = vector.load %arg2[%c16, %c0_166, %c0_167] : memref<18x128x128xbf16, #tpu.memory_space<vmem>>, vector<1x128x128xbf16>
    %144 = vector.shape_cast %143 : vector<1x128x128xbf16> to vector<128x128xbf16>
    %cst_168 = arith.constant dense<0.000000e+00> : vector<512x128xf32>
    %145 = tpu.matmul %135, %144, %cst_168 {dimension_numbers = #tpu.dot_dimension_numbers<[1], [0], [0], [1], [0, 0, 1, 1], [], []>} : vector<512x128xbf16>, vector<128x128xbf16>, vector<512x128xf32> -> vector<512x128xf32>
    %c0_169 = arith.constant 0 : index
    %c0_170 = arith.constant 0 : index
    %146 = vector.load %arg7[%c0_169, %c0_170] : memref<512x128xf32, #tpu.memory_space<vmem>>, vector<512x128xf32>
    %147 = arith.addf %146, %145 : vector<512x128xf32>
    %c0_171 = arith.constant 0 : index
    %c0_172 = arith.constant 0 : index
    %148 = vector.load %arg7[%c0_171, %c0_172] : memref<512x128xf32, #tpu.memory_space<vmem>>, vector<512x128xf32>
    tpu.vector_store %arg7[%c0_171, %c0_172], %147 {strides = array<i32>} : memref<512x128xf32, #tpu.memory_space<vmem>>, vector<512x128xf32>,
    %c17_173 = arith.constant 17 : index
    %c0_174 = arith.constant 0 : index
    %c0_175 = arith.constant 0 : index
    %149 = vector.load %arg2[%c17_173, %c0_174, %c0_175] : memref<18x128x128xbf16, #tpu.memory_space<vmem>>, vector<1x128x128xbf16>
    %150 = vector.shape_cast %149 : vector<1x128x128xbf16> to vector<128x128xbf16>
    %cst_176 = arith.constant dense<0.000000e+00> : vector<512x128xf32>
    %151 = tpu.matmul %135, %150, %cst_176 {dimension_numbers = #tpu.dot_dimension_numbers<[1], [0], [0], [1], [0, 0, 1, 1], [], []>} : vector<512x128xbf16>, vector<128x128xbf16>, vector<512x128xf32> -> vector<512x128xf32>
    %c511_i32_177 = arith.constant 511 : i32
    %152 = tpu.dynamic_rotate %151 by %c511_i32_177 dim 0 : vector<512x128xf32>, i32 -> vector<512x128xf32>
    %c0_178 = arith.constant 0 : index
    %c0_179 = arith.constant 0 : index
    %153 = vector.load %arg7[%c0_178, %c0_179] : memref<512x128xf32, #tpu.memory_space<vmem>>, vector<512x128xf32>
    %154 = arith.addf %153, %152 : vector<512x128xf32>
    %c0_180 = arith.constant 0 : index
    %c0_181 = arith.constant 0 : index
    %155 = vector.load %arg7[%c0_180, %c0_181] : memref<512x128xf32, #tpu.memory_space<vmem>>, vector<512x128xf32>
    tpu.vector_store %arg7[%c0_180, %c0_181], %154 {strides = array<i32>} : memref<512x128xf32, #tpu.memory_space<vmem>>, vector<512x128xf32>,
    %c0_182 = arith.constant 0 : index
    %c0_183 = arith.constant 0 : index
    %156 = vector.load %arg7[%c0_182, %c0_183] : memref<512x128xf32, #tpu.memory_space<vmem>>, vector<512x128xf32>
    %157 = vector.shape_cast %156 : vector<512x128xf32> to vector<16x32x128xf32>
    %158 = vector.extract_strided_slice %157 {offsets = [0, 8, 0], sizes = [16, 16, 128], strides = [1, 1, 1]} : vector<16x32x128xf32> to vector<16x16x128xf32>
    %c1_184 = arith.constant 1 : index
    %c0_185 = arith.constant 0 : index
    %c0_186 = arith.constant 0 : index
    %159 = vector.load %arg3[%c1_184, %c0_185, %c0_186] : memref<2x1x128xf32, #tpu.memory_space<vmem>>, vector<1x1x128xf32>
    %160 = vector.shape_cast %159 : vector<1x1x128xf32> to vector<1x128xf32>
    %161 = vector.shape_cast %160 : vector<1x128xf32> to vector<1x1x128xf32>
    %162 = vector.broadcast %161 : vector<1x1x128xf32> to vector<16x16x128xf32>
    %163 = arith.addf %158, %162 : vector<16x16x128xf32>
    %cst_187 = arith.constant 0.000000e+00 : f32
    %164 = vector.broadcast %cst_187 : f32 to vector<16x16x128xf32>
    %165 = arith.maximumf %163, %164 : vector<16x16x128xf32>
    %166 = vector.shape_cast %165 : vector<16x16x128xf32> to vector<8x2x16x128xf32>
    %167 = vector.extract_strided_slice %166 {offsets = [0, 0, 0, 0], sizes = [8, 1, 16, 128], strides = [1, 1, 1, 1]} : vector<8x2x16x128xf32> to vector<8x1x16x128xf32>
    %168 = vector.shape_cast %167 : vector<8x1x16x128xf32> to vector<8x16x128xf32>
    %169 = vector.extract_strided_slice %166 {offsets = [0, 1, 0, 0], sizes = [8, 1, 16, 128], strides = [1, 1, 1, 1]} : vector<8x2x16x128xf32> to vector<8x1x16x128xf32>
    %170 = vector.shape_cast %169 : vector<8x1x16x128xf32> to vector<8x16x128xf32>
    %171 = arith.maximumf %168, %170 : vector<8x16x128xf32>
    %172 = vector.shape_cast %171 : vector<8x16x128xf32> to vector<128x128xf32>
    %c0_188 = arith.constant 0 : index
    %c0_189 = arith.constant 0 : index
    %173 = vector.load %arg8[%c0_188, %c0_189] : memref<128x128xf32, #tpu.memory_space<vmem>>, vector<128x128xf32>
    tpu.vector_store %arg8[%c0_188, %c0_189], %172 {strides = array<i32>} : memref<128x128xf32, #tpu.memory_space<vmem>>, vector<128x128xf32>,
    %c0_190 = arith.constant 0 : index
    %c0_191 = arith.constant 0 : index
    %174 = tpu.strided_load %arg8[%c0_190, %c0_191] {strides = array<i32: 2, 1>} : memref<128x128xf32, #tpu.memory_space<vmem>>, vector<64x128xf32>
    %c1_192 = arith.constant 1 : index
    %c0_193 = arith.constant 0 : index
    %175 = tpu.strided_load %arg8[%c1_192, %c0_193] {strides = array<i32: 2, 1>} : memref<128x128xf32, #tpu.memory_space<vmem>>, vector<64x128xf32>
    %176 = arith.maximumf %174, %175 : vector<64x128xf32>
    %c0_194 = arith.constant 0 : index
    %c0_195 = arith.constant 0 : index
    %c0_196 = arith.constant 0 : index
    %177 = vector.load %arg4[%c0_194, %c0_195, %c0_196] : memref<1x64x128xf32, #tpu.memory_space<vmem>>, vector<1x64x128xf32>
    %178 = vector.shape_cast %177 : vector<1x64x128xf32> to vector<64x128xf32>
    %179 = vector.shape_cast %176 : vector<64x128xf32> to vector<1x64x128xf32>
    tpu.vector_store %arg4[%c0_194, %c0_195, %c0_196], %179 {strides = array<i32>} : memref<1x64x128xf32, #tpu.memory_space<vmem>>, vector<1x64x128xf32>,
    return
  }
  func.func @transform_0(%arg0: i32) -> (i32, i32, i32, i32) {
    %c0_i32 = arith.constant 0 : i32
    %c0_i32_0 = arith.constant 0 : i32
    %c0_i32_1 = arith.constant 0 : i32
    %c0_i32_2 = arith.constant 0 : i32
    return %arg0, %c0_i32, %c0_i32_0, %c0_i32_1 : i32, i32, i32, i32
  }
  func.func @transform_1(%arg0: i32) -> (i32, i32, i32) {
    %c0_i32 = arith.constant 0 : i32
    %c0_i32_0 = arith.constant 0 : i32
    %c0_i32_1 = arith.constant 0 : i32
    %c0_i32_2 = arith.constant 0 : i32
    return %c0_i32, %c0_i32_0, %c0_i32_1 : i32, i32, i32
  }
  func.func @transform_2(%arg0: i32) -> (i32, i32, i32) {
    %c0_i32 = arith.constant 0 : i32
    %c0_i32_0 = arith.constant 0 : i32
    %c0_i32_1 = arith.constant 0 : i32
    %c0_i32_2 = arith.constant 0 : i32
    return %c0_i32, %c0_i32_0, %c0_i32_1 : i32, i32, i32
  }
  func.func @transform_3(%arg0: i32) -> (i32, i32, i32) {
    %c0_i32 = arith.constant 0 : i32
    %c0_i32_0 = arith.constant 0 : i32
    %c0_i32_1 = arith.constant 0 : i32
    return %arg0, %c0_i32, %c0_i32_0 : i32, i32, i32
  }
}

</mosaic_0001>

<bundles_post_ra>
// kernel: conv_block_forward.1
= control target key start
LH: loop header
LB: loop body
LE: loop exit
PB: predicated region body
PF: predicated region fallthrough
CT: control target
= control target key end

     0   :  { %8 = vsyncpa [#allocation7], 0  ;;  %s15002_s12 = smov 0   ;;  %s17740_s0 = inlined_call_operand.vmem [shape: f32[2,16,16,4], index: 0, kind: input, shape index: {}]   ;;  %s17741_s1 = inlined_call_operand.hbm [shape: bf16[18,128,128], index: 1, kind: input, shape index: {}]   ;;  %s17742_s2 = inlined_call_operand.vmem [shape: f32[2,1,128], index: 2, kind: input, shape index: {}]   ;;  %s17743_s3 = inlined_call_operand.vmem [shape: f32[2,64,128], index: 3, kind: output, shape index: {}]  }
   0x1 LB: > { %s15008_s13 = sadd.s32 4294967295, %s14975_s12   ;;  %p12447_p0 = scmp.ge.s32.totalorder %s14975_s12, 1  ;;  %s14975_s12 = sphi %s15002_s12, %s14_s12  }
   0x2   : > { %p113_p1 = scmp.lt.s32.totalorder %s14975_s12, 3  ;;  %s14977_s14 = smov [#allocation6]  }
   0x3   : > { %s125_s15 = sshll.u32 %s14977_s14, 4  ;;  %p14775_p3 = scmp.eq.s32.totalorder %s15008_s13, 0  ;;  %s126_s15 = int_to_ptr.vmem [resolvable:$true] %s125_s15 }
   0x4   : > { %p15012_p2 = pnand %p12447_p0, %p113_p1  ;;  %s14950_s17 = scalar_lea.vmem %s126_s15, 18432 }
   0x5   : > { %p14951_p7 = scmp.ne.s32.totalorder %s126_s15, %s14950_s17  ;;  %p14958_p10 = scmp.lt.s32.totalorder %s126_s15, %s126_s15 }
   0x6   : > { %p14771_p4 = pneg %p15012_p2  ;;  %p14959_p11 = scmp.lt.s32.totalorder %s14950_s17, %s14950_s17 }
   0x8   : > { %p14772_p5 = pnand %p14775_p3, %p14771_p4  ;;  %p14960_p12 = por %p14959_p11, %p14958_p10 }
   0xa   : > { %p14941_p6 = pneg %p14772_p5 }
   0xc   : > { %p14953_p8 = pnand %p14951_p7, %p14941_p6 }
   0xe   : > { %p14954_p9 = pneg %p14953_p8 }
  0x10   : > { %p14961_p13 = pnand %p14960_p12, %p14954_p9 }
  0x12   : > { %14964 = shalt.err (!%p14961_p13)
}
  0x13   : > { %s14978_s18 = smov 64   ;;  %s14979_s19 = smov 4  }
  0x14   : > { %14774 = dma.hbm_to_vmem [thread:$0]  (!%p14772_p5), %s17741_s1, 18432, %s126_s15, [#allocation7], %s14978_s18, %s14978_s18, %s14979_s19  }
  0x15   : > { %152 = sbr.rel (%p15012_p2) target bundleno = 1629 (0x65d), region = 32 }
  0x1a   : > { %14970 = dma.done.wait (%p14775_p3), [#allocation7], 18432  }
  0x1b   : > { %14972 = vsyncadd (%p14775_p3), [#allocation7], 4294948864  ;;  %v14980_v0 = vmov 0.0   ;;  %v17744_v1 = vmov 0.0|0.0   ;;  %v14790_v2 = vld [vmem:[#allocation6 + $0x38] sm:$0xff]   ;;  %v14792_v4 = vld [vmem:[#allocation6 + $0x30] sm:$0xff]  }
  0x1c   : > { %187 = vst [vmem:[#allocation2] sm:$0xff] %v14980_v0  ;;  %192 = vst [vmem:[#allocation2 + $0x28] sm:$0xff] %v14980_v0  ;;  %13343 = vmatprep.mubr.bf16.mxu0 %v17744_v1  ;;  %13423 = vmatprep.mubr.bf16.mxu1 %v17744_v1  ;;  %v14791_v3 = vld [vmem:[#allocation6 + $0x78] sm:$0xff]   ;;  %v14793_v5 = vld [vmem:[#allocation6 + $0x70] sm:$0xff]   ;;  %p176_p0 = scmp.lt.s32.totalorder %s15008_s13, 1  ;;  %vm337_vm0 = vcmask 31744  }
  0x1d   : > { %193 = vst [vmem:[#allocation2 + $0x30] sm:$0xff] %v14980_v0  ;;  %196 = vst [vmem:[#allocation2 + $0x48] sm:$0xff] %v14980_v0  ;;  %13327 = vmatprep.subr.bf16.mxu0 %v14790_v2  ;;  %13407 = vmatprep.subr.bf16.mxu1 %v14791_v3  ;;  %v14794_v6 = vld [vmem:[#allocation6 + $0x28] sm:$0xff]   ;;  %v14796_v8 = vld [vmem:[#allocation6 + $0x20] sm:$0xff]  }
  0x1e   : > { %197 = vst [vmem:[#allocation2 + $0x50] sm:$0xff] %v14980_v0  ;;  %200 = vst [vmem:[#allocation2 + $0x68] sm:$0xff] %v14980_v0  ;;  %13328 = vmatpush3.bf16.msra.mxu0 %v14790_v2  ;;  %13408 = vmatpush3.bf16.msra.mxu1 %v14791_v3  ;;  %v14795_v7 = vld [vmem:[#allocation6 + $0x68] sm:$0xff]   ;;  %s17929_s13 = smov (!%p176_p0, %s15008_s13), 1  ;;  %v14797_v9 = vld [vmem:[#allocation6 + $0x60] sm:$0xff]  }
  0x1f   : > { %201 = vst [vmem:[#allocation2 + $0x70] sm:$0xff] %v14980_v0  ;;  %204 = vst [vmem:[#allocation2 + $0x88] sm:$0xff] %v14980_v0  ;;  %13329 = vmatprep.subr.bf16.mxu0 %v14792_v4  ;;  %13409 = vmatprep.subr.bf16.mxu1 %v14793_v5  ;;  %s12605_s22 = sshll.u32 %s17929_s13, 8  ;;  %v14798_v10 = vld [vmem:[#allocation6 + $0x18] sm:$0xff]   ;;  %v14800_v12 = vld [vmem:[#allocation6 + $0x10] sm:$0xff]   ;;  %s12606_s5 = sshll.u32 %s17929_s13, 6 }
  0x20   : > { %205 = vst [vmem:[#allocation2 + $0x90] sm:$0xff] %v14980_v0  ;;  %208 = vst [vmem:[#allocation2 + $0xa8] sm:$0xff] %v14980_v0  ;;  %v14799_v11 = vld [vmem:[#allocation6 + $0x58] sm:$0xff]   ;;  %s15073_s25 = scalar_lea.vmem %s17740_s0, %s12605_s22  ;;  %v14801_v13 = vld [vmem:[#allocation6 + $0x50] sm:$0xff]   ;;  %s17625_s8 = scalar_lea.vmem %s17743_s3, %s12606_s5 }
  0x21   : > { %209 = vst [vmem:[#allocation2 + $0xb0] sm:$0xff] %v14980_v0  ;;  %212 = vst [vmem:[#allocation2 + $0xc8] sm:$0xff] %v14980_v0  ;;  %v304_v14 = vld [vmem:[%s15073_s25] sm:$0xff]  ;;  %v305_v15 = vld [vmem:[%s15073_s25 + $0x8] sm:$0xff] }
  0x22   : > { %213 = vst [vmem:[#allocation2 + $0xd0] sm:$0xff] %v14980_v0  ;;  %216 = vst [vmem:[#allocation2 + $0xe8] sm:$0xff] %v14980_v0  ;;  %13330 = vmatpush3.bf16.msra.mxu0 %v14792_v4  ;;  %13410 = vmatpush3.bf16.msra.mxu1 %v14793_v5  ;;  %v306_v16 = vld [vmem:[%s15073_s25 + $0x10] sm:$0xff]  ;;  %v307_v17 = vld [vmem:[%s15073_s25 + $0x18] sm:$0xff] }
  0x23   : > { %217 = vst [vmem:[#allocation2 + $0xf0] sm:$0xff] %v14980_v0  ;;  %220 = vst [vmem:[#allocation2 + $0x108] sm:$0xff] %v14980_v0  ;;  %13331 = vmatprep.subr.bf16.mxu0 %v14794_v6  ;;  %13411 = vmatprep.subr.bf16.mxu1 %v14795_v7  ;;  %v14802_v18 = vld [vmem:[#allocation6 + $0x8] sm:$0xff]   ;;  %v308_v19 = vld [vmem:[%s15073_s25 + $0x20] sm:$0xff] }
  0x24   : > { %221 = vst [vmem:[#allocation2 + $0x110] sm:$0xff] %v14980_v0  ;;  %224 = vst [vmem:[#allocation2 + $0x128] sm:$0xff] %v14980_v0  ;;  %v309_v20 = vld [vmem:[%s15073_s25 + $0x28] sm:$0xff]  ;;  %v310_v21 = vld [vmem:[%s15073_s25 + $0x30] sm:$0xff] }
  0x25   : > { %225 = vst [vmem:[#allocation2 + $0x130] sm:$0xff] %v14980_v0  ;;  %228 = vst [vmem:[#allocation2 + $0x148] sm:$0xff] %v14980_v0  ;;  %v311_v22 = vld [vmem:[%s15073_s25 + $0x38] sm:$0xff]  ;;  %v14803_v23 = vld [vmem:[#allocation6 + $0x48] sm:$0xff]  }
  0x26   : > { %229 = vst [vmem:[#allocation2 + $0x150] sm:$0xff] %v14980_v0  ;;  %232 = vst [vmem:[#allocation2 + $0x168] sm:$0xff] %v14980_v0  ;;  %13332 = vmatpush3.bf16.msra.mxu0 %v14794_v6  ;;  %13412 = vmatpush3.bf16.msra.mxu1 %v14795_v7  ;;  %v312_v24 = vld [vmem:[%s15073_s25 + $0x40] sm:$0xff]  ;;  %v313_v25 = vld [vmem:[%s15073_s25 + $0x48] sm:$0xff] }
  0x27   : > { %233 = vst [vmem:[#allocation2 + $0x170] sm:$0xff] %v14980_v0  ;;  %236 = vst [vmem:[#allocation2 + $0x188] sm:$0xff] %v14980_v0  ;;  %13333 = vmatprep.subr.bf16.mxu0 %v14796_v8  ;;  %13413 = vmatprep.subr.bf16.mxu1 %v14797_v9  ;;  %v314_v26 = vld [vmem:[%s15073_s25 + $0x50] sm:$0xff]  ;;  %v315_v27 = vld [vmem:[%s15073_s25 + $0x58] sm:$0xff] }
  0x28   : > { %237 = vst [vmem:[#allocation2 + $0x190] sm:$0xff] %v14980_v0  ;;  %240 = vst [vmem:[#allocation2 + $0x1a8] sm:$0xff] %v14980_v0  ;;  %v14804_v28 = vld [vmem:[#allocation6] sm:$0xff]   ;;  %v317_v30 = vld [vmem:[%s15073_s25 + $0x68] sm:$0xff] }
  0x29   : > { %241 = vst [vmem:[#allocation2 + $0x1b0] sm:$0xff] %v14980_v0  ;;  %244 = vst [vmem:[#allocation2 + $0x1c8] sm:$0xff] %v14980_v0  ;;  %v316_v29 = vld [vmem:[%s15073_s25 + $0x60] sm:$0xff]  ;;  %v318_v31 = vld [vmem:[%s15073_s25 + $0x70] sm:$0xff] }
  0x2a   : > { %245 = vst [vmem:[#allocation2 + $0x1d0] sm:$0xff] %v14980_v0  ;;  %248 = vst [vmem:[#allocation2 + $0x1e8] sm:$0xff] %v14980_v0  ;;  %13334 = vmatpush3.bf16.msra.mxu0 %v14796_v8  ;;  %13414 = vmatpush3.bf16.msra.mxu1 %v14797_v9  ;;  %v14805_v32 = vld [vmem:[#allocation6 + $0x40] sm:$0xff]   ;;  %v319_v33 = vld [vmem:[%s15073_s25 + $0x78] sm:$0xff] }
  0x2b   : > { %249 = vst [vmem:[#allocation2 + $0x1f0] sm:$0xff] %v14980_v0  ;;  %252 = vst [vmem:[#allocation2 + $0x208] sm:$0xff] %v14980_v0  ;;  %13335 = vmatprep.subr.bf16.mxu0 %v14798_v10  ;;  %13415 = vmatprep.subr.bf16.mxu1 %v14799_v11  ;;  %v14806_v34 = vld [vmem:[#allocation6 + $0xb8] sm:$0xff]   ;;  %v320_v36 = vld [vmem:[%s15073_s25 + $0x80] sm:$0xff] }
  0x2c   : > { %253 = vst [vmem:[#allocation2 + $0x210] sm:$0xff] %v14980_v0  ;;  %338 = vst.msk [vmem:[#allocation2 + $0x28] sm:$0xff] %vm337_vm0, %v304_v14  ;;  %v321_v37 = vld [vmem:[%s15073_s25 + $0x88] sm:$0xff]  ;;  %v322_v38 = vld [vmem:[%s15073_s25 + $0x90] sm:$0xff] }
  0x2d   : > { %339 = vst.msk [vmem:[#allocation2 + $0x30] sm:$0xff] %vm337_vm0, %v305_v15  ;;  %340 = vst.msk [vmem:[#allocation2 + $0x48] sm:$0xff] %vm337_vm0, %v306_v16  ;;  %v323_v39 = vld [vmem:[%s15073_s25 + $0x98] sm:$0xff]  ;;  %v14807_v41 = vld [vmem:[#allocation6 + $0xb0] sm:$0xff]  }
  0x2e   : > { %13336 = vmatpush3.bf16.msra.mxu0 %v14798_v10  ;;  %341 = vst.msk [vmem:[#allocation2 + $0x50] sm:$0xff] %vm337_vm0, %v307_v17  ;;  %13416 = vmatpush3.bf16.msra.mxu1 %v14799_v11  ;;  %342 = vst.msk [vmem:[#allocation2 + $0x68] sm:$0xff] %vm337_vm0, %v308_v19  ;;  %v324_v42 = vld [vmem:[%s15073_s25 + $0xa0] sm:$0xff]  ;;  %v14808_v44 = vld [vmem:[#allocation6 + $0xa8] sm:$0xff]  }
  0x2f   : > { %13337 = vmatprep.subr.bf16.mxu0 %v14800_v12  ;;  %343 = vst.msk [vmem:[#allocation2 + $0x70] sm:$0xff] %vm337_vm0, %v309_v20  ;;  %13417 = vmatprep.subr.bf16.mxu1 %v14801_v13  ;;  %344 = vst.msk [vmem:[#allocation2 + $0x88] sm:$0xff] %vm337_vm0, %v310_v21  ;;  %v325_v45 = vld [vmem:[%s15073_s25 + $0xa8] sm:$0xff]  ;;  %v326_v46 = vld [vmem:[%s15073_s25 + $0xb0] sm:$0xff] }
  0x30   : > { %345 = vst.msk [vmem:[#allocation2 + $0x90] sm:$0xff] %vm337_vm0, %v311_v22  ;;  %346 = vst.msk [vmem:[#allocation2 + $0xa8] sm:$0xff] %vm337_vm0, %v312_v24  ;;  %v327_v47 = vld [vmem:[%s15073_s25 + $0xb8] sm:$0xff]  ;;  %v14814_v51 = vld [vmem:[#allocation6 + $0xf0] sm:$0xff]  }
  0x31   : > { %347 = vst.msk [vmem:[#allocation2 + $0xb0] sm:$0xff] %vm337_vm0, %v313_v25  ;;  %348 = vst.msk [vmem:[#allocation2 + $0xc8] sm:$0xff] %vm337_vm0, %v314_v26  ;;  %v14813_v49 = vld [vmem:[#allocation6 + $0xf8] sm:$0xff]   ;;  %v328_v53 = vld [vmem:[%s15073_s25 + $0xc0] sm:$0xff] }
  0x32   : > { %13338 = vmatpush3.bf16.msra.mxu0 %v14800_v12  ;;  %349 = vst.msk [vmem:[#allocation2 + $0xd0] sm:$0xff] %vm337_vm0, %v315_v27  ;;  %13418 = vmatpush3.bf16.msra.mxu1 %v14801_v13  ;;  %350 = vst.msk [vmem:[#allocation2 + $0xe8] sm:$0xff] %vm337_vm0, %v316_v29  ;;  %v329_v54 = vld [vmem:[%s15073_s25 + $0xc8] sm:$0xff]  ;;  %v14809_v55 = vld [vmem:[#allocation6 + $0xa0] sm:$0xff]  }
  0x33   : > { %13339 = vmatprep.subr.bf16.mxu0 %v14802_v18  ;;  %13419 = vmatprep.subr.bf16.mxu1 %v14803_v23  ;;  %351 = vst.msk [vmem:[#allocation2 + $0xf0] sm:$0xff] %vm337_vm0, %v317_v30  ;;  %352 = vst.msk [vmem:[#allocation2 + $0x108] sm:$0xff] %vm337_vm0, %v318_v31  ;;  %v375_v35 = vld [vmem:[#allocation2 + $0x28] sm:$0xff]  ;;  %v330_v59 = vld [vmem:[%s15073_s25 + $0xd0] sm:$0xff] }
  0x34   : > { %353 = vst.msk [vmem:[#allocation2 + $0x110] sm:$0xff] %vm337_vm0, %v319_v33  ;;  %354 = vst.msk [vmem:[#allocation2 + $0x128] sm:$0xff] %vm337_vm0, %v320_v36  ;;  %v15114_v40 = vpack.c.bf16 %v375_v35, %v14980_v0  ;;  %v376_v43 = vld [vmem:[#allocation2 + $0x30] sm:$0xff]  ;;  %v379_v48 = vld [vmem:[#allocation2 + $0x48] sm:$0xff] }
  0x35   : > { %355 = vst.msk [vmem:[#allocation2 + $0x130] sm:$0xff] %vm337_vm0, %v321_v37  ;;  %356 = vst.msk [vmem:[#allocation2 + $0x148] sm:$0xff] %vm337_vm0, %v322_v38  ;;  %v15131_v50 = vpack.c.bf16 %v14980_v0, %v376_v43  ;;  %v15134_v52 = vpack.c.bf16 %v379_v48, %v14980_v0  ;;  %v14815_v56 = vld [vmem:[#allocation6 + $0xe8] sm:$0xff]   ;;  %v380_v57 = vld [vmem:[#allocation2 + $0x50] sm:$0xff] }
  0x36   : > { %13340 = vmatpush3.bf16.msra.mxu0 %v14802_v18  ;;  %13420 = vmatpush3.bf16.msra.mxu1 %v14803_v23  ;;  %357 = vst.msk [vmem:[#allocation2 + $0x150] sm:$0xff] %vm337_vm0, %v323_v39  ;;  %358 = vst.msk [vmem:[#allocation2 + $0x168] sm:$0xff] %vm337_vm0, %v324_v42  ;;  %v383_v58 = vld [vmem:[#allocation2 + $0x68] sm:$0xff]  ;;  %v331_v60 = vld [vmem:[%s15073_s25 + $0xd8] sm:$0xff]  ;;  %v15149_v62 = vpack.c.bf16 %v14980_v0, %v380_v57 }
  0x37   : > { %13341 = vmatprep.subr.bf16.mxu0 %v14804_v28  ;;  %13421 = vmatprep.subr.bf16.mxu1 %v14805_v32  ;;  %359 = vst.msk [vmem:[#allocation2 + $0x170] sm:$0xff] %vm337_vm0, %v325_v45  ;;  %360 = vst.msk [vmem:[#allocation2 + $0x188] sm:$0xff] %vm337_vm0, %v326_v46  ;;  %v14810_v61 = vld [vmem:[#allocation6 + $0x98] sm:$0xff]   ;;  %v14816_v63 = vld [vmem:[#allocation6 + $0xe0] sm:$0xff]   ;;  %v15152_v2 = vpack.c.bf16 %v383_v58, %v14980_v0 }
  0x38   : > { %361 = vst.msk [vmem:[#allocation2 + $0x190] sm:$0xff] %vm337_vm0, %v327_v47  ;;  %362 = vst.msk [vmem:[#allocation2 + $0x1a8] sm:$0xff] %vm337_vm0, %v328_v53  ;;  %v332_v3 = vld [vmem:[%s15073_s25 + $0xe0] sm:$0xff]  ;;  %v333_v4 = vld [vmem:[%s15073_s25 + $0xe8] sm:$0xff] }
  0x39   : > { %363 = vst.msk [vmem:[#allocation2 + $0x1b0] sm:$0xff] %vm337_vm0, %v329_v54  ;;  %364 = vst.msk [vmem:[#allocation2 + $0x1c8] sm:$0xff] %vm337_vm0, %v330_v59  ;;  %v14811_v5 = vld [vmem:[#allocation6 + $0x90] sm:$0xff]   ;;  %v14818_v6 = vld [vmem:[#allocation6 + $0xd8] sm:$0xff]  }
  0x3a   : > { %13342 = vmatpush3.bf16.msra.mxu0 %v14804_v28  ;;  %13422 = vmatpush3.bf16.msra.mxu1 %v14805_v32  ;;  %365 = vst.msk [vmem:[#allocation2 + $0x1d0] sm:$0xff] %vm337_vm0, %v331_v60  ;;  %366 = vst.msk [vmem:[#allocation2 + $0x1e8] sm:$0xff] %vm337_vm0, %v332_v3  ;;  %v384_v7 = vld [vmem:[#allocation2 + $0x70] sm:$0xff]  ;;  %v387_v8 = vld [vmem:[#allocation2 + $0x88] sm:$0xff] }
  0x3b   : > { %13487 = vmatprep.subr.bf16.mxu0 %v14806_v34  ;;  %13567 = vmatprep.subr.bf16.mxu1 %v14813_v49  ;;  %367 = vst.msk [vmem:[#allocation2 + $0x1f0] sm:$0xff] %vm337_vm0, %v333_v4  ;;  %v14812_v9 = vld [vmem:[#allocation6 + $0x88] sm:$0xff]   ;;  %v14819_v10 = vld [vmem:[#allocation6 + $0xd0] sm:$0xff]   ;;  %v15163_v11 = vpack.c.bf16 %v14980_v0, %v384_v7  ;;  %v15166_v12 = vpack.c.bf16 %v387_v8, %v14980_v0  ;;  %v14817_v13 = vld [vmem:[#allocation6 + $0x80] sm:$0xff]  }
  0x3c   : > { %v14820_v14 = vld [vmem:[#allocation6 + $0xc8] sm:$0xff]   ;;  %v388_v15 = vld [vmem:[#allocation2 + $0x90] sm:$0xff]  ;;  %v15171_v17 = vld [vmem:[#allocation6 + $0x138] sm:$0xff]  }
  0x3d   : > { %13344 = vmatmul.mubr.bf16.vlgmr.msra.gmra.mxu0 %v17744_v1  ;;  %13424 = vmatmul.mubr.bf16.vlgmr.msra.gmra.mxu1 %v17744_v1  ;;  %v391_v16 = vld [vmem:[#allocation2 + $0xa8] sm:$0xff]  ;;  %v14821_v18 = vld [vmem:[#allocation6 + $0xc0] sm:$0xff]   ;;  %v15175_v19 = vpack.c.bf16 %v14980_v0, %v388_v15  ;;  %v392_v21 = vld [vmem:[#allocation2 + $0xb0] sm:$0xff] }
  0x3e   : > { %13488 = vmatpush3.bf16.msra.mxu0 %v14806_v34  ;;  %13347 = vmatprep.mubr.bf16.mxu0 %v15114_v40  ;;  %v15178_v20 = vpack.c.bf16 %v391_v16, %v14980_v0  ;;  %v395_v22 = vld [vmem:[#allocation2 + $0xc8] sm:$0xff]  ;;  %v15186_v23 = vpack.c.bf16 %v14980_v0, %v392_v21  ;;  %v396_v25 = vld [vmem:[#allocation2 + $0xd0] sm:$0xff]  ;;  %v15225_v39 = vld [vmem:[#allocation2] sm:$0xff] }
  0x3f   : > { %13427 = vmatprep.mubr.bf16.mxu1 %v15114_v40  ;;  %13489 = vmatprep.subr.bf16.mxu0 %v14807_v41  ;;  %v15189_v24 = vpack.c.bf16 %v395_v22, %v14980_v0  ;;  %v399_v26 = vld [vmem:[#allocation2 + $0xe8] sm:$0xff]  ;;  %v15196_v27 = vpack.c.bf16 %v14980_v0, %v396_v25  ;;  %v400_v29 = vld [vmem:[#allocation2 + $0xf0] sm:$0xff]  ;;  %v14825_v15 = vld [vmem:[#allocation6 + $0x120] sm:$0xff]  }
  0x40   : > { %13568 = vmatpush3.bf16.msra.mxu1 %v14813_v49  ;;  %v15199_v28 = vpack.c.bf16 %v399_v26, %v14980_v0  ;;  %v403_v30 = vld [vmem:[#allocation2 + $0x108] sm:$0xff]  ;;  %v15206_v31 = vpack.c.bf16 %v14980_v0, %v400_v29  ;;  %v404_v33 = vld [vmem:[#allocation2 + $0x110] sm:$0xff]  ;;  %v14832_v16 = vld [vmem:[#allocation6 + $0x160] sm:$0xff]  }
  0x41   : > { %13569 = vmatprep.subr.bf16.mxu1 %v14814_v51  ;;  %v15209_v32 = vpack.c.bf16 %v403_v30, %v14980_v0  ;;  %v407_v34 = vld [vmem:[#allocation2 + $0x128] sm:$0xff]  ;;  %v15216_v35 = vpack.c.bf16 %v14980_v0, %v404_v33  ;;  %v408_v37 = vld [vmem:[#allocation2 + $0x130] sm:$0xff]  ;;  %v14833_v29 = vld [vmem:[#allocation6 + $0x100] sm:$0xff]  }
  0x42   : > { %13490 = vmatpush3.bf16.msra.mxu0 %v14807_v41  ;;  %v15219_v36 = vpack.c.bf16 %v407_v34, %v14980_v0  ;;  %v411_v38 = vld [vmem:[#allocation2 + $0x148] sm:$0xff]  ;;  %v15228_v41 = vpack.c.bf16 %v15225_v39, %v408_v37  ;;  %v412_v0 = vld [vmem:[#allocation2 + $0x150] sm:$0xff]  ;;  %v14837_v30 = vld [vmem:[#allocation6 + $0x140] sm:$0xff]   ;;  %v883_v34 = vlaneseq }
  0x43   : > { %13491 = vmatprep.subr.bf16.mxu0 %v14808_v44  ;;  %v15231_v42 = vpack.c.bf16 %v411_v38, %v15225_v39  ;;  %v415_v43 = vld [vmem:[#allocation2 + $0x168] sm:$0xff]  ;;  %v416_v46 = vld [vmem:[#allocation2 + $0x170] sm:$0xff]  ;;  %v15315_v33 = vld [vmem:[#allocation6 + $0x1b8] sm:$0xff]  }
  0x44   : > { %13570 = vmatpush3.bf16.msra.mxu1 %v14814_v51  ;;  %v15241_v45 = vpack.c.bf16 %v415_v43, %v15225_v39  ;;  %v419_v47 = vld [vmem:[#allocation2 + $0x188] sm:$0xff]  ;;  %v15248_v48 = vpack.c.bf16 %v15225_v39, %v416_v46  ;;  %v420_v51 = vld [vmem:[#allocation2 + $0x190] sm:$0xff]  ;;  %v15337_v43 = vshrl.u32 %v883_v34, 7 }
  0x45   : > { %13348 = vmatmul.mubr.bf16.gmra.mxu0 %v15131_v50  ;;  %13428 = vmatmul.mubr.bf16.gmra.mxu1 %v15131_v50  ;;  %v15251_v49 = vpack.c.bf16 %v419_v47, %v15225_v39  ;;  %v423_v53 = vld [vmem:[#allocation2 + $0x1a8] sm:$0xff]  ;;  %v15258_v54 = vpack.c.bf16 %v15225_v39, %v420_v51  ;;  %v424_v57 = vld [vmem:[#allocation2 + $0x1b0] sm:$0xff] }
  0x46   : > { %13351 = vmatprep.mubr.bf16.mxu0 %v15134_v52  ;;  %13431 = vmatprep.mubr.bf16.mxu1 %v15134_v52  ;;  %v427_v58 = vld [vmem:[#allocation2 + $0x1c8] sm:$0xff]  ;;  %v15268_v59 = vpack.c.bf16 %v15225_v39, %v424_v57  ;;  %v432_v7 = vld [vmem:[#allocation2 + $0x1f0] sm:$0xff]  ;;  %vm885_vm1 = vcmp.lt.s32.totalorder %v15337_v43, 1  ;;  %vm1978_vm2 = vcmp.lt.s32.totalorder %v15337_v43, 7 }
  0x47   : > { %13492 = vmatpush3.bf16.msra.mxu0 %v14808_v44  ;;  %13571 = vmatprep.subr.bf16.mxu1 %v14815_v56  ;;  %v15238_v44 = vpack.c.bf16 %v15225_v39, %v412_v0  ;;  %v15271_v60 = vpack.c.bf16 %v427_v58, %v15225_v39  ;;  %v15292_v8 = vpack.c.bf16 %v15225_v39, %v432_v7  ;;  %v14827_v21 = vld [vmem:[#allocation6 + $0x110] sm:$0xff]   ;;  %v14828_v25 = vld [vmem:[#allocation6 + $0x108] sm:$0xff]  }
  0x48   : > { %13493 = vmatprep.subr.bf16.mxu0 %v14809_v55  ;;  %13572 = vmatpush3.bf16.msra.mxu1 %v14815_v56  ;;  %v14829_v56 = vld [vmem:[#allocation6 + $0x178] sm:$0xff]   ;;  %v14835_v22 = vld [vmem:[#allocation6 + $0x150] sm:$0xff]   ;;  %v14836_v26 = vld [vmem:[#allocation6 + $0x148] sm:$0xff]  }
  0x49   : > { %13573 = vmatprep.subr.bf16.mxu1 %v14816_v63 }
  0x4b   : > { %13494 = vmatpush3.bf16.msra.mxu0 %v14809_v55  ;;  %v15261_v55 = vpack.c.bf16 %v423_v53, %v15225_v39 }
  0x4c   : > { %13495 = vmatprep.subr.bf16.mxu0 %v14810_v61  ;;  %13574 = vmatpush3.bf16.msra.mxu1 %v14816_v63  ;;  %v431_v63 = vld [vmem:[#allocation2 + $0x1e8] sm:$0xff] }
  0x4d   : > { %13352 = vmatmul.mubr.bf16.gmra.mxu0 %v15149_v62  ;;  %13432 = vmatmul.mubr.bf16.gmra.mxu1 %v15149_v62  ;;  %v15281_v4 = vpack.c.bf16 %v431_v63, %v15225_v39 }
  0x4e   : > { %13355 = vmatprep.mubr.bf16.mxu0 %v15152_v2  ;;  %13435 = vmatprep.mubr.bf16.mxu1 %v15152_v2 }
  0x4f   : > { %13496 = vmatpush3.bf16.msra.mxu0 %v14810_v61  ;;  %13575 = vmatprep.subr.bf16.mxu1 %v14818_v6  ;;  %v428_v61 = vld [vmem:[#allocation2 + $0x1d0] sm:$0xff] }
  0x50   : > { %13497 = vmatprep.subr.bf16.mxu0 %v14811_v5  ;;  %13576 = vmatpush3.bf16.msra.mxu1 %v14818_v6  ;;  %v15278_v3 = vpack.c.bf16 %v15225_v39, %v428_v61  ;;  %v335_v6 = vld [vmem:[%s15073_s25 + $0xf8] sm:$0xff] }
  0x51   : > { %13577 = vmatprep.subr.bf16.mxu1 %v14819_v10  ;;  %369 = vst.msk [vmem:[#allocation2 + $0x210] sm:$0xff] %vm337_vm0, %v335_v6 }
  0x53   : > { %13498 = vmatpush3.bf16.msra.mxu0 %v14811_v5  ;;  %v334_v5 = vld [vmem:[%s15073_s25 + $0xf0] sm:$0xff] }
  0x54   : > { %13499 = vmatprep.subr.bf16.mxu0 %v14812_v9  ;;  %13578 = vmatpush3.bf16.msra.mxu1 %v14819_v10  ;;  %368 = vst.msk [vmem:[#allocation2 + $0x208] sm:$0xff] %vm337_vm0, %v334_v5  ;;  %v14830_v10 = vld [vmem:[#allocation6 + $0x170] sm:$0xff]  }
  0x55   : > { %13356 = vmatmul.mubr.bf16.gmra.mxu0 %v15163_v11  ;;  %13436 = vmatmul.mubr.bf16.gmra.mxu1 %v15163_v11 }
  0x56   : > { %13359 = vmatprep.mubr.bf16.mxu0 %v15166_v12  ;;  %13439 = vmatprep.mubr.bf16.mxu1 %v15166_v12 }
  0x57   : > { %13500 = vmatpush3.bf16.msra.mxu0 %v14812_v9  ;;  %13579 = vmatprep.subr.bf16.mxu1 %v14820_v14  ;;  %v14823_v9 = vld [vmem:[#allocation6 + $0x130] sm:$0xff]  }
  0x58   : > { %13501 = vmatprep.subr.bf16.mxu0 %v14817_v13  ;;  %13580 = vmatpush3.bf16.msra.mxu1 %v14820_v14  ;;  %v14831_v14 = vld [vmem:[#allocation6 + $0x168] sm:$0xff]  }
  0x59   : > { %13581 = vmatprep.subr.bf16.mxu1 %v14821_v18 }
  0x5b   : > { %13502 = vmatpush3.bf16.msra.mxu0 %v14817_v13  ;;  %v14824_v13 = vld [vmem:[#allocation6 + $0x128] sm:$0xff]  }
  0x5c   : > { %13647 = vmatprep.subr.bf16.mxu0 %v15171_v17  ;;  %13582 = vmatpush3.bf16.msra.mxu1 %v14821_v18  ;;  %v14834_v18 = vld [vmem:[#allocation6 + $0x158] sm:$0xff]  }
  0x5d   : > { %13360 = vmatmul.mubr.bf16.gmra.mxu0 %v15175_v19  ;;  %13440 = vmatmul.mubr.bf16.gmra.mxu1 %v15175_v19 }
  0x5e   : > { %13363 = vmatprep.mubr.bf16.mxu0 %v15178_v20  ;;  %13443 = vmatprep.mubr.bf16.mxu1 %v15178_v20 }
  0x5f   : > { %13727 = vmatprep.subr.bf16.mxu1 %v14829_v56 }
  0x65   : > { %13364 = vmatmul.mubr.bf16.gmra.mxu0 %v15186_v23  ;;  %13444 = vmatmul.mubr.bf16.gmra.mxu1 %v15186_v23 }
  0x66   : > { %13367 = vmatprep.mubr.bf16.mxu0 %v15189_v24  ;;  %13447 = vmatprep.mubr.bf16.mxu1 %v15189_v24 }
  0x6d   : > { %13368 = vmatmul.mubr.bf16.gmra.mxu0 %v15196_v27  ;;  %13448 = vmatmul.mubr.bf16.gmra.mxu1 %v15196_v27 }
  0x6e   : > { %13371 = vmatprep.mubr.bf16.mxu0 %v15199_v28  ;;  %13451 = vmatprep.mubr.bf16.mxu1 %v15199_v28 }
  0x75   : > { %13372 = vmatmul.mubr.bf16.gmra.mxu0 %v15206_v31  ;;  %13452 = vmatmul.mubr.bf16.gmra.mxu1 %v15206_v31 }
  0x76   : > { %13375 = vmatprep.mubr.bf16.mxu0 %v15209_v32  ;;  %13455 = vmatprep.mubr.bf16.mxu1 %v15209_v32 }
  0x7d   : > { %13376 = vmatmul.mubr.bf16.gmra.mxu0 %v15216_v35  ;;  %13456 = vmatmul.mubr.bf16.gmra.mxu1 %v15216_v35 }
  0x7e   : > { %13379 = vmatprep.mubr.bf16.mxu0 %v15219_v36  ;;  %13459 = vmatprep.mubr.bf16.mxu1 %v15219_v36 }
  0x85   : > { %13380 = vmatmul.mubr.bf16.gmra.mxu0 %v15228_v41  ;;  %13460 = vmatmul.mubr.bf16.gmra.mxu1 %v15228_v41 }
  0x86   : > { %13383 = vmatprep.mubr.bf16.mxu0 %v15231_v42  ;;  %13463 = vmatprep.mubr.bf16.mxu1 %v15231_v42 }
  0x8d   : > { %13384 = vmatmul.mubr.bf16.gmra.mxu0 %v15238_v44  ;;  %13464 = vmatmul.mubr.bf16.gmra.mxu1 %v15238_v44 }
  0x8e   : > { %13387 = vmatprep.mubr.bf16.mxu0 %v15241_v45  ;;  %13467 = vmatprep.mubr.bf16.mxu1 %v15241_v45 }
  0x95   : > { %13388 = vmatmul.mubr.bf16.gmra.mxu0 %v15248_v48  ;;  %13468 = vmatmul.mubr.bf16.gmra.mxu1 %v15248_v48 }
  0x96   : > { %13391 = vmatprep.mubr.bf16.mxu0 %v15251_v49  ;;  %13471 = vmatprep.mubr.bf16.mxu1 %v15251_v49 }
  0x9d   : > { %13392 = vmatmul.mubr.bf16.gmra.mxu0 %v15258_v54  ;;  %13472 = vmatmul.mubr.bf16.gmra.mxu1 %v15258_v54 }
  0x9e   : > { %13395 = vmatprep.mubr.bf16.mxu0 %v15261_v55  ;;  %13475 = vmatprep.mubr.bf16.mxu1 %v15261_v55 }
  0xa5   : > { %13396 = vmatmul.mubr.bf16.gmra.mxu0 %v15268_v59  ;;  %13476 = vmatmul.mubr.bf16.gmra.mxu1 %v15268_v59 }
  0xa6   : > { %13399 = vmatprep.mubr.bf16.mxu0 %v15271_v60  ;;  %13479 = vmatprep.mubr.bf16.mxu1 %v15271_v60 }
  0xad   : > { %13400 = vmatmul.mubr.bf16.gmra.mxu0 %v15278_v3  ;;  %13480 = vmatmul.mubr.bf16.gmra.mxu1 %v15278_v3 }
  0xae   : > { %13403 = vmatprep.mubr.bf16.mxu0 %v15281_v4  ;;  %13483 = vmatprep.mubr.bf16.mxu1 %v15281_v4 }
  0xb5   : > { %13404 = vmatmul.mubr.bf16.gmra.mxu0 %v15292_v8  ;;  %13484 = vmatmul.mubr.bf16.gmra.mxu1 %v15292_v8 }
  0xb6   : > { %13503 = vmatprep.mubr.bf16.mxu0 %v17744_v1  ;;  %13583 = vmatprep.mubr.bf16.mxu1 %v15114_v40 }
  0xbd   : > { %13504 = vmatmul.mubr.bf16.vlgmr.msra.gmra.mxu0 %v17744_v1  ;;  %13584 = vmatmul.mubr.bf16.vlgmr.msra.gmra.mxu1 %v15131_v50 }
  0xbe   : > { %13648 = vmatpush3.bf16.msra.mxu0 %v15171_v17  ;;  %13507 = vmatprep.mubr.bf16.mxu0 %v15114_v40  ;;  %v14826_v17 = vld [vmem:[#allocation6 + $0x118] sm:$0xff]  }
  0xbf   : > { %13587 = vmatprep.mubr.bf16.mxu1 %v15134_v52  ;;  %13649 = vmatprep.subr.bf16.mxu0 %v14823_v9 }
  0xc0   : > { %13728 = vmatpush3.bf16.msra.mxu1 %v14829_v56 }
  0xc1   : > { %13729 = vmatprep.subr.bf16.mxu1 %v14830_v10 }
  0xc2   : > { %13650 = vmatpush3.bf16.msra.mxu0 %v14823_v9 }
  0xc3   : > { %13651 = vmatprep.subr.bf16.mxu0 %v14824_v13 }
  0xc4   : > { %13730 = vmatpush3.bf16.msra.mxu1 %v14830_v10 }
  0xc5   : > { %13508 = vmatmul.mubr.bf16.gmra.mxu0 %v15131_v50  ;;  %13731 = vmatprep.subr.bf16.mxu1 %v14831_v14 }
  0xc6   : > { %13588 = vmatmul.mubr.bf16.gmra.mxu1 %v15149_v62  ;;  %13511 = vmatprep.mubr.bf16.mxu0 %v15134_v52 }
  0xc7   : > { %13591 = vmatprep.mubr.bf16.mxu1 %v15152_v2  ;;  %13652 = vmatpush3.bf16.msra.mxu0 %v14824_v13 }
  0xc8   : > { %13653 = vmatprep.subr.bf16.mxu0 %v14825_v15  ;;  %13732 = vmatpush3.bf16.msra.mxu1 %v14831_v14 }
  0xc9   : > { %13733 = vmatprep.subr.bf16.mxu1 %v14832_v16 }
  0xcb   : > { %13654 = vmatpush3.bf16.msra.mxu0 %v14825_v15 }
  0xcc   : > { %13655 = vmatprep.subr.bf16.mxu0 %v14826_v17  ;;  %13734 = vmatpush3.bf16.msra.mxu1 %v14832_v16 }
  0xcd   : > { %13512 = vmatmul.mubr.bf16.gmra.mxu0 %v15149_v62  ;;  %13735 = vmatprep.subr.bf16.mxu1 %v14834_v18 }
  0xce   : > { %13592 = vmatmul.mubr.bf16.gmra.mxu1 %v15163_v11  ;;  %13515 = vmatprep.mubr.bf16.mxu0 %v15152_v2 }
  0xcf   : > { %13595 = vmatprep.mubr.bf16.mxu1 %v15166_v12  ;;  %13656 = vmatpush3.bf16.msra.mxu0 %v14826_v17 }
  0xd0   : > { %13657 = vmatprep.subr.bf16.mxu0 %v14827_v21  ;;  %13736 = vmatpush3.bf16.msra.mxu1 %v14834_v18 }
  0xd1   : > { %13737 = vmatprep.subr.bf16.mxu1 %v14835_v22 }
  0xd3   : > { %13658 = vmatpush3.bf16.msra.mxu0 %v14827_v21 }
  0xd4   : > { %13659 = vmatprep.subr.bf16.mxu0 %v14828_v25  ;;  %13738 = vmatpush3.bf16.msra.mxu1 %v14835_v22 }
  0xd5   : > { %13516 = vmatmul.mubr.bf16.gmra.mxu0 %v15163_v11  ;;  %13739 = vmatprep.subr.bf16.mxu1 %v14836_v26 }
  0xd6   : > { %13596 = vmatmul.mubr.bf16.gmra.mxu1 %v15175_v19  ;;  %13519 = vmatprep.mubr.bf16.mxu0 %v15166_v12 }
  0xd7   : > { %13599 = vmatprep.mubr.bf16.mxu1 %v15178_v20  ;;  %13660 = vmatpush3.bf16.msra.mxu0 %v14828_v25 }
  0xd8   : > { %13661 = vmatprep.subr.bf16.mxu0 %v14833_v29  ;;  %13740 = vmatpush3.bf16.msra.mxu1 %v14836_v26 }
  0xd9   : > { %13741 = vmatprep.subr.bf16.mxu1 %v14837_v30 }
  0xdb   : > { %13662 = vmatpush3.bf16.msra.mxu0 %v14833_v29 }
  0xdc   : > { %13742 = vmatpush3.bf16.msra.mxu1 %v14837_v30  ;;  %13807 = vmatprep.subr.bf16.mxu0 %v15315_v33 }
  0xdd   : > { %13520 = vmatmul.mubr.bf16.gmra.mxu0 %v15175_v19 }
  0xde   : > { %13600 = vmatmul.mubr.bf16.gmra.mxu1 %v15186_v23  ;;  %13523 = vmatprep.mubr.bf16.mxu0 %v15178_v20 }
  0xdf   : > { %13603 = vmatprep.mubr.bf16.mxu1 %v15189_v24 }
  0xe5   : > { %13524 = vmatmul.mubr.bf16.gmra.mxu0 %v15186_v23 }
  0xe6   : > { %13604 = vmatmul.mubr.bf16.gmra.mxu1 %v15196_v27  ;;  %13527 = vmatprep.mubr.bf16.mxu0 %v15189_v24 }
  0xe7   : > { %13607 = vmatprep.mubr.bf16.mxu1 %v15199_v28 }
  0xed   : > { %13528 = vmatmul.mubr.bf16.gmra.mxu0 %v15196_v27 }
  0xee   : > { %13608 = vmatmul.mubr.bf16.gmra.mxu1 %v15206_v31  ;;  %13531 = vmatprep.mubr.bf16.mxu0 %v15199_v28 }
  0xef   : > { %13611 = vmatprep.mubr.bf16.mxu1 %v15209_v32 }
  0xf5   : > { %13532 = vmatmul.mubr.bf16.gmra.mxu0 %v15206_v31 }
  0xf6   : > { %13612 = vmatmul.mubr.bf16.gmra.mxu1 %v15216_v35  ;;  %13535 = vmatprep.mubr.bf16.mxu0 %v15209_v32 }
  0xf7   : > { %13615 = vmatprep.mubr.bf16.mxu1 %v15219_v36 }
  0xfd   : > { %v13345_v37 = vpop.f32.mrf.mxu0  ;;  %13536 = vmatmul.mubr.bf16.gmra.mxu0 %v15216_v35  ;;  %v13425_v38 = vpop.f32.mrf.mxu1 }
  0xfe   : > { %13616 = vmatmul.mubr.bf16.gmra.mxu1 %v15228_v41  ;;  %13539 = vmatprep.mubr.bf16.mxu0 %v15219_v36  ;;  %v821_v56 = vrot.slane %v13345_v37, 7 }
  0xff   : > { %v564_v0 = vpop.f32.mrf.mxu0  ;;  %13619 = vmatprep.mubr.bf16.mxu1 %v15231_v42  ;;  %v1113_v46 = vpop.f32.mrf.mxu1 }
 0x100   : > { %v819_v57 = vrot.slane %v564_v0, 7 }
 0x101   : > { %v13346_v47 = vpop.f32.mrf.mxu0  ;;  %v13426_v51 = vpop.f32.mrf.mxu1 }
 0x103   : > { %v567_v53 = vpop.f32.mrf.mxu0  ;;  %v1116_v61 = vpop.f32.mrf.mxu1 }
 0x104   : > { %v820_v58 = vrot.slane %v567_v53, 7 }
 0x105   : > { %v13349_v63 = vpop.f32.mrf.mxu0  ;;  %13540 = vmatmul.mubr.bf16.gmra.mxu0 %v15228_v41  ;;  %v13429_v7 = vpop.f32.mrf.mxu1 }
 0x106   : > { %v947_v5 = vsel %vm885_vm1, %v820_v58, %v821_v56  ;;  %v948_v6 = vsel %vm885_vm1, %v819_v57, %v820_v58  ;;  %13620 = vmatmul.mubr.bf16.gmra.mxu1 %v15238_v44  ;;  %13543 = vmatprep.mubr.bf16.mxu0 %v15231_v42  ;;  %v825_v18 = vrot.slane %v13349_v63, 7 }
 0x107   : > { %v15348_v9 = vadd.f32 %v1116_v61, %v948_v6  ;;  %v580_v10 = vpop.f32.mrf.mxu0  ;;  %13623 = vmatprep.mubr.bf16.mxu1 %v15241_v45  ;;  %v15351_v13 = vadd.f32 %v13425_v38, %v947_v5  ;;  %v1129_v14 = vpop.f32.mrf.mxu1 }
 0x108   : > { %v823_v21 = vrot.slane %v580_v10, 7 }
 0x109   : > { %v13350_v15 = vpop.f32.mrf.mxu0  ;;  %v13430_v16 = vpop.f32.mrf.mxu1 }
 0x10b   : > { %v583_v17 = vpop.f32.mrf.mxu0  ;;  %v1132_v25 = vpop.f32.mrf.mxu1 }
 0x10c   : > { %v824_v22 = vrot.slane %v583_v17, 7 }
 0x10d   : > { %v13353_v26 = vpop.f32.mrf.mxu0  ;;  %13544 = vmatmul.mubr.bf16.gmra.mxu0 %v15238_v44  ;;  %v13433_v34 = vpop.f32.mrf.mxu1 }
 0x10e   : > { %v943_v29 = vsel %vm885_vm1, %v824_v22, %v825_v18  ;;  %v944_v30 = vsel %vm885_vm1, %v823_v21, %v824_v22  ;;  %13624 = vmatmul.mubr.bf16.gmra.mxu1 %v15248_v48  ;;  %13547 = vmatprep.mubr.bf16.mxu0 %v15241_v45  ;;  %v829_v56 = vrot.slane %v13353_v26, 7 }
 0x10f   : > { %v15360_v37 = vadd.f32 %v1132_v25, %v944_v30  ;;  %v596_v38 = vpop.f32.mrf.mxu0  ;;  %13627 = vmatprep.mubr.bf16.mxu1 %v15251_v49  ;;  %v15363_v0 = vadd.f32 %v13429_v7, %v943_v29  ;;  %v1145_v46 = vpop.f32.mrf.mxu1 }
 0x110   : > { %v827_v57 = vrot.slane %v596_v38, 7 }
 0x111   : > { %v13354_v47 = vpop.f32.mrf.mxu0  ;;  %v13434_v51 = vpop.f32.mrf.mxu1 }
 0x113   : > { %v599_v53 = vpop.f32.mrf.mxu0  ;;  %v1148_v61 = vpop.f32.mrf.mxu1 }
 0x114   : > { %v828_v58 = vrot.slane %v599_v53, 7 }
 0x115   : > { %v13357_v63 = vpop.f32.mrf.mxu0  ;;  %13548 = vmatmul.mubr.bf16.gmra.mxu0 %v15248_v48  ;;  %v13437_v10 = vpop.f32.mrf.mxu1 }
 0x116   : > { %v939_v5 = vsel %vm885_vm1, %v828_v58, %v829_v56  ;;  %v940_v6 = vsel %vm885_vm1, %v827_v57, %v828_v58  ;;  %13628 = vmatmul.mubr.bf16.gmra.mxu1 %v15258_v54  ;;  %13551 = vmatprep.mubr.bf16.mxu0 %v15251_v49  ;;  %v833_v22 = vrot.slane %v13357_v63, 7  ;;  %v15389_v58 = vld [vmem:[#allocation6 + $0x1f8] sm:$0xff]  }
 0x117   : > { %v15372_v7 = vadd.f32 %v1148_v61, %v940_v6  ;;  %v612_v14 = vpop.f32.mrf.mxu0  ;;  %13631 = vmatprep.mubr.bf16.mxu1 %v15261_v55  ;;  %v15375_v15 = vadd.f32 %v13433_v34, %v939_v5  ;;  %v1161_v16 = vpop.f32.mrf.mxu1  ;;  %13887 = vmatprep.subr.bf16.mxu1 %v15389_v58 }
 0x118   : > { %v831_v25 = vrot.slane %v612_v14, 7 }
 0x119   : > { %v13358_v17 = vpop.f32.mrf.mxu0  ;;  %v13438_v18 = vpop.f32.mrf.mxu1 }
 0x11b   : > { %v615_v21 = vpop.f32.mrf.mxu0  ;;  %v1164_v29 = vpop.f32.mrf.mxu1 }
 0x11c   : > { %v832_v26 = vrot.slane %v615_v21, 7 }
 0x11d   : > { %v13361_v30 = vpop.f32.mrf.mxu0  ;;  %13552 = vmatmul.mubr.bf16.gmra.mxu0 %v15258_v54  ;;  %v13441_v47 = vpop.f32.mrf.mxu1 }
 0x11e   : > { %v935_v38 = vsel %vm885_vm1, %v832_v26, %v833_v22  ;;  %v936_v46 = vsel %vm885_vm1, %v831_v25, %v832_v26  ;;  %13632 = vmatmul.mubr.bf16.gmra.mxu1 %v15268_v59  ;;  %13555 = vmatprep.mubr.bf16.mxu0 %v15261_v55  ;;  %v837_v5 = vrot.slane %v13361_v30, 7  ;;  %v2296_v30 = vld [vmem:[#allocation2 + $0x208] sm:$0xff] }
 0x11f   : > { %v15384_v34 = vadd.f32 %v1164_v29, %v936_v46  ;;  %v628_v51 = vpop.f32.mrf.mxu0  ;;  %13635 = vmatprep.mubr.bf16.mxu1 %v15271_v60  ;;  %v15387_v53 = vadd.f32 %v13437_v10, %v935_v38  ;;  %v1177_v56 = vpop.f32.mrf.mxu1 }
 0x120   : > { %v835_v6 = vrot.slane %v628_v51, 7  ;;  %v15405_v56 = vpack.c.bf16 %v2296_v30, %v15225_v39 }
 0x121   : > { %v13362_v57 = vpop.f32.mrf.mxu0  ;;  %v13442_v61 = vpop.f32.mrf.mxu1 }
 0x123   : > { %v631_v63 = vpop.f32.mrf.mxu0  ;;  %v1180_v16 = vpop.f32.mrf.mxu1 }
 0x124   : > { %v836_v14 = vrot.slane %v631_v63, 7 }
 0x125   : > { %v13365_v17 = vpop.f32.mrf.mxu0  ;;  %13556 = vmatmul.mubr.bf16.gmra.mxu0 %v15268_v59  ;;  %v13445_v21 = vpop.f32.mrf.mxu1 }
 0x126   : > { %v931_v18 = vsel %vm885_vm1, %v836_v14, %v837_v5  ;;  %v932_v10 = vsel %vm885_vm1, %v835_v6, %v836_v14  ;;  %13636 = vmatmul.mubr.bf16.gmra.mxu1 %v15278_v3  ;;  %13559 = vmatprep.mubr.bf16.mxu0 %v15271_v60  ;;  %v841_v57 = vrot.slane %v13365_v17, 7 }
 0x127   : > { %v15399_v22 = vadd.f32 %v1180_v16, %v932_v10  ;;  %v644_v25 = vpop.f32.mrf.mxu0  ;;  %13639 = vmatprep.mubr.bf16.mxu1 %v15281_v4  ;;  %v15402_v26 = vadd.f32 %v13441_v47, %v931_v18  ;;  %v1193_v29 = vpop.f32.mrf.mxu1  ;;  %v2297_v10 = vld [vmem:[#allocation2 + $0x210] sm:$0xff] }
 0x128   : > { %v839_v61 = vrot.slane %v644_v25, 7 }
 0x129   : > { %17794 = vst [vmem:[#allocation9_spill] sm:$0xff] %v15399_v22  ;;  %v13366_v38 = vpop.f32.mrf.mxu0  ;;  %v13446_v46 = vpop.f32.mrf.mxu1 }
 0x12a   : > { %v15420_v46 = vpack.c.bf16 %v15225_v39, %v2297_v10 }
 0x12b   : > { %v647_v51 = vpop.f32.mrf.mxu0  ;;  %v1196_v5 = vpop.f32.mrf.mxu1 }
 0x12c   : > { %v840_v63 = vrot.slane %v647_v51, 7  ;;  %17796 = vst [vmem:[#allocation11_spill] sm:$0xff] %v15420_v46 }
 0x12d   : > { %v13369_v6 = vpop.f32.mrf.mxu0  ;;  %13560 = vmatmul.mubr.bf16.gmra.mxu0 %v15278_v3  ;;  %v13449_v16 = vpop.f32.mrf.mxu1 }
 0x12e   : > { %v927_v14 = vsel %vm885_vm1, %v840_v63, %v841_v57  ;;  %v928_v47 = vsel %vm885_vm1, %v839_v61, %v840_v63  ;;  %13640 = vmatmul.mubr.bf16.gmra.mxu1 %v15292_v8  ;;  %13563 = vmatprep.mubr.bf16.mxu0 %v15281_v4  ;;  %v845_v57 = vrot.slane %v13369_v6, 7 }
 0x12f   : > { %v15414_v18 = vadd.f32 %v1196_v5, %v928_v47  ;;  %v660_v17 = vpop.f32.mrf.mxu0  ;;  %13643 = vmatprep.mubr.bf16.mxu1 %v15405_v56  ;;  %v15417_v25 = vadd.f32 %v13445_v21, %v927_v14  ;;  %v1209_v29 = vpop.f32.mrf.mxu1 }
 0x130   : > { %v843_v61 = vrot.slane %v660_v17, 7 }
 0x131   : > { %17795 = vst [vmem:[#allocation10_spill] sm:$0xff] %v15414_v18  ;;  %v13370_v30 = vpop.f32.mrf.mxu0  ;;  %v13450_v38 = vpop.f32.mrf.mxu1 }
 0x133   : > { %v663_v51 = vpop.f32.mrf.mxu0  ;;  %v1212_v1 = vpop.f32.mrf.mxu1 }
 0x134   : > { %v844_v63 = vrot.slane %v663_v51, 7 }
 0x135   : > { %v13373_v22 = vpop.f32.mrf.mxu0  ;;  %13564 = vmatmul.mubr.bf16.gmra.mxu0 %v15292_v8  ;;  %v13453_v14 = vpop.f32.mrf.mxu1 }
 0x136   : > { %v923_v5 = vsel %vm885_vm1, %v844_v63, %v845_v57  ;;  %v924_v21 = vsel %vm885_vm1, %v843_v61, %v844_v63  ;;  %13644 = vmatmul.mubr.bf16.gmra.mxu1 %v15420_v46  ;;  %13663 = vmatprep.mubr.bf16.mxu0 %v15114_v40  ;;  %v849_v38 = vrot.slane %v13373_v22, 7  ;;  %v14839_v63 = vld [vmem:[#allocation6 + $0x1b0] sm:$0xff]  }
 0x137   : > { %v15429_v39 = vadd.f32 %v1212_v1, %v924_v21  ;;  %v676_v6 = vpop.f32.mrf.mxu0  ;;  %13743 = vmatprep.mubr.bf16.mxu1 %v15114_v40  ;;  %v15432_v47 = vadd.f32 %v13449_v16, %v923_v5  ;;  %v1225_v17 = vpop.f32.mrf.mxu1  ;;  %v14846_v46 = vld [vmem:[#allocation6 + $0x1f0] sm:$0xff]   ;;  %v14840_v21 = vld [vmem:[#allocation6 + $0x1a8] sm:$0xff]  }
 0x138   : > { %v847_v51 = vrot.slane %v676_v6, 7 }
 0x139   : > { %v13374_v10 = vpop.f32.mrf.mxu0  ;;  %v13454_v29 = vpop.f32.mrf.mxu1 }
 0x13a   : > { %v14847_v29 = vld [vmem:[#allocation6 + $0x1e8] sm:$0xff]  }
 0x13b   : > { %v679_v30 = vpop.f32.mrf.mxu0  ;;  %v1228_v61 = vpop.f32.mrf.mxu1 }
 0x13c   : > { %v848_v57 = vrot.slane %v679_v30, 7 }
 0x13d   : > { %v13377_v18 = vpop.f32.mrf.mxu0  ;;  %13664 = vmatmul.mubr.bf16.vlgmr.msra.gmra.mxu0 %v15131_v50  ;;  %v13457_v16 = vpop.f32.mrf.mxu1 }
 0x13e   : > { %v919_v1 = vsel %vm885_vm1, %v848_v57, %v849_v38  ;;  %v920_v40 = vsel %vm885_vm1, %v847_v51, %v848_v57  ;;  %13744 = vmatmul.mubr.bf16.vlgmr.msra.gmra.mxu1 %v15131_v50  ;;  %13808 = vmatpush3.bf16.msra.mxu0 %v15315_v33  ;;  %v853_v30 = vrot.slane %v13377_v18, 7 }
 0x13f   : > { %v15441_v22 = vadd.f32 %v1228_v61, %v920_v40  ;;  %v692_v5 = vpop.f32.mrf.mxu0  ;;  %13667 = vmatprep.mubr.bf16.mxu0 %v15134_v52  ;;  %13747 = vmatprep.mubr.bf16.mxu1 %v15134_v52  ;;  %v15445_v6 = vadd.f32 %v13453_v14, %v919_v1  ;;  %v1241_v17 = vpop.f32.mrf.mxu1  ;;  %v14841_v61 = vld [vmem:[#allocation6 + $0x1a0] sm:$0xff]  }
 0x140   : > { %13809 = vmatprep.subr.bf16.mxu0 %v14839_v63  ;;  %13888 = vmatpush3.bf16.msra.mxu1 %v15389_v58  ;;  %v851_v38 = vrot.slane %v692_v5, 7  ;;  %v14849_v14 = vld [vmem:[#allocation6 + $0x1e0] sm:$0xff]   ;;  %v14842_v17 = vld [vmem:[#allocation6 + $0x198] sm:$0xff]  }
 0x141   : > { %v13378_v10 = vpop.f32.mrf.mxu0  ;;  %13889 = vmatprep.subr.bf16.mxu1 %v14846_v46  ;;  %v13458_v50 = vpop.f32.mrf.mxu1 }
 0x142   : > { %13810 = vmatpush3.bf16.msra.mxu0 %v14839_v63  ;;  %v14850_v50 = vld [vmem:[#allocation6 + $0x1d8] sm:$0xff]  }
 0x143   : > { %v695_v33 = vpop.f32.mrf.mxu0  ;;  %13811 = vmatprep.subr.bf16.mxu0 %v14840_v21  ;;  %v1244_v57 = vpop.f32.mrf.mxu1 }
 0x144   : > { %v852_v51 = vrot.slane %v695_v33, 7  ;;  %13890 = vmatpush3.bf16.msra.mxu1 %v14846_v46 }
 0x145   : > { %v13381_v52 = vpop.f32.mrf.mxu0  ;;  %13668 = vmatmul.mubr.bf16.gmra.mxu0 %v15149_v62  ;;  %13891 = vmatprep.subr.bf16.mxu1 %v14847_v29  ;;  %v13461_v63 = vpop.f32.mrf.mxu1 }
 0x146   : > { %v915_v58 = vsel %vm885_vm1, %v852_v51, %v853_v30  ;;  %v916_v1 = vsel %vm885_vm1, %v851_v38, %v852_v51  ;;  %13748 = vmatmul.mubr.bf16.gmra.mxu1 %v15149_v62  ;;  %13671 = vmatprep.mubr.bf16.mxu0 %v15152_v2  ;;  %v857_v62 = vrot.slane %v13381_v52, 7 }
 0x147   : > { %v15455_v18 = vadd.f32 %v1244_v57, %v916_v1  ;;  %v708_v40 = vpop.f32.mrf.mxu0  ;;  %13751 = vmatprep.mubr.bf16.mxu1 %v15152_v2  ;;  %13812 = vmatpush3.bf16.msra.mxu0 %v14840_v21  ;;  %v15458_v46 = vadd.f32 %v13457_v16, %v915_v58  ;;  %v1257_v5 = vpop.f32.mrf.mxu1  ;;  %v14843_v1 = vld [vmem:[#allocation6 + $0x190] sm:$0xff]  }
 0x148   : > { %13813 = vmatprep.subr.bf16.mxu0 %v14841_v61  ;;  %13892 = vmatpush3.bf16.msra.mxu1 %v14847_v29  ;;  %v855_v38 = vrot.slane %v708_v40, 7  ;;  %v14851_v16 = vld [vmem:[#allocation6 + $0x1d0] sm:$0xff]   ;;  %v14844_v5 = vld [vmem:[#allocation6 + $0x188] sm:$0xff]  }
 0x149   : > { %v13382_v10 = vpop.f32.mrf.mxu0  ;;  %13893 = vmatprep.subr.bf16.mxu1 %v14849_v14  ;;  %v13462_v33 = vpop.f32.mrf.mxu1 }
 0x14a   : > { %v14852_v33 = vld [vmem:[#allocation6 + $0x1c8] sm:$0xff]  }
 0x14b   : > { %v711_v30 = vpop.f32.mrf.mxu0  ;;  %13814 = vmatpush3.bf16.msra.mxu0 %v14841_v61  ;;  %v1260_v57 = vpop.f32.mrf.mxu1 }
 0x14c   : > { %v856_v51 = vrot.slane %v711_v30, 7  ;;  %13815 = vmatprep.subr.bf16.mxu0 %v14842_v17  ;;  %13894 = vmatpush3.bf16.msra.mxu1 %v14849_v14 }
 0x14d   : > { %v13385_v2 = vpop.f32.mrf.mxu0  ;;  %13672 = vmatmul.mubr.bf16.gmra.mxu0 %v15163_v11  ;;  %13895 = vmatprep.subr.bf16.mxu1 %v14850_v50  ;;  %v13465_v58 = vpop.f32.mrf.mxu1 }
 0x14e   : > { %v911_v21 = vsel %vm885_vm1, %v856_v51, %v857_v62  ;;  %v912_v29 = vsel %vm885_vm1, %v855_v38, %v856_v51  ;;  %13752 = vmatmul.mubr.bf16.gmra.mxu1 %v15163_v11  ;;  %13675 = vmatprep.mubr.bf16.mxu0 %v15166_v12  ;;  %v861_v11 = vrot.slane %v13385_v2, 7 }
 0x14f   : > { %v15467_v61 = vadd.f32 %v1260_v57, %v912_v29  ;;  %v724_v52 = vpop.f32.mrf.mxu0  ;;  %13755 = vmatprep.mubr.bf16.mxu1 %v15166_v12  ;;  %13816 = vmatpush3.bf16.msra.mxu0 %v14842_v17  ;;  %v15470_v14 = vadd.f32 %v13461_v63, %v911_v21  ;;  %v1273_v40 = vpop.f32.mrf.mxu1  ;;  %v14848_v29 = vld [vmem:[#allocation6 + $0x180] sm:$0xff]  }
 0x150   : > { %13817 = vmatprep.subr.bf16.mxu0 %v14843_v1  ;;  %13896 = vmatpush3.bf16.msra.mxu1 %v14850_v50  ;;  %v859_v38 = vrot.slane %v724_v52, 7  ;;  %v14854_v63 = vld [vmem:[#allocation6 + $0x1c0] sm:$0xff]   ;;  %v15484_v40 = vld [vmem:[#allocation6 + $0x238] sm:$0xff]  }
 0x151   : > { %v13386_v10 = vpop.f32.mrf.mxu0  ;;  %13897 = vmatprep.subr.bf16.mxu1 %v14851_v16  ;;  %v13466_v30 = vpop.f32.mrf.mxu1 }
 0x153   : > { %v727_v62 = vpop.f32.mrf.mxu0  ;;  %13818 = vmatpush3.bf16.msra.mxu0 %v14843_v1  ;;  %v1276_v57 = vpop.f32.mrf.mxu1 }
 0x154   : > { %v860_v51 = vrot.slane %v727_v62, 7  ;;  %13819 = vmatprep.subr.bf16.mxu0 %v14844_v5  ;;  %13898 = vmatpush3.bf16.msra.mxu1 %v14851_v16 }
 0x155   : > { %v13389_v12 = vpop.f32.mrf.mxu0  ;;  %13676 = vmatmul.mubr.bf16.gmra.mxu0 %v15175_v19  ;;  %13899 = vmatprep.subr.bf16.mxu1 %v14852_v33  ;;  %v13469_v21 = vpop.f32.mrf.mxu1 }
 0x156   : > { %v907_v17 = vsel %vm885_vm1, %v860_v51, %v861_v11  ;;  %v908_v50 = vsel %vm885_vm1, %v859_v38, %v860_v51  ;;  %13756 = vmatmul.mubr.bf16.gmra.mxu1 %v15175_v19  ;;  %13679 = vmatprep.mubr.bf16.mxu0 %v15178_v20  ;;  %v865_v19 = vrot.slane %v13389_v12, 7 }
 0x157   : > { %v15479_v1 = vadd.f32 %v1276_v57, %v908_v50  ;;  %v740_v2 = vpop.f32.mrf.mxu0  ;;  %13759 = vmatprep.mubr.bf16.mxu1 %v15178_v20  ;;  %13820 = vmatpush3.bf16.msra.mxu0 %v14844_v5  ;;  %v15482_v16 = vadd.f32 %v13465_v58, %v907_v17  ;;  %v1289_v52 = vpop.f32.mrf.mxu1 }
 0x158   : > { %13821 = vmatprep.subr.bf16.mxu0 %v14848_v29  ;;  %13900 = vmatpush3.bf16.msra.mxu1 %v14852_v33  ;;  %v863_v11 = vrot.slane %v740_v2, 7 }
 0x159   : > { %v13390_v10 = vpop.f32.mrf.mxu0  ;;  %13901 = vmatprep.subr.bf16.mxu1 %v14854_v63  ;;  %v13470_v30 = vpop.f32.mrf.mxu1 }
 0x15b   : > { %v743_v62 = vpop.f32.mrf.mxu0  ;;  %13822 = vmatpush3.bf16.msra.mxu0 %v14848_v29  ;;  %v1292_v51 = vpop.f32.mrf.mxu1 }
 0x15c   : > { %v864_v38 = vrot.slane %v743_v62, 7  ;;  %13967 = vmatprep.subr.bf16.mxu0 %v15484_v40  ;;  %13902 = vmatpush3.bf16.msra.mxu1 %v14854_v63 }
 0x15d   : > { %v13393_v20 = vpop.f32.mrf.mxu0  ;;  %13680 = vmatmul.mubr.bf16.gmra.mxu0 %v15186_v23  ;;  %v13473_v33 = vpop.f32.mrf.mxu1 }
 0x15e   : > { %v903_v58 = vsel %vm885_vm1, %v864_v38, %v865_v19  ;;  %v904_v5 = vsel %vm885_vm1, %v863_v11, %v864_v38  ;;  %13760 = vmatmul.mubr.bf16.gmra.mxu1 %v15186_v23  ;;  %13683 = vmatprep.mubr.bf16.mxu0 %v15189_v24  ;;  %v869_v52 = vrot.slane %v13393_v20, 7 }
 0x15f   : > { %v15494_v57 = vadd.f32 %v1292_v51, %v904_v5  ;;  %v756_v29 = vpop.f32.mrf.mxu0  ;;  %13763 = vmatprep.mubr.bf16.mxu1 %v15189_v24  ;;  %v15497_v12 = vadd.f32 %v13469_v21, %v903_v58  ;;  %v1305_v63 = vpop.f32.mrf.mxu1 }
 0x160   : > { %v867_v10 = vrot.slane %v756_v29, 7 }
 0x161   : > { %v13394_v17 = vpop.f32.mrf.mxu0  ;;  %v13474_v50 = vpop.f32.mrf.mxu1 }
 0x163   : > { %v759_v2 = vpop.f32.mrf.mxu0  ;;  %v1308_v62 = vpop.f32.mrf.mxu1 }
 0x164   : > { %v868_v30 = vrot.slane %v759_v2, 7 }
 0x165   : > { %v13397_v19 = vpop.f32.mrf.mxu0  ;;  %13684 = vmatmul.mubr.bf16.gmra.mxu0 %v15196_v27  ;;  %v13477_v24 = vpop.f32.mrf.mxu1 }
 0x166   : > { %v899_v23 = vsel %vm885_vm1, %v868_v30, %v869_v52  ;;  %v900_v11 = vsel %vm885_vm1, %v867_v10, %v868_v30  ;;  %13764 = vmatmul.mubr.bf16.gmra.mxu1 %v15196_v27  ;;  %13687 = vmatprep.mubr.bf16.mxu0 %v15199_v28  ;;  %v873_v63 = vrot.slane %v13397_v19, 7 }
 0x167   : > { %v15506_v21 = vadd.f32 %v1308_v62, %v900_v11  ;;  %v772_v38 = vpop.f32.mrf.mxu0  ;;  %13767 = vmatprep.mubr.bf16.mxu1 %v15199_v28  ;;  %v15509_v51 = vadd.f32 %v13473_v33, %v899_v23  ;;  %v1321_v20 = vpop.f32.mrf.mxu1 }
 0x168   : > { %v871_v17 = vrot.slane %v772_v38, 7 }
 0x169   : > { %v13398_v58 = vpop.f32.mrf.mxu0  ;;  %v13478_v5 = vpop.f32.mrf.mxu1 }
 0x16b   : > { %v775_v29 = vpop.f32.mrf.mxu0  ;;  %v1324_v2 = vpop.f32.mrf.mxu1 }
 0x16c   : > { %v872_v50 = vrot.slane %v775_v29, 7 }
 0x16d   : > { %v13401_v52 = vpop.f32.mrf.mxu0  ;;  %13688 = vmatmul.mubr.bf16.gmra.mxu0 %v15206_v31  ;;  %v13481_v28 = vpop.f32.mrf.mxu1 }
 0x16e   : > { %v895_v27 = vsel %vm885_vm1, %v872_v50, %v873_v63  ;;  %v896_v10 = vsel %vm885_vm1, %v871_v17, %v872_v50  ;;  %13768 = vmatmul.mubr.bf16.gmra.mxu1 %v15206_v31  ;;  %13691 = vmatprep.mubr.bf16.mxu0 %v15209_v32  ;;  %v877_v20 = vrot.slane %v13401_v52, 7 }
 0x16f   : > { %v15518_v33 = vadd.f32 %v1324_v2, %v896_v10  ;;  %v788_v30 = vpop.f32.mrf.mxu0  ;;  %13771 = vmatprep.mubr.bf16.mxu1 %v15209_v32  ;;  %v15521_v62 = vadd.f32 %v13477_v24, %v895_v27  ;;  %v1337_v19 = vpop.f32.mrf.mxu1 }
 0x170   : > { %v875_v58 = vrot.slane %v788_v30, 7 }
 0x171   : > { %v13402_v23 = vpop.f32.mrf.mxu0  ;;  %v13482_v11 = vpop.f32.mrf.mxu1 }
 0x173   : > { %v791_v38 = vpop.f32.mrf.mxu0  ;;  %v1340_v29 = vpop.f32.mrf.mxu1 }
 0x174   : > { %v876_v5 = vrot.slane %v791_v38, 7 }
 0x175   : > { %v13405_v63 = vpop.f32.mrf.mxu0  ;;  %13692 = vmatmul.mubr.bf16.gmra.mxu0 %v15216_v35  ;;  %v13485_v32 = vpop.f32.mrf.mxu1 }
 0x176   : > { %v891_v31 = vsel %vm885_vm1, %v876_v5, %v877_v20  ;;  %v892_v17 = vsel %vm885_vm1, %v875_v58, %v876_v5  ;;  %13772 = vmatmul.mubr.bf16.gmra.mxu1 %v15216_v35  ;;  %13695 = vmatprep.mubr.bf16.mxu0 %v15219_v36  ;;  %v881_v19 = vrot.slane %v13405_v63, 7 }
 0x177   : > { %v15530_v24 = vadd.f32 %v1340_v29, %v892_v17  ;;  %v804_v50 = vpop.f32.mrf.mxu0  ;;  %13775 = vmatprep.mubr.bf16.mxu1 %v15219_v36  ;;  %v15533_v2 = vadd.f32 %v13481_v28, %v891_v31  ;;  %v1353_v52 = vpop.f32.mrf.mxu1 }
 0x178   : > { %v879_v23 = vrot.slane %v804_v50, 7 }
 0x179   : > { %v13406_v27 = vpop.f32.mrf.mxu0  ;;  %v13486_v10 = vpop.f32.mrf.mxu1 }
 0x17b   : > { %v807_v30 = vpop.f32.mrf.mxu0  ;;  %v1356_v38 = vpop.f32.mrf.mxu1 }
 0x17c   : > { %v880_v11 = vrot.slane %v807_v30, 7 }
 0x17d   : > { %v13505_v20 = vpop.f32.mrf.mxu0  ;;  %13696 = vmatmul.mubr.bf16.gmra.mxu0 %v15228_v41  ;;  %v13585_v36 = vpop.f32.mrf.mxu1 }
 0x17e   : > { %v887_v35 = vsel %vm885_vm1, %v880_v11, %v881_v19  ;;  %v888_v58 = vsel %vm885_vm1, %v879_v23, %v880_v11  ;;  %13776 = vmatmul.mubr.bf16.gmra.mxu1 %v15228_v41  ;;  %13699 = vmatprep.mubr.bf16.mxu0 %v15231_v42  ;;  %v1916_v17 = vrot.slane %v13505_v20, 1  ;;  %v2687_v27 = vrot.slane %v13585_v36, 7 }
 0x17f   : > { %v15542_v28 = vadd.f32 %v1356_v38, %v888_v58  ;;  %v1659_v5 = vpop.f32.mrf.mxu0  ;;  %13779 = vmatprep.mubr.bf16.mxu1 %v15231_v42  ;;  %v15545_v29 = vadd.f32 %v13485_v32, %v887_v35  ;;  %v2430_v63 = vpop.f32.mrf.mxu1 }
 0x180   : > { %v2685_v10 = vrot.slane %v2430_v63, 7 }
 0x181   : > { %v13506_v31 = vpop.f32.mrf.mxu0  ;;  %v13586_v52 = vpop.f32.mrf.mxu1 }
 0x182   : > { %v1917_v50 = vrot.slane %v13506_v31, 1 }
 0x183   : > { %v1662_v30 = vpop.f32.mrf.mxu0  ;;  %v2433_v23 = vpop.f32.mrf.mxu1 }
 0x184   : > { %v2039_v41 = vsel %vm1978_vm2, %v1916_v17, %v1917_v50  ;;  %v1915_v19 = vrot.slane %v1662_v30, 1  ;;  %v2686_v11 = vrot.slane %v2433_v23, 7 }
 0x185   : > { %v13509_v38 = vpop.f32.mrf.mxu0  ;;  %13700 = vmatmul.mubr.bf16.gmra.mxu0 %v15238_v44  ;;  %v2109_v42 = vadd.f32 %v2039_v41, %v15351_v13 }
 0x186   : > { %v2040_v32 = vsel %vm1978_vm2, %v1915_v19, %v1916_v17  ;;  %v13589_v20 = vpop.f32.mrf.mxu1  ;;  %13780 = vmatmul.mubr.bf16.gmra.mxu1 %v15238_v44  ;;  %13703 = vmatprep.mubr.bf16.mxu0 %v15241_v45  ;;  %v2810_v58 = vsel %vm885_vm1, %v2686_v11, %v2687_v27  ;;  %v2811_v5 = vsel %vm885_vm1, %v2685_v10, %v2686_v11  ;;  %v1920_v44 = vrot.slane %v13509_v38, 1 }
 0x187   : > { %v1675_v35 = vpop.f32.mrf.mxu0  ;;  %13783 = vmatprep.mubr.bf16.mxu1 %v15241_v45  ;;  %v2108_v36 = vadd.f32 %v2040_v32, %v15348_v9  ;;  %v15562_v63 = vadd.f32 %v2810_v58, %v2109_v42  ;;  %v2691_v30 = vrot.slane %v13589_v20, 7 }
 0x188   : > { %v2446_v13 = vpop.f32.mrf.mxu1 }
 0x189   : > { %v13510_v31 = vpop.f32.mrf.mxu0  ;;  %v15564_v17 = vadd.f32 %v2811_v5, %v2108_v36  ;;  %v2689_v41 = vrot.slane %v2446_v13, 7 }
 0x18a   : > { %v1921_v50 = vrot.slane %v13510_v31, 1  ;;  %v13590_v52 = vpop.f32.mrf.mxu1 }
 0x18b   : > { %v1678_v45 = vpop.f32.mrf.mxu0 }
 0x18c   : > { %v2035_v27 = vsel %vm1978_vm2, %v1920_v44, %v1921_v50  ;;  %v1919_v19 = vrot.slane %v1678_v45, 1  ;;  %v2449_v9 = vpop.f32.mrf.mxu1 }
 0x18d   : > { %v2690_v23 = vrot.slane %v2449_v9, 7  ;;  %v13513_v32 = vpop.f32.mrf.mxu0  ;;  %13704 = vmatmul.mubr.bf16.gmra.mxu0 %v15248_v48  ;;  %v2113_v10 = vadd.f32 %v2035_v27, %v15363_v0 }
 0x18e   : > { %v2036_v11 = vsel %vm1978_vm2, %v1919_v19, %v1920_v44  ;;  %v13593_v38 = vpop.f32.mrf.mxu1  ;;  %13784 = vmatmul.mubr.bf16.gmra.mxu1 %v15248_v48  ;;  %13707 = vmatprep.mubr.bf16.mxu0 %v15251_v49  ;;  %v1924_v48 = vrot.slane %v13513_v32, 1 }
 0x18f   : > { %v1691_v42 = vpop.f32.mrf.mxu0  ;;  %13787 = vmatprep.mubr.bf16.mxu1 %v15251_v49  ;;  %v2806_v20 = vsel %vm885_vm1, %v2690_v23, %v2691_v30  ;;  %v2112_v35 = vadd.f32 %v2036_v11, %v15360_v37  ;;  %v2807_v58 = vsel %vm885_vm1, %v2689_v41, %v2690_v23  ;;  %v2695_v50 = vrot.slane %v13593_v38, 7 }
 0x190   : > { %v2462_v0 = vpop.f32.mrf.mxu1  ;;  %v15580_v36 = vadd.f32 %v2806_v20, %v2113_v10 }
 0x191   : > { %v13514_v5 = vpop.f32.mrf.mxu0  ;;  %v15582_v13 = vadd.f32 %v2807_v58, %v2112_v35  ;;  %v2693_v52 = vrot.slane %v2462_v0, 7 }
 0x192   : > { %v1925_v31 = vrot.slane %v13514_v5, 1  ;;  %v13594_v44 = vpop.f32.mrf.mxu1 }
 0x193   : > { %v1694_v49 = vpop.f32.mrf.mxu0 }
 0x194   : > { %v2031_v30 = vsel %vm1978_vm2, %v1924_v48, %v1925_v31  ;;  %v1923_v45 = vrot.slane %v1694_v49, 1  ;;  %v2465_v37 = vpop.f32.mrf.mxu1 }
 0x195   : > { %v2694_v27 = vrot.slane %v2465_v37, 7  ;;  %v13517_v19 = vpop.f32.mrf.mxu0  ;;  %13708 = vmatmul.mubr.bf16.gmra.mxu0 %v15258_v54  ;;  %v2117_v41 = vadd.f32 %v2031_v30, %v15375_v15 }
 0x196   : > { %v2032_v9 = vsel %vm1978_vm2, %v1923_v45, %v1924_v48  ;;  %v13597_v23 = vpop.f32.mrf.mxu1  ;;  %13788 = vmatmul.mubr.bf16.gmra.mxu1 %v15258_v54  ;;  %13711 = vmatprep.mubr.bf16.mxu0 %v15261_v55  ;;  %v1928_v54 = vrot.slane %v13517_v19, 1 }
 0x197   : > { %v1707_v32 = vpop.f32.mrf.mxu0  ;;  %13791 = vmatprep.mubr.bf16.mxu1 %v15261_v55  ;;  %v2802_v10 = vsel %vm885_vm1, %v2694_v27, %v2695_v50  ;;  %v2116_v11 = vadd.f32 %v2032_v9, %v15372_v7  ;;  %v2803_v38 = vsel %vm885_vm1, %v2693_v52, %v2694_v27  ;;  %v2699_v5 = vrot.slane %v13597_v23, 7 }
 0x198   : > { %v2478_v15 = vpop.f32.mrf.mxu1  ;;  %v15598_v42 = vadd.f32 %v2802_v10, %v2117_v41 }
 0x199   : > { %v13518_v20 = vpop.f32.mrf.mxu0  ;;  %v15600_v35 = vadd.f32 %v2803_v38, %v2116_v11  ;;  %v2697_v48 = vrot.slane %v2478_v15, 7 }
 0x19a   : > { %v1929_v58 = vrot.slane %v13518_v20, 1  ;;  %v13598_v0 = vpop.f32.mrf.mxu1 }
 0x19b   : > { %v1710_v55 = vpop.f32.mrf.mxu0 }
 0x19c   : > { %v2027_v31 = vsel %vm1978_vm2, %v1928_v54, %v1929_v58  ;;  %v1927_v44 = vrot.slane %v1710_v55, 1  ;;  %v2481_v7 = vpop.f32.mrf.mxu1 }
 0x19d   : > { %v2698_v50 = vrot.slane %v2481_v7, 7  ;;  %v13521_v49 = vpop.f32.mrf.mxu0  ;;  %13712 = vmatmul.mubr.bf16.gmra.mxu0 %v15268_v59  ;;  %v2121_v52 = vadd.f32 %v2027_v31, %v15387_v53  ;;  %v17797_v7 = vld [vmem:[#allocation9_spill] sm:$0xff] }
 0x19e   : > { %v2028_v30 = vsel %vm1978_vm2, %v1927_v44, %v1928_v54  ;;  %v13601_v45 = vpop.f32.mrf.mxu1  ;;  %13792 = vmatmul.mubr.bf16.gmra.mxu1 %v15268_v59  ;;  %13715 = vmatprep.mubr.bf16.mxu0 %v15271_v60  ;;  %v1932_v59 = vrot.slane %v13521_v49, 1 }
 0x19f   : > { %v1723_v37 = vpop.f32.mrf.mxu0  ;;  %13795 = vmatprep.mubr.bf16.mxu1 %v15271_v60  ;;  %v2798_v27 = vsel %vm885_vm1, %v2698_v50, %v2699_v5  ;;  %v2120_v19 = vadd.f32 %v2028_v30, %v15384_v34  ;;  %v2799_v41 = vsel %vm885_vm1, %v2697_v48, %v2698_v50  ;;  %v2703_v38 = vrot.slane %v13601_v45, 7 }
 0x1a0   : > { %v2494_v53 = vpop.f32.mrf.mxu1  ;;  %v15616_v9 = vadd.f32 %v2798_v27, %v2121_v52 }
 0x1a1   : > { %v13522_v23 = vpop.f32.mrf.mxu0  ;;  %v15618_v32 = vadd.f32 %v2799_v41, %v2120_v19  ;;  %v2701_v15 = vrot.slane %v2494_v53, 7 }
 0x1a2   : > { %v1933_v10 = vrot.slane %v13522_v23, 1  ;;  %v13602_v11 = vpop.f32.mrf.mxu1 }
 0x1a3   : > { %v1726_v60 = vpop.f32.mrf.mxu0 }
 0x1a4   : > { %v2023_v20 = vsel %vm1978_vm2, %v1932_v59, %v1933_v10  ;;  %v1931_v54 = vrot.slane %v1726_v60, 1  ;;  %v2497_v34 = vpop.f32.mrf.mxu1 }
 0x1a5   : > { %v2702_v58 = vrot.slane %v2497_v34, 7  ;;  %v13525_v0 = vpop.f32.mrf.mxu0  ;;  %13716 = vmatmul.mubr.bf16.gmra.mxu0 %v15278_v3  ;;  %v2125_v5 = vadd.f32 %v2023_v20, %v15402_v26 }
 0x1a6   : > { %v2024_v48 = vsel %vm1978_vm2, %v1931_v54, %v1932_v59  ;;  %v13605_v55 = vpop.f32.mrf.mxu1  ;;  %13796 = vmatmul.mubr.bf16.gmra.mxu1 %v15278_v3  ;;  %13719 = vmatprep.mubr.bf16.mxu0 %v15281_v4  ;;  %v1936_v3 = vrot.slane %v13525_v0, 1  ;;  %v4227_v54 = vld [vmem:[#allocation2 + $0x48] sm:$0xff] }
 0x1a7   : > { %v1739_v31 = vpop.f32.mrf.mxu0  ;;  %13799 = vmatprep.mubr.bf16.mxu1 %v15281_v4  ;;  %v2794_v44 = vsel %vm885_vm1, %v2702_v58, %v2703_v38  ;;  %v2124_v50 = vadd.f32 %v2024_v48, %v17797_v7  ;;  %v2795_v49 = vsel %vm885_vm1, %v2701_v15, %v2702_v58  ;;  %v2707_v19 = vrot.slane %v13605_v55, 7  ;;  %v17798_v58 = vld [vmem:[#allocation10_spill] sm:$0xff] }
 0x1a8   : > { %v2510_v26 = vpop.f32.mrf.mxu1  ;;  %v15634_v52 = vadd.f32 %v2794_v44, %v2125_v5 }
 0x1a9   : > { %v13526_v30 = vpop.f32.mrf.mxu0  ;;  %v15636_v45 = vadd.f32 %v2795_v49, %v2124_v50  ;;  %v2705_v41 = vrot.slane %v2510_v26, 7  ;;  %v15656_v50 = vld [vmem:[#allocation2] sm:$0xff] }
 0x1aa   : > { %v1937_v37 = vrot.slane %v13526_v30, 1  ;;  %v13606_v27 = vpop.f32.mrf.mxu1 }
 0x1ab   : > { %v1742_v4 = vpop.f32.mrf.mxu0 }
 0x1ac   : > { %v2019_v53 = vsel %vm1978_vm2, %v1936_v3, %v1937_v37  ;;  %v1935_v23 = vrot.slane %v1742_v4, 1  ;;  %v2513_v59 = vpop.f32.mrf.mxu1  ;;  %v17799_v4 = vld [vmem:[#allocation11_spill] sm:$0xff] }
 0x1ad   : > { %v2706_v10 = vrot.slane %v2513_v59, 7  ;;  %v13529_v11 = vpop.f32.mrf.mxu0  ;;  %13720 = vmatmul.mubr.bf16.gmra.mxu0 %v15292_v8  ;;  %v2129_v38 = vadd.f32 %v2019_v53, %v15417_v25 }
 0x1ae   : > { %v2020_v15 = vsel %vm1978_vm2, %v1935_v23, %v1936_v3  ;;  %v13609_v60 = vpop.f32.mrf.mxu1  ;;  %13800 = vmatmul.mubr.bf16.gmra.mxu1 %v15292_v8  ;;  %13723 = vmatprep.mubr.bf16.mxu0 %v15405_v56  ;;  %v1940_v8 = vrot.slane %v13529_v11, 1 }
 0x1af   : > { %v1755_v20 = vpop.f32.mrf.mxu0  ;;  %13803 = vmatprep.mubr.bf16.mxu1 %v15405_v56  ;;  %v2790_v34 = vsel %vm885_vm1, %v2706_v10, %v2707_v19  ;;  %v2128_v0 = vadd.f32 %v2020_v15, %v17798_v58  ;;  %v2791_v25 = vsel %vm885_vm1, %v2705_v41, %v2706_v10  ;;  %v15659_v56 = vpack.c.bf16 %v4227_v54, %v15656_v50  ;;  %v4228_v10 = vld [vmem:[#allocation2 + $0x50] sm:$0xff] }
 0x1b0   : > { %v2526_v5 = vpop.f32.mrf.mxu1  ;;  %v15652_v48 = vadd.f32 %v2790_v34, %v2129_v38  ;;  %v2711_v49 = vrot.slane %v13609_v60, 7  ;;  %v4231_v20 = vld [vmem:[#allocation2 + $0x68] sm:$0xff]  ;;  %v15678_v58 = vpack.c.bf16 %v15656_v50, %v4228_v10 }
 0x1b1   : > { %v13530_v55 = vpop.f32.mrf.mxu0  ;;  %v15654_v31 = vadd.f32 %v2791_v25, %v2128_v0  ;;  %v2709_v26 = vrot.slane %v2526_v5, 7  ;;  %v14856_v10 = vld [vmem:[#allocation6 + $0x228] sm:$0xff]  }
 0x1b2   : > { %v1941_v44 = vrot.slane %v13530_v55, 1  ;;  %v13610_v7 = vpop.f32.mrf.mxu1 }
 0x1b3   : > { %v1758_v30 = vpop.f32.mrf.mxu0 }
 0x1b4   : > { %v2015_v3 = vsel %vm1978_vm2, %v1940_v8, %v1941_v44  ;;  %v1939_v37 = vrot.slane %v1758_v30, 1  ;;  %v2529_v27 = vpop.f32.mrf.mxu1 }
 0x1b5   : > { %v2710_v19 = vrot.slane %v2529_v27, 7  ;;  %v13533_v41 = vpop.f32.mrf.mxu0  ;;  %13724 = vmatmul.mubr.bf16.gmra.mxu0 %v17799_v4  ;;  %v2133_v53 = vadd.f32 %v2015_v3, %v15432_v47  ;;  %v14855_v3 = vld [vmem:[#allocation6 + $0x230] sm:$0xff]  }
 0x1b6   : > { %v2016_v23 = vsel %vm1978_vm2, %v1939_v37, %v1940_v8  ;;  %v13613_v59 = vpop.f32.mrf.mxu1  ;;  %13804 = vmatmul.mubr.bf16.gmra.mxu1 %v17799_v4  ;;  %13823 = vmatprep.mubr.bf16.mxu0 %v15659_v56  ;;  %v1944_v25 = vrot.slane %v13533_v41, 1 }
 0x1b7   : > { %v1771_v11 = vpop.f32.mrf.mxu0  ;;  %13903 = vmatprep.mubr.bf16.mxu1 %v15659_v56  ;;  %v2786_v38 = vsel %vm885_vm1, %v2710_v19, %v2711_v49  ;;  %v2132_v15 = vadd.f32 %v2016_v23, %v15429_v39  ;;  %v2787_v47 = vsel %vm885_vm1, %v2709_v26, %v2710_v19  ;;  %v2715_v8 = vrot.slane %v13613_v59, 7  ;;  %v4235_v59 = vld [vmem:[#allocation2 + $0x88] sm:$0xff] }
 0x1b8   : > { %v2542_v60 = vpop.f32.mrf.mxu1  ;;  %v15675_v54 = vadd.f32 %v2786_v38, %v2133_v53  ;;  %v15683_v39 = vpack.c.bf16 %v4231_v20, %v15656_v50  ;;  %v4232_v53 = vld [vmem:[#allocation2 + $0x70] sm:$0xff] }
 0x1b9   : > { %v13534_v34 = vpop.f32.mrf.mxu0  ;;  %v15680_v0 = vadd.f32 %v2787_v47, %v2132_v15  ;;  %v2713_v44 = vrot.slane %v2542_v60, 7  ;;  %v15703_v60 = vpack.c.bf16 %v15656_v50, %v4232_v53 }
 0x1ba   : > { %v1945_v5 = vrot.slane %v13534_v34, 1  ;;  %v13614_v55 = vpop.f32.mrf.mxu1 }
 0x1bb   : > { %v1774_v7 = vpop.f32.mrf.mxu0  ;;  %v15708_v55 = vpack.c.bf16 %v4235_v59, %v15656_v50 }
 0x1bc   : > { %v2011_v49 = vsel %vm1978_vm2, %v1944_v25, %v1945_v5  ;;  %v1943_v26 = vrot.slane %v1774_v7, 1  ;;  %v2545_v30 = vpop.f32.mrf.mxu1 }
 0x1bd   : > { %v2714_v37 = vrot.slane %v2545_v30, 7  ;;  %v13537_v27 = vpop.f32.mrf.mxu0  ;;  %13824 = vmatmul.mubr.bf16.vlgmr.msra.gmra.mxu0 %v15678_v58  ;;  %v2137_v19 = vadd.f32 %v2011_v49, %v15445_v6  ;;  %v14857_v30 = vld [vmem:[#allocation6 + $0x220] sm:$0xff]  }
 0x1be   : > { %v2012_v41 = vsel %vm1978_vm2, %v1943_v26, %v1944_v25  ;;  %v13617_v4 = vpop.f32.mrf.mxu1  ;;  %13968 = vmatpush3.bf16.msra.mxu0 %v15484_v40  ;;  %13904 = vmatmul.mubr.bf16.vlgmr.msra.gmra.mxu1 %v15678_v58  ;;  %v1948_v34 = vrot.slane %v13537_v27, 1 }
 0x1bf   : > { %v1787_v23 = vpop.f32.mrf.mxu0  ;;  %13827 = vmatprep.mubr.bf16.mxu0 %v15683_v39  ;;  %13907 = vmatprep.mubr.bf16.mxu1 %v15683_v39  ;;  %v2782_v11 = vsel %vm885_vm1, %v2714_v37, %v2715_v8  ;;  %v2136_v6 = vadd.f32 %v2012_v41, %v15441_v22  ;;  %v2783_v38 = vsel %vm885_vm1, %v2713_v44, %v2714_v37  ;;  %v2719_v22 = vrot.slane %v13617_v4, 7  ;;  %v4236_v4 = vld [vmem:[#allocation2 + $0x90] sm:$0xff] }
 0x1c0   : > { %v2558_v15 = vpop.f32.mrf.mxu1  ;;  %13969 = vmatprep.subr.bf16.mxu0 %v14855_v3  ;;  %v15700_v40 = vadd.f32 %v2782_v11, %v2137_v19  ;;  %v4239_v23 = vld [vmem:[#allocation2 + $0xa8] sm:$0xff] }
 0x1c1   : > { %v13538_v47 = vpop.f32.mrf.mxu0  ;;  %v15705_v20 = vadd.f32 %v2783_v38, %v2136_v6  ;;  %v2717_v8 = vrot.slane %v2558_v15, 7  ;;  %v14858_v38 = vld [vmem:[#allocation6 + $0x218] sm:$0xff]  }
 0x1c2   : > { %v1949_v25 = vrot.slane %v13538_v47, 1  ;;  %v13618_v5 = vpop.f32.mrf.mxu1  ;;  %13970 = vmatpush3.bf16.msra.mxu0 %v14855_v3 }
 0x1c3   : > { %v1790_v44 = vpop.f32.mrf.mxu0  ;;  %13971 = vmatprep.subr.bf16.mxu0 %v14856_v10 }
 0x1c4   : > { %v2007_v7 = vsel %vm1978_vm2, %v1948_v34, %v1949_v25  ;;  %v1947_v49 = vrot.slane %v1790_v44, 1  ;;  %v2561_v26 = vpop.f32.mrf.mxu1 }
 0x1c5   : > { %v2718_v37 = vrot.slane %v2561_v26, 7  ;;  %v13541_v19 = vpop.f32.mrf.mxu0  ;;  %13828 = vmatmul.mubr.bf16.gmra.mxu0 %v15703_v60  ;;  %v2141_v27 = vadd.f32 %v2007_v7, %v15458_v46 }
 0x1c6   : > { %v2008_v41 = vsel %vm1978_vm2, %v1947_v49, %v1948_v34  ;;  %v13621_v3 = vpop.f32.mrf.mxu1  ;;  %13908 = vmatmul.mubr.bf16.gmra.mxu1 %v15703_v60  ;;  %13831 = vmatprep.mubr.bf16.mxu0 %v15708_v55  ;;  %v15727_v34 = vpack.c.bf16 %v15656_v50, %v4236_v4 }
 0x1c7   : > { %v1803_v53 = vpop.f32.mrf.mxu0  ;;  %13911 = vmatprep.mubr.bf16.mxu1 %v15708_v55  ;;  %13972 = vmatpush3.bf16.msra.mxu0 %v14856_v10  ;;  %v2778_v59 = vsel %vm885_vm1, %v2718_v37, %v2719_v22  ;;  %v2140_v11 = vadd.f32 %v2008_v41, %v15455_v18  ;;  %v2779_v46 = vsel %vm885_vm1, %v2717_v8, %v2718_v37  ;;  %v1952_v10 = vrot.slane %v13541_v19, 1 }
 0x1c8   : > { %v2574_v6 = vpop.f32.mrf.mxu1  ;;  %13973 = vmatprep.subr.bf16.mxu0 %v14857_v30  ;;  %v15724_v15 = vadd.f32 %v2778_v59, %v2141_v27  ;;  %v15732_v22 = vpack.c.bf16 %v4239_v23, %v15656_v50  ;;  %v2723_v18 = vrot.slane %v13621_v3, 7  ;;  %v14859_v27 = vld [vmem:[#allocation6 + $0x210] sm:$0xff]   ;;  %v4243_v59 = vld [vmem:[#allocation2 + $0xc8] sm:$0xff] }
 0x1c9   : > { %v13542_v47 = vpop.f32.mrf.mxu0  ;;  %v15729_v25 = vadd.f32 %v2779_v46, %v2140_v11  ;;  %v2721_v7 = vrot.slane %v2574_v6, 7 }
 0x1ca   : > { %v1953_v5 = vrot.slane %v13542_v47, 1  ;;  %v13622_v44 = vpop.f32.mrf.mxu1  ;;  %v14860_v47 = vld [vmem:[#allocation6 + $0x208] sm:$0xff]  }
 0x1cb   : > { %v1806_v8 = vpop.f32.mrf.mxu0  ;;  %13974 = vmatpush3.bf16.msra.mxu0 %v14857_v30  ;;  %v4240_v30 = vld [vmem:[#allocation2 + $0xb0] sm:$0xff] }
 0x1cc   : > { %v2003_v49 = vsel %vm1978_vm2, %v1952_v10, %v1953_v5  ;;  %v1951_v26 = vrot.slane %v1806_v8, 1  ;;  %v2577_v37 = vpop.f32.mrf.mxu1  ;;  %13975 = vmatprep.subr.bf16.mxu0 %v14858_v38  ;;  %v15751_v44 = vpack.c.bf16 %v15656_v50, %v4240_v30  ;;  %v14861_v30 = vld [vmem:[#allocation6 + $0x200] sm:$0xff]  }
 0x1cd   : > { %v2722_v41 = vrot.slane %v2577_v37, 7  ;;  %v13545_v4 = vpop.f32.mrf.mxu0  ;;  %13832 = vmatmul.mubr.bf16.gmra.mxu0 %v15727_v34  ;;  %v2145_v19 = vadd.f32 %v2003_v49, %v15470_v14 }
 0x1ce   : > { %v2004_v53 = vsel %vm1978_vm2, %v1951_v26, %v1952_v10  ;;  %v13625_v3 = vpop.f32.mrf.mxu1  ;;  %13912 = vmatmul.mubr.bf16.gmra.mxu1 %v15727_v34  ;;  %13835 = vmatprep.mubr.bf16.mxu0 %v15732_v22 }
 0x1cf   : > { %v1819_v23 = vpop.f32.mrf.mxu0  ;;  %13915 = vmatprep.mubr.bf16.mxu1 %v15732_v22  ;;  %13976 = vmatpush3.bf16.msra.mxu0 %v14858_v38  ;;  %v2774_v11 = vsel %vm885_vm1, %v2722_v41, %v2723_v18  ;;  %v2144_v46 = vadd.f32 %v2004_v53, %v15467_v61  ;;  %v2775_v14 = vsel %vm885_vm1, %v2721_v7, %v2722_v41  ;;  %v1956_v38 = vrot.slane %v13545_v4, 1 }
 0x1d0   : > { %v2590_v6 = vpop.f32.mrf.mxu1  ;;  %13977 = vmatprep.subr.bf16.mxu0 %v14859_v27  ;;  %v15748_v10 = vadd.f32 %v2774_v11, %v2145_v19  ;;  %v15756_v18 = vpack.c.bf16 %v4243_v59, %v15656_v50  ;;  %v2727_v61 = vrot.slane %v13625_v3, 7 }
 0x1d1   : > { %v13546_v5 = vpop.f32.mrf.mxu0  ;;  %v15753_v8 = vadd.f32 %v2775_v14, %v2144_v46  ;;  %v2725_v37 = vrot.slane %v2590_v6, 7  ;;  %v4247_v14 = vld [vmem:[#allocation2 + $0xe8] sm:$0xff] }
 0x1d2   : > { %v1957_v49 = vrot.slane %v13546_v5, 1  ;;  %v13626_v26 = vpop.f32.mrf.mxu1 }
 0x1d3   : > { %v1822_v7 = vpop.f32.mrf.mxu0  ;;  %13978 = vmatpush3.bf16.msra.mxu0 %v14859_v27  ;;  %v4244_v27 = vld [vmem:[#allocation2 + $0xd0] sm:$0xff] }
 0x1d4   : > { %v1999_v41 = vsel %vm1978_vm2, %v1956_v38, %v1957_v49  ;;  %v1955_v19 = vrot.slane %v1822_v7, 1  ;;  %v2593_v53 = vpop.f32.mrf.mxu1  ;;  %13979 = vmatprep.subr.bf16.mxu0 %v14860_v47  ;;  %v15775_v7 = vpack.c.bf16 %v15656_v50, %v4244_v27 }
 0x1d5   : > { %v2726_v23 = vrot.slane %v2593_v53, 7  ;;  %v13549_v11 = vpop.f32.mrf.mxu0  ;;  %13836 = vmatmul.mubr.bf16.gmra.mxu0 %v15751_v44  ;;  %v2149_v4 = vadd.f32 %v1999_v41, %v15482_v16 }
 0x1d6   : > { %v2000_v59 = vsel %vm1978_vm2, %v1955_v19, %v1956_v38  ;;  %v13629_v3 = vpop.f32.mrf.mxu1  ;;  %13916 = vmatmul.mubr.bf16.gmra.mxu1 %v15751_v44  ;;  %13839 = vmatprep.mubr.bf16.mxu0 %v15756_v18  ;;  %17800 = vst [vmem:[#allocation9_spill] sm:$0xff] %v15775_v7  ;;  %v1960_v19 = vrot.slane %v13549_v11, 1 }
 0x1d7   : > { %v1835_v46 = vpop.f32.mrf.mxu0  ;;  %13919 = vmatprep.mubr.bf16.mxu1 %v15756_v18  ;;  %13980 = vmatpush3.bf16.msra.mxu0 %v14860_v47  ;;  %v2770_v6 = vsel %vm885_vm1, %v2726_v23, %v2727_v61  ;;  %v2148_v5 = vadd.f32 %v2000_v59, %v15479_v1  ;;  %v2771_v16 = vsel %vm885_vm1, %v2725_v37, %v2726_v23  ;;  %v2731_v1 = vrot.slane %v13629_v3, 7 }
 0x1d8   : > { %v2606_v38 = vpop.f32.mrf.mxu1  ;;  %13981 = vmatprep.subr.bf16.mxu0 %v14861_v30  ;;  %v15772_v49 = vadd.f32 %v2770_v6, %v2149_v4  ;;  %v15780_v61 = vpack.c.bf16 %v4247_v14, %v15656_v50 }
 0x1d9   : > { %v13550_v26 = vpop.f32.mrf.mxu0  ;;  %v15777_v41 = vadd.f32 %v2771_v16, %v2148_v5  ;;  %v2729_v59 = vrot.slane %v2606_v38, 7  ;;  %v4251_v16 = vld [vmem:[#allocation2 + $0x108] sm:$0xff] }
 0x1da   : > { %v1961_v47 = vrot.slane %v13550_v26, 1  ;;  %v13630_v53 = vpop.f32.mrf.mxu1  ;;  %17801 = vst [vmem:[#allocation10_spill] sm:$0xff] %v15780_v61 }
 0x1db   : > { %v1838_v46 = vpop.f32.mrf.mxu0  ;;  %13982 = vmatpush3.bf16.msra.mxu0 %v14861_v30  ;;  %v4248_v30 = vld [vmem:[#allocation2 + $0xf0] sm:$0xff] }
 0x1dc   : > { %v1995_v37 = vsel %vm1978_vm2, %v1960_v19, %v1961_v47  ;;  %v1959_v23 = vrot.slane %v1838_v46, 1  ;;  %v2609_v4 = vpop.f32.mrf.mxu1  ;;  %v15799_v46 = vpack.c.bf16 %v15656_v50, %v4248_v30 }
 0x1dd   : > { %v2730_v6 = vrot.slane %v2609_v4, 7  ;;  %v13553_v27 = vpop.f32.mrf.mxu0  ;;  %13840 = vmatmul.mubr.bf16.gmra.mxu0 %v15775_v7  ;;  %v2153_v11 = vadd.f32 %v1995_v37, %v15497_v12 }
 0x1de   : > { %v1996_v5 = vsel %vm1978_vm2, %v1959_v23, %v1960_v19  ;;  %v13633_v14 = vpop.f32.mrf.mxu1  ;;  %13920 = vmatmul.mubr.bf16.gmra.mxu1 %v15775_v7  ;;  %13843 = vmatprep.mubr.bf16.mxu0 %v15780_v61  ;;  %17802 = vst [vmem:[#allocation11_spill] sm:$0xff] %v15799_v46  ;;  %v1964_v23 = vrot.slane %v13553_v27, 1 }
 0x1df   : > { %v1851_v3 = vpop.f32.mrf.mxu0  ;;  %13923 = vmatprep.mubr.bf16.mxu1 %v15780_v61  ;;  %v2766_v38 = vsel %vm885_vm1, %v2730_v6, %v2731_v1  ;;  %v2152_v26 = vadd.f32 %v1996_v5, %v15494_v57  ;;  %v2767_v12 = vsel %vm885_vm1, %v2729_v59, %v2730_v6  ;;  %v15804_v61 = vpack.c.bf16 %v4251_v16, %v15656_v50 }
 0x1e0   : > { %v2622_v47 = vpop.f32.mrf.mxu1  ;;  %v15796_v19 = vadd.f32 %v2766_v38, %v2153_v11  ;;  %v2735_v1 = vrot.slane %v13633_v14, 7  ;;  %v4252_v14 = vld [vmem:[#allocation2 + $0x110] sm:$0xff] }
 0x1e1   : > { %v13554_v53 = vpop.f32.mrf.mxu0  ;;  %v15801_v37 = vadd.f32 %v2767_v12, %v2152_v26  ;;  %17803 = vst [vmem:[#allocation12_spill] sm:$0xff] %v15804_v61  ;;  %v2733_v57 = vrot.slane %v2622_v47, 7  ;;  %v4255_v12 = vld [vmem:[#allocation2 + $0x128] sm:$0xff] }
 0x1e2   : > { %v1965_v4 = vrot.slane %v13554_v53, 1  ;;  %v13634_v3 = vpop.f32.mrf.mxu1 }
 0x1e3   : > { %v1854_v5 = vpop.f32.mrf.mxu0 }
 0x1e4   : > { %v1991_v59 = vsel %vm1978_vm2, %v1964_v23, %v1965_v4  ;;  %v1963_v6 = vrot.slane %v1854_v5, 1  ;;  %v2625_v11 = vpop.f32.mrf.mxu1  ;;  %v15823_v5 = vpack.c.bf16 %v15656_v50, %v4252_v14 }
 0x1e5   : > { %v2734_v38 = vrot.slane %v2625_v11, 7  ;;  %v13557_v7 = vpop.f32.mrf.mxu0  ;;  %13844 = vmatmul.mubr.bf16.gmra.mxu0 %v15799_v46  ;;  %v2157_v30 = vadd.f32 %v1991_v59, %v15509_v51 }
 0x1e6   : > { %v1992_v27 = vsel %vm1978_vm2, %v1963_v6, %v1964_v23  ;;  %v13637_v26 = vpop.f32.mrf.mxu1  ;;  %13924 = vmatmul.mubr.bf16.gmra.mxu1 %v15799_v46  ;;  %13847 = vmatprep.mubr.bf16.mxu0 %v15804_v61  ;;  %17804 = vst [vmem:[#allocation13_spill] sm:$0xff] %v15823_v5  ;;  %v1968_v6 = vrot.slane %v13557_v7, 1 }
 0x1e7   : > { %v1867_v16 = vpop.f32.mrf.mxu0  ;;  %13927 = vmatprep.mubr.bf16.mxu1 %v15804_v61  ;;  %v2762_v47 = vsel %vm885_vm1, %v2734_v38, %v2735_v1  ;;  %v2156_v53 = vadd.f32 %v1992_v27, %v15506_v21  ;;  %v2763_v51 = vsel %vm885_vm1, %v2733_v57, %v2734_v38  ;;  %v15828_v61 = vpack.c.bf16 %v4255_v12, %v15656_v50 }
 0x1e8   : > { %v2638_v4 = vpop.f32.mrf.mxu1  ;;  %v15820_v23 = vadd.f32 %v2762_v47, %v2157_v30  ;;  %v2739_v1 = vrot.slane %v13637_v26, 7  ;;  %v4256_v26 = vld [vmem:[#allocation2 + $0x130] sm:$0xff] }
 0x1e9   : > { %v13558_v3 = vpop.f32.mrf.mxu0  ;;  %v15825_v59 = vadd.f32 %v2763_v51, %v2156_v53  ;;  %17805 = vst [vmem:[#allocation14_spill] sm:$0xff] %v15828_v61  ;;  %v2737_v21 = vrot.slane %v2638_v4, 7  ;;  %v4259_v51 = vld [vmem:[#allocation2 + $0x148] sm:$0xff] }
 0x1ea   : > { %v1969_v11 = vrot.slane %v13558_v3, 1  ;;  %v13638_v16 = vpop.f32.mrf.mxu1 }
 0x1eb   : > { %v1870_v27 = vpop.f32.mrf.mxu0 }
 0x1ec   : > { %v1987_v57 = vsel %vm1978_vm2, %v1968_v6, %v1969_v11  ;;  %v1967_v38 = vrot.slane %v1870_v27, 1  ;;  %v2641_v30 = vpop.f32.mrf.mxu1  ;;  %v15847_v27 = vpack.c.bf16 %v15656_v50, %v4256_v26 }
 0x1ed   : > { %v2738_v47 = vrot.slane %v2641_v30, 7  ;;  %v13561_v46 = vpop.f32.mrf.mxu0  ;;  %13848 = vmatmul.mubr.bf16.gmra.mxu0 %v15823_v5  ;;  %v2161_v14 = vadd.f32 %v1987_v57, %v15521_v62 }
 0x1ee   : > { %v1988_v7 = vsel %vm1978_vm2, %v1967_v38, %v1968_v6  ;;  %v13641_v53 = vpop.f32.mrf.mxu1  ;;  %13928 = vmatmul.mubr.bf16.gmra.mxu1 %v15823_v5  ;;  %13851 = vmatprep.mubr.bf16.mxu0 %v15828_v61  ;;  %17806 = vst [vmem:[#allocation15_spill] sm:$0xff] %v15847_v27  ;;  %v1972_v38 = vrot.slane %v13561_v46, 1 }
 0x1ef   : > { %v1883_v12 = vpop.f32.mrf.mxu0  ;;  %13931 = vmatprep.mubr.bf16.mxu1 %v15828_v61  ;;  %v2758_v4 = vsel %vm885_vm1, %v2738_v47, %v2739_v1  ;;  %v2160_v3 = vadd.f32 %v1988_v7, %v15518_v33  ;;  %v2759_v62 = vsel %vm885_vm1, %v2737_v21, %v2738_v47  ;;  %v15852_v61 = vpack.c.bf16 %v4259_v51, %v15656_v50 }
 0x1f0   : > { %v2654_v11 = vpop.f32.mrf.mxu1  ;;  %v15844_v6 = vadd.f32 %v2758_v4, %v2161_v14  ;;  %v2743_v1 = vrot.slane %v13641_v53, 7  ;;  %v4260_v53 = vld [vmem:[#allocation2 + $0x150] sm:$0xff] }
 0x1f1   : > { %v13562_v16 = vpop.f32.mrf.mxu0  ;;  %v15849_v57 = vadd.f32 %v2759_v62, %v2160_v3  ;;  %17807 = vst [vmem:[#allocation16_spill] sm:$0xff] %v15852_v61  ;;  %v2741_v33 = vrot.slane %v2654_v11, 7  ;;  %v4263_v62 = vld [vmem:[#allocation2 + $0x168] sm:$0xff] }
 0x1f2   : > { %v1973_v30 = vrot.slane %v13562_v16, 1  ;;  %v13642_v12 = vpop.f32.mrf.mxu1 }
 0x1f3   : > { %v1886_v7 = vpop.f32.mrf.mxu0 }
 0x1f4   : > { %v1983_v21 = vsel %vm1978_vm2, %v1972_v38, %v1973_v30  ;;  %v1971_v47 = vrot.slane %v1886_v7, 1  ;;  %v2657_v14 = vpop.f32.mrf.mxu1  ;;  %v15871_v7 = vpack.c.bf16 %v15656_v50, %v4260_v53 }
 0x1f5   : > { %v2742_v4 = vrot.slane %v2657_v14, 7  ;;  %v13565_v5 = vpop.f32.mrf.mxu0  ;;  %13852 = vmatmul.mubr.bf16.gmra.mxu0 %v15847_v27  ;;  %v2165_v26 = vadd.f32 %v1983_v21, %v15533_v2 }
 0x1f6   : > { %v1984_v46 = vsel %vm1978_vm2, %v1971_v47, %v1972_v38  ;;  %v13645_v3 = vpop.f32.mrf.mxu1  ;;  %13932 = vmatmul.mubr.bf16.gmra.mxu1 %v15847_v27  ;;  %13855 = vmatprep.mubr.bf16.mxu0 %v15852_v61  ;;  %v1976_v47 = vrot.slane %v13565_v5, 1 }
 0x1f7   : > { %v1899_v51 = vpop.f32.mrf.mxu0  ;;  %13935 = vmatprep.mubr.bf16.mxu1 %v15852_v61  ;;  %v2754_v11 = vsel %vm885_vm1, %v2742_v4, %v2743_v1  ;;  %v2164_v16 = vadd.f32 %v1984_v46, %v15530_v24  ;;  %v2755_v2 = vsel %vm885_vm1, %v2741_v33, %v2742_v4  ;;  %v15876_v61 = vpack.c.bf16 %v4263_v62, %v15656_v50 }
 0x1f8   : > { %v2670_v30 = vpop.f32.mrf.mxu1  ;;  %v15868_v38 = vadd.f32 %v2754_v11, %v2165_v26  ;;  %v2747_v1 = vrot.slane %v13645_v3, 7  ;;  %v4264_v3 = vld [vmem:[#allocation2 + $0x170] sm:$0xff] }
 0x1f9   : > { %v13566_v12 = vpop.f32.mrf.mxu0  ;;  %v15873_v21 = vadd.f32 %v2755_v2, %v2164_v16  ;;  %v2745_v24 = vrot.slane %v2670_v30, 7  ;;  %v4267_v30 = vld [vmem:[#allocation2 + $0x188] sm:$0xff] }
 0x1fa   : > { %v1977_v14 = vrot.slane %v13566_v12, 1  ;;  %v13646_v51 = vpop.f32.mrf.mxu1 }
 0x1fb   : > { %v1902_v46 = vpop.f32.mrf.mxu0 }
 0x1fc   : > { %v1979_v33 = vsel %vm1978_vm2, %v1976_v47, %v1977_v14  ;;  %v1975_v4 = vrot.slane %v1902_v46, 1  ;;  %v2673_v26 = vpop.f32.mrf.mxu1  ;;  %v15896_v46 = vpack.c.bf16 %v15656_v50, %v4264_v3 }
 0x1fd   : > { %v2746_v11 = vrot.slane %v2673_v26, 7  ;;  %v13665_v27 = vpop.f32.mrf.mxu0  ;;  %13856 = vmatmul.mubr.bf16.gmra.mxu0 %v15871_v7  ;;  %v2169_v53 = vadd.f32 %v1979_v33, %v15545_v29  ;;  %v15901_v26 = vpack.c.bf16 %v4267_v30, %v15656_v50  ;;  %v4268_v30 = vld [vmem:[#allocation2 + $0x190] sm:$0xff] }
 0x1fe   : > { %v1980_v5 = vsel %vm1978_vm2, %v1975_v4, %v1976_v47  ;;  %v3425_v62 = vadd.f32 %v13665_v27, %v15562_v63  ;;  %v13745_v16 = vpop.f32.mrf.mxu1  ;;  %13936 = vmatmul.mubr.bf16.gmra.mxu1 %v15871_v7  ;;  %13859 = vmatprep.mubr.bf16.mxu0 %v15876_v61 }
 0x1ff   : > { %v3104_v2 = vpop.f32.mrf.mxu0  ;;  %13939 = vmatprep.mubr.bf16.mxu1 %v15876_v61  ;;  %v2750_v12 = vsel %vm885_vm1, %v2746_v11, %v2747_v1  ;;  %v2168_v29 = vadd.f32 %v1980_v5, %v15542_v28  ;;  %v2751_v47 = vsel %vm885_vm1, %v2745_v24, %v2746_v11  ;;  %v3907_v27 = vrot.slane %v13745_v16, 1 }
 0x200   : > { %v3650_v14 = vpop.f32.mrf.mxu1  ;;  %v15893_v63 = vadd.f32 %v2750_v12, %v2169_v53 }
 0x201   : > { %v13666_v51 = vpop.f32.mrf.mxu0  ;;  %v15898_v33 = vadd.f32 %v2751_v47, %v2168_v29  ;;  %v4271_v47 = vld [vmem:[#allocation2 + $0x1a8] sm:$0xff] }
 0x202   : > { %v13746_v4 = vpop.f32.mrf.mxu1 }
 0x203   : > { %v3908_v1 = vrot.slane %v13746_v4, 1  ;;  %v3107_v2 = vpop.f32.mrf.mxu0 }
 0x204   : > { %v3424_v28 = vadd.f32 %v3107_v2, %v15564_v17  ;;  %v3653_v5 = vpop.f32.mrf.mxu1 }
 0x205   : > { %v4029_v24 = vsel %vm1978_vm2, %v3907_v27, %v3908_v1  ;;  %v3906_v11 = vrot.slane %v3653_v5, 1  ;;  %v13669_v53 = vpop.f32.mrf.mxu0  ;;  %13860 = vmatmul.mubr.bf16.gmra.mxu0 %v15896_v46  ;;  %v14862_v1 = vld [vmem:[#allocation6 + $0x278] sm:$0xff]   ;;  %v15921_v5 = vpack.c.bf16 %v4271_v47, %v15656_v50 }
 0x206   : > { %v15907_v16 = vadd.f32 %v4029_v24, %v3425_v62  ;;  %v3429_v3 = vadd.f32 %v13669_v53, %v15580_v36  ;;  %v13749_v12 = vpop.f32.mrf.mxu1  ;;  %13940 = vmatmul.mubr.bf16.gmra.mxu1 %v15896_v46  ;;  %13863 = vmatprep.mubr.bf16.mxu0 %v15901_v26  ;;  %v15918_v36 = vpack.c.bf16 %v15656_v50, %v4268_v30 }
 0x207   : > { %v4030_v17 = vsel %vm1978_vm2, %v3906_v11, %v3907_v27  ;;  %v3120_v29 = vpop.f32.mrf.mxu0  ;;  %13943 = vmatprep.mubr.bf16.mxu1 %v15901_v26  ;;  %v3911_v62 = vrot.slane %v13749_v12, 1  ;;  %14047 = vmatprep.subr.bf16.mxu1 %v14862_v1 }
 0x208   : > { %v3666_v14 = vpop.f32.mrf.mxu1  ;;  %v15915_v51 = vadd.f32 %v4030_v17, %v3424_v28  ;;  %14048 = vmatpush3.bf16.msra.mxu1 %v14862_v1  ;;  %v4275_v1 = vld [vmem:[#allocation2 + $0x1c8] sm:$0xff] }
 0x209   : > { %v13670_v4 = vpop.f32.mrf.mxu0  ;;  %v4272_v14 = vld [vmem:[#allocation2 + $0x1b0] sm:$0xff] }
 0x20a   : > { %v13750_v2 = vpop.f32.mrf.mxu1 }
 0x20b   : > { %v3912_v24 = vrot.slane %v13750_v2, 1  ;;  %v3123_v53 = vpop.f32.mrf.mxu0 }
 0x20c   : > { %v3428_v27 = vadd.f32 %v3123_v53, %v15582_v13  ;;  %v3669_v11 = vpop.f32.mrf.mxu1 }
 0x20d   : > { %v4025_v28 = vsel %vm1978_vm2, %v3911_v62, %v3912_v24  ;;  %v3910_v12 = vrot.slane %v3669_v11, 1  ;;  %v13673_v17 = vpop.f32.mrf.mxu0  ;;  %13864 = vmatmul.mubr.bf16.gmra.mxu0 %v15918_v36 }
 0x20e   : > { %v15927_v30 = vadd.f32 %v4025_v28, %v3429_v3  ;;  %v3433_v29 = vadd.f32 %v13673_v17, %v15598_v42  ;;  %v13753_v47 = vpop.f32.mrf.mxu1  ;;  %13944 = vmatmul.mubr.bf16.gmra.mxu1 %v15918_v36  ;;  %13867 = vmatprep.mubr.bf16.mxu0 %v15921_v5  ;;  %v15938_v42 = vpack.c.bf16 %v15656_v50, %v4272_v14 }
 0x20f   : > { %v4026_v13 = vsel %vm1978_vm2, %v3910_v12, %v3911_v62  ;;  %v3136_v4 = vpop.f32.mrf.mxu0  ;;  %13947 = vmatprep.mubr.bf16.mxu1 %v15921_v5  ;;  %v3915_v3 = vrot.slane %v13753_v47, 1  ;;  %v15941_v28 = vpack.c.bf16 %v4275_v1, %v15656_v50  ;;  %v4276_v1 = vld [vmem:[#allocation2 + $0x1d0] sm:$0xff] }
 0x210   : > { %17808 = vst [vmem:[#allocation17_spill] sm:$0xff] %v15927_v30  ;;  %v3682_v2 = vpop.f32.mrf.mxu1  ;;  %v15935_v24 = vadd.f32 %v4026_v13, %v3428_v27  ;;  %17810 = vst [vmem:[#allocation19_spill] sm:$0xff] %v15938_v42 }
 0x211   : > { %v13674_v53 = vpop.f32.mrf.mxu0 }
 0x212   : > { %17809 = vst [vmem:[#allocation18_spill] sm:$0xff] %v15935_v24  ;;  %v13754_v11 = vpop.f32.mrf.mxu1  ;;  %v4279_v53 = vld [vmem:[#allocation2 + $0x1e8] sm:$0xff] }
 0x213   : > { %v3916_v17 = vrot.slane %v13754_v11, 1  ;;  %v3139_v30 = vpop.f32.mrf.mxu0 }
 0x214   : > { %v3432_v62 = vadd.f32 %v3139_v30, %v15600_v35  ;;  %v3685_v12 = vpop.f32.mrf.mxu1 }
 0x215   : > { %v4021_v4 = vsel %vm1978_vm2, %v3915_v3, %v3916_v17  ;;  %v3914_v2 = vrot.slane %v3685_v12, 1  ;;  %v13677_v27 = vpop.f32.mrf.mxu0  ;;  %13868 = vmatmul.mubr.bf16.gmra.mxu0 %v15938_v42 }
 0x216   : > { %v15947_v47 = vadd.f32 %v4021_v4, %v3433_v29  ;;  %v3437_v14 = vadd.f32 %v13677_v27, %v15616_v9  ;;  %v13757_v13 = vpop.f32.mrf.mxu1  ;;  %13948 = vmatmul.mubr.bf16.gmra.mxu1 %v15938_v42  ;;  %13871 = vmatprep.mubr.bf16.mxu0 %v15941_v28  ;;  %v15958_v9 = vpack.c.bf16 %v15656_v50, %v4276_v1  ;;  %v14863_v4 = vld [vmem:[#allocation6 + $0x270] sm:$0xff]  }
 0x217   : > { %v4022_v35 = vsel %vm1978_vm2, %v3914_v2, %v3915_v3  ;;  %v3152_v30 = vpop.f32.mrf.mxu0  ;;  %13951 = vmatprep.mubr.bf16.mxu1 %v15941_v28  ;;  %v3919_v29 = vrot.slane %v13757_v13, 1  ;;  %14049 = vmatprep.subr.bf16.mxu1 %v14863_v4 }
 0x218   : > { %17811 = vst [vmem:[#allocation20_spill] sm:$0xff] %v15947_v47  ;;  %v3698_v11 = vpop.f32.mrf.mxu1  ;;  %v15955_v17 = vadd.f32 %v4022_v35, %v3432_v62  ;;  %v15961_v47 = vpack.c.bf16 %v4279_v53, %v15656_v50  ;;  %14050 = vmatpush3.bf16.msra.mxu1 %v14863_v4 }
 0x219   : > { %v13678_v12 = vpop.f32.mrf.mxu0  ;;  %v4280_v11 = vld [vmem:[#allocation2 + $0x1f0] sm:$0xff] }
 0x21a   : > { %v13758_v27 = vpop.f32.mrf.mxu1 }
 0x21b   : > { %v3920_v42 = vrot.slane %v13758_v27, 1  ;;  %v3155_v24 = vpop.f32.mrf.mxu0 }
 0x21c   : > { %v3436_v3 = vadd.f32 %v3155_v24, %v15618_v32  ;;  %v3701_v2 = vpop.f32.mrf.mxu1 }
 0x21d   : > { %v4017_v62 = vsel %vm1978_vm2, %v3919_v29, %v3920_v42  ;;  %v3918_v13 = vrot.slane %v3701_v2, 1  ;;  %v13681_v35 = vpop.f32.mrf.mxu0  ;;  %13872 = vmatmul.mubr.bf16.gmra.mxu0 %v15958_v9  ;;  %v4283_v42 = vld [vmem:[#allocation2 + $0x208] sm:$0xff] }
 0x21e   : > { %v15967_v1 = vadd.f32 %v4017_v62, %v3437_v14  ;;  %v3441_v30 = vadd.f32 %v13681_v35, %v15634_v52  ;;  %v13761_v53 = vpop.f32.mrf.mxu1  ;;  %13952 = vmatmul.mubr.bf16.gmra.mxu1 %v15958_v9  ;;  %13875 = vmatprep.mubr.bf16.mxu0 %v15961_v47  ;;  %v15978_v52 = vpack.c.bf16 %v15656_v50, %v4280_v11 }
 0x21f   : > { %v4018_v32 = vsel %vm1978_vm2, %v3918_v13, %v3919_v29  ;;  %v3168_v24 = vpop.f32.mrf.mxu0  ;;  %13955 = vmatprep.mubr.bf16.mxu1 %v15961_v47  ;;  %v3923_v14 = vrot.slane %v13761_v53, 1  ;;  %v15981_v62 = vpack.c.bf16 %v4283_v42, %v15656_v50  ;;  %v4284_v42 = vld [vmem:[#allocation2 + $0x210] sm:$0xff] }
 0x220   : > { %17812 = vst [vmem:[#allocation21_spill] sm:$0xff] %v15967_v1  ;;  %v3714_v12 = vpop.f32.mrf.mxu1  ;;  %v15975_v4 = vadd.f32 %v4018_v32, %v3436_v3  ;;  %17813 = vst [vmem:[#allocation22_spill] sm:$0xff] %v15978_v52 }
 0x221   : > { %v13682_v27 = vpop.f32.mrf.mxu0 }
 0x222   : > { %v13762_v2 = vpop.f32.mrf.mxu1 }
 0x223   : > { %v3924_v35 = vrot.slane %v13762_v2, 1  ;;  %v3171_v1 = vpop.f32.mrf.mxu0 }
 0x224   : > { %v3440_v29 = vadd.f32 %v3171_v1, %v15636_v45  ;;  %v3717_v13 = vpop.f32.mrf.mxu1 }
 0x225   : > { %v4013_v24 = vsel %vm1978_vm2, %v3923_v14, %v3924_v35  ;;  %v3922_v12 = vrot.slane %v3717_v13, 1  ;;  %v13685_v3 = vpop.f32.mrf.mxu0  ;;  %13876 = vmatmul.mubr.bf16.gmra.mxu0 %v15978_v52  ;;  %v15998_v13 = vpack.c.bf16 %v15656_v50, %v4284_v42 }
 0x226   : > { %v15987_v53 = vadd.f32 %v4013_v24, %v3441_v30  ;;  %v3445_v11 = vadd.f32 %v13685_v3, %v15652_v48  ;;  %v13765_v32 = vpop.f32.mrf.mxu1  ;;  %13956 = vmatmul.mubr.bf16.gmra.mxu1 %v15978_v52  ;;  %13879 = vmatprep.mubr.bf16.mxu0 %v15981_v62  ;;  %v14864_v48 = vld [vmem:[#allocation6 + $0x268] sm:$0xff]   ;;  %v16002_v3 = vpack.c.bf16 %v15656_v50, %v15656_v50 }
 0x227   : > { %v4014_v45 = vsel %vm1978_vm2, %v3922_v12, %v3923_v14  ;;  %v3184_v1 = vpop.f32.mrf.mxu0  ;;  %13959 = vmatprep.mubr.bf16.mxu1 %v15981_v62  ;;  %v3927_v35 = vrot.slane %v13765_v32, 1  ;;  %17815 = vst [vmem:[#allocation24_spill] sm:$0xff] %v15998_v13  ;;  %14051 = vmatprep.subr.bf16.mxu1 %v14864_v48 }
 0x228   : > { %17814 = vst [vmem:[#allocation23_spill] sm:$0xff] %v15987_v53  ;;  %v3730_v27 = vpop.f32.mrf.mxu1  ;;  %v15995_v2 = vadd.f32 %v4014_v45, %v3440_v29  ;;  %14052 = vmatpush3.bf16.msra.mxu1 %v14864_v48 }
 0x229   : > { %v13686_v30 = vpop.f32.mrf.mxu0 }
 0x22a   : > { %v13766_v24 = vpop.f32.mrf.mxu1 }
 0x22b   : > { %v3928_v53 = vrot.slane %v13766_v24, 1  ;;  %v3187_v52 = vpop.f32.mrf.mxu0 }
 0x22c   : > { %v3444_v14 = vadd.f32 %v3187_v52, %v15654_v31  ;;  %v3733_v12 = vpop.f32.mrf.mxu1 }
 0x22d   : > { %v4009_v29 = vsel %vm1978_vm2, %v3927_v35, %v3928_v53  ;;  %v3926_v32 = vrot.slane %v3733_v12, 1  ;;  %v13689_v45 = vpop.f32.mrf.mxu0  ;;  %13880 = vmatmul.mubr.bf16.gmra.mxu0 %v15998_v13 }
 0x22e   : > { %v16008_v42 = vadd.f32 %v4009_v29, %v3445_v11  ;;  %v3449_v1 = vadd.f32 %v13689_v45, %v15675_v54  ;;  %v13769_v50 = vpop.f32.mrf.mxu1  ;;  %13960 = vmatmul.mubr.bf16.gmra.mxu1 %v15998_v13  ;;  %13883 = vmatprep.mubr.bf16.mxu0 %v16002_v3 }
 0x22f   : > { %v4010_v31 = vsel %vm1978_vm2, %v3926_v32, %v3927_v35  ;;  %v3200_v52 = vpop.f32.mrf.mxu0  ;;  %13963 = vmatprep.mubr.bf16.mxu1 %v16002_v3  ;;  %v3931_v30 = vrot.slane %v13769_v50, 1 }
 0x230   : > { %17816 = vst [vmem:[#allocation25_spill] sm:$0xff] %v16008_v42  ;;  %v3746_v53 = vpop.f32.mrf.mxu1  ;;  %v16016_v27 = vadd.f32 %v4010_v31, %v3444_v14 }
 0x231   : > { %v13690_v48 = vpop.f32.mrf.mxu0 }
 0x232   : > { %v13770_v11 = vpop.f32.mrf.mxu1 }
 0x233   : > { %v3932_v24 = vrot.slane %v13770_v11, 1  ;;  %v3203_v12 = vpop.f32.mrf.mxu0  ;;  %v14865_v11 = vld [vmem:[#allocation6 + $0x260] sm:$0xff]  }
 0x234   : > { %v3448_v54 = vadd.f32 %v3203_v12, %v15680_v0  ;;  %v3749_v29 = vpop.f32.mrf.mxu1  ;;  %14053 = vmatprep.subr.bf16.mxu1 %v14865_v11 }
 0x235   : > { %v4005_v45 = vsel %vm1978_vm2, %v3931_v30, %v3932_v24  ;;  %v3930_v42 = vrot.slane %v3749_v29, 1  ;;  %v13693_v13 = vpop.f32.mrf.mxu0  ;;  %13884 = vmatmul.mubr.bf16.gmra.mxu0 %v16002_v3  ;;  %14054 = vmatpush3.bf16.msra.mxu1 %v14865_v11 }
 0x236   : > { %v16022_v35 = vadd.f32 %v4005_v45, %v3449_v1  ;;  %v3453_v14 = vadd.f32 %v13693_v13, %v15700_v40  ;;  %v13773_v32 = vpop.f32.mrf.mxu1  ;;  %13964 = vmatmul.mubr.bf16.gmra.mxu1 %v16002_v3  ;;  %13983 = vmatprep.mubr.bf16.mxu0 %v15659_v56 }
 0x237   : > { %v4006_v0 = vsel %vm1978_vm2, %v3930_v42, %v3931_v30  ;;  %v3216_v50 = vpop.f32.mrf.mxu0  ;;  %v3935_v53 = vrot.slane %v13773_v32, 1 }
 0x238   : > { %v3762_v31 = vpop.f32.mrf.mxu1  ;;  %v16029_v52 = vadd.f32 %v4006_v0, %v3448_v54 }
 0x239   : > { %v13694_v48 = vpop.f32.mrf.mxu0 }
 0x23a   : > { %v13774_v24 = vpop.f32.mrf.mxu1 }
 0x23b   : > { %v3936_v1 = vrot.slane %v13774_v24, 1  ;;  %v3219_v12 = vpop.f32.mrf.mxu0 }
 0x23c   : > { %v3452_v40 = vadd.f32 %v3219_v12, %v15705_v20  ;;  %v3765_v13 = vpop.f32.mrf.mxu1 }
 0x23d   : > { %v4001_v56 = vsel %vm1978_vm2, %v3935_v53, %v3936_v1  ;;  %v3934_v29 = vrot.slane %v3765_v13, 1  ;;  %v13697_v42 = vpop.f32.mrf.mxu0  ;;  %13984 = vmatmul.mubr.bf16.vlgmr.msra.gmra.mxu0 %v15678_v58 }
 0x23e   : > { %v16035_v30 = vadd.f32 %v4001_v56, %v3453_v14  ;;  %v3457_v54 = vadd.f32 %v13697_v42, %v15724_v15  ;;  %v13777_v45 = vpop.f32.mrf.mxu1  ;;  %13987 = vmatprep.mubr.bf16.mxu0 %v15683_v39 }
 0x23f   : > { %v4002_v32 = vsel %vm1978_vm2, %v3934_v29, %v3935_v53  ;;  %v3232_v20 = vpop.f32.mrf.mxu0  ;;  %v3939_v31 = vrot.slane %v13777_v45, 1 }
 0x240   : > { %v3778_v0 = vpop.f32.mrf.mxu1  ;;  %v16041_v50 = vadd.f32 %v4002_v32, %v3452_v40  ;;  %v14866_v20 = vld [vmem:[#allocation6 + $0x258] sm:$0xff]  }
 0x241   : > { %v13698_v48 = vpop.f32.mrf.mxu0  ;;  %14055 = vmatprep.subr.bf16.mxu1 %v14866_v20 }
 0x242   : > { %v13778_v11 = vpop.f32.mrf.mxu1  ;;  %14056 = vmatpush3.bf16.msra.mxu1 %v14866_v20 }
 0x243   : > { %v3940_v24 = vrot.slane %v13778_v11, 1  ;;  %v3235_v1 = vpop.f32.mrf.mxu0 }
 0x244   : > { %v3456_v58 = vadd.f32 %v3235_v1, %v15729_v25  ;;  %v3781_v14 = vpop.f32.mrf.mxu1 }
 0x245   : > { %v3997_v15 = vsel %vm1978_vm2, %v3939_v31, %v3940_v24  ;;  %v3938_v12 = vrot.slane %v3781_v14, 1  ;;  %v13701_v39 = vpop.f32.mrf.mxu0  ;;  %13988 = vmatmul.mubr.bf16.gmra.mxu0 %v15703_v60 }
 0x246   : > { %v16047_v53 = vadd.f32 %v3997_v15, %v3457_v54  ;;  %v3461_v40 = vadd.f32 %v13701_v39, %v15748_v10  ;;  %v13781_v13 = vpop.f32.mrf.mxu1  ;;  %13991 = vmatprep.mubr.bf16.mxu0 %v15708_v55 }
 0x247   : > { %v3998_v56 = vsel %vm1978_vm2, %v3938_v12, %v3939_v31  ;;  %v3248_v29 = vpop.f32.mrf.mxu0  ;;  %v3943_v45 = vrot.slane %v13781_v13, 1 }
 0x248   : > { %v3794_v25 = vpop.f32.mrf.mxu1  ;;  %v16053_v42 = vadd.f32 %v3998_v56, %v3456_v58 }
 0x249   : > { %v13702_v32 = vpop.f32.mrf.mxu0 }
 0x24a   : > { %v13782_v0 = vpop.f32.mrf.mxu1 }
 0x24b   : > { %v3944_v48 = vrot.slane %v13782_v0, 1  ;;  %v3251_v60 = vpop.f32.mrf.mxu0 }
 0x24c   : > { %v3460_v54 = vadd.f32 %v3251_v60, %v15753_v8  ;;  %v3797_v10 = vpop.f32.mrf.mxu1 }
 0x24d   : > { %v3993_v55 = vsel %vm1978_vm2, %v3943_v45, %v3944_v48  ;;  %v3942_v11 = vrot.slane %v3797_v10, 1  ;;  %v13705_v31 = vpop.f32.mrf.mxu0  ;;  %13992 = vmatmul.mubr.bf16.gmra.mxu0 %v15727_v34 }
 0x24e   : > { %v16059_v24 = vadd.f32 %v3993_v55, %v3461_v40  ;;  %v3465_v1 = vadd.f32 %v13705_v31, %v15772_v49  ;;  %v13785_v58 = vpop.f32.mrf.mxu1  ;;  %13995 = vmatprep.mubr.bf16.mxu0 %v15732_v22 }
 0x24f   : > { %v3994_v14 = vsel %vm1978_vm2, %v3942_v11, %v3943_v45  ;;  %v3264_v8 = vpop.f32.mrf.mxu0  ;;  %v3947_v39 = vrot.slane %v13785_v58, 1  ;;  %v14867_v11 = vld [vmem:[#allocation6 + $0x250] sm:$0xff]  }
 0x250   : > { %v3810_v15 = vpop.f32.mrf.mxu1  ;;  %v16065_v12 = vadd.f32 %v3994_v14, %v3460_v54  ;;  %14057 = vmatprep.subr.bf16.mxu1 %v14867_v11 }
 0x251   : > { %v13706_v13 = vpop.f32.mrf.mxu0  ;;  %14058 = vmatpush3.bf16.msra.mxu1 %v14867_v11  ;;  %v17817_v15 = vld [vmem:[#allocation9_spill] sm:$0xff] }
 0x252   : > { %v13786_v56 = vpop.f32.mrf.mxu1 }
 0x253   : > { %v3948_v29 = vrot.slane %v13786_v56, 1  ;;  %v3267_v25 = vpop.f32.mrf.mxu0 }
 0x254   : > { %v3464_v34 = vadd.f32 %v3267_v25, %v15777_v41  ;;  %v3813_v40 = vpop.f32.mrf.mxu1 }
 0x255   : > { %v3989_v49 = vsel %vm1978_vm2, %v3947_v39, %v3948_v29  ;;  %v3946_v32 = vrot.slane %v3813_v40, 1  ;;  %v13709_v22 = vpop.f32.mrf.mxu0  ;;  %13996 = vmatmul.mubr.bf16.gmra.mxu0 %v15751_v44  ;;  %v17818_v29 = vld [vmem:[#allocation10_spill] sm:$0xff] }
 0x256   : > { %v16071_v45 = vadd.f32 %v3989_v49, %v3465_v1  ;;  %v3469_v20 = vadd.f32 %v13709_v22, %v15796_v19  ;;  %v13789_v0 = vpop.f32.mrf.mxu1  ;;  %13999 = vmatprep.mubr.bf16.mxu0 %v15756_v18 }
 0x257   : > { %v3990_v48 = vsel %vm1978_vm2, %v3946_v32, %v3947_v39  ;;  %v3280_v60 = vpop.f32.mrf.mxu0  ;;  %v3951_v10 = vrot.slane %v13789_v0, 1 }
 0x258   : > { %v3826_v41 = vpop.f32.mrf.mxu1  ;;  %v16077_v54 = vadd.f32 %v3990_v48, %v3464_v34 }
 0x259   : > { %v13710_v55 = vpop.f32.mrf.mxu0  ;;  %v14868_v41 = vld [vmem:[#allocation6 + $0x2b8] sm:$0xff]  }
 0x25a   : > { %v13790_v31 = vpop.f32.mrf.mxu1  ;;  %14127 = vmatprep.subr.bf16.mxu0 %v14868_v41 }
 0x25b   : > { %v3952_v58 = vrot.slane %v13790_v31, 1  ;;  %v3283_v44 = vpop.f32.mrf.mxu0  ;;  %v17819_v31 = vld [vmem:[#allocation11_spill] sm:$0xff]  ;;  %14128 = vmatpush3.bf16.msra.mxu0 %v14868_v41 }
 0x25c   : > { %v3468_v1 = vadd.f32 %v3283_v44, %v15801_v37  ;;  %v3829_v19 = vpop.f32.mrf.mxu1 }
 0x25d   : > { %v3985_v18 = vsel %vm1978_vm2, %v3951_v10, %v3952_v58  ;;  %v3950_v14 = vrot.slane %v3829_v19, 1  ;;  %v13713_v8 = vpop.f32.mrf.mxu0  ;;  %14000 = vmatmul.mubr.bf16.gmra.mxu0 %v17817_v15 }
 0x25e   : > { %v16083_v39 = vadd.f32 %v3985_v18, %v3469_v20  ;;  %v3473_v13 = vadd.f32 %v13713_v8, %v15820_v23  ;;  %v13793_v56 = vpop.f32.mrf.mxu1  ;;  %14003 = vmatprep.mubr.bf16.mxu0 %v17818_v29  ;;  %v14870_v8 = vld [vmem:[#allocation6 + $0x2b0] sm:$0xff]   ;;  %v14869_v29 = vld [vmem:[#allocation6 + $0x248] sm:$0xff]  }
 0x25f   : > { %v3986_v25 = vsel %vm1978_vm2, %v3950_v14, %v3951_v10  ;;  %v3296_v37 = vpop.f32.mrf.mxu0  ;;  %v3955_v49 = vrot.slane %v13793_v56, 1  ;;  %14129 = vmatprep.subr.bf16.mxu0 %v14870_v8  ;;  %14059 = vmatprep.subr.bf16.mxu1 %v14869_v29 }
 0x260   : > { %v3842_v34 = vpop.f32.mrf.mxu1  ;;  %v16089_v40 = vadd.f32 %v3986_v25, %v3468_v1  ;;  %v17820_v1 = vld [vmem:[#allocation12_spill] sm:$0xff]  ;;  %14130 = vmatpush3.bf16.msra.mxu0 %v14870_v8  ;;  %14060 = vmatpush3.bf16.msra.mxu1 %v14869_v29 }
 0x261   : > { %v13714_v32 = vpop.f32.mrf.mxu0 }
 0x262   : > { %v13794_v22 = vpop.f32.mrf.mxu1 }
 0x263   : > { %v3956_v0 = vrot.slane %v13794_v22, 1  ;;  %v3299_v48 = vpop.f32.mrf.mxu0 }
 0x264   : > { %v3472_v20 = vadd.f32 %v3299_v48, %v15825_v59  ;;  %v3845_v60 = vpop.f32.mrf.mxu1  ;;  %v17821_v48 = vld [vmem:[#allocation13_spill] sm:$0xff] }
 0x265   : > { %v3981_v23 = vsel %vm1978_vm2, %v3955_v49, %v3956_v0  ;;  %v3954_v55 = vrot.slane %v3845_v60, 1  ;;  %v13717_v11 = vpop.f32.mrf.mxu0  ;;  %14004 = vmatmul.mubr.bf16.gmra.mxu0 %v17819_v31 }
 0x266   : > { %v16095_v10 = vadd.f32 %v3981_v23, %v3473_v13  ;;  %v3477_v58 = vadd.f32 %v13717_v11, %v15844_v6  ;;  %v13797_v44 = vpop.f32.mrf.mxu1  ;;  %14007 = vmatprep.mubr.bf16.mxu0 %v17820_v1  ;;  %v17822_v23 = vld [vmem:[#allocation14_spill] sm:$0xff] }
 0x267   : > { %v3982_v59 = vsel %vm1978_vm2, %v3954_v55, %v3955_v49  ;;  %v3312_v19 = vpop.f32.mrf.mxu0  ;;  %v3959_v15 = vrot.slane %v13797_v44, 1  ;;  %v14871_v49 = vld [vmem:[#allocation6 + $0x2a8] sm:$0xff]   ;;  %v14872_v44 = vld [vmem:[#allocation6 + $0x2a0] sm:$0xff]  }
 0x268   : > { %v3858_v18 = vpop.f32.mrf.mxu1  ;;  %v16101_v14 = vadd.f32 %v3982_v59, %v3472_v20  ;;  %14131 = vmatprep.subr.bf16.mxu0 %v14871_v49 }
 0x269   : > { %v13718_v56 = vpop.f32.mrf.mxu0  ;;  %14132 = vmatpush3.bf16.msra.mxu0 %v14871_v49  ;;  %v17824_v49 = vld [vmem:[#allocation16_spill] sm:$0xff] }
 0x26a   : > { %v13798_v13 = vpop.f32.mrf.mxu1  ;;  %14133 = vmatprep.subr.bf16.mxu0 %v14872_v44  ;;  %v14873_v56 = vld [vmem:[#allocation6 + $0x298] sm:$0xff]  }
 0x26b   : > { %v3960_v25 = vrot.slane %v13798_v13, 1  ;;  %v3315_v6 = vpop.f32.mrf.mxu0 }
 0x26c   : > { %v3476_v37 = vadd.f32 %v3315_v6, %v15849_v57  ;;  %v3861_v34 = vpop.f32.mrf.mxu1 }
 0x26d   : > { %v3977_v32 = vsel %vm1978_vm2, %v3959_v15, %v3960_v25  ;;  %v3958_v22 = vrot.slane %v3861_v34, 1  ;;  %v13721_v0 = vpop.f32.mrf.mxu0  ;;  %14008 = vmatmul.mubr.bf16.gmra.mxu0 %v17821_v48  ;;  %v17823_v25 = vld [vmem:[#allocation15_spill] sm:$0xff] }
 0x26e   : > { %v16107_v20 = vadd.f32 %v3977_v32, %v3477_v58  ;;  %v3481_v60 = vadd.f32 %v13721_v0, %v15868_v38  ;;  %v13801_v41 = vpop.f32.mrf.mxu1  ;;  %14011 = vmatprep.mubr.bf16.mxu0 %v17822_v23  ;;  %14134 = vmatpush3.bf16.msra.mxu0 %v14872_v44  ;;  %v14875_v48 = vld [vmem:[#allocation6 + $0x290] sm:$0xff]  }
 0x26f   : > { %v3978_v57 = vsel %vm1978_vm2, %v3958_v22, %v3959_v15  ;;  %v3328_v55 = vpop.f32.mrf.mxu0  ;;  %v3963_v1 = vrot.slane %v13801_v41, 1  ;;  %14135 = vmatprep.subr.bf16.mxu0 %v14873_v56 }
 0x270   : > { %v3874_v11 = vpop.f32.mrf.mxu1  ;;  %v16113_v31 = vadd.f32 %v3978_v57, %v3476_v37  ;;  %v14874_v57 = vld [vmem:[#allocation6 + $0x240] sm:$0xff]  }
 0x271   : > { %v13722_v59 = vpop.f32.mrf.mxu0  ;;  %14061 = vmatprep.subr.bf16.mxu1 %v14874_v57 }
 0x272   : > { %v13802_v19 = vpop.f32.mrf.mxu1  ;;  %14136 = vmatpush3.bf16.msra.mxu0 %v14873_v56  ;;  %14062 = vmatpush3.bf16.msra.mxu1 %v14874_v57 }
 0x273   : > { %v3964_v58 = vrot.slane %v13802_v19, 1  ;;  %v3331_v18 = vpop.f32.mrf.mxu0  ;;  %14137 = vmatprep.subr.bf16.mxu0 %v14875_v48 }
 0x274   : > { %v3480_v38 = vadd.f32 %v3331_v18, %v15873_v21  ;;  %v3877_v8 = vpop.f32.mrf.mxu1 }
 0x275   : > { %v3973_v15 = vsel %vm1978_vm2, %v3963_v1, %v3964_v58  ;;  %v3962_v29 = vrot.slane %v3877_v8, 1  ;;  %v13725_v13 = vpop.f32.mrf.mxu0  ;;  %14012 = vmatmul.mubr.bf16.gmra.mxu0 %v17823_v25 }
 0x276   : > { %v16119_v6 = vadd.f32 %v3973_v15, %v3481_v60  ;;  %v3485_v37 = vadd.f32 %v13725_v13, %v15893_v63  ;;  %v13805_v34 = vpop.f32.mrf.mxu1  ;;  %14015 = vmatprep.mubr.bf16.mxu0 %v17824_v49  ;;  %14138 = vmatpush3.bf16.msra.mxu0 %v14875_v48 }
 0x277   : > { %v3974_v21 = vsel %vm1978_vm2, %v3962_v29, %v3963_v1  ;;  %v3344_v32 = vpop.f32.mrf.mxu0  ;;  %v3967_v41 = vrot.slane %v13805_v34, 1  ;;  %v14876_v1 = vld [vmem:[#allocation6 + $0x288] sm:$0xff]   ;;  %v14877_v29 = vld [vmem:[#allocation6 + $0x280] sm:$0xff]   ;;  %v17825_v34 = vmov 0.0|0.0  }
 0x278   : > { %v3890_v22 = vpop.f32.mrf.mxu1  ;;  %v16125_v0 = vadd.f32 %v3974_v21, %v3480_v38  ;;  %14139 = vmatprep.subr.bf16.mxu0 %v14876_v1  ;;  %14063 = vmatprep.mubr.bf16.mxu1 %v17825_v34 }
 0x279   : > { %v13726_v23 = vpop.f32.mrf.mxu0  ;;  %14064 = vmatmul.mubr.bf16.vlgmr.msra.gmra.mxu1 %v17825_v34 }
 0x27a   : > { %v13806_v60 = vpop.f32.mrf.mxu1  ;;  %14140 = vmatpush3.bf16.msra.mxu0 %v14876_v1 }
 0x27b   : > { %v3968_v55 = vrot.slane %v13806_v60, 1  ;;  %v3347_v63 = vpop.f32.mrf.mxu0  ;;  %14141 = vmatprep.subr.bf16.mxu0 %v14877_v29 }
 0x27c   : > { %v3484_v11 = vadd.f32 %v3347_v63, %v15898_v33  ;;  %v3893_v44 = vpop.f32.mrf.mxu1 }
 0x27d   : > { %v3969_v59 = vsel %vm1978_vm2, %v3967_v41, %v3968_v55  ;;  %v3966_v19 = vrot.slane %v3893_v44, 1  ;;  %v13825_v58 = vpop.f32.mrf.mxu0  ;;  %14016 = vmatmul.mubr.bf16.gmra.mxu0 %v15871_v7 }
 0x27e   : > { %v16131_v18 = vadd.f32 %v3969_v59, %v3485_v37  ;;  %v13905_v38 = vpop.f32.mrf.mxu1  ;;  %14019 = vmatprep.mubr.bf16.mxu0 %v15876_v61  ;;  %14142 = vmatpush3.bf16.msra.mxu0 %v14877_v29  ;;  %v4678_v61 = vrot.slane %v13825_v58, 7 }
 0x27f   : > { %v3970_v8 = vsel %vm1978_vm2, %v3966_v19, %v3967_v41  ;;  %v4421_v33 = vpop.f32.mrf.mxu0 }
 0x280   : > { %v5095_v56 = vpop.f32.mrf.mxu1  ;;  %v16136_v15 = vadd.f32 %v3970_v8, %v3484_v11  ;;  %v4676_v37 = vrot.slane %v4421_v33, 7 }
 0x281   : > { %v13826_v13 = vpop.f32.mrf.mxu0 }
 0x282   : > { %v13906_v25 = vpop.f32.mrf.mxu1  ;;  %v17827_v13 = vld [vmem:[#allocation18_spill] sm:$0xff] }
 0x283   : > { %v4424_v7 = vpop.f32.mrf.mxu0 }
 0x284   : > { %v4677_v49 = vrot.slane %v4424_v7, 7  ;;  %v16140_v21 = vpop.f32.mrf.mxu1 }
 0x285   : > { %v13829_v32 = vpop.f32.mrf.mxu0  ;;  %14020 = vmatmul.mubr.bf16.gmra.mxu0 %v15896_v46 }
 0x286   : > { %v4801_v22 = vsel %vm885_vm1, %v4677_v49, %v4678_v61  ;;  %v4802_v48 = vsel %vm885_vm1, %v4676_v37, %v4677_v49  ;;  %v13909_v41 = vpop.f32.mrf.mxu1  ;;  %14023 = vmatprep.mubr.bf16.mxu0 %v15901_v26  ;;  %v4682_v1 = vrot.slane %v13829_v32, 7  ;;  %v14878_v26 = vld [vmem:[#allocation6 + $0x2f8] sm:$0xff]  }
 0x287   : > { %v4870_v23 = vadd.f32 %v4801_v22, %v15907_v16  ;;  %v4437_v57 = vpop.f32.mrf.mxu0  ;;  %v16150_v60 = vadd.f32 %v4802_v48, %v15915_v51  ;;  %14207 = vmatprep.subr.bf16.mxu1 %v14878_v26 }
 0x288   : > { %v5111_v55 = vpop.f32.mrf.mxu1  ;;  %v4680_v59 = vrot.slane %v4437_v57, 7  ;;  %14208 = vmatpush3.bf16.msra.mxu1 %v14878_v26  ;;  %v17828_v57 = vld [vmem:[#allocation19_spill] sm:$0xff] }
 0x289   : > { %v13830_v63 = vpop.f32.mrf.mxu0  ;;  %v16152_v11 = vadd.f32 %v13905_v38, %v4870_v23  ;;  %v17826_v38 = vld [vmem:[#allocation17_spill] sm:$0xff] }
 0x28a   : > { %v13910_v46 = vpop.f32.mrf.mxu1 }
 0x28b   : > { %v4440_v44 = vpop.f32.mrf.mxu0 }
 0x28c   : > { %v4681_v19 = vrot.slane %v4440_v44, 7  ;;  %v16154_v58 = vpop.f32.mrf.mxu1 }
 0x28d   : > { %v13833_v8 = vpop.f32.mrf.mxu0  ;;  %14024 = vmatmul.mubr.bf16.gmra.mxu0 %v15918_v36 }
 0x28e   : > { %v4797_v16 = vsel %vm885_vm1, %v4681_v19, %v4682_v1  ;;  %v4798_v51 = vsel %vm885_vm1, %v4680_v59, %v4681_v19  ;;  %v13913_v33 = vpop.f32.mrf.mxu1  ;;  %14027 = vmatprep.mubr.bf16.mxu0 %v15921_v5  ;;  %v4686_v32 = vrot.slane %v13833_v8, 7 }
 0x28f   : > { %v4874_v56 = vadd.f32 %v4797_v16, %v17826_v38  ;;  %v4453_v29 = vpop.f32.mrf.mxu0  ;;  %v16164_v25 = vadd.f32 %v4798_v51, %v17827_v13 }
 0x290   : > { %v5127_v7 = vpop.f32.mrf.mxu1  ;;  %v4684_v22 = vrot.slane %v4453_v29, 7 }
 0x291   : > { %v13834_v36 = vpop.f32.mrf.mxu0  ;;  %v16166_v61 = vadd.f32 %v13909_v41, %v4874_v56  ;;  %v17829_v41 = vld [vmem:[#allocation20_spill] sm:$0xff] }
 0x292   : > { %v13914_v37 = vpop.f32.mrf.mxu1 }
 0x293   : > { %v4456_v49 = vpop.f32.mrf.mxu0 }
 0x294   : > { %v4685_v48 = vrot.slane %v4456_v49, 7  ;;  %v16168_v23 = vpop.f32.mrf.mxu1 }
 0x295   : > { %v13837_v5 = vpop.f32.mrf.mxu0  ;;  %14028 = vmatmul.mubr.bf16.gmra.mxu0 %v17828_v57 }
 0x296   : > { %v4793_v55 = vsel %vm885_vm1, %v4685_v48, %v4686_v32  ;;  %v4794_v63 = vsel %vm885_vm1, %v4684_v22, %v4685_v48  ;;  %v13917_v46 = vpop.f32.mrf.mxu1  ;;  %14031 = vmatprep.mubr.bf16.mxu0 %v15941_v28  ;;  %v4690_v38 = vrot.slane %v13837_v5, 7  ;;  %v14879_v28 = vld [vmem:[#allocation6 + $0x2f0] sm:$0xff]  }
 0x297   : > { %v4878_v44 = vadd.f32 %v4793_v55, %v17829_v41  ;;  %v4469_v1 = vpop.f32.mrf.mxu0  ;;  %v16178_v59 = vadd.f32 %v4794_v63, %v15955_v17  ;;  %14209 = vmatprep.subr.bf16.mxu1 %v14879_v28 }
 0x298   : > { %v5143_v19 = vpop.f32.mrf.mxu1  ;;  %v4688_v56 = vrot.slane %v4469_v1, 7  ;;  %14210 = vmatpush3.bf16.msra.mxu1 %v14879_v28 }
 0x299   : > { %v13838_v8 = vpop.f32.mrf.mxu0  ;;  %v16180_v26 = vadd.f32 %v13913_v33, %v4878_v44  ;;  %v17830_v33 = vld [vmem:[#allocation21_spill] sm:$0xff]  ;;  %v17831_v19 = vld [vmem:[#allocation22_spill] sm:$0xff] }
 0x29a   : > { %v13918_v16 = vpop.f32.mrf.mxu1 }
 0x29b   : > { %v4472_v51 = vpop.f32.mrf.mxu0 }
 0x29c   : > { %v4689_v29 = vrot.slane %v4472_v51, 7  ;;  %v16182_v13 = vpop.f32.mrf.mxu1 }
 0x29d   : > { %v13841_v7 = vpop.f32.mrf.mxu0  ;;  %14032 = vmatmul.mubr.bf16.gmra.mxu0 %v15958_v9 }
 0x29e   : > { %v4789_v36 = vsel %vm885_vm1, %v4689_v29, %v4690_v38  ;;  %v4790_v17 = vsel %vm885_vm1, %v4688_v56, %v4689_v29  ;;  %v13921_v37 = vpop.f32.mrf.mxu1  ;;  %14035 = vmatprep.mubr.bf16.mxu0 %v15961_v47  ;;  %v4694_v63 = vrot.slane %v13841_v7, 7 }
 0x29f   : > { %v4882_v49 = vadd.f32 %v4789_v36, %v17830_v33  ;;  %v4485_v32 = vpop.f32.mrf.mxu0  ;;  %v16192_v22 = vadd.f32 %v4790_v17, %v15975_v4 }
 0x2a0   : > { %v5159_v48 = vpop.f32.mrf.mxu1  ;;  %v4692_v41 = vrot.slane %v4485_v32, 7 }
 0x2a1   : > { %v13842_v9 = vpop.f32.mrf.mxu0  ;;  %v16194_v5 = vadd.f32 %v13917_v46, %v4882_v49  ;;  %v17832_v46 = vld [vmem:[#allocation23_spill] sm:$0xff] }
 0x2a2   : > { %v13922_v57 = vpop.f32.mrf.mxu1 }
 0x2a3   : > { %v4488_v55 = vpop.f32.mrf.mxu0  ;;  %v17833_v57 = vld [vmem:[#allocation24_spill] sm:$0xff] }
 0x2a4   : > { %v4693_v44 = vrot.slane %v4488_v55, 7  ;;  %v16196_v1 = vpop.f32.mrf.mxu1 }
 0x2a5   : > { %v13845_v47 = vpop.f32.mrf.mxu0  ;;  %14036 = vmatmul.mubr.bf16.gmra.mxu0 %v17831_v19 }
 0x2a6   : > { %v4785_v4 = vsel %vm885_vm1, %v4693_v44, %v4694_v63  ;;  %v4786_v8 = vsel %vm885_vm1, %v4692_v41, %v4693_v44  ;;  %v13925_v16 = vpop.f32.mrf.mxu1  ;;  %14039 = vmatprep.mubr.bf16.mxu0 %v15981_v62  ;;  %v4698_v33 = vrot.slane %v13845_v47, 7  ;;  %v14880_v62 = vld [vmem:[#allocation6 + $0x2e8] sm:$0xff]  }
 0x2a7   : > { %v4886_v51 = vadd.f32 %v4785_v4, %v17832_v46  ;;  %v4501_v38 = vpop.f32.mrf.mxu0  ;;  %v16206_v56 = vadd.f32 %v4786_v8, %v15995_v2  ;;  %14211 = vmatprep.subr.bf16.mxu1 %v14880_v62 }
 0x2a8   : > { %v5175_v29 = vpop.f32.mrf.mxu1  ;;  %v4696_v49 = vrot.slane %v4501_v38, 7  ;;  %14212 = vmatpush3.bf16.msra.mxu1 %v14880_v62 }
 0x2a9   : > { %v13846_v7 = vpop.f32.mrf.mxu0  ;;  %v16208_v28 = vadd.f32 %v13921_v37, %v4886_v51  ;;  %v17834_v37 = vld [vmem:[#allocation25_spill] sm:$0xff] }
 0x2aa   : > { %v13926_v36 = vpop.f32.mrf.mxu1 }
 0x2ab   : > { %v4504_v17 = vpop.f32.mrf.mxu0 }
 0x2ac   : > { %v4697_v32 = vrot.slane %v4504_v17, 7  ;;  %v16210_v48 = vpop.f32.mrf.mxu1 }
 0x2ad   : > { %v13849_v9 = vpop.f32.mrf.mxu0  ;;  %14040 = vmatmul.mubr.bf16.gmra.mxu0 %v17833_v57 }
 0x2ae   : > { %v4781_v55 = vsel %vm885_vm1, %v4697_v32, %v4698_v33  ;;  %v4782_v2 = vsel %vm885_vm1, %v4696_v49, %v4697_v32  ;;  %v13929_v63 = vpop.f32.mrf.mxu1  ;;  %14043 = vmatprep.mubr.bf16.mxu0 %v16002_v3  ;;  %v4702_v38 = vrot.slane %v13849_v9, 7 }
 0x2af   : > { %v4890_v41 = vadd.f32 %v4781_v55, %v17834_v37  ;;  %v4517_v44 = vpop.f32.mrf.mxu0  ;;  %v16220_v47 = vadd.f32 %v4782_v2, %v16016_v27 }
 0x2b0   : > { %v5191_v19 = vpop.f32.mrf.mxu1  ;;  %v4700_v29 = vrot.slane %v4517_v44, 7 }
 0x2b1   : > { %v13850_v4 = vpop.f32.mrf.mxu0  ;;  %v16222_v8 = vadd.f32 %v13925_v16, %v4890_v41 }
 0x2b2   : > { %v13930_v46 = vpop.f32.mrf.mxu1 }
 0x2b3   : > { %v4520_v51 = vpop.f32.mrf.mxu0  ;;  %v14881_v46 = vld [vmem:[#allocation6 + $0x2e0] sm:$0xff]  }
 0x2b4   : > { %v4701_v7 = vrot.slane %v4520_v51, 7  ;;  %v16224_v36 = vpop.f32.mrf.mxu1  ;;  %14213 = vmatprep.subr.bf16.mxu1 %v14881_v46 }
 0x2b5   : > { %v13853_v17 = vpop.f32.mrf.mxu0  ;;  %14044 = vmatmul.mubr.bf16.gmra.mxu0 %v16002_v3  ;;  %14214 = vmatpush3.bf16.msra.mxu1 %v14881_v46 }
 0x2b6   : > { %v4777_v27 = vsel %vm885_vm1, %v4701_v7, %v4702_v38  ;;  %v4778_v33 = vsel %vm885_vm1, %v4700_v29, %v4701_v7  ;;  %v13933_v49 = vpop.f32.mrf.mxu1  ;;  %14143 = vmatprep.mubr.bf16.mxu0 %v17825_v34  ;;  %v4706_v37 = vrot.slane %v13853_v17, 7 }
 0x2b7   : > { %v4894_v16 = vadd.f32 %v4777_v27, %v16022_v35  ;;  %v4533_v32 = vpop.f32.mrf.mxu0  ;;  %v16234_v9 = vadd.f32 %v4778_v33, %v16029_v52 }
 0x2b8   : > { %v5207_v57 = vpop.f32.mrf.mxu1  ;;  %v4704_v41 = vrot.slane %v4533_v32, 7 }
 0x2b9   : > { %v13854_v62 = vpop.f32.mrf.mxu0  ;;  %v16236_v55 = vadd.f32 %v13929_v63, %v4894_v16 }
 0x2ba   : > { %v13934_v3 = vpop.f32.mrf.mxu1 }
 0x2bb   : > { %v4536_v2 = vpop.f32.mrf.mxu0 }
 0x2bc   : > { %v4705_v44 = vrot.slane %v4536_v2, 7  ;;  %v16238_v19 = vpop.f32.mrf.mxu1 }
 0x2bd   : > { %v13857_v4 = vpop.f32.mrf.mxu0  ;;  %14144 = vmatmul.mubr.bf16.vlgmr.msra.gmra.mxu0 %v17825_v34 }
 0x2be   : > { %v4773_v35 = vsel %vm885_vm1, %v4705_v44, %v4706_v37  ;;  %v4774_v52 = vsel %vm885_vm1, %v4704_v41, %v4705_v44  ;;  %v13937_v51 = vpop.f32.mrf.mxu1  ;;  %v4710_v32 = vrot.slane %v13857_v4, 7 }
 0x2bf   : > { %v4898_v63 = vadd.f32 %v4773_v35, %v16035_v30  ;;  %v4549_v38 = vpop.f32.mrf.mxu0  ;;  %v16247_v29 = vadd.f32 %v4774_v52, %v16041_v50 }
 0x2c0   : > { %v5223_v7 = vpop.f32.mrf.mxu1  ;;  %v4708_v57 = vrot.slane %v4549_v38, 7 }
 0x2c1   : > { %v13858_v17 = vpop.f32.mrf.mxu0  ;;  %v16249_v27 = vadd.f32 %v13933_v49, %v4898_v63 }
 0x2c2   : > { %v13938_v33 = vpop.f32.mrf.mxu1 }
 0x2c3   : > { %v4552_v16 = vpop.f32.mrf.mxu0 }
 0x2c4   : > { %v4709_v62 = vrot.slane %v4552_v16, 7  ;;  %v16251_v3 = vpop.f32.mrf.mxu1 }
 0x2c5   : > { %v13861_v2 = vpop.f32.mrf.mxu0 }
 0x2c6   : > { %v4769_v30 = vsel %vm885_vm1, %v4709_v62, %v4710_v32  ;;  %v4770_v50 = vsel %vm885_vm1, %v4708_v57, %v4709_v62  ;;  %v13941_v37 = vpop.f32.mrf.mxu1  ;;  %v4714_v38 = vrot.slane %v13861_v2, 7  ;;  %v14882_v32 = vld [vmem:[#allocation6 + $0x2d8] sm:$0xff]  }
 0x2c7   : > { %v4902_v41 = vadd.f32 %v4769_v30, %v16047_v53  ;;  %v4565_v44 = vpop.f32.mrf.mxu0  ;;  %v16259_v49 = vadd.f32 %v4770_v50, %v16053_v42  ;;  %14215 = vmatprep.subr.bf16.mxu1 %v14882_v32 }
 0x2c8   : > { %v5239_v46 = vpop.f32.mrf.mxu1  ;;  %v4712_v7 = vrot.slane %v4565_v44, 7  ;;  %14216 = vmatpush3.bf16.msra.mxu1 %v14882_v32 }
 0x2c9   : > { %v13862_v4 = vpop.f32.mrf.mxu0  ;;  %v16261_v35 = vadd.f32 %v13937_v51, %v4902_v41 }
 0x2ca   : > { %v13942_v52 = vpop.f32.mrf.mxu1 }
 0x2cb   : > { %v4568_v63 = vpop.f32.mrf.mxu0 }
 0x2cc   : > { %v4713_v17 = vrot.slane %v4568_v63, 7  ;;  %v16263_v33 = vpop.f32.mrf.mxu1 }
 0x2cd   : > { %v13865_v16 = vpop.f32.mrf.mxu0 }
 0x2ce   : > { %v4765_v53 = vsel %vm885_vm1, %v4713_v17, %v4714_v38  ;;  %v4766_v42 = vsel %vm885_vm1, %v4712_v7, %v4713_v17  ;;  %v13945_v57 = vpop.f32.mrf.mxu1  ;;  %v4718_v4 = vrot.slane %v13865_v16, 7 }
 0x2cf   : > { %v4906_v62 = vadd.f32 %v4765_v53, %v16059_v24  ;;  %v4581_v51 = vpop.f32.mrf.mxu0  ;;  %v16271_v30 = vadd.f32 %v4766_v42, %v16065_v12 }
 0x2d0   : > { %v5255_v2 = vpop.f32.mrf.mxu1  ;;  %v4716_v52 = vrot.slane %v4581_v51, 7 }
 0x2d1   : > { %v13866_v50 = vpop.f32.mrf.mxu0  ;;  %v16273_v41 = vadd.f32 %v13941_v37, %v4906_v62 }
 0x2d2   : > { %v13946_v44 = vpop.f32.mrf.mxu1 }
 0x2d3   : > { %v4584_v46 = vpop.f32.mrf.mxu0 }
 0x2d4   : > { %v4717_v63 = vrot.slane %v4584_v46, 7  ;;  %v16275_v38 = vpop.f32.mrf.mxu1 }
 0x2d5   : > { %v13869_v7 = vpop.f32.mrf.mxu0 }
 0x2d6   : > { %v4761_v24 = vsel %vm885_vm1, %v4717_v63, %v4718_v4  ;;  %v4762_v12 = vsel %vm885_vm1, %v4716_v52, %v4717_v63  ;;  %v13949_v17 = vpop.f32.mrf.mxu1  ;;  %v4722_v50 = vrot.slane %v13869_v7, 7  ;;  %v14883_v52 = vld [vmem:[#allocation6 + $0x2d0] sm:$0xff]  }
 0x2d7   : > { %v4910_v32 = vadd.f32 %v4761_v24, %v16071_v45  ;;  %v4597_v53 = vpop.f32.mrf.mxu0  ;;  %v16283_v37 = vadd.f32 %v4762_v12, %v16077_v54  ;;  %14217 = vmatprep.subr.bf16.mxu1 %v14883_v52 }
 0x2d8   : > { %v5271_v42 = vpop.f32.mrf.mxu1  ;;  %v4720_v44 = vrot.slane %v4597_v53, 7  ;;  %14218 = vmatpush3.bf16.msra.mxu1 %v14883_v52 }
 0x2d9   : > { %v13870_v16 = vpop.f32.mrf.mxu0  ;;  %v16285_v62 = vadd.f32 %v13945_v57, %v4910_v32 }
 0x2da   : > { %v13950_v51 = vpop.f32.mrf.mxu1 }
 0x2db   : > { %v4600_v2 = vpop.f32.mrf.mxu0 }
 0x2dc   : > { %v4721_v46 = vrot.slane %v4600_v2, 7  ;;  %v16287_v4 = vpop.f32.mrf.mxu1 }
 0x2dd   : > { %17835 = vst [vmem:[#allocation9_spill] sm:$0xff] %v16287_v4  ;;  %v13873_v34 = vpop.f32.mrf.mxu0 }
 0x2de   : > { %v4757_v45 = vsel %vm885_vm1, %v4721_v46, %v4722_v50  ;;  %v4758_v54 = vsel %vm885_vm1, %v4720_v44, %v4721_v46  ;;  %v13953_v63 = vpop.f32.mrf.mxu1  ;;  %v4726_v51 = vrot.slane %v13873_v34, 7 }
 0x2df   : > { %v4914_v24 = vadd.f32 %v4757_v45, %v16083_v39  ;;  %v4613_v57 = vpop.f32.mrf.mxu0  ;;  %v16295_v12 = vadd.f32 %v4758_v54, %v16089_v40  ;;  %v14885_v54 = vld [vmem:[#allocation6 + $0x338] sm:$0xff]  }
 0x2e0   : > { %v5287_v7 = vpop.f32.mrf.mxu1  ;;  %v4724_v2 = vrot.slane %v4613_v57, 7  ;;  %14287 = vmatprep.subr.bf16.mxu0 %v14885_v54 }
 0x2e1   : > { %v13874_v32 = vpop.f32.mrf.mxu0  ;;  %v16297_v53 = vadd.f32 %v13949_v17, %v4914_v24  ;;  %14288 = vmatpush3.bf16.msra.mxu0 %v14885_v54 }
 0x2e2   : > { %v13954_v42 = vpop.f32.mrf.mxu1 }
 0x2e3   : > { %v4616_v16 = vpop.f32.mrf.mxu0  ;;  %v14886_v42 = vld [vmem:[#allocation6 + $0x330] sm:$0xff]  }
 0x2e4   : > { %v4725_v50 = vrot.slane %v4616_v16, 7  ;;  %v16299_v4 = vpop.f32.mrf.mxu1  ;;  %14289 = vmatprep.subr.bf16.mxu0 %v14886_v42 }
 0x2e5   : > { %v13877_v44 = vpop.f32.mrf.mxu0  ;;  %14290 = vmatpush3.bf16.msra.mxu0 %v14886_v42 }
 0x2e6   : > { %v4753_v39 = vsel %vm885_vm1, %v4725_v50, %v4726_v51  ;;  %v4754_v40 = vsel %vm885_vm1, %v4724_v2, %v4725_v50  ;;  %v13957_v46 = vpop.f32.mrf.mxu1  ;;  %v4730_v16 = vrot.slane %v13877_v44, 7 }
 0x2e7   : > { %v4918_v52 = vadd.f32 %v4753_v39, %v16095_v10  ;;  %v4629_v45 = vpop.f32.mrf.mxu0  ;;  %v16307_v17 = vadd.f32 %v4754_v40, %v16101_v14  ;;  %v14884_v39 = vld [vmem:[#allocation6 + $0x2c8] sm:$0xff]  }
 0x2e8   : > { %v5303_v34 = vpop.f32.mrf.mxu1  ;;  %v4728_v51 = vrot.slane %v4629_v45, 7  ;;  %14219 = vmatprep.subr.bf16.mxu1 %v14884_v39  ;;  %v14887_v45 = vld [vmem:[#allocation6 + $0x328] sm:$0xff]  }
 0x2e9   : > { %v13878_v24 = vpop.f32.mrf.mxu0  ;;  %v16309_v57 = vadd.f32 %v13953_v63, %v4918_v52  ;;  %14220 = vmatpush3.bf16.msra.mxu1 %v14884_v39  ;;  %14291 = vmatprep.subr.bf16.mxu0 %v14887_v45 }
 0x2ea   : > { %v13958_v7 = vpop.f32.mrf.mxu1  ;;  %14292 = vmatpush3.bf16.msra.mxu0 %v14887_v45 }
 0x2eb   : > { %v4632_v32 = vpop.f32.mrf.mxu0 }
 0x2ec   : > { %v4729_v2 = vrot.slane %v4632_v32, 7  ;;  %v16311_v50 = vpop.f32.mrf.mxu1 }
 0x2ed   : > { %17836 = vst [vmem:[#allocation10_spill] sm:$0xff] %v16311_v50  ;;  %v13881_v10 = vpop.f32.mrf.mxu0 }
 0x2ee   : > { %v4749_v14 = vsel %vm885_vm1, %v4729_v2, %v4730_v16  ;;  %v4750_v63 = vsel %vm885_vm1, %v4728_v51, %v4729_v2  ;;  %v13961_v40 = vpop.f32.mrf.mxu1  ;;  %v14888_v51 = vld [vmem:[#allocation6 + $0x320] sm:$0xff]   ;;  %v4734_v2 = vrot.slane %v13881_v10, 7  ;;  %v14890_v10 = vld [vmem:[#allocation6 + $0x318] sm:$0xff]  }
 0x2ef   : > { %v4922_v52 = vadd.f32 %v4749_v14, %v16107_v20  ;;  %v4645_v54 = vpop.f32.mrf.mxu0  ;;  %v16319_v44 = vadd.f32 %v4750_v63, %v16113_v31  ;;  %14293 = vmatprep.subr.bf16.mxu0 %v14888_v51 }
 0x2f0   : > { %v5319_v34 = vpop.f32.mrf.mxu1  ;;  %v4732_v42 = vrot.slane %v4645_v54, 7  ;;  %14294 = vmatpush3.bf16.msra.mxu0 %v14888_v51 }
 0x2f1   : > { %v13882_v24 = vpop.f32.mrf.mxu0  ;;  %v16321_v7 = vadd.f32 %v13957_v46, %v4922_v52  ;;  %14295 = vmatprep.subr.bf16.mxu0 %v14890_v10 }
 0x2f2   : > { %v13962_v32 = vpop.f32.mrf.mxu1 }
 0x2f3   : > { %17837 = vst [vmem:[#allocation11_spill] sm:$0xff] %v16321_v7  ;;  %v4648_v16 = vpop.f32.mrf.mxu0  ;;  %v14889_v7 = vld [vmem:[#allocation6 + $0x2c0] sm:$0xff]  }
 0x2f4   : > { %v4733_v50 = vrot.slane %v4648_v16, 7  ;;  %v16323_v20 = vpop.f32.mrf.mxu1  ;;  %14296 = vmatpush3.bf16.msra.mxu0 %v14890_v10  ;;  %14221 = vmatprep.subr.bf16.mxu1 %v14889_v7 }
 0x2f5   : > { %17838 = vst [vmem:[#allocation12_spill] sm:$0xff] %v16323_v20  ;;  %v13885_v14 = vpop.f32.mrf.mxu0  ;;  %14222 = vmatpush3.bf16.msra.mxu1 %v14889_v7  ;;  %v5415_v7 = vadd.f32 %v16140_v21, %v16150_v60 }
 0x2f6   : > { %v4745_v31 = vsel %vm885_vm1, %v4733_v50, %v4734_v2  ;;  %v4746_v39 = vsel %vm885_vm1, %v4732_v42, %v4733_v50  ;;  %v13965_v46 = vpop.f32.mrf.mxu1  ;;  %v14891_v2 = vld [vmem:[#allocation6 + $0x310] sm:$0xff]   ;;  %v4738_v20 = vrot.slane %v13885_v14, 7  ;;  %v14892_v14 = vld [vmem:[#allocation6 + $0x308] sm:$0xff]  }
 0x2f7   : > { %v4926_v63 = vadd.f32 %v4745_v31, %v16119_v6  ;;  %v4661_v52 = vpop.f32.mrf.mxu0  ;;  %v16331_v45 = vadd.f32 %v4746_v39, %v16125_v0  ;;  %14297 = vmatprep.subr.bf16.mxu0 %v14891_v2 }
 0x2f8   : > { %v5335_v54 = vpop.f32.mrf.mxu1  ;;  %v4736_v50 = vrot.slane %v4661_v52, 7  ;;  %14298 = vmatpush3.bf16.msra.mxu0 %v14891_v2 }
 0x2f9   : > { %v13886_v34 = vpop.f32.mrf.mxu0  ;;  %v16333_v24 = vadd.f32 %v13961_v40, %v4926_v63  ;;  %14299 = vmatprep.subr.bf16.mxu0 %v14892_v14 }
 0x2fa   : > { %v13966_v32 = vpop.f32.mrf.mxu1  ;;  %v14893_v34 = vld [vmem:[#allocation6 + $0x300] sm:$0xff]  }
 0x2fb   : > { %v4664_v16 = vpop.f32.mrf.mxu0 }
 0x2fc   : > { %v4737_v42 = vrot.slane %v4664_v16, 7  ;;  %14300 = vmatpush3.bf16.msra.mxu0 %v14892_v14 }
 0x2fd   : > { %v13985_v51 = vpop.f32.mrf.mxu0  ;;  %14301 = vmatprep.subr.bf16.mxu0 %v14893_v34 }
 0x2fe   : > { %v4741_v6 = vsel %vm885_vm1, %v4737_v42, %v4738_v20  ;;  %v4742_v0 = vsel %vm885_vm1, %v4736_v50, %v4737_v42  ;;  %v5898_v10 = vrot.slane %v13985_v51, 1 }
 0x2ff   : > { %v4930_v40 = vadd.f32 %v4741_v6, %v16131_v18  ;;  %v5641_v31 = vpop.f32.mrf.mxu0  ;;  %v16341_v39 = vadd.f32 %v4742_v0, %v16136_v15  ;;  %v16350_v18 = vld [vmem:[%s17742_s2] ss:$0 sm:$0xff]  ;;  %v16358_v6 = vld [vmem:[#allocation6 + $0x378] sm:$0xff]  }
 0x300   : > { %14302 = vmatpush3.bf16.msra.mxu0 %v14893_v34  ;;  %14367 = vmatprep.subr.bf16.mxu1 %v16358_v6 }
 0x301   : > { %v13986_v63 = vpop.f32.mrf.mxu0  ;;  %v16343_v52 = vadd.f32 %v13965_v46, %v4930_v40 }
 0x302   : > { %v5899_v54 = vrot.slane %v13986_v63, 1 }
 0x303   : > { %v5644_v20 = vpop.f32.mrf.mxu0 }
 0x304   : > { %v6020_v32 = vsel %vm1978_vm2, %v5898_v10, %v5899_v54  ;;  %v5897_v15 = vrot.slane %v5644_v20, 1  ;;  %v5419_v54 = vadd.f32 %v16154_v58, %v16164_v25  ;;  %v16366_v20 = vld [vmem:[#allocation2] sm:$0xff] }
 0x305   : > { %v6090_v46 = vadd.f32 %v6020_v32, %v16152_v11  ;;  %v13989_v16 = vpop.f32.mrf.mxu0 }
 0x306   : > { %v6021_v2 = vsel %vm1978_vm2, %v5897_v15, %v5898_v10  ;;  %v5902_v14 = vrot.slane %v13989_v16, 1 }
 0x307   : > { %v6256_v50 = vadd.f32 %v16350_v18, %v6090_v46  ;;  %v6089_v42 = vadd.f32 %v6021_v2, %v5415_v7  ;;  %v5657_v51 = vpop.f32.mrf.mxu0 }
 0x309   : > { %v6255_v0 = vadd.f32 %v16350_v18, %v6089_v42  ;;  %v13990_v40 = vpop.f32.mrf.mxu0  ;;  %v6288_v31 = vmax.f32 %v6256_v50, 0.0 }
 0x30a   : > { %v5903_v21 = vrot.slane %v13990_v40, 1 }
 0x30b   : > { %v6287_v60 = vmax.f32 %v6255_v0, 0.0  ;;  %v5660_v11 = vpop.f32.mrf.mxu0  ;;  %v16373_v7 = vpack.c.bf16 %v16366_v20, %v6288_v31 }
 0x30c   : > { %v6016_v63 = vsel %vm1978_vm2, %v5902_v14, %v5903_v21  ;;  %v5901_v10 = vrot.slane %v5660_v11, 1  ;;  %v5423_v21 = vadd.f32 %v16168_v23, %v16178_v59 }
 0x30d   : > { %v16369_v34 = vpack.c.bf16 %v6287_v60, %v16366_v20  ;;  %v6094_v32 = vadd.f32 %v6016_v63, %v16166_v61  ;;  %v13993_v15 = vpop.f32.mrf.mxu0 }
 0x30e   : > { %v6017_v46 = vsel %vm1978_vm2, %v5901_v10, %v5902_v14  ;;  %v5906_v42 = vrot.slane %v13993_v15, 1 }
 0x30f   : > { %v6258_v16 = vadd.f32 %v16350_v18, %v6094_v32  ;;  %v6093_v2 = vadd.f32 %v6017_v46, %v5419_v54  ;;  %v5673_v50 = vpop.f32.mrf.mxu0  ;;  %14067 = vmatprep.mubr.bf16.mxu1 %v16369_v34  ;;  %14147 = vmatprep.mubr.bf16.mxu0 %v16369_v34 }
 0x310   : > { %14068 = vmatmul.mubr.bf16.gmra.mxu1 %v16373_v7  ;;  %14148 = vmatmul.mubr.bf16.gmra.mxu0 %v16373_v7 }
 0x311   : > { %v6257_v58 = vadd.f32 %v16350_v18, %v6093_v2  ;;  %v13994_v25 = vpop.f32.mrf.mxu0  ;;  %v6290_v61 = vmax.f32 %v6258_v16, 0.0 }
 0x312   : > { %v5907_v51 = vrot.slane %v13994_v25, 1 }
 0x313   : > { %v6289_v0 = vmax.f32 %v6257_v58, 0.0  ;;  %v5676_v40 = vpop.f32.mrf.mxu0  ;;  %v16392_v10 = vpack.c.bf16 %v16366_v20, %v6290_v61 }
 0x314   : > { %v6012_v31 = vsel %vm1978_vm2, %v5906_v42, %v5907_v51  ;;  %v5905_v14 = vrot.slane %v5676_v40, 1 }
 0x315   : > { %v16388_v60 = vpack.c.bf16 %v6289_v0, %v16366_v20  ;;  %v6098_v11 = vadd.f32 %v6012_v31, %v16180_v26  ;;  %v13997_v63 = vpop.f32.mrf.mxu0 }
 0x316   : > { %v6013_v54 = vsel %vm1978_vm2, %v5905_v14, %v5906_v42  ;;  %v5910_v16 = vrot.slane %v13997_v63, 1  ;;  %v5427_v42 = vadd.f32 %v16182_v13, %v16192_v22 }
 0x317   : > { %17839 = vst [vmem:[#allocation13_spill] sm:$0xff] %v16388_v60  ;;  %v6260_v32 = vadd.f32 %v16350_v18, %v6098_v11  ;;  %v6097_v15 = vadd.f32 %v6013_v54, %v5423_v21  ;;  %v5689_v46 = vpop.f32.mrf.mxu0  ;;  %14071 = vmatprep.mubr.bf16.mxu1 %v16388_v60  ;;  %14151 = vmatprep.mubr.bf16.mxu0 %v16388_v60 }
 0x318   : > { %14072 = vmatmul.mubr.bf16.gmra.mxu1 %v16392_v10  ;;  %14152 = vmatmul.mubr.bf16.gmra.mxu0 %v16392_v10 }
 0x319   : > { %v6259_v23 = vadd.f32 %v16350_v18, %v6097_v15  ;;  %v13998_v59 = vpop.f32.mrf.mxu0  ;;  %v6292_v26 = vmax.f32 %v6260_v32, 0.0 }
 0x31a   : > { %v5911_v2 = vrot.slane %v13998_v59, 1 }
 0x31b   : > { %v6291_v50 = vmax.f32 %v6259_v23, 0.0  ;;  %v5692_v58 = vpop.f32.mrf.mxu0  ;;  %v16411_v31 = vpack.c.bf16 %v16366_v20, %v6292_v26  ;;  %v5431_v26 = vadd.f32 %v16196_v1, %v16206_v56 }
 0x31c   : > { %v6008_v25 = vsel %vm1978_vm2, %v5910_v16, %v5911_v2  ;;  %v5909_v61 = vrot.slane %v5692_v58, 1 }
 0x31d   : > { %v16407_v51 = vpack.c.bf16 %v6291_v50, %v16366_v20  ;;  %v6102_v0 = vadd.f32 %v6008_v25, %v16194_v5  ;;  %v14001_v40 = vpop.f32.mrf.mxu0  ;;  %17840 = vst [vmem:[#allocation14_spill] sm:$0xff] %v16411_v31 }
 0x31e   : > { %v6009_v14 = vsel %vm1978_vm2, %v5909_v61, %v5910_v16  ;;  %v5914_v54 = vrot.slane %v14001_v40, 1 }
 0x31f   : > { %v6262_v21 = vadd.f32 %v16350_v18, %v6102_v0  ;;  %v6101_v11 = vadd.f32 %v6009_v14, %v5427_v42  ;;  %v5705_v63 = vpop.f32.mrf.mxu0  ;;  %14075 = vmatprep.mubr.bf16.mxu1 %v16407_v51  ;;  %14155 = vmatprep.mubr.bf16.mxu0 %v16407_v51 }
 0x320   : > { %14076 = vmatmul.mubr.bf16.gmra.mxu1 %v16411_v31  ;;  %14156 = vmatmul.mubr.bf16.gmra.mxu0 %v16411_v31 }
 0x321   : > { %v6261_v13 = vadd.f32 %v16350_v18, %v6101_v11  ;;  %v14002_v22 = vpop.f32.mrf.mxu0  ;;  %v6294_v5 = vmax.f32 %v6262_v21, 0.0 }
 0x322   : > { %v5915_v32 = vrot.slane %v14002_v22, 1  ;;  %v5435_v22 = vadd.f32 %v16210_v48, %v16220_v47 }
 0x323   : > { %v6293_v15 = vmax.f32 %v6261_v13, 0.0  ;;  %v5708_v46 = vpop.f32.mrf.mxu0  ;;  %v16430_v58 = vpack.c.bf16 %v16366_v20, %v6294_v5 }
 0x324   : > { %v6004_v23 = vsel %vm1978_vm2, %v5914_v54, %v5915_v32  ;;  %v5913_v59 = vrot.slane %v5708_v46, 1 }
 0x325   : > { %v16426_v16 = vpack.c.bf16 %v6293_v15, %v16366_v20  ;;  %v6106_v2 = vadd.f32 %v6004_v23, %v16208_v28  ;;  %v14005_v50 = vpop.f32.mrf.mxu0  ;;  %17842 = vst [vmem:[#allocation16_spill] sm:$0xff] %v16430_v58 }
 0x326   : > { %v6005_v25 = vsel %vm1978_vm2, %v5913_v59, %v5914_v54  ;;  %v5918_v40 = vrot.slane %v14005_v50, 1 }
 0x327   : > { %17841 = vst [vmem:[#allocation15_spill] sm:$0xff] %v16426_v16  ;;  %v6264_v61 = vadd.f32 %v16350_v18, %v6106_v2  ;;  %v6105_v42 = vadd.f32 %v6005_v25, %v5431_v26  ;;  %v5721_v0 = vpop.f32.mrf.mxu0  ;;  %14079 = vmatprep.mubr.bf16.mxu1 %v16426_v16  ;;  %14159 = vmatprep.mubr.bf16.mxu0 %v16426_v16 }
 0x328   : > { %14080 = vmatmul.mubr.bf16.gmra.mxu1 %v16430_v58  ;;  %14160 = vmatmul.mubr.bf16.gmra.mxu0 %v16430_v58 }
 0x329   : > { %v6263_v1 = vadd.f32 %v16350_v18, %v6105_v42  ;;  %v14006_v56 = vpop.f32.mrf.mxu0  ;;  %v6296_v28 = vmax.f32 %v6264_v61, 0.0 }
 0x32a   : > { %v5919_v14 = vrot.slane %v14006_v56, 1 }
 0x32b   : > { %v6295_v21 = vmax.f32 %v6263_v1, 0.0  ;;  %v5724_v11 = vpop.f32.mrf.mxu0  ;;  %v16449_v15 = vpack.c.bf16 %v16366_v20, %v6296_v28  ;;  %v5439_v1 = vadd.f32 %v16224_v36, %v16234_v9 }
 0x32c   : > { %v6000_v63 = vsel %vm1978_vm2, %v5918_v40, %v5919_v14  ;;  %v5917_v13 = vrot.slane %v5724_v11, 1 }
 0x32d   : > { %v16445_v5 = vpack.c.bf16 %v6295_v21, %v16366_v20  ;;  %v6110_v54 = vadd.f32 %v6000_v63, %v16222_v8  ;;  %v14009_v32 = vpop.f32.mrf.mxu0  ;;  %17844 = vst [vmem:[#allocation18_spill] sm:$0xff] %v16449_v15 }
 0x32e   : > { %v6001_v46 = vsel %vm1978_vm2, %v5917_v13, %v5918_v40  ;;  %v5922_v2 = vrot.slane %v14009_v32, 1 }
 0x32f   : > { %17843 = vst [vmem:[#allocation17_spill] sm:$0xff] %v16445_v5  ;;  %v6266_v23 = vadd.f32 %v16350_v18, %v6110_v54  ;;  %v6109_v59 = vadd.f32 %v6001_v46, %v5435_v22  ;;  %v5737_v26 = vpop.f32.mrf.mxu0  ;;  %14083 = vmatprep.mubr.bf16.mxu1 %v16445_v5  ;;  %14163 = vmatprep.mubr.bf16.mxu0 %v16445_v5 }
 0x330   : > { %14084 = vmatmul.mubr.bf16.gmra.mxu1 %v16449_v15  ;;  %14164 = vmatmul.mubr.bf16.gmra.mxu0 %v16449_v15  ;;  %v5443_v26 = vadd.f32 %v16238_v19, %v16247_v29  ;;  %v16496_v19 = vpop.f32.mrf.mxu1 }
 0x331   : > { %v6265_v48 = vadd.f32 %v16350_v18, %v6109_v59  ;;  %v14010_v47 = vpop.f32.mrf.mxu0  ;;  %v6298_v8 = vmax.f32 %v6266_v23, 0.0 }
 0x332   : > { %v5923_v50 = vrot.slane %v14010_v47, 1 }
 0x333   : > { %v6297_v25 = vmax.f32 %v6265_v48, 0.0  ;;  %v5740_v61 = vpop.f32.mrf.mxu0  ;;  %v16468_v14 = vpack.c.bf16 %v16366_v20, %v6298_v8 }
 0x334   : > { %v5996_v42 = vsel %vm1978_vm2, %v5922_v2, %v5923_v50  ;;  %v5921_v0 = vrot.slane %v5740_v61, 1 }
 0x335   : > { %v16464_v56 = vpack.c.bf16 %v6297_v25, %v16366_v20  ;;  %v6114_v28 = vadd.f32 %v5996_v42, %v16236_v55  ;;  %v14013_v40 = vpop.f32.mrf.mxu0  ;;  %17846 = vst [vmem:[#allocation20_spill] sm:$0xff] %v16468_v14 }
 0x336   : > { %v5997_v21 = vsel %vm1978_vm2, %v5921_v0, %v5922_v2  ;;  %v5926_v22 = vrot.slane %v14013_v40, 1 }
 0x337   : > { %17845 = vst [vmem:[#allocation19_spill] sm:$0xff] %v16464_v56  ;;  %v6268_v11 = vadd.f32 %v16350_v18, %v6114_v28  ;;  %v6113_v63 = vadd.f32 %v5997_v21, %v5439_v1  ;;  %v5753_v13 = vpop.f32.mrf.mxu0  ;;  %14087 = vmatprep.mubr.bf16.mxu1 %v16464_v56  ;;  %14167 = vmatprep.mubr.bf16.mxu0 %v16464_v56 }
 0x338   : > { %14088 = vmatmul.mubr.bf16.gmra.mxu1 %v16468_v14  ;;  %14168 = vmatmul.mubr.bf16.gmra.mxu0 %v16468_v14 }
 0x339   : > { %v6267_v36 = vadd.f32 %v16350_v18, %v6113_v63  ;;  %v14014_v9 = vpop.f32.mrf.mxu0  ;;  %v6300_v55 = vmax.f32 %v6268_v11, 0.0  ;;  %v16499_v11 = vpop.f32.mrf.mxu1 }
 0x33a   : > { %v5927_v54 = vrot.slane %v14014_v9, 1 }
 0x33b   : > { %v6299_v32 = vmax.f32 %v6267_v36, 0.0  ;;  %v5756_v46 = vpop.f32.mrf.mxu0  ;;  %v16487_v2 = vpack.c.bf16 %v16366_v20, %v6300_v55  ;;  %v5447_v36 = vadd.f32 %v16251_v3, %v16259_v49 }
 0x33c   : > { %v5992_v23 = vsel %vm1978_vm2, %v5926_v22, %v5927_v54  ;;  %v5925_v59 = vrot.slane %v5756_v46, 1  ;;  %v16509_v54 = vpop.f32.mrf.mxu1 }
 0x33d   : > { %v16483_v48 = vpack.c.bf16 %v6299_v32, %v16366_v20  ;;  %v6118_v47 = vadd.f32 %v5992_v23, %v16249_v27  ;;  %v14017_v8 = vpop.f32.mrf.mxu0  ;;  %17848 = vst [vmem:[#allocation22_spill] sm:$0xff] %v16487_v2 }
 0x33e   : > { %v5993_v50 = vsel %vm1978_vm2, %v5925_v59, %v5926_v22  ;;  %v5930_v1 = vrot.slane %v14017_v8, 1  ;;  %v14066_v3 = vpop.f32.mrf.mxu1 }
 0x33f   : > { %17847 = vst [vmem:[#allocation21_spill] sm:$0xff] %v16483_v48  ;;  %v6270_v25 = vadd.f32 %v16350_v18, %v6118_v47  ;;  %v6117_v61 = vadd.f32 %v5993_v50, %v5443_v26  ;;  %v5769_v42 = vpop.f32.mrf.mxu0  ;;  %14091 = vmatprep.mubr.bf16.mxu1 %v16483_v48  ;;  %14171 = vmatprep.mubr.bf16.mxu0 %v16483_v48 }
 0x340   : > { %14092 = vmatmul.mubr.bf16.gmra.mxu1 %v16487_v2  ;;  %14172 = vmatmul.mubr.bf16.gmra.mxu0 %v16487_v2  ;;  %v5455_v3 = vadd.f32 %v16275_v38, %v16283_v37 }
 0x341   : > { %v6269_v29 = vadd.f32 %v16350_v18, %v6117_v61  ;;  %v14018_v27 = vpop.f32.mrf.mxu0  ;;  %v6302_v0 = vmax.f32 %v6270_v25, 0.0 }
 0x342   : > { %v5931_v28 = vrot.slane %v14018_v27, 1  ;;  %v5451_v27 = vadd.f32 %v16263_v33, %v16271_v30 }
 0x343   : > { %v6301_v40 = vmax.f32 %v6269_v29, 0.0  ;;  %v5772_v21 = vpop.f32.mrf.mxu0  ;;  %v16512_v32 = vpack.c.bf16 %v16366_v20, %v6302_v0 }
 0x344   : > { %v5988_v63 = vsel %vm1978_vm2, %v5930_v1, %v5931_v28  ;;  %v5929_v13 = vrot.slane %v5772_v21, 1 }
 0x345   : > { %v16506_v9 = vpack.c.bf16 %v6301_v40, %v16366_v20  ;;  %v6122_v55 = vadd.f32 %v5988_v63, %v16261_v35  ;;  %v14021_v22 = vpop.f32.mrf.mxu0  ;;  %17850 = vst [vmem:[#allocation24_spill] sm:$0xff] %v16512_v32 }
 0x346   : > { %v5989_v46 = vsel %vm1978_vm2, %v5929_v13, %v5930_v1  ;;  %v5934_v8 = vrot.slane %v14021_v22, 1 }
 0x347   : > { %17849 = vst [vmem:[#allocation23_spill] sm:$0xff] %v16506_v9  ;;  %v6272_v23 = vadd.f32 %v16350_v18, %v6122_v55  ;;  %v6121_v59 = vadd.f32 %v5989_v46, %v5447_v36  ;;  %v5785_v26 = vpop.f32.mrf.mxu0  ;;  %14095 = vmatprep.mubr.bf16.mxu1 %v16506_v9  ;;  %14175 = vmatprep.mubr.bf16.mxu0 %v16506_v9 }
 0x348   : > { %14096 = vmatmul.mubr.bf16.gmra.mxu1 %v16512_v32  ;;  %14176 = vmatmul.mubr.bf16.gmra.mxu0 %v16512_v32 }
 0x349   : > { %v6271_v49 = vadd.f32 %v16350_v18, %v6121_v59  ;;  %v14022_v35 = vpop.f32.mrf.mxu0  ;;  %v6304_v47 = vmax.f32 %v6272_v23, 0.0 }
 0x34a   : > { %v5935_v50 = vrot.slane %v14022_v35, 1 }
 0x34b   : > { %v6303_v25 = vmax.f32 %v6271_v49, 0.0  ;;  %v5788_v61 = vpop.f32.mrf.mxu0  ;;  %v16531_v40 = vpack.c.bf16 %v16366_v20, %v6304_v47 }
 0x34c   : > { %v5984_v42 = vsel %vm1978_vm2, %v5934_v8, %v5935_v50  ;;  %v5933_v29 = vrot.slane %v5788_v61, 1 }
 0x34d   : > { %v16527_v0 = vpack.c.bf16 %v6303_v25, %v16366_v20  ;;  %v6126_v1 = vadd.f32 %v5984_v42, %v16273_v41  ;;  %v14025_v28 = vpop.f32.mrf.mxu0 }
 0x34e   : > { %v5985_v21 = vsel %vm1978_vm2, %v5933_v29, %v5934_v8  ;;  %v5938_v55 = vrot.slane %v14025_v28, 1 }
 0x34f   : > { %17851 = vst [vmem:[#allocation25_spill] sm:$0xff] %v16527_v0  ;;  %v6274_v63 = vadd.f32 %v16350_v18, %v6126_v1  ;;  %v6125_v13 = vadd.f32 %v5985_v21, %v5451_v27  ;;  %v5801_v36 = vpop.f32.mrf.mxu0  ;;  %14099 = vmatprep.mubr.bf16.mxu1 %v16527_v0  ;;  %14179 = vmatprep.mubr.bf16.mxu0 %v16527_v0 }
 0x350   : > { %14100 = vmatmul.mubr.bf16.gmra.mxu1 %v16531_v40  ;;  %14180 = vmatmul.mubr.bf16.gmra.mxu0 %v16531_v40 }
 0x351   : > { %v6273_v33 = vadd.f32 %v16350_v18, %v6125_v13  ;;  %v14026_v30 = vpop.f32.mrf.mxu0  ;;  %v6306_v41 = vmax.f32 %v6274_v63, 0.0  ;;  %v17852_v13 = vld [vmem:[#allocation9_spill] sm:$0xff] }
 0x352   : > { %v5939_v22 = vrot.slane %v14026_v30, 1  ;;  %v5459_v36 = vadd.f32 %v17852_v13, %v16295_v12 }
 0x353   : > { %v6305_v46 = vmax.f32 %v6273_v33, 0.0  ;;  %v5804_v23 = vpop.f32.mrf.mxu0  ;;  %v16550_v8 = vpack.c.bf16 %v16366_v20, %v6306_v41 }
 0x354   : > { %v5980_v59 = vsel %vm1978_vm2, %v5938_v55, %v5939_v22  ;;  %v5937_v26 = vrot.slane %v5804_v23, 1 }
 0x355   : > { %v16546_v49 = vpack.c.bf16 %v6305_v46, %v16366_v20  ;;  %v6130_v35 = vadd.f32 %v5980_v59, %v16285_v62  ;;  %v14029_v47 = vpop.f32.mrf.mxu0 }
 0x356   : > { %v5981_v50 = vsel %vm1978_vm2, %v5937_v26, %v5938_v55  ;;  %v5942_v29 = vrot.slane %v14029_v47, 1 }
 0x357   : > { %v6276_v25 = vadd.f32 %v16350_v18, %v6130_v35  ;;  %v6129_v61 = vadd.f32 %v5981_v50, %v5455_v3  ;;  %v5817_v42 = vpop.f32.mrf.mxu0  ;;  %14103 = vmatprep.mubr.bf16.mxu1 %v16546_v49  ;;  %14183 = vmatprep.mubr.bf16.mxu0 %v16546_v49 }
 0x358   : > { %14104 = vmatmul.mubr.bf16.gmra.mxu1 %v16550_v8  ;;  %14184 = vmatmul.mubr.bf16.gmra.mxu0 %v16550_v8  ;;  %v5463_v42 = vadd.f32 %v16299_v4, %v16307_v17  ;;  %v16595_v4 = vld [vmem:[#allocation6 + $0x3b8] sm:$0xff]  }
 0x359   : > { %v6275_v38 = vadd.f32 %v16350_v18, %v6129_v61  ;;  %v14030_v37 = vpop.f32.mrf.mxu0  ;;  %v6308_v62 = vmax.f32 %v6276_v25, 0.0  ;;  %14447 = vmatprep.subr.bf16.mxu0 %v16595_v4 }
 0x35a   : > { %v5943_v27 = vrot.slane %v14030_v37, 1 }
 0x35b   : > { %v6307_v1 = vmax.f32 %v6275_v38, 0.0  ;;  %v5820_v28 = vpop.f32.mrf.mxu0  ;;  %v16569_v55 = vpack.c.bf16 %v16366_v20, %v6308_v62 }
 0x35c   : > { %v5976_v21 = vsel %vm1978_vm2, %v5942_v29, %v5943_v27  ;;  %v5941_v63 = vrot.slane %v5820_v28, 1 }
 0x35d   : > { %v16565_v33 = vpack.c.bf16 %v6307_v1, %v16366_v20  ;;  %v6134_v30 = vadd.f32 %v5976_v21, %v16297_v53  ;;  %v14033_v41 = vpop.f32.mrf.mxu0 }
 0x35e   : > { %v5977_v22 = vsel %vm1978_vm2, %v5941_v63, %v5942_v29  ;;  %v5946_v3 = vrot.slane %v14033_v41, 1 }
 0x35f   : > { %17853 = vst [vmem:[#allocation9_spill] sm:$0xff] %v16565_v33  ;;  %v6278_v46 = vadd.f32 %v16350_v18, %v6134_v30  ;;  %v6133_v23 = vadd.f32 %v5977_v22, %v5459_v36  ;;  %v5833_v59 = vpop.f32.mrf.mxu0  ;;  %14107 = vmatprep.mubr.bf16.mxu1 %v16565_v33  ;;  %14187 = vmatprep.mubr.bf16.mxu0 %v16565_v33 }
 0x360   : > { %14108 = vmatmul.mubr.bf16.gmra.mxu1 %v16569_v55  ;;  %14188 = vmatmul.mubr.bf16.gmra.mxu0 %v16569_v55 }
 0x361   : > { %v6277_v12 = vadd.f32 %v16350_v18, %v6133_v23  ;;  %v14034_v53 = vpop.f32.mrf.mxu0  ;;  %v6310_v26 = vmax.f32 %v6278_v46, 0.0  ;;  %v17854_v23 = vld [vmem:[#allocation10_spill] sm:$0xff] }
 0x362   : > { %v5947_v35 = vrot.slane %v14034_v53, 1  ;;  %v5467_v59 = vadd.f32 %v17854_v23, %v16319_v44  ;;  %v17856_v53 = vld [vmem:[#allocation11_spill] sm:$0xff] }
 0x363   : > { %v6309_v47 = vmax.f32 %v6277_v12, 0.0  ;;  %v5836_v50 = vpop.f32.mrf.mxu0  ;;  %v16588_v29 = vpack.c.bf16 %v16366_v20, %v6310_v26 }
 0x364   : > { %v5972_v25 = vsel %vm1978_vm2, %v5946_v3, %v5947_v35  ;;  %v5945_v61 = vrot.slane %v5836_v50, 1 }
 0x365   : > { %v16584_v38 = vpack.c.bf16 %v6309_v47, %v16366_v20  ;;  %v6138_v37 = vadd.f32 %v5972_v25, %v16309_v57  ;;  %v14037_v62 = vpop.f32.mrf.mxu0 }
 0x366   : > { %v5973_v27 = vsel %vm1978_vm2, %v5945_v61, %v5946_v3  ;;  %v5950_v13 = vrot.slane %v14037_v62, 1 }
 0x367   : > { %v6280_v1 = vadd.f32 %v16350_v18, %v6138_v37  ;;  %v6137_v28 = vadd.f32 %v5973_v27, %v5463_v42  ;;  %v5849_v21 = vpop.f32.mrf.mxu0  ;;  %14111 = vmatprep.mubr.bf16.mxu1 %v16584_v38  ;;  %14191 = vmatprep.mubr.bf16.mxu0 %v16584_v38 }
 0x368   : > { %14112 = vmatmul.mubr.bf16.gmra.mxu1 %v16588_v29  ;;  %14192 = vmatmul.mubr.bf16.gmra.mxu0 %v16588_v29 }
 0x369   : > { %v6279_v17 = vadd.f32 %v16350_v18, %v6137_v28  ;;  %v14038_v57 = vpop.f32.mrf.mxu0  ;;  %v6312_v63 = vmax.f32 %v6280_v1, 0.0 }
 0x36a   : > { %v5951_v36 = vrot.slane %v14038_v57, 1  ;;  %v16622_v57 = vpop.f32.mrf.mxu1 }
 0x36b   : > { %v6311_v30 = vmax.f32 %v6279_v17, 0.0  ;;  %v5852_v41 = vpop.f32.mrf.mxu0  ;;  %v16610_v35 = vpack.c.bf16 %v16366_v20, %v6312_v63  ;;  %v17857_v63 = vld [vmem:[#allocation12_spill] sm:$0xff] }
 0x36c   : > { %v5968_v22 = vsel %vm1978_vm2, %v5950_v13, %v5951_v36  ;;  %v5949_v46 = vrot.slane %v5852_v41, 1 }
 0x36d   : > { %v16606_v12 = vpack.c.bf16 %v6311_v30, %v16366_v20  ;;  %v6142_v26 = vadd.f32 %v5968_v22, %v17856_v53  ;;  %v14041_v3 = vpop.f32.mrf.mxu0 }
 0x36e   : > { %v5969_v47 = vsel %vm1978_vm2, %v5949_v46, %v5950_v13  ;;  %v5954_v62 = vrot.slane %v14041_v3, 1  ;;  %v5471_v13 = vadd.f32 %v17857_v63, %v16331_v45  ;;  %v6804_v45 = vrot.slane %v16499_v11, 7 }
 0x36f   : > { %17855 = vst [vmem:[#allocation10_spill] sm:$0xff] %v16606_v12  ;;  %v6282_v50 = vadd.f32 %v16350_v18, %v6142_v26  ;;  %v6141_v25 = vadd.f32 %v5969_v47, %v5467_v59  ;;  %v5865_v61 = vpop.f32.mrf.mxu0  ;;  %14115 = vmatprep.mubr.bf16.mxu1 %v16606_v12  ;;  %14195 = vmatprep.mubr.bf16.mxu0 %v16606_v12  ;;  %v17760_v26 = vrot.slane %v16622_v57, 7 }
 0x370   : > { %14116 = vmatmul.mubr.bf16.gmra.mxu1 %v16610_v35  ;;  %14196 = vmatmul.mubr.bf16.gmra.mxu0 %v16610_v35 }
 0x371   : > { %v6281_v44 = vadd.f32 %v16350_v18, %v6141_v25  ;;  %v14042_v42 = vpop.f32.mrf.mxu0  ;;  %v6314_v37 = vmax.f32 %v6282_v50, 0.0 }
 0x372   : > { %v5955_v27 = vrot.slane %v14042_v42, 1  ;;  %v6927_v42 = vsel %vm885_vm1, %v17760_v26, %v6804_v45  ;;  %v14899_v45 = vld [vmem:[#allocation6 + $0x350] sm:$0xff]  }
 0x373   : > { %v6313_v1 = vmax.f32 %v6281_v44, 0.0  ;;  %v5868_v28 = vpop.f32.mrf.mxu0  ;;  %v16631_v22 = vpack.c.bf16 %v16366_v20, %v6314_v37 }
 0x374   : > { %v5964_v21 = vsel %vm1978_vm2, %v5954_v62, %v5955_v27  ;;  %v5953_v17 = vrot.slane %v5868_v28, 1 }
 0x375   : > { %v16627_v36 = vpack.c.bf16 %v6313_v1, %v16366_v20  ;;  %v6146_v30 = vadd.f32 %v5964_v21, %v16333_v24  ;;  %v14045_v41 = vpop.f32.mrf.mxu0  ;;  %17858 = vst [vmem:[#allocation11_spill] sm:$0xff] %v16631_v22 }
 0x376   : > { %v5965_v46 = vsel %vm1978_vm2, %v5953_v17, %v5954_v62  ;;  %v5958_v24 = vrot.slane %v14045_v41, 1  ;;  %v5475_v62 = vadd.f32 %v16496_v19, %v16341_v39  ;;  %v14902_v41 = vld [vmem:[#allocation6 + $0x3b0] sm:$0xff]  }
 0x377   : > { %v6284_v23 = vadd.f32 %v16350_v18, %v6146_v30  ;;  %v6145_v59 = vadd.f32 %v5965_v46, %v5471_v13  ;;  %v5881_v53 = vpop.f32.mrf.mxu0  ;;  %14119 = vmatprep.mubr.bf16.mxu1 %v16627_v36  ;;  %14199 = vmatprep.mubr.bf16.mxu0 %v16627_v36  ;;  %v14895_v30 = vld [vmem:[#allocation6 + $0x370] sm:$0xff]   ;;  %v14896_v46 = vld [vmem:[#allocation6 + $0x368] sm:$0xff]  }
 0x378   : > { %14120 = vmatmul.mubr.bf16.gmra.mxu1 %v16631_v22  ;;  %14200 = vmatmul.mubr.bf16.gmra.mxu0 %v16631_v22  ;;  %v14904_v53 = vld [vmem:[#allocation6 + $0x3a0] sm:$0xff]  }
 0x379   : > { %v6283_v3 = vadd.f32 %v16350_v18, %v6145_v59  ;;  %v14046_v47 = vpop.f32.mrf.mxu0  ;;  %v6316_v50 = vmax.f32 %v6284_v23, 0.0  ;;  %v14903_v23 = vld [vmem:[#allocation6 + $0x3a8] sm:$0xff]   ;;  %v14897_v59 = vld [vmem:[#allocation6 + $0x360] sm:$0xff]  }
 0x37a   : > { %v5959_v25 = vrot.slane %v14046_v47, 1  ;;  %v14908_v47 = vld [vmem:[#allocation6 + $0x388] sm:$0xff]  }
 0x37b   : > { %v6315_v61 = vmax.f32 %v6283_v3, 0.0  ;;  %v5884_v44 = vpop.f32.mrf.mxu0  ;;  %v16658_v21 = vpack.c.bf16 %v16366_v20, %v6316_v50  ;;  %v14900_v3 = vld [vmem:[#allocation6 + $0x348] sm:$0xff]   ;;  %v14905_v50 = vld [vmem:[#allocation6 + $0x340] sm:$0xff]  }
 0x37c   : > { %v5960_v11 = vsel %vm1978_vm2, %v5958_v24, %v5959_v25  ;;  %v5957_v37 = vrot.slane %v5884_v44, 1  ;;  %v14909_v25 = vld [vmem:[#allocation6 + $0x380] sm:$0xff]  }
 0x37d   : > { %v16652_v27 = vpack.c.bf16 %v6315_v61, %v16366_v20  ;;  %v16655_v1 = vadd.f32 %v5960_v11, %v16343_v52  ;;  %v14145_v28 = vpop.f32.mrf.mxu0  ;;  %v17860_v52 = vmov 0.0|0.0   ;;  %v16690_v61 = vld [vmem:[#allocation6 + $0x3f8] sm:$0xff]  }
 0x37e   : > { %v5961_v17 = vsel %vm1978_vm2, %v5957_v37, %v5958_v24  ;;  %v16662_v63 = vadd.f32 %v14145_v28, %v6927_v42  ;;  %v14907_v24 = vld [vmem:[#allocation6 + $0x390] sm:$0xff]  }
 0x37f   : > { %17859 = vst [vmem:[#allocation12_spill] sm:$0xff] %v16652_v27  ;;  %v16664_v13 = vadd.f32 %v5961_v17, %v5475_v62  ;;  %14123 = vmatprep.mubr.bf16.mxu1 %v16652_v27  ;;  %14203 = vmatprep.mubr.bf16.mxu0 %v16652_v27  ;;  %v7093_v39 = vpop.f32.mrf.mxu0 }
 0x380   : > { %14124 = vmatmul.mubr.bf16.gmra.mxu1 %v16658_v21  ;;  %14204 = vmatmul.mubr.bf16.gmra.mxu0 %v16658_v21 }
 0x381   : > { %14303 = vmatprep.mubr.bf16.mxu0 %v16369_v34  ;;  %14223 = vmatprep.mubr.bf16.mxu1 %v17860_v52  ;;  %v14146_v19 = vpop.f32.mrf.mxu0 }
 0x383   : > { %v16713_v44 = vpop.f32.mrf.mxu0 }
 0x388   : > { %14224 = vmatmul.mubr.bf16.vlgmr.msra.gmra.mxu1 %v17860_v52  ;;  %14304 = vmatmul.mubr.bf16.vlgmr.msra.gmra.mxu0 %v16373_v7 }
 0x389   : > { %14227 = vmatprep.mubr.bf16.mxu1 %v16369_v34  ;;  %14307 = vmatprep.mubr.bf16.mxu0 %v16388_v60 }
 0x38a   : > { %14368 = vmatpush3.bf16.msra.mxu1 %v16358_v6  ;;  %14448 = vmatpush3.bf16.msra.mxu0 %v16595_v4  ;;  %v14898_v6 = vld [vmem:[#allocation6 + $0x358] sm:$0xff]  }
 0x38b   : > { %14369 = vmatprep.subr.bf16.mxu1 %v14895_v30  ;;  %14449 = vmatprep.subr.bf16.mxu0 %v14902_v41  ;;  %v14906_v4 = vld [vmem:[#allocation6 + $0x398] sm:$0xff]  }
 0x38e   : > { %14370 = vmatpush3.bf16.msra.mxu1 %v14895_v30  ;;  %14450 = vmatpush3.bf16.msra.mxu0 %v14902_v41 }
 0x38f   : > { %14371 = vmatprep.subr.bf16.mxu1 %v14896_v46  ;;  %14451 = vmatprep.subr.bf16.mxu0 %v14903_v23 }
 0x390   : > { %14228 = vmatmul.mubr.bf16.gmra.mxu1 %v16373_v7  ;;  %14308 = vmatmul.mubr.bf16.gmra.mxu0 %v16392_v10 }
 0x391   : > { %14231 = vmatprep.mubr.bf16.mxu1 %v16388_v60  ;;  %14311 = vmatprep.mubr.bf16.mxu0 %v16407_v51 }
 0x392   : > { %14372 = vmatpush3.bf16.msra.mxu1 %v14896_v46  ;;  %14452 = vmatpush3.bf16.msra.mxu0 %v14903_v23 }
 0x393   : > { %14373 = vmatprep.subr.bf16.mxu1 %v14897_v59  ;;  %14453 = vmatprep.subr.bf16.mxu0 %v14904_v53 }
 0x396   : > { %14374 = vmatpush3.bf16.msra.mxu1 %v14897_v59  ;;  %14454 = vmatpush3.bf16.msra.mxu0 %v14904_v53 }
 0x397   : > { %14375 = vmatprep.subr.bf16.mxu1 %v14898_v6  ;;  %14455 = vmatprep.subr.bf16.mxu0 %v14906_v4 }
 0x398   : > { %14232 = vmatmul.mubr.bf16.gmra.mxu1 %v16392_v10  ;;  %14312 = vmatmul.mubr.bf16.gmra.mxu0 %v16411_v31 }
 0x399   : > { %14235 = vmatprep.mubr.bf16.mxu1 %v16407_v51  ;;  %14315 = vmatprep.mubr.bf16.mxu0 %v16426_v16 }
 0x39a   : > { %14376 = vmatpush3.bf16.msra.mxu1 %v14898_v6  ;;  %14456 = vmatpush3.bf16.msra.mxu0 %v14906_v4 }
 0x39b   : > { %14377 = vmatprep.subr.bf16.mxu1 %v14899_v45  ;;  %14457 = vmatprep.subr.bf16.mxu0 %v14907_v24 }
 0x39e   : > { %14378 = vmatpush3.bf16.msra.mxu1 %v14899_v45  ;;  %14458 = vmatpush3.bf16.msra.mxu0 %v14907_v24 }
 0x39f   : > { %14379 = vmatprep.subr.bf16.mxu1 %v14900_v3  ;;  %14459 = vmatprep.subr.bf16.mxu0 %v14908_v47 }
 0x3a0   : > { %14236 = vmatmul.mubr.bf16.gmra.mxu1 %v16411_v31  ;;  %14316 = vmatmul.mubr.bf16.gmra.mxu0 %v16430_v58 }
 0x3a1   : > { %14239 = vmatprep.mubr.bf16.mxu1 %v16426_v16  ;;  %14319 = vmatprep.mubr.bf16.mxu0 %v16445_v5 }
 0x3a2   : > { %14380 = vmatpush3.bf16.msra.mxu1 %v14900_v3  ;;  %14460 = vmatpush3.bf16.msra.mxu0 %v14908_v47 }
 0x3a3   : > { %14381 = vmatprep.subr.bf16.mxu1 %v14905_v50  ;;  %14461 = vmatprep.subr.bf16.mxu0 %v14909_v25 }
 0x3a6   : > { %14382 = vmatpush3.bf16.msra.mxu1 %v14905_v50  ;;  %14462 = vmatpush3.bf16.msra.mxu0 %v14909_v25 }
 0x3a7   : > { %14527 = vmatprep.subr.bf16.mxu1 %v16690_v61 }
 0x3a8   : > { %14240 = vmatmul.mubr.bf16.gmra.mxu1 %v16430_v58  ;;  %14320 = vmatmul.mubr.bf16.gmra.mxu0 %v16449_v15 }
 0x3a9   : > { %14243 = vmatprep.mubr.bf16.mxu1 %v16445_v5  ;;  %14323 = vmatprep.mubr.bf16.mxu0 %v16464_v56 }
 0x3b0   : > { %14244 = vmatmul.mubr.bf16.gmra.mxu1 %v16449_v15  ;;  %14324 = vmatmul.mubr.bf16.gmra.mxu0 %v16468_v14 }
 0x3b1   : > { %14247 = vmatprep.mubr.bf16.mxu1 %v16464_v56  ;;  %14327 = vmatprep.mubr.bf16.mxu0 %v16483_v48 }
 0x3b8   : > { %14248 = vmatmul.mubr.bf16.gmra.mxu1 %v16468_v14  ;;  %14328 = vmatmul.mubr.bf16.gmra.mxu0 %v16487_v2 }
 0x3b9   : > { %14251 = vmatprep.mubr.bf16.mxu1 %v16483_v48  ;;  %14331 = vmatprep.mubr.bf16.mxu0 %v16506_v9 }
 0x3c0   : > { %14252 = vmatmul.mubr.bf16.gmra.mxu1 %v16487_v2  ;;  %14332 = vmatmul.mubr.bf16.gmra.mxu0 %v16512_v32 }
 0x3c1   : > { %14255 = vmatprep.mubr.bf16.mxu1 %v16506_v9  ;;  %14335 = vmatprep.mubr.bf16.mxu0 %v16527_v0 }
 0x3c8   : > { %14256 = vmatmul.mubr.bf16.gmra.mxu1 %v16512_v32  ;;  %14336 = vmatmul.mubr.bf16.gmra.mxu0 %v16531_v40 }
 0x3c9   : > { %14259 = vmatprep.mubr.bf16.mxu1 %v16527_v0  ;;  %14339 = vmatprep.mubr.bf16.mxu0 %v16546_v49 }
 0x3d0   : > { %v14069_v42 = vpop.f32.mrf.mxu1  ;;  %v14149_v11 = vpop.f32.mrf.mxu0  ;;  %14260 = vmatmul.mubr.bf16.gmra.mxu1 %v16531_v40  ;;  %14340 = vmatmul.mubr.bf16.gmra.mxu0 %v16550_v8 }
 0x3d1   : > { %14263 = vmatprep.mubr.bf16.mxu1 %v16546_v49  ;;  %14343 = vmatprep.mubr.bf16.mxu0 %v16565_v33  ;;  %v6808_v30 = vrot.slane %v14069_v42, 7 }
 0x3d2   : > { %v6563_v37 = vpop.f32.mrf.mxu1  ;;  %v7109_v62 = vpop.f32.mrf.mxu0 }
 0x3d3   : > { %v6806_v41 = vrot.slane %v6563_v37, 7 }
 0x3d4   : > { %v14070_v28 = vpop.f32.mrf.mxu1  ;;  %v14150_v17 = vpop.f32.mrf.mxu0 }
 0x3d6   : > { %v6566_v39 = vpop.f32.mrf.mxu1  ;;  %v7112_v19 = vpop.f32.mrf.mxu0 }
 0x3d7   : > { %v6807_v46 = vrot.slane %v6566_v39, 7 }
 0x3d8   : > { %v14073_v23 = vpop.f32.mrf.mxu1  ;;  %v14153_v59 = vpop.f32.mrf.mxu0  ;;  %14264 = vmatmul.mubr.bf16.gmra.mxu1 %v16550_v8  ;;  %14344 = vmatmul.mubr.bf16.gmra.mxu0 %v16569_v55 }
 0x3d9   : > { %v6923_v53 = vsel %vm885_vm1, %v6807_v46, %v6808_v30  ;;  %v6924_v6 = vsel %vm885_vm1, %v6806_v41, %v6807_v46  ;;  %14267 = vmatprep.mubr.bf16.mxu1 %v16565_v33  ;;  %14347 = vmatprep.mubr.bf16.mxu0 %v16584_v38  ;;  %v6812_v37 = vrot.slane %v14073_v23, 7 }
 0x3da   : > { %v16727_v4 = vadd.f32 %v7112_v19, %v6924_v6  ;;  %v6579_v45 = vpop.f32.mrf.mxu1  ;;  %v7125_v24 = vpop.f32.mrf.mxu0  ;;  %v16729_v3 = vadd.f32 %v14149_v11, %v6923_v53 }
 0x3db   : > { %v6810_v62 = vrot.slane %v6579_v45, 7 }
 0x3dc   : > { %v14074_v47 = vpop.f32.mrf.mxu1  ;;  %v14154_v50 = vpop.f32.mrf.mxu0 }
 0x3de   : > { %v6582_v25 = vpop.f32.mrf.mxu1  ;;  %v7128_v42 = vpop.f32.mrf.mxu0 }
 0x3df   : > { %v6811_v28 = vrot.slane %v6582_v25, 7 }
 0x3e0   : > { %v14077_v17 = vpop.f32.mrf.mxu1  ;;  %v14157_v39 = vpop.f32.mrf.mxu0  ;;  %14268 = vmatmul.mubr.bf16.gmra.mxu1 %v16569_v55  ;;  %14348 = vmatmul.mubr.bf16.gmra.mxu0 %v16588_v29 }
 0x3e1   : > { %v6919_v19 = vsel %vm885_vm1, %v6811_v28, %v6812_v37  ;;  %v6920_v11 = vsel %vm885_vm1, %v6810_v62, %v6811_v28  ;;  %14271 = vmatprep.mubr.bf16.mxu1 %v16584_v38  ;;  %14351 = vmatprep.mubr.bf16.mxu0 %v16606_v12  ;;  %v6816_v47 = vrot.slane %v14077_v17, 7  ;;  %v16743_v37 = vld [vmem:[#allocation6 + $0x438] sm:$0xff]  }
 0x3e2   : > { %v16739_v30 = vadd.f32 %v7128_v42, %v6920_v11  ;;  %v6595_v41 = vpop.f32.mrf.mxu1  ;;  %v7141_v46 = vpop.f32.mrf.mxu0  ;;  %v16741_v23 = vadd.f32 %v14153_v59, %v6919_v19  ;;  %14607 = vmatprep.subr.bf16.mxu0 %v16743_v37 }
 0x3e3   : > { %v6814_v50 = vrot.slane %v6595_v41, 7 }
 0x3e4   : > { %17861 = vst [vmem:[#allocation26_spill] sm:$0xff] %v16739_v30  ;;  %v14078_v53 = vpop.f32.mrf.mxu1  ;;  %v14158_v6 = vpop.f32.mrf.mxu0 }
 0x3e6   : > { %v6598_v45 = vpop.f32.mrf.mxu1  ;;  %v7144_v24 = vpop.f32.mrf.mxu0 }
 0x3e7   : > { %v6815_v25 = vrot.slane %v6598_v45, 7 }
 0x3e8   : > { %v14081_v62 = vpop.f32.mrf.mxu1  ;;  %v14161_v28 = vpop.f32.mrf.mxu0  ;;  %14272 = vmatmul.mubr.bf16.gmra.mxu1 %v16588_v29  ;;  %14352 = vmatmul.mubr.bf16.gmra.mxu0 %v16610_v35 }
 0x3e9   : > { %v6915_v42 = vsel %vm885_vm1, %v6815_v25, %v6816_v47  ;;  %v6916_v59 = vsel %vm885_vm1, %v6814_v50, %v6815_v25  ;;  %14275 = vmatprep.mubr.bf16.mxu1 %v16606_v12  ;;  %14355 = vmatprep.mubr.bf16.mxu0 %v16627_v36  ;;  %v6285_v47 = vadd.f32 %v16350_v18, %v16664_v13  ;;  %v6820_v50 = vrot.slane %v14081_v62, 7 }
 0x3ea   : > { %v16753_v17 = vadd.f32 %v7144_v24, %v6916_v59  ;;  %v6611_v19 = vpop.f32.mrf.mxu1  ;;  %v7157_v11 = vpop.f32.mrf.mxu0  ;;  %v16756_v41 = vadd.f32 %v14157_v39, %v6915_v42 }
 0x3eb   : > { %v6818_v25 = vrot.slane %v6611_v19, 7  ;;  %v6317_v59 = vmax.f32 %v6285_v47, 0.0 }
 0x3ec   : > { %v14082_v46 = vpop.f32.mrf.mxu1  ;;  %v14162_v53 = vpop.f32.mrf.mxu0 }
 0x3ed   : > { %v14937_v46 = vld [vmem:[%s17742_s2] ss:$0 sm:$0xff] }
 0x3ee   : > { %v6614_v6 = vpop.f32.mrf.mxu1  ;;  %v7160_v45 = vpop.f32.mrf.mxu0  ;;  %v6286_v53 = vadd.f32 %v14937_v46, %v16655_v1  ;;  %v14938_v46 = vld [vmem:[#allocation2] sm:$0xff] }
 0x3ef   : > { %v6819_v26 = vrot.slane %v6614_v6, 7 }
 0x3f0   : > { %v14085_v52 = vpop.f32.mrf.mxu1  ;;  %v14165_v30 = vpop.f32.mrf.mxu0  ;;  %14276 = vmatmul.mubr.bf16.gmra.mxu1 %v16610_v35  ;;  %14356 = vmatmul.mubr.bf16.gmra.mxu0 %v16631_v22 }
 0x3f1   : > { %v6911_v39 = vsel %vm885_vm1, %v6819_v26, %v6820_v50  ;;  %v6912_v24 = vsel %vm885_vm1, %v6818_v25, %v6819_v26  ;;  %14279 = vmatprep.mubr.bf16.mxu1 %v16627_v36  ;;  %14359 = vmatprep.mubr.bf16.mxu0 %v16652_v27  ;;  %v16777_v50 = vpack.c.bf16 %v6317_v59, %v16366_v20  ;;  %v6318_v20 = vmax.f32 %v6286_v53, 0.0 }
 0x3f2   : > { %v16768_v18 = vadd.f32 %v7160_v45, %v6912_v24  ;;  %v6627_v13 = vpop.f32.mrf.mxu1  ;;  %v7173_v62 = vpop.f32.mrf.mxu0  ;;  %v16770_v42 = vadd.f32 %v14161_v28, %v6911_v39  ;;  %v6824_v45 = vrot.slane %v14085_v52, 7 }
 0x3f3   : > { %v6822_v25 = vrot.slane %v6627_v13, 7 }
 0x3f4   : > { %17862 = vst [vmem:[#allocation27_spill] sm:$0xff] %v16768_v18  ;;  %17863 = vst [vmem:[#allocation28_spill] sm:$0xff] %v16770_v42  ;;  %v14086_v19 = vpop.f32.mrf.mxu1  ;;  %v14166_v11 = vpop.f32.mrf.mxu0 }
 0x3f6   : > { %v6630_v26 = vpop.f32.mrf.mxu1  ;;  %v7176_v6 = vpop.f32.mrf.mxu0 }
 0x3f7   : > { %v6823_v24 = vrot.slane %v6630_v26, 7  ;;  %v16791_v26 = vpack.c.bf16 %v14938_v46, %v6318_v20 }
 0x3f8   : > { %v14089_v62 = vpop.f32.mrf.mxu1  ;;  %v14169_v28 = vpop.f32.mrf.mxu0  ;;  %14280 = vmatmul.mubr.bf16.gmra.mxu1 %v16631_v22  ;;  %14360 = vmatmul.mubr.bf16.gmra.mxu0 %v16658_v21 }
 0x3f9   : > { %v6907_v47 = vsel %vm885_vm1, %v6823_v24, %v6824_v45  ;;  %v6908_v1 = vsel %vm885_vm1, %v6822_v25, %v6823_v24  ;;  %14283 = vmatprep.mubr.bf16.mxu1 %v16652_v27  ;;  %14363 = vmatprep.mubr.bf16.mxu0 %v16777_v50  ;;  %17864 = vst [vmem:[#allocation29_spill] sm:$0xff] %v16791_v26  ;;  %v6828_v42 = vrot.slane %v14089_v62, 7 }
 0x3fa   : > { %v16787_v52 = vadd.f32 %v7176_v6, %v6908_v1  ;;  %v6643_v39 = vpop.f32.mrf.mxu1  ;;  %v7189_v13 = vpop.f32.mrf.mxu0  ;;  %v16789_v59 = vadd.f32 %v14165_v30, %v6907_v47 }
 0x3fb   : > { %v6826_v25 = vrot.slane %v6643_v39, 7 }
 0x3fc   : > { %v14090_v19 = vpop.f32.mrf.mxu1  ;;  %v14170_v11 = vpop.f32.mrf.mxu0 }
 0x3fe   : > { %v6646_v45 = vpop.f32.mrf.mxu1  ;;  %v7192_v18 = vpop.f32.mrf.mxu0 }
 0x3ff   : > { %v6827_v24 = vrot.slane %v6646_v45, 7  ;;  %v14911_v45 = vld [vmem:[#allocation6 + $0x3f0] sm:$0xff]  }
 0x400   : > { %v14093_v27 = vpop.f32.mrf.mxu1  ;;  %v14173_v22 = vpop.f32.mrf.mxu0  ;;  %14284 = vmatmul.mubr.bf16.gmra.mxu1 %v16658_v21  ;;  %14364 = vmatmul.mubr.bf16.gmra.mxu0 %v16791_v26  ;;  %v14918_v26 = vld [vmem:[#allocation6 + $0x430] sm:$0xff]  }
 0x401   : > { %v6903_v30 = vsel %vm885_vm1, %v6827_v24, %v6828_v42  ;;  %v6904_v53 = vsel %vm885_vm1, %v6826_v25, %v6827_v24  ;;  %14383 = vmatprep.mubr.bf16.mxu1 %v16369_v34  ;;  %14463 = vmatprep.mubr.bf16.mxu0 %v16369_v34  ;;  %v6832_v11 = vrot.slane %v14093_v27, 7 }
 0x402   : > { %v16801_v6 = vadd.f32 %v7192_v18, %v6904_v53  ;;  %v6659_v62 = vpop.f32.mrf.mxu1  ;;  %v7205_v47 = vpop.f32.mrf.mxu0  ;;  %v16803_v1 = vadd.f32 %v14169_v28, %v6903_v30 }
 0x403   : > { %v6830_v46 = vrot.slane %v6659_v62, 7  ;;  %v14919_v62 = vld [vmem:[#allocation6 + $0x428] sm:$0xff]  }
 0x404   : > { %v14094_v20 = vpop.f32.mrf.mxu1  ;;  %v14174_v39 = vpop.f32.mrf.mxu0 }
 0x406   : > { %v6662_v13 = vpop.f32.mrf.mxu1  ;;  %v7208_v19 = vpop.f32.mrf.mxu0 }
 0x407   : > { %v6831_v42 = vrot.slane %v6662_v13, 7 }
 0x408   : > { %v14097_v25 = vpop.f32.mrf.mxu1  ;;  %v14177_v24 = vpop.f32.mrf.mxu0  ;;  %14384 = vmatmul.mubr.bf16.vlgmr.msra.gmra.mxu1 %v16373_v7  ;;  %14464 = vmatmul.mubr.bf16.vlgmr.msra.gmra.mxu0 %v16373_v7  ;;  %v14912_v7 = vld [vmem:[#allocation6 + $0x3e8] sm:$0xff]  }
 0x409   : > { %v6899_v34 = vsel %vm885_vm1, %v6831_v42, %v6832_v11  ;;  %v6900_v18 = vsel %vm885_vm1, %v6830_v46, %v6831_v42  ;;  %14387 = vmatprep.mubr.bf16.mxu1 %v16388_v60  ;;  %14467 = vmatprep.mubr.bf16.mxu0 %v16388_v60  ;;  %v14920_v42 = vld [vmem:[#allocation6 + $0x420] sm:$0xff]  }
 0x40a   : > { %v16813_v27 = vadd.f32 %v7208_v19, %v6900_v18  ;;  %14528 = vmatpush3.bf16.msra.mxu1 %v16690_v61  ;;  %v6675_v28 = vpop.f32.mrf.mxu1  ;;  %v7221_v30 = vpop.f32.mrf.mxu0  ;;  %14608 = vmatpush3.bf16.msra.mxu0 %v16743_v37  ;;  %v16817_v53 = vadd.f32 %v14173_v22, %v6899_v34  ;;  %v6836_v19 = vrot.slane %v14097_v25, 7  ;;  %v14913_v61 = vld [vmem:[#allocation6 + $0x3e0] sm:$0xff]  }
 0x40b   : > { %14529 = vmatprep.subr.bf16.mxu1 %v14911_v45  ;;  %14609 = vmatprep.subr.bf16.mxu0 %v14918_v26  ;;  %v6834_v11 = vrot.slane %v6675_v28, 7  ;;  %v14914_v30 = vld [vmem:[#allocation6 + $0x3d8] sm:$0xff]  }
 0x40c   : > { %17865 = vst [vmem:[#allocation30_spill] sm:$0xff] %v16813_v27  ;;  %v14098_v47 = vpop.f32.mrf.mxu1  ;;  %v14178_v20 = vpop.f32.mrf.mxu0 }
 0x40d   : > { %v14922_v47 = vld [vmem:[#allocation6 + $0x418] sm:$0xff]  }
 0x40e   : > { %v6678_v39 = vpop.f32.mrf.mxu1  ;;  %v7224_v13 = vpop.f32.mrf.mxu0  ;;  %14530 = vmatpush3.bf16.msra.mxu1 %v14911_v45  ;;  %14610 = vmatpush3.bf16.msra.mxu0 %v14918_v26 }
 0x40f   : > { %v6835_v46 = vrot.slane %v6678_v39, 7  ;;  %14531 = vmatprep.subr.bf16.mxu1 %v14912_v7  ;;  %14611 = vmatprep.subr.bf16.mxu0 %v14919_v62 }
 0x410   : > { %v14101_v37 = vpop.f32.mrf.mxu1  ;;  %v14181_v22 = vpop.f32.mrf.mxu0  ;;  %14388 = vmatmul.mubr.bf16.gmra.mxu1 %v16392_v10  ;;  %14468 = vmatmul.mubr.bf16.gmra.mxu0 %v16392_v10 }
 0x411   : > { %v6895_v34 = vsel %vm885_vm1, %v6835_v46, %v6836_v19  ;;  %v6896_v45 = vsel %vm885_vm1, %v6834_v11, %v6835_v46  ;;  %14391 = vmatprep.mubr.bf16.mxu1 %v16407_v51  ;;  %14471 = vmatprep.mubr.bf16.mxu0 %v16407_v51  ;;  %v6840_v46 = vrot.slane %v14101_v37, 7 }
 0x412   : > { %v16827_v26 = vadd.f32 %v7224_v13, %v6896_v45  ;;  %v6691_v25 = vpop.f32.mrf.mxu1  ;;  %v7237_v18 = vpop.f32.mrf.mxu0  ;;  %14532 = vmatpush3.bf16.msra.mxu1 %v14912_v7  ;;  %14612 = vmatpush3.bf16.msra.mxu0 %v14919_v62  ;;  %v16829_v28 = vadd.f32 %v14177_v24, %v6895_v34  ;;  %v14915_v45 = vld [vmem:[#allocation6 + $0x3d0] sm:$0xff]  }
 0x413   : > { %14533 = vmatprep.subr.bf16.mxu1 %v14913_v61  ;;  %14613 = vmatprep.subr.bf16.mxu0 %v14920_v42  ;;  %v6838_v27 = vrot.slane %v6691_v25, 7  ;;  %v14923_v7 = vld [vmem:[#allocation6 + $0x410] sm:$0xff]  }
 0x414   : > { %17866 = vst [vmem:[#allocation31_spill] sm:$0xff] %v16827_v26  ;;  %v14102_v20 = vpop.f32.mrf.mxu1  ;;  %v14182_v39 = vpop.f32.mrf.mxu0 }
 0x415   : > { %v14916_v20 = vld [vmem:[#allocation6 + $0x3c8] sm:$0xff]  }
 0x416   : > { %v6694_v19 = vpop.f32.mrf.mxu1  ;;  %v7240_v11 = vpop.f32.mrf.mxu0  ;;  %14534 = vmatpush3.bf16.msra.mxu1 %v14913_v61  ;;  %14614 = vmatpush3.bf16.msra.mxu0 %v14920_v42  ;;  %v14924_v39 = vld [vmem:[#allocation6 + $0x408] sm:$0xff]  }
 0x417   : > { %v6839_v13 = vrot.slane %v6694_v19, 7  ;;  %14535 = vmatprep.subr.bf16.mxu1 %v14914_v30  ;;  %14615 = vmatprep.subr.bf16.mxu0 %v14922_v47 }
 0x418   : > { %v14105_v62 = vpop.f32.mrf.mxu1  ;;  %v14185_v24 = vpop.f32.mrf.mxu0  ;;  %14392 = vmatmul.mubr.bf16.gmra.mxu1 %v16411_v31  ;;  %14472 = vmatmul.mubr.bf16.gmra.mxu0 %v16411_v31 }
 0x419   : > { %v6891_v34 = vsel %vm885_vm1, %v6839_v13, %v6840_v46  ;;  %v6892_v61 = vsel %vm885_vm1, %v6838_v27, %v6839_v13  ;;  %14395 = vmatprep.mubr.bf16.mxu1 %v16426_v16  ;;  %14475 = vmatprep.mubr.bf16.mxu0 %v16426_v16  ;;  %v6844_v13 = vrot.slane %v14105_v62, 7 }
 0x41a   : > { %v16839_v42 = vadd.f32 %v7240_v11, %v6892_v61  ;;  %v6707_v37 = vpop.f32.mrf.mxu1  ;;  %v7253_v25 = vpop.f32.mrf.mxu0  ;;  %14536 = vmatpush3.bf16.msra.mxu1 %v14914_v30  ;;  %14616 = vmatpush3.bf16.msra.mxu0 %v14922_v47  ;;  %v16841_v18 = vadd.f32 %v14181_v22, %v6891_v34  ;;  %v14921_v61 = vld [vmem:[#allocation6 + $0x3c0] sm:$0xff]  }
 0x41b   : > { %14537 = vmatprep.subr.bf16.mxu1 %v14915_v45  ;;  %14617 = vmatprep.subr.bf16.mxu0 %v14923_v7  ;;  %v6842_v16 = vrot.slane %v6707_v37, 7  ;;  %v14925_v30 = vld [vmem:[#allocation6 + $0x400] sm:$0xff]   ;;  %v16855_v25 = vld [vmem:[#allocation6 + $0x478] sm:$0xff]  }
 0x41c   : > { %17867 = vst [vmem:[#allocation32_spill] sm:$0xff] %v16839_v42  ;;  %v14106_v19 = vpop.f32.mrf.mxu1  ;;  %v14186_v46 = vpop.f32.mrf.mxu0 }
 0x41e   : > { %v6710_v26 = vpop.f32.mrf.mxu1  ;;  %v7256_v27 = vpop.f32.mrf.mxu0  ;;  %14538 = vmatpush3.bf16.msra.mxu1 %v14915_v45  ;;  %14618 = vmatpush3.bf16.msra.mxu0 %v14923_v7 }
 0x41f   : > { %v6843_v11 = vrot.slane %v6710_v26, 7  ;;  %14539 = vmatprep.subr.bf16.mxu1 %v14916_v20  ;;  %14619 = vmatprep.subr.bf16.mxu0 %v14924_v39 }
 0x420   : > { %v14109_v47 = vpop.f32.mrf.mxu1  ;;  %v14189_v22 = vpop.f32.mrf.mxu0  ;;  %14396 = vmatmul.mubr.bf16.gmra.mxu1 %v16430_v58  ;;  %14476 = vmatmul.mubr.bf16.gmra.mxu0 %v16430_v58 }
 0x421   : > { %v6887_v34 = vsel %vm885_vm1, %v6843_v11, %v6844_v13  ;;  %v6888_v45 = vsel %vm885_vm1, %v6842_v16, %v6843_v11  ;;  %14399 = vmatprep.mubr.bf16.mxu1 %v16445_v5  ;;  %14479 = vmatprep.mubr.bf16.mxu0 %v16445_v5  ;;  %v6848_v11 = vrot.slane %v14109_v47, 7 }
 0x422   : > { %v16851_v26 = vadd.f32 %v7256_v27, %v6888_v45  ;;  %v6723_v7 = vpop.f32.mrf.mxu1  ;;  %v7269_v62 = vpop.f32.mrf.mxu0  ;;  %14540 = vmatpush3.bf16.msra.mxu1 %v14916_v20  ;;  %14620 = vmatpush3.bf16.msra.mxu0 %v14924_v39  ;;  %v16853_v37 = vadd.f32 %v14185_v24, %v6887_v34 }
 0x423   : > { %14541 = vmatprep.subr.bf16.mxu1 %v14921_v61  ;;  %14621 = vmatprep.subr.bf16.mxu0 %v14925_v30  ;;  %v6846_v42 = vrot.slane %v6723_v7, 7 }
 0x424   : > { %17868 = vst [vmem:[#allocation33_spill] sm:$0xff] %v16851_v26  ;;  %17869 = vst [vmem:[#allocation34_spill] sm:$0xff] %v16853_v37  ;;  %v14110_v19 = vpop.f32.mrf.mxu1  ;;  %v14190_v46 = vpop.f32.mrf.mxu0 }
 0x426   : > { %v6726_v13 = vpop.f32.mrf.mxu1  ;;  %v7272_v16 = vpop.f32.mrf.mxu0  ;;  %14542 = vmatpush3.bf16.msra.mxu1 %v14921_v61  ;;  %14622 = vmatpush3.bf16.msra.mxu0 %v14925_v30 }
 0x427   : > { %v6847_v27 = vrot.slane %v6726_v13, 7  ;;  %14687 = vmatprep.subr.bf16.mxu1 %v16855_v25 }
 0x428   : > { %v14113_v45 = vpop.f32.mrf.mxu1  ;;  %v14193_v20 = vpop.f32.mrf.mxu0  ;;  %14400 = vmatmul.mubr.bf16.gmra.mxu1 %v16449_v15  ;;  %14480 = vmatmul.mubr.bf16.gmra.mxu0 %v16449_v15 }
 0x429   : > { %v6883_v24 = vsel %vm885_vm1, %v6847_v27, %v6848_v11  ;;  %v6884_v39 = vsel %vm885_vm1, %v6846_v42, %v6847_v27  ;;  %14403 = vmatprep.mubr.bf16.mxu1 %v16464_v56  ;;  %14483 = vmatprep.mubr.bf16.mxu0 %v16464_v56  ;;  %v6852_v13 = vrot.slane %v14113_v45, 7 }
 0x42a   : > { %v16866_v61 = vadd.f32 %v7272_v16, %v6884_v39  ;;  %v6739_v30 = vpop.f32.mrf.mxu1  ;;  %v7285_v47 = vpop.f32.mrf.mxu0  ;;  %v16868_v34 = vadd.f32 %v14189_v22, %v6883_v24 }
 0x42b   : > { %v6850_v26 = vrot.slane %v6739_v30, 7 }
 0x42c   : > { %17870 = vst [vmem:[#allocation35_spill] sm:$0xff] %v16866_v61  ;;  %17871 = vst [vmem:[#allocation36_spill] sm:$0xff] %v16868_v34  ;;  %v14114_v7 = vpop.f32.mrf.mxu1  ;;  %v14194_v62 = vpop.f32.mrf.mxu0 }
 0x42e   : > { %v6742_v19 = vpop.f32.mrf.mxu1  ;;  %v7288_v46 = vpop.f32.mrf.mxu0 }
 0x42f   : > { %v6851_v11 = vrot.slane %v6742_v19, 7 }
 0x430   : > { %v14117_v37 = vpop.f32.mrf.mxu1  ;;  %v14197_v15 = vpop.f32.mrf.mxu0  ;;  %14404 = vmatmul.mubr.bf16.gmra.mxu1 %v16468_v14  ;;  %14484 = vmatmul.mubr.bf16.gmra.mxu0 %v16468_v14 }
 0x431   : > { %v6879_v42 = vsel %vm885_vm1, %v6851_v11, %v6852_v13  ;;  %v6880_v22 = vsel %vm885_vm1, %v6850_v26, %v6851_v11  ;;  %14407 = vmatprep.mubr.bf16.mxu1 %v16483_v48  ;;  %14487 = vmatprep.mubr.bf16.mxu0 %v16483_v48  ;;  %v6856_v62 = vrot.slane %v14117_v37, 7 }
 0x432   : > { %v16878_v16 = vadd.f32 %v7288_v46, %v6880_v22  ;;  %v6755_v27 = vpop.f32.mrf.mxu1  ;;  %v7301_v45 = vpop.f32.mrf.mxu0  ;;  %v16880_v24 = vadd.f32 %v14193_v20, %v6879_v42 }
 0x433   : > { %v6854_v19 = vrot.slane %v6755_v27, 7 }
 0x434   : > { %17872 = vst [vmem:[#allocation37_spill] sm:$0xff] %v16878_v16  ;;  %17873 = vst [vmem:[#allocation38_spill] sm:$0xff] %v16880_v24  ;;  %v14118_v39 = vpop.f32.mrf.mxu1  ;;  %v14198_v30 = vpop.f32.mrf.mxu0 }
 0x436   : > { %v6758_v47 = vpop.f32.mrf.mxu1  ;;  %v7304_v7 = vpop.f32.mrf.mxu0 }
 0x437   : > { %v6855_v13 = vrot.slane %v6758_v47, 7 }
 0x438   : > { %v14121_v61 = vpop.f32.mrf.mxu1  ;;  %v14201_v34 = vpop.f32.mrf.mxu0  ;;  %14408 = vmatmul.mubr.bf16.gmra.mxu1 %v16487_v2  ;;  %14488 = vmatmul.mubr.bf16.gmra.mxu0 %v16487_v2 }
 0x439   : > { %v6875_v26 = vsel %vm885_vm1, %v6855_v13, %v6856_v62  ;;  %v6876_v20 = vsel %vm885_vm1, %v6854_v19, %v6855_v13  ;;  %14411 = vmatprep.mubr.bf16.mxu1 %v16506_v9  ;;  %14491 = vmatprep.mubr.bf16.mxu0 %v16506_v9  ;;  %v6860_v30 = vrot.slane %v14121_v61, 7 }
 0x43a   : > { %v16890_v46 = vadd.f32 %v7304_v7, %v6876_v20  ;;  %v6771_v37 = vpop.f32.mrf.mxu1  ;;  %v7317_v11 = vpop.f32.mrf.mxu0  ;;  %v16892_v42 = vadd.f32 %v14197_v15, %v6875_v26 }
 0x43b   : > { %v6858_v47 = vrot.slane %v6771_v37, 7 }
 0x43c   : > { %17874 = vst [vmem:[#allocation39_spill] sm:$0xff] %v16890_v46  ;;  %17875 = vst [vmem:[#allocation40_spill] sm:$0xff] %v16892_v42  ;;  %v14122_v22 = vpop.f32.mrf.mxu1  ;;  %v14202_v27 = vpop.f32.mrf.mxu0 }
 0x43e   : > { %v6774_v45 = vpop.f32.mrf.mxu1  ;;  %v7320_v39 = vpop.f32.mrf.mxu0 }
 0x43f   : > { %v6859_v62 = vrot.slane %v6774_v45, 7 }
 0x440   : > { %v14125_v16 = vpop.f32.mrf.mxu1  ;;  %v14205_v24 = vpop.f32.mrf.mxu0  ;;  %14412 = vmatmul.mubr.bf16.gmra.mxu1 %v16512_v32  ;;  %14492 = vmatmul.mubr.bf16.gmra.mxu0 %v16512_v32 }
 0x441   : > { %v6871_v7 = vsel %vm885_vm1, %v6859_v62, %v6860_v30  ;;  %v6872_v15 = vsel %vm885_vm1, %v6858_v47, %v6859_v62  ;;  %14415 = vmatprep.mubr.bf16.mxu1 %v16527_v0  ;;  %14495 = vmatprep.mubr.bf16.mxu0 %v16527_v0  ;;  %v6864_v27 = vrot.slane %v14125_v16, 7 }
 0x442   : > { %v16902_v19 = vadd.f32 %v7320_v39, %v6872_v15  ;;  %v6787_v61 = vpop.f32.mrf.mxu1  ;;  %v7333_v13 = vpop.f32.mrf.mxu0  ;;  %v16904_v26 = vadd.f32 %v14201_v34, %v6871_v7  ;;  %v6802_v39 = vrot.slane %v16509_v54, 7  ;;  %v17877_v54 = vrot.slane %v16622_v57, 7 }
 0x443   : > { %v6862_v45 = vrot.slane %v6787_v61, 7 }
 0x444   : > { %v14126_v20 = vpop.f32.mrf.mxu1  ;;  %v14206_v37 = vpop.f32.mrf.mxu0 }
 0x445   : > { %v6928_v20 = vsel %vm885_vm1, %v6802_v39, %v17877_v54 }
 0x446   : > { %v6790_v11 = vpop.f32.mrf.mxu1  ;;  %v7336_v22 = vpop.f32.mrf.mxu0 }
 0x447   : > { %v6863_v30 = vrot.slane %v6790_v11, 7 }
 0x448   : > { %v14225_v46 = vpop.f32.mrf.mxu1  ;;  %v14305_v42 = vpop.f32.mrf.mxu0  ;;  %14416 = vmatmul.mubr.bf16.gmra.mxu1 %v16531_v40  ;;  %14496 = vmatmul.mubr.bf16.gmra.mxu0 %v16531_v40 }
 0x449   : > { %v6867_v47 = vsel %vm885_vm1, %v6863_v30, %v6864_v27  ;;  %v6868_v34 = vsel %vm885_vm1, %v6862_v45, %v6863_v30  ;;  %14419 = vmatprep.mubr.bf16.mxu1 %v16546_v49  ;;  %14499 = vmatprep.mubr.bf16.mxu0 %v16546_v49  ;;  %v7896_v37 = vrot.slane %v14225_v46, 1  ;;  %v8666_v30 = vrot.slane %v14305_v42, 7 }
 0x44a   : > { %v16915_v16 = vadd.f32 %v7336_v22, %v6868_v34  ;;  %v7639_v62 = vpop.f32.mrf.mxu1  ;;  %v8409_v7 = vpop.f32.mrf.mxu0  ;;  %v16917_v15 = vadd.f32 %v14205_v24, %v6867_v47  ;;  %v7413_v24 = vadd.f32 %v16713_v44, %v6928_v20 }
 0x44b   : > { %v8664_v47 = vrot.slane %v8409_v7, 7 }
 0x44c   : > { %17876 = vst [vmem:[#allocation41_spill] sm:$0xff] %v16915_v16  ;;  %v14226_v61 = vpop.f32.mrf.mxu1  ;;  %v14306_v13 = vpop.f32.mrf.mxu0 }
 0x44d   : > { %v7897_v11 = vrot.slane %v14226_v61, 1 }
 0x44e   : > { %v7642_v27 = vpop.f32.mrf.mxu1  ;;  %v8412_v45 = vpop.f32.mrf.mxu0 }
 0x44f   : > { %v8018_v22 = vsel %vm1978_vm2, %v7896_v37, %v7897_v11  ;;  %v7895_v34 = vrot.slane %v7642_v27, 1  ;;  %v8665_v62 = vrot.slane %v8412_v45, 7 }
 0x450   : > { %v14229_v16 = vpop.f32.mrf.mxu1  ;;  %v14309_v13 = vpop.f32.mrf.mxu0  ;;  %14420 = vmatmul.mubr.bf16.gmra.mxu1 %v16550_v8  ;;  %14500 = vmatmul.mubr.bf16.gmra.mxu0 %v16550_v8  ;;  %v8088_v57 = vadd.f32 %v8018_v22, %v16662_v63 }
 0x451   : > { %v8019_v46 = vsel %vm1978_vm2, %v7895_v34, %v7896_v37  ;;  %14423 = vmatprep.mubr.bf16.mxu1 %v16565_v33  ;;  %14503 = vmatprep.mubr.bf16.mxu0 %v16565_v33  ;;  %v8789_v42 = vsel %vm885_vm1, %v8665_v62, %v8666_v30  ;;  %v8790_v54 = vsel %vm885_vm1, %v8664_v47, %v8665_v62  ;;  %v7900_v37 = vrot.slane %v14229_v16, 1 }
 0x452   : > { %v7655_v44 = vpop.f32.mrf.mxu1  ;;  %v8425_v39 = vpop.f32.mrf.mxu0  ;;  %v16935_v7 = vadd.f32 %v8789_v42, %v8088_v57  ;;  %v8087_v61 = vadd.f32 %v8019_v46, %v7413_v24  ;;  %v8670_v34 = vrot.slane %v14309_v13, 7 }
 0x453   : > { %v8668_v57 = vrot.slane %v8425_v39, 7 }
 0x454   : > { %v14230_v20 = vpop.f32.mrf.mxu1  ;;  %v14310_v63 = vpop.f32.mrf.mxu0  ;;  %v16939_v11 = vadd.f32 %v8790_v54, %v8087_v61 }
 0x455   : > { %v7901_v27 = vrot.slane %v14230_v20, 1 }
 0x456   : > { %v7658_v45 = vpop.f32.mrf.mxu1  ;;  %v8428_v22 = vpop.f32.mrf.mxu0 }
 0x457   : > { %v8014_v30 = vsel %vm1978_vm2, %v7900_v37, %v7901_v27  ;;  %v7899_v44 = vrot.slane %v7658_v45, 1  ;;  %v8669_v33 = vrot.slane %v8428_v22, 7 }
 0x458   : > { %v14233_v42 = vpop.f32.mrf.mxu1  ;;  %v14313_v24 = vpop.f32.mrf.mxu0  ;;  %14424 = vmatmul.mubr.bf16.gmra.mxu1 %v16569_v55  ;;  %14504 = vmatmul.mubr.bf16.gmra.mxu0 %v16569_v55  ;;  %v8092_v62 = vadd.f32 %v8014_v30, %v16729_v3 }
 0x459   : > { %v8015_v16 = vsel %vm1978_vm2, %v7899_v44, %v7900_v37  ;;  %14427 = vmatprep.mubr.bf16.mxu1 %v16584_v38  ;;  %14507 = vmatprep.mubr.bf16.mxu0 %v16584_v38  ;;  %v8785_v47 = vsel %vm885_vm1, %v8669_v33, %v8670_v34  ;;  %v8786_v54 = vsel %vm885_vm1, %v8668_v57, %v8669_v33  ;;  %v7904_v37 = vrot.slane %v14233_v42, 1 }
 0x45a   : > { %v7671_v13 = vpop.f32.mrf.mxu1  ;;  %v8441_v46 = vpop.f32.mrf.mxu0  ;;  %v16952_v39 = vadd.f32 %v8785_v47, %v8092_v62  ;;  %v8091_v61 = vadd.f32 %v8015_v16, %v16727_v4  ;;  %v8674_v30 = vrot.slane %v14313_v24, 7 }
 0x45b   : > { %v8672_v47 = vrot.slane %v8441_v46, 7 }
 0x45c   : > { %v14234_v3 = vpop.f32.mrf.mxu1  ;;  %v14314_v20 = vpop.f32.mrf.mxu0  ;;  %v16957_v63 = vadd.f32 %v8786_v54, %v8091_v61  ;;  %v17878_v61 = vld [vmem:[#allocation26_spill] sm:$0xff] }
 0x45d   : > { %v7905_v27 = vrot.slane %v14234_v3, 1 }
 0x45e   : > { %v7674_v45 = vpop.f32.mrf.mxu1  ;;  %v8444_v22 = vpop.f32.mrf.mxu0 }
 0x45f   : > { %v8010_v34 = vsel %vm1978_vm2, %v7904_v37, %v7905_v27  ;;  %v7903_v44 = vrot.slane %v7674_v45, 1  ;;  %v8673_v62 = vrot.slane %v8444_v22, 7 }
 0x460   : > { %v14237_v13 = vpop.f32.mrf.mxu1  ;;  %v14317_v4 = vpop.f32.mrf.mxu0  ;;  %14428 = vmatmul.mubr.bf16.gmra.mxu1 %v16588_v29  ;;  %14508 = vmatmul.mubr.bf16.gmra.mxu0 %v16588_v29  ;;  %v8096_v33 = vadd.f32 %v8010_v34, %v16741_v23 }
 0x461   : > { %v8011_v57 = vsel %vm1978_vm2, %v7903_v44, %v7904_v37  ;;  %14431 = vmatprep.mubr.bf16.mxu1 %v16606_v12  ;;  %14511 = vmatprep.mubr.bf16.mxu0 %v16606_v12  ;;  %v8781_v42 = vsel %vm885_vm1, %v8673_v62, %v8674_v30  ;;  %v8782_v3 = vsel %vm885_vm1, %v8672_v47, %v8673_v62  ;;  %v7908_v37 = vrot.slane %v14237_v13, 1 }
 0x462   : > { %v7687_v24 = vpop.f32.mrf.mxu1  ;;  %v8457_v16 = vpop.f32.mrf.mxu0  ;;  %v16970_v46 = vadd.f32 %v8781_v42, %v8096_v33  ;;  %v8095_v54 = vadd.f32 %v8011_v57, %v17878_v61  ;;  %v8678_v44 = vrot.slane %v14317_v4, 7 }
 0x463   : > { %v8676_v42 = vrot.slane %v8457_v16, 7 }
 0x464   : > { %v14238_v23 = vpop.f32.mrf.mxu1  ;;  %v14318_v20 = vpop.f32.mrf.mxu0  ;;  %v16975_v27 = vadd.f32 %v8782_v3, %v8095_v54 }
 0x465   : > { %v7909_v45 = vrot.slane %v14238_v23, 1 }
 0x466   : > { %v7690_v22 = vpop.f32.mrf.mxu1  ;;  %v8460_v34 = vpop.f32.mrf.mxu0 }
 0x467   : > { %v8006_v30 = vsel %vm1978_vm2, %v7908_v37, %v7909_v45  ;;  %v7907_v24 = vrot.slane %v7690_v22, 1  ;;  %v8677_v33 = vrot.slane %v8460_v34, 7 }
 0x468   : > { %v14241_v12 = vpop.f32.mrf.mxu1  ;;  %v14321_v57 = vpop.f32.mrf.mxu0  ;;  %14432 = vmatmul.mubr.bf16.gmra.mxu1 %v16610_v35  ;;  %14512 = vmatmul.mubr.bf16.gmra.mxu0 %v16610_v35  ;;  %v8100_v62 = vadd.f32 %v8006_v30, %v16756_v41 }
 0x469   : > { %v8007_v47 = vsel %vm1978_vm2, %v7907_v24, %v7908_v37  ;;  %14435 = vmatprep.mubr.bf16.mxu1 %v16627_v36  ;;  %14515 = vmatprep.mubr.bf16.mxu0 %v16627_v36  ;;  %v8777_v13 = vsel %vm885_vm1, %v8677_v33, %v8678_v44  ;;  %v8778_v3 = vsel %vm885_vm1, %v8676_v42, %v8677_v33  ;;  %v7912_v37 = vrot.slane %v14241_v12, 1  ;;  %v17881_v33 = vld [vmem:[#allocation28_spill] sm:$0xff] }
 0x46a   : > { %v7703_v4 = vpop.f32.mrf.mxu1  ;;  %v8473_v16 = vpop.f32.mrf.mxu0  ;;  %v16988_v61 = vadd.f32 %v8777_v13, %v8100_v62  ;;  %v8099_v54 = vadd.f32 %v8007_v47, %v16753_v17  ;;  %v8682_v30 = vrot.slane %v14321_v57, 7  ;;  %v17880_v47 = vld [vmem:[#allocation11_spill] sm:$0xff] }
 0x46b   : > { %v8680_v13 = vrot.slane %v8473_v16, 7 }
 0x46c   : > { %v14242_v41 = vpop.f32.mrf.mxu1  ;;  %v14322_v23 = vpop.f32.mrf.mxu0  ;;  %v16993_v20 = vadd.f32 %v8778_v3, %v8099_v54  ;;  %v17882_v54 = vld [vmem:[#allocation12_spill] sm:$0xff] }
 0x46d   : > { %v7913_v45 = vrot.slane %v14242_v41, 1  ;;  %v17884_v23 = vld [vmem:[#allocation27_spill] sm:$0xff] }
 0x46e   : > { %17879 = vst [vmem:[#allocation26_spill] sm:$0xff] %v16993_v20  ;;  %v7706_v22 = vpop.f32.mrf.mxu1  ;;  %v8476_v34 = vpop.f32.mrf.mxu0 }
 0x46f   : > { %v8002_v44 = vsel %vm1978_vm2, %v7912_v37, %v7913_v45  ;;  %v7911_v24 = vrot.slane %v7706_v22, 1  ;;  %v8681_v62 = vrot.slane %v8476_v34, 7 }
 0x470   : > { %v14245_v4 = vpop.f32.mrf.mxu1  ;;  %v14325_v17 = vpop.f32.mrf.mxu0  ;;  %14436 = vmatmul.mubr.bf16.gmra.mxu1 %v17880_v47  ;;  %14516 = vmatmul.mubr.bf16.gmra.mxu0 %v17880_v47  ;;  %v8104_v42 = vadd.f32 %v8002_v44, %v17881_v33 }
 0x471   : > { %v8003_v12 = vsel %vm1978_vm2, %v7911_v24, %v7912_v37  ;;  %14439 = vmatprep.mubr.bf16.mxu1 %v17882_v54  ;;  %14519 = vmatprep.mubr.bf16.mxu0 %v17882_v54  ;;  %v8773_v57 = vsel %vm885_vm1, %v8681_v62, %v8682_v30  ;;  %v8774_v22 = vsel %vm885_vm1, %v8680_v13, %v8681_v62  ;;  %v7916_v37 = vrot.slane %v14245_v4, 1 }
 0x472   : > { %v7719_v3 = vpop.f32.mrf.mxu1  ;;  %v8489_v16 = vpop.f32.mrf.mxu0  ;;  %v17006_v41 = vadd.f32 %v8773_v57, %v8104_v42  ;;  %v8103_v45 = vadd.f32 %v8003_v12, %v17884_v23  ;;  %v8686_v20 = vrot.slane %v14325_v17, 7 }
 0x473   : > { %v8684_v57 = vrot.slane %v8489_v16, 7 }
 0x474   : > { %17883 = vst [vmem:[#allocation28_spill] sm:$0xff] %v17006_v41  ;;  %v14246_v34 = vpop.f32.mrf.mxu1  ;;  %v14326_v44 = vpop.f32.mrf.mxu0  ;;  %v17011_v33 = vadd.f32 %v8774_v22, %v8103_v45 }
 0x475   : > { %v7917_v24 = vrot.slane %v14246_v34, 1 }
 0x476   : > { %v7722_v47 = vpop.f32.mrf.mxu1  ;;  %v8492_v54 = vpop.f32.mrf.mxu0 }
 0x477   : > { %v7998_v30 = vsel %vm1978_vm2, %v7916_v37, %v7917_v24  ;;  %v7915_v3 = vrot.slane %v7722_v47, 1  ;;  %v8685_v42 = vrot.slane %v8492_v54, 7 }
 0x478   : > { %v14249_v41 = vpop.f32.mrf.mxu1  ;;  %v14329_v12 = vpop.f32.mrf.mxu0  ;;  %14440 = vmatmul.mubr.bf16.gmra.mxu1 %v16658_v21  ;;  %14520 = vmatmul.mubr.bf16.gmra.mxu0 %v16658_v21  ;;  %v8108_v62 = vadd.f32 %v7998_v30, %v16789_v59 }
 0x479   : > { %v7999_v13 = vsel %vm1978_vm2, %v7915_v3, %v7916_v37  ;;  %14443 = vmatprep.mubr.bf16.mxu1 %v16777_v50  ;;  %14523 = vmatprep.mubr.bf16.mxu0 %v16777_v50  ;;  %v8769_v4 = vsel %vm885_vm1, %v8685_v42, %v8686_v20  ;;  %v8770_v23 = vsel %vm885_vm1, %v8684_v57, %v8685_v42  ;;  %v7920_v34 = vrot.slane %v14249_v41, 1 }
 0x47a   : > { %v7735_v17 = vpop.f32.mrf.mxu1  ;;  %v8505_v47 = vpop.f32.mrf.mxu0  ;;  %v17024_v54 = vadd.f32 %v8769_v4, %v8108_v62  ;;  %v8107_v16 = vadd.f32 %v7999_v13, %v16787_v52  ;;  %v8690_v30 = vrot.slane %v14329_v12, 7  ;;  %v17885_v13 = vld [vmem:[#allocation29_spill] sm:$0xff] }
 0x47b   : > { %v8688_v4 = vrot.slane %v8505_v47, 7 }
 0x47c   : > { %v14250_v59 = vpop.f32.mrf.mxu1  ;;  %v14330_v45 = vpop.f32.mrf.mxu0  ;;  %v17029_v22 = vadd.f32 %v8770_v23, %v8107_v16 }
 0x47d   : > { %v7921_v44 = vrot.slane %v14250_v59, 1 }
 0x47e   : > { %v7738_v37 = vpop.f32.mrf.mxu1  ;;  %v8508_v24 = vpop.f32.mrf.mxu0 }
 0x47f   : > { %v7994_v20 = vsel %vm1978_vm2, %v7920_v34, %v7921_v44  ;;  %v7919_v3 = vrot.slane %v7738_v37, 1  ;;  %v8689_v62 = vrot.slane %v8508_v24, 7 }
 0x480   : > { %v14253_v17 = vpop.f32.mrf.mxu1  ;;  %v14333_v52 = vpop.f32.mrf.mxu0  ;;  %14444 = vmatmul.mubr.bf16.gmra.mxu1 %v17885_v13  ;;  %14524 = vmatmul.mubr.bf16.gmra.mxu0 %v17885_v13  ;;  %v8112_v42 = vadd.f32 %v7994_v20, %v16803_v1 }
 0x481   : > { %v7995_v41 = vsel %vm1978_vm2, %v7919_v3, %v7920_v34  ;;  %14543 = vmatprep.mubr.bf16.mxu1 %v16388_v60  ;;  %14623 = vmatprep.mubr.bf16.mxu0 %v16388_v60  ;;  %v8765_v57 = vsel %vm885_vm1, %v8689_v62, %v8690_v30  ;;  %v8766_v59 = vsel %vm885_vm1, %v8688_v4, %v8689_v62  ;;  %v7924_v34 = vrot.slane %v14253_v17, 1 }
 0x482   : > { %v7751_v12 = vpop.f32.mrf.mxu1  ;;  %v8521_v47 = vpop.f32.mrf.mxu0  ;;  %v17042_v16 = vadd.f32 %v8765_v57, %v8112_v42  ;;  %v8111_v23 = vadd.f32 %v7995_v41, %v16801_v6  ;;  %v8694_v3 = vrot.slane %v14333_v52, 7  ;;  %v14927_v57 = vld [vmem:[#allocation6 + $0x470] sm:$0xff]  }
 0x483   : > { %v8692_v60 = vrot.slane %v8521_v47, 7 }
 0x484   : > { %v14254_v1 = vpop.f32.mrf.mxu1  ;;  %v14334_v45 = vpop.f32.mrf.mxu0  ;;  %v17047_v44 = vadd.f32 %v8766_v59, %v8111_v23  ;;  %v17886_v59 = vld [vmem:[#allocation30_spill] sm:$0xff] }
 0x485   : > { %v7925_v37 = vrot.slane %v14254_v1, 1  ;;  %v14928_v45 = vld [vmem:[#allocation6 + $0x468] sm:$0xff]  }
 0x486   : > { %v7754_v24 = vpop.f32.mrf.mxu1  ;;  %v8524_v20 = vpop.f32.mrf.mxu0 }
 0x487   : > { %v7990_v30 = vsel %vm1978_vm2, %v7924_v34, %v7925_v37  ;;  %v7923_v12 = vrot.slane %v7754_v24, 1  ;;  %v8693_v42 = vrot.slane %v8524_v20, 7 }
 0x488   : > { %v14257_v6 = vpop.f32.mrf.mxu1  ;;  %v14337_v41 = vpop.f32.mrf.mxu0  ;;  %14544 = vmatmul.mubr.bf16.vlgmr.msra.gmra.mxu1 %v16392_v10  ;;  %14624 = vmatmul.mubr.bf16.vlgmr.msra.gmra.mxu0 %v16392_v10  ;;  %v8116_v62 = vadd.f32 %v7990_v30, %v16817_v53 }
 0x489   : > { %v7991_v4 = vsel %vm1978_vm2, %v7923_v12, %v7924_v34  ;;  %14547 = vmatprep.mubr.bf16.mxu1 %v16407_v51  ;;  %14627 = vmatprep.mubr.bf16.mxu0 %v16407_v51  ;;  %v8761_v17 = vsel %vm885_vm1, %v8693_v42, %v8694_v3  ;;  %v8762_v53 = vsel %vm885_vm1, %v8692_v60, %v8693_v42  ;;  %v7928_v20 = vrot.slane %v14257_v6, 1 }
 0x48a   : > { %14688 = vmatpush3.bf16.msra.mxu1 %v16855_v25  ;;  %v7767_v52 = vpop.f32.mrf.mxu1  ;;  %v8537_v47 = vpop.f32.mrf.mxu0  ;;  %v17061_v23 = vadd.f32 %v8761_v17, %v8116_v62  ;;  %v8115_v1 = vadd.f32 %v7991_v4, %v17886_v59  ;;  %v8698_v25 = vrot.slane %v14337_v41, 7  ;;  %v17887_v41 = vld [vmem:[#allocation15_spill] sm:$0xff] }
 0x48b   : > { %14689 = vmatprep.subr.bf16.mxu1 %v14927_v57  ;;  %v14929_v52 = vld [vmem:[#allocation6 + $0x460] sm:$0xff]   ;;  %v8696_v60 = vrot.slane %v8537_v47, 7 }
 0x48c   : > { %v14258_v34 = vpop.f32.mrf.mxu1  ;;  %v14338_v37 = vpop.f32.mrf.mxu0  ;;  %v17066_v24 = vadd.f32 %v8762_v53, %v8115_v1 }
 0x48d   : > { %v7929_v30 = vrot.slane %v14258_v34, 1  ;;  %v17888_v37 = vld [vmem:[#allocation31_spill] sm:$0xff] }
 0x48e   : > { %v7770_v3 = vpop.f32.mrf.mxu1  ;;  %v8540_v12 = vpop.f32.mrf.mxu0  ;;  %14690 = vmatpush3.bf16.msra.mxu1 %v14927_v57 }
 0x48f   : > { %v7986_v62 = vsel %vm1978_vm2, %v7928_v20, %v7929_v30  ;;  %v7927_v17 = vrot.slane %v7770_v3, 1  ;;  %v8697_v4 = vrot.slane %v8540_v12, 7  ;;  %14691 = vmatprep.subr.bf16.mxu1 %v14928_v45  ;;  %v14930_v3 = vld [vmem:[#allocation6 + $0x458] sm:$0xff]  }
 0x490   : > { %v14261_v42 = vpop.f32.mrf.mxu1  ;;  %v14341_v59 = vpop.f32.mrf.mxu0  ;;  %14548 = vmatmul.mubr.bf16.gmra.mxu1 %v16411_v31  ;;  %14628 = vmatmul.mubr.bf16.gmra.mxu0 %v16411_v31  ;;  %v8120_v6 = vadd.f32 %v7986_v62, %v16829_v28 }
 0x491   : > { %v7987_v57 = vsel %vm1978_vm2, %v7927_v17, %v7928_v20  ;;  %14551 = vmatprep.mubr.bf16.mxu1 %v17887_v41  ;;  %14631 = vmatprep.mubr.bf16.mxu0 %v17887_v41  ;;  %v8757_v1 = vsel %vm885_vm1, %v8697_v4, %v8698_v25  ;;  %v8758_v28 = vsel %vm885_vm1, %v8696_v60, %v8697_v4  ;;  %v7932_v17 = vrot.slane %v14261_v42, 1 }
 0x492   : > { %v7783_v53 = vpop.f32.mrf.mxu1  ;;  %v8553_v47 = vpop.f32.mrf.mxu0  ;;  %14692 = vmatpush3.bf16.msra.mxu1 %v14928_v45  ;;  %v17079_v34 = vadd.f32 %v8757_v1, %v8120_v6  ;;  %v8119_v30 = vadd.f32 %v7987_v57, %v17888_v37  ;;  %v14931_v1 = vld [vmem:[#allocation6 + $0x450] sm:$0xff]  }
 0x493   : > { %14693 = vmatprep.subr.bf16.mxu1 %v14929_v52  ;;  %v8702_v53 = vrot.slane %v14341_v59, 7  ;;  %v8700_v4 = vrot.slane %v8553_v47, 7 }
 0x494   : > { %v14262_v20 = vpop.f32.mrf.mxu1  ;;  %v14342_v12 = vpop.f32.mrf.mxu0  ;;  %v17084_v62 = vadd.f32 %v8758_v28, %v8119_v30  ;;  %v17889_v30 = vld [vmem:[#allocation32_spill] sm:$0xff] }
 0x495   : > { %v7933_v41 = vrot.slane %v14262_v20, 1  ;;  %v14932_v20 = vld [vmem:[#allocation6 + $0x448] sm:$0xff]  }
 0x496   : > { %v7786_v31 = vpop.f32.mrf.mxu1  ;;  %v8556_v25 = vpop.f32.mrf.mxu0  ;;  %14694 = vmatpush3.bf16.msra.mxu1 %v14929_v52 }
 0x497   : > { %v7982_v45 = vsel %vm1978_vm2, %v7932_v17, %v7933_v41  ;;  %v7931_v6 = vrot.slane %v7786_v31, 1  ;;  %v8701_v57 = vrot.slane %v8556_v25, 7  ;;  %14695 = vmatprep.subr.bf16.mxu1 %v14930_v3 }
 0x498   : > { %v14265_v60 = vpop.f32.mrf.mxu1  ;;  %v14345_v37 = vpop.f32.mrf.mxu0  ;;  %14552 = vmatmul.mubr.bf16.gmra.mxu1 %v16430_v58  ;;  %14632 = vmatmul.mubr.bf16.gmra.mxu0 %v16430_v58  ;;  %v8124_v42 = vadd.f32 %v7982_v45, %v16841_v18  ;;  %v17890_v58 = vld [vmem:[#allocation18_spill] sm:$0xff] }
 0x499   : > { %v7983_v52 = vsel %vm1978_vm2, %v7931_v6, %v7932_v17  ;;  %14555 = vmatprep.mubr.bf16.mxu1 %v16445_v5  ;;  %14635 = vmatprep.mubr.bf16.mxu0 %v16445_v5  ;;  %v8753_v31 = vsel %vm885_vm1, %v8701_v57, %v8702_v53  ;;  %v8754_v18 = vsel %vm885_vm1, %v8700_v4, %v8701_v57  ;;  %v7936_v45 = vrot.slane %v14265_v60, 1  ;;  %v17891_v60 = vld [vmem:[#allocation34_spill] sm:$0xff] }
 0x49a   : > { %v7799_v59 = vpop.f32.mrf.mxu1  ;;  %v8569_v41 = vpop.f32.mrf.mxu0  ;;  %14696 = vmatpush3.bf16.msra.mxu1 %v14930_v3  ;;  %v17097_v47 = vadd.f32 %v8753_v31, %v8124_v42  ;;  %v8123_v28 = vadd.f32 %v7983_v52, %v17889_v30  ;;  %v14933_v31 = vld [vmem:[#allocation6 + $0x440] sm:$0xff]  }
 0x49b   : > { %14697 = vmatprep.subr.bf16.mxu1 %v14931_v1  ;;  %v8706_v59 = vrot.slane %v14345_v37, 7  ;;  %v8704_v57 = vrot.slane %v8569_v41, 7 }
 0x49c   : > { %v14266_v12 = vpop.f32.mrf.mxu1  ;;  %v14346_v17 = vpop.f32.mrf.mxu0  ;;  %v17102_v25 = vadd.f32 %v8754_v18, %v8123_v28 }
 0x49d   : > { %v7937_v6 = vrot.slane %v14266_v12, 1  ;;  %v17892_v12 = vld [vmem:[#allocation33_spill] sm:$0xff] }
 0x49e   : > { %v7802_v5 = vpop.f32.mrf.mxu1  ;;  %v8572_v53 = vpop.f32.mrf.mxu0  ;;  %14698 = vmatpush3.bf16.msra.mxu1 %v14931_v1 }
 0x49f   : > { %v7978_v3 = vsel %vm1978_vm2, %v7936_v45, %v7937_v6  ;;  %v7935_v42 = vrot.slane %v7802_v5, 1  ;;  %v8705_v52 = vrot.slane %v8572_v53, 7  ;;  %14699 = vmatprep.subr.bf16.mxu1 %v14932_v20 }
 0x4a0   : > { %v14269_v4 = vpop.f32.mrf.mxu1  ;;  %v14349_v30 = vpop.f32.mrf.mxu0  ;;  %14556 = vmatmul.mubr.bf16.gmra.mxu1 %v17890_v58  ;;  %14636 = vmatmul.mubr.bf16.gmra.mxu0 %v17890_v58  ;;  %v8128_v28 = vadd.f32 %v7978_v3, %v17891_v60 }
 0x4a1   : > { %v7979_v1 = vsel %vm1978_vm2, %v7935_v42, %v7936_v45  ;;  %14559 = vmatprep.mubr.bf16.mxu1 %v16464_v56  ;;  %14639 = vmatprep.mubr.bf16.mxu0 %v16464_v56  ;;  %v8749_v5 = vsel %vm885_vm1, %v8705_v52, %v8706_v59  ;;  %v8750_v6 = vsel %vm885_vm1, %v8704_v57, %v8705_v52  ;;  %v7940_v42 = vrot.slane %v14269_v4, 1  ;;  %v17893_v52 = vld [vmem:[#allocation36_spill] sm:$0xff] }
 0x4a2   : > { %v7815_v37 = vpop.f32.mrf.mxu1  ;;  %v8585_v41 = vpop.f32.mrf.mxu0  ;;  %14700 = vmatpush3.bf16.msra.mxu1 %v14932_v20  ;;  %v17115_v18 = vadd.f32 %v8749_v5, %v8128_v28  ;;  %v8127_v17 = vadd.f32 %v7979_v1, %v17892_v12  ;;  %v8710_v59 = vrot.slane %v14349_v30, 7 }
 0x4a3   : > { %14701 = vmatprep.subr.bf16.mxu1 %v14933_v31  ;;  %v8708_v1 = vrot.slane %v8585_v41, 7  ;;  %v17894_v41 = vld [vmem:[#allocation35_spill] sm:$0xff] }
 0x4a4   : > { %v14270_v53 = vpop.f32.mrf.mxu1  ;;  %v14350_v45 = vpop.f32.mrf.mxu0  ;;  %v17120_v3 = vadd.f32 %v8750_v6, %v8127_v17 }
 0x4a5   : > { %v7941_v60 = vrot.slane %v14270_v53, 1 }
 0x4a6   : > { %v7818_v56 = vpop.f32.mrf.mxu1  ;;  %v8588_v58 = vpop.f32.mrf.mxu0  ;;  %14702 = vmatpush3.bf16.msra.mxu1 %v14933_v31 }
 0x4a7   : > { %v7974_v20 = vsel %vm1978_vm2, %v7940_v42, %v7941_v60  ;;  %v7939_v28 = vrot.slane %v7818_v56, 1  ;;  %v8709_v5 = vrot.slane %v8588_v58, 7 }
 0x4a8   : > { %v14273_v37 = vpop.f32.mrf.mxu1  ;;  %v14353_v12 = vpop.f32.mrf.mxu0  ;;  %14560 = vmatmul.mubr.bf16.gmra.mxu1 %v16468_v14  ;;  %14640 = vmatmul.mubr.bf16.gmra.mxu0 %v16468_v14  ;;  %v8132_v57 = vadd.f32 %v7974_v20, %v17893_v52 }
 0x4a9   : > { %v7975_v4 = vsel %vm1978_vm2, %v7939_v28, %v7940_v42  ;;  %14563 = vmatprep.mubr.bf16.mxu1 %v16483_v48  ;;  %14643 = vmatprep.mubr.bf16.mxu0 %v16483_v48  ;;  %v8745_v56 = vsel %vm885_vm1, %v8709_v5, %v8710_v59  ;;  %v8746_v6 = vsel %vm885_vm1, %v8708_v1, %v8709_v5  ;;  %v7944_v42 = vrot.slane %v14273_v37, 1  ;;  %v17895_v5 = vld [vmem:[#allocation38_spill] sm:$0xff] }
 0x4aa   : > { %v7831_v58 = vpop.f32.mrf.mxu1  ;;  %v8601_v31 = vpop.f32.mrf.mxu0  ;;  %v17133_v30 = vadd.f32 %v8745_v56, %v8132_v57  ;;  %v8131_v17 = vadd.f32 %v7975_v4, %v17894_v41  ;;  %v8714_v48 = vrot.slane %v14353_v12, 7 }
 0x4ab   : > { %v8712_v56 = vrot.slane %v8601_v31, 7 }
 0x4ac   : > { %v14274_v53 = vpop.f32.mrf.mxu1  ;;  %v14354_v45 = vpop.f32.mrf.mxu0  ;;  %v17138_v60 = vadd.f32 %v8746_v6, %v8131_v17  ;;  %v17896_v6 = vld [vmem:[#allocation37_spill] sm:$0xff] }
 0x4ad   : > { %v7945_v20 = vrot.slane %v14274_v53, 1 }
 0x4ae   : > { %v7834_v28 = vpop.f32.mrf.mxu1  ;;  %v8604_v52 = vpop.f32.mrf.mxu0 }
 0x4af   : > { %v7970_v59 = vsel %vm1978_vm2, %v7944_v42, %v7945_v20  ;;  %v7943_v58 = vrot.slane %v7834_v28, 1  ;;  %v8713_v57 = vrot.slane %v8604_v52, 7 }
 0x4b0   : > { %v14277_v14 = vpop.f32.mrf.mxu1  ;;  %v14357_v4 = vpop.f32.mrf.mxu0  ;;  %14564 = vmatmul.mubr.bf16.gmra.mxu1 %v16487_v2  ;;  %14644 = vmatmul.mubr.bf16.gmra.mxu0 %v16487_v2  ;;  %v8136_v1 = vadd.f32 %v7970_v59, %v17895_v5 }
 0x4b1   : > { %v7971_v37 = vsel %vm1978_vm2, %v7943_v58, %v7944_v42  ;;  %14567 = vmatprep.mubr.bf16.mxu1 %v16506_v9  ;;  %14647 = vmatprep.mubr.bf16.mxu0 %v16506_v9  ;;  %v8741_v12 = vsel %vm885_vm1, %v8713_v57, %v8714_v48  ;;  %v8742_v45 = vsel %vm885_vm1, %v8712_v56, %v8713_v57  ;;  %v7948_v42 = vrot.slane %v14277_v14, 1  ;;  %v17897_v57 = vld [vmem:[#allocation40_spill] sm:$0xff] }
 0x4b2   : > { %v7847_v41 = vpop.f32.mrf.mxu1  ;;  %v8617_v31 = vpop.f32.mrf.mxu0  ;;  %v17151_v17 = vadd.f32 %v8741_v12, %v8136_v1  ;;  %v8135_v53 = vadd.f32 %v7971_v37, %v17896_v6  ;;  %v8718_v9 = vrot.slane %v14357_v4, 7 }
 0x4b3   : > { %v8716_v12 = vrot.slane %v8617_v31, 7 }
 0x4b4   : > { %v14278_v20 = vpop.f32.mrf.mxu1  ;;  %v14358_v28 = vpop.f32.mrf.mxu0  ;;  %v17156_v52 = vadd.f32 %v8742_v45, %v8135_v53  ;;  %v17898_v45 = vld [vmem:[#allocation39_spill] sm:$0xff] }
 0x4b5   : > { %v7949_v59 = vrot.slane %v14278_v20, 1 }
 0x4b6   : > { %v7850_v58 = vpop.f32.mrf.mxu1  ;;  %v8620_v5 = vpop.f32.mrf.mxu0 }
 0x4b7   : > { %v7966_v48 = vsel %vm1978_vm2, %v7948_v42, %v7949_v59  ;;  %v7947_v41 = vrot.slane %v7850_v58, 1  ;;  %v8717_v1 = vrot.slane %v8620_v5, 7 }
 0x4b8   : > { %v14281_v2 = vpop.f32.mrf.mxu1  ;;  %v14361_v37 = vpop.f32.mrf.mxu0  ;;  %14568 = vmatmul.mubr.bf16.gmra.mxu1 %v16512_v32  ;;  %14648 = vmatmul.mubr.bf16.gmra.mxu0 %v16512_v32  ;;  %v8140_v56 = vadd.f32 %v7966_v48, %v17897_v57 }
 0x4b9   : > { %v7967_v14 = vsel %vm1978_vm2, %v7947_v41, %v7948_v42  ;;  %14571 = vmatprep.mubr.bf16.mxu1 %v16527_v0  ;;  %14651 = vmatprep.mubr.bf16.mxu0 %v16527_v0  ;;  %v8737_v4 = vsel %vm885_vm1, %v8717_v1, %v8718_v9  ;;  %v8738_v28 = vsel %vm885_vm1, %v8716_v12, %v8717_v1  ;;  %v7952_v42 = vrot.slane %v14281_v2, 1 }
 0x4ba   : > { %v7863_v6 = vpop.f32.mrf.mxu1  ;;  %v8633_v31 = vpop.f32.mrf.mxu0  ;;  %v17169_v53 = vadd.f32 %v8737_v4, %v8140_v56  ;;  %v8139_v20 = vadd.f32 %v7967_v14, %v17898_v45  ;;  %v8722_v0 = vrot.slane %v14361_v37, 7 }
 0x4bb   : > { %v8720_v4 = vrot.slane %v8633_v31, 7 }
 0x4bc   : > { %v14282_v59 = vpop.f32.mrf.mxu1  ;;  %v14362_v58 = vpop.f32.mrf.mxu0  ;;  %v17174_v5 = vadd.f32 %v8738_v28, %v8139_v20 }
 0x4bd   : > { %v7953_v48 = vrot.slane %v14282_v59, 1 }
 0x4be   : > { %v7866_v41 = vpop.f32.mrf.mxu1  ;;  %v8636_v57 = vpop.f32.mrf.mxu0 }
 0x4bf   : > { %v7962_v9 = vsel %vm1978_vm2, %v7952_v42, %v7953_v48  ;;  %v7951_v6 = vrot.slane %v7866_v41, 1  ;;  %v8721_v56 = vrot.slane %v8636_v57, 7 }
 0x4c0   : > { %v14285_v32 = vpop.f32.mrf.mxu1  ;;  %v14365_v14 = vpop.f32.mrf.mxu0  ;;  %14572 = vmatmul.mubr.bf16.gmra.mxu1 %v16531_v40  ;;  %14652 = vmatmul.mubr.bf16.gmra.mxu0 %v16531_v40  ;;  %v8144_v1 = vadd.f32 %v7962_v9, %v16904_v26 }
 0x4c1   : > { %v7963_v2 = vsel %vm1978_vm2, %v7951_v6, %v7952_v42  ;;  %14575 = vmatprep.mubr.bf16.mxu1 %v16546_v49  ;;  %14655 = vmatprep.mubr.bf16.mxu0 %v16546_v49  ;;  %v8733_v12 = vsel %vm885_vm1, %v8721_v56, %v8722_v0  ;;  %v8734_v28 = vsel %vm885_vm1, %v8720_v4, %v8721_v56  ;;  %v7956_v42 = vrot.slane %v14285_v32, 1 }
 0x4c2   : > { %v7879_v37 = vpop.f32.mrf.mxu1  ;;  %v8649_v31 = vpop.f32.mrf.mxu0  ;;  %v17187_v45 = vadd.f32 %v8733_v12, %v8144_v1  ;;  %v8143_v20 = vadd.f32 %v7963_v2, %v16902_v19  ;;  %v8726_v9 = vrot.slane %v14365_v14, 7  ;;  %v17899_v14 = vld [vmem:[#allocation9_spill] sm:$0xff] }
 0x4c3   : > { %v8724_v12 = vrot.slane %v8649_v31, 7 }
 0x4c4   : > { %v14286_v26 = vpop.f32.mrf.mxu1  ;;  %v14366_v59 = vpop.f32.mrf.mxu0  ;;  %v17192_v58 = vadd.f32 %v8734_v28, %v8143_v20 }
 0x4c5   : > { %v7957_v48 = vrot.slane %v14286_v26, 1  ;;  %v17900_v26 = vld [vmem:[#allocation41_spill] sm:$0xff] }
 0x4c6   : > { %v7882_v41 = vpop.f32.mrf.mxu1  ;;  %v8652_v57 = vpop.f32.mrf.mxu0 }
 0x4c7   : > { %v7958_v0 = vsel %vm1978_vm2, %v7956_v42, %v7957_v48  ;;  %v7955_v6 = vrot.slane %v7882_v41, 1  ;;  %v8725_v1 = vrot.slane %v8652_v57, 7 }
 0x4c8   : > { %v14385_v37 = vpop.f32.mrf.mxu1  ;;  %v14465_v19 = vpop.f32.mrf.mxu0  ;;  %14576 = vmatmul.mubr.bf16.gmra.mxu1 %v16550_v8  ;;  %14656 = vmatmul.mubr.bf16.gmra.mxu0 %v16550_v8  ;;  %v8148_v56 = vadd.f32 %v7958_v0, %v16917_v15 }
 0x4c9   : > { %v7959_v32 = vsel %vm1978_vm2, %v7955_v6, %v7956_v42  ;;  %v9404_v4 = vadd.f32 %v14385_v37, %v16935_v7  ;;  %14579 = vmatprep.mubr.bf16.mxu1 %v17899_v14  ;;  %14659 = vmatprep.mubr.bf16.mxu0 %v17899_v14  ;;  %v8729_v2 = vsel %vm885_vm1, %v8725_v1, %v8726_v9  ;;  %v9886_v7 = vrot.slane %v14465_v19, 1 }
 0x4ca   : > { %v9083_v31 = vpop.f32.mrf.mxu1  ;;  %v9629_v20 = vpop.f32.mrf.mxu0  ;;  %v17206_v28 = vadd.f32 %v8729_v2, %v8148_v56  ;;  %v8147_v59 = vadd.f32 %v7959_v32, %v17900_v26  ;;  %v8730_v15 = vsel %vm885_vm1, %v8724_v12, %v8725_v1 }
 0x4cc   : > { %v14386_v48 = vpop.f32.mrf.mxu1  ;;  %v14466_v42 = vpop.f32.mrf.mxu0  ;;  %v17211_v41 = vadd.f32 %v8730_v15, %v8147_v59 }
 0x4cd   : > { %v9887_v57 = vrot.slane %v14466_v42, 1 }
 0x4ce   : > { %v9086_v0 = vpop.f32.mrf.mxu1  ;;  %v9632_v6 = vpop.f32.mrf.mxu0 }
 0x4cf   : > { %v10008_v9 = vsel %vm1978_vm2, %v9886_v7, %v9887_v57  ;;  %v9403_v37 = vadd.f32 %v9086_v0, %v16939_v11  ;;  %v9885_v56 = vrot.slane %v9632_v6, 1 }
 0x4d0   : > { %v17216_v2 = vadd.f32 %v10008_v9, %v9404_v4  ;;  %v14389_v32 = vpop.f32.mrf.mxu1  ;;  %v14469_v31 = vpop.f32.mrf.mxu0  ;;  %14580 = vmatmul.mubr.bf16.gmra.mxu1 %v16569_v55  ;;  %14660 = vmatmul.mubr.bf16.gmra.mxu0 %v16569_v55 }
 0x4d1   : > { %v9408_v1 = vadd.f32 %v14389_v32, %v16952_v39  ;;  %14583 = vmatprep.mubr.bf16.mxu1 %v16584_v38  ;;  %14663 = vmatprep.mubr.bf16.mxu0 %v16584_v38  ;;  %v10009_v12 = vsel %vm1978_vm2, %v9885_v56, %v9886_v7  ;;  %v9890_v59 = vrot.slane %v14469_v31, 1  ;;  %v17901_v56 = vld [vmem:[#allocation10_spill] sm:$0xff] }
 0x4d2   : > { %v9099_v19 = vpop.f32.mrf.mxu1  ;;  %v9645_v11 = vpop.f32.mrf.mxu0  ;;  %v17225_v20 = vadd.f32 %v10009_v12, %v9403_v37 }
 0x4d4   : > { %v14390_v4 = vpop.f32.mrf.mxu1  ;;  %v14470_v26 = vpop.f32.mrf.mxu0 }
 0x4d5   : > { %v9891_v15 = vrot.slane %v14470_v26, 1 }
 0x4d6   : > { %v9102_v48 = vpop.f32.mrf.mxu1  ;;  %v9648_v42 = vpop.f32.mrf.mxu0 }
 0x4d7   : > { %v10004_v39 = vsel %vm1978_vm2, %v9890_v59, %v9891_v15  ;;  %v9407_v57 = vadd.f32 %v9102_v48, %v16957_v63  ;;  %v9889_v0 = vrot.slane %v9648_v42, 1 }
 0x4d8   : > { %v17230_v6 = vadd.f32 %v10004_v39, %v9408_v1  ;;  %v14393_v9 = vpop.f32.mrf.mxu1  ;;  %v14473_v7 = vpop.f32.mrf.mxu0  ;;  %14584 = vmatmul.mubr.bf16.gmra.mxu1 %v16588_v29  ;;  %14664 = vmatmul.mubr.bf16.gmra.mxu0 %v16588_v29 }
 0x4d9   : > { %v9412_v37 = vadd.f32 %v14393_v9, %v16970_v46  ;;  %14587 = vmatprep.mubr.bf16.mxu1 %v17901_v56  ;;  %14667 = vmatprep.mubr.bf16.mxu0 %v17901_v56  ;;  %v10005_v32 = vsel %vm1978_vm2, %v9889_v0, %v9890_v59  ;;  %v9894_v11 = vrot.slane %v14473_v7, 1 }
 0x4da   : > { %v9115_v31 = vpop.f32.mrf.mxu1  ;;  %v9661_v63 = vpop.f32.mrf.mxu0  ;;  %v17239_v12 = vadd.f32 %v10005_v32, %v9407_v57 }
 0x4dc   : > { %v14394_v1 = vpop.f32.mrf.mxu1  ;;  %v14474_v19 = vpop.f32.mrf.mxu0 }
 0x4dd   : > { %v9895_v4 = vrot.slane %v14474_v19, 1 }
 0x4de   : > { %v9118_v26 = vpop.f32.mrf.mxu1  ;;  %v9664_v15 = vpop.f32.mrf.mxu0 }
 0x4df   : > { %v10000_v46 = vsel %vm1978_vm2, %v9894_v11, %v9895_v4  ;;  %v9411_v48 = vadd.f32 %v9118_v26, %v16975_v27  ;;  %v9893_v42 = vrot.slane %v9664_v15, 1  ;;  %v17903_v26 = vld [vmem:[#allocation26_spill] sm:$0xff] }
 0x4e0   : > { %v17244_v39 = vadd.f32 %v10000_v46, %v9412_v37  ;;  %v14397_v9 = vpop.f32.mrf.mxu1  ;;  %v14477_v59 = vpop.f32.mrf.mxu0  ;;  %14588 = vmatmul.mubr.bf16.gmra.mxu1 %v16610_v35  ;;  %14668 = vmatmul.mubr.bf16.gmra.mxu0 %v16610_v35 }
 0x4e1   : > { %v9416_v57 = vadd.f32 %v14397_v9, %v16988_v61  ;;  %14591 = vmatprep.mubr.bf16.mxu1 %v16627_v36  ;;  %14671 = vmatprep.mubr.bf16.mxu0 %v16627_v36  ;;  %v10001_v0 = vsel %vm1978_vm2, %v9893_v42, %v9894_v11  ;;  %v9898_v63 = vrot.slane %v14477_v59, 1  ;;  %v17905_v42 = vld [vmem:[#allocation11_spill] sm:$0xff]  ;;  %v17907_v59 = vld [vmem:[#allocation12_spill] sm:$0xff] }
 0x4e2   : > { %17902 = vst [vmem:[#allocation27_spill] sm:$0xff] %v17244_v39  ;;  %v9131_v7 = vpop.f32.mrf.mxu1  ;;  %v9677_v27 = vpop.f32.mrf.mxu0  ;;  %v17253_v32 = vadd.f32 %v10001_v0, %v9411_v48  ;;  %v17906_v48 = vld [vmem:[#allocation28_spill] sm:$0xff] }
 0x4e4   : > { %v14398_v37 = vpop.f32.mrf.mxu1  ;;  %v14478_v31 = vpop.f32.mrf.mxu0 }
 0x4e5   : > { %v9899_v1 = vrot.slane %v14478_v31, 1 }
 0x4e6   : > { %v9134_v19 = vpop.f32.mrf.mxu1  ;;  %v9680_v4 = vpop.f32.mrf.mxu0 }
 0x4e7   : > { %v9996_v61 = vsel %vm1978_vm2, %v9898_v63, %v9899_v1  ;;  %v9415_v15 = vadd.f32 %v9134_v19, %v17903_v26  ;;  %v9897_v46 = vrot.slane %v9680_v4, 1 }
 0x4e8   : > { %v17258_v9 = vadd.f32 %v9996_v61, %v9416_v57  ;;  %v14401_v39 = vpop.f32.mrf.mxu1  ;;  %v14481_v11 = vpop.f32.mrf.mxu0  ;;  %14592 = vmatmul.mubr.bf16.gmra.mxu1 %v17905_v42  ;;  %14672 = vmatmul.mubr.bf16.gmra.mxu0 %v17905_v42 }
 0x4e9   : > { %v9420_v0 = vadd.f32 %v14401_v39, %v17906_v48  ;;  %14595 = vmatprep.mubr.bf16.mxu1 %v17907_v59  ;;  %14675 = vmatprep.mubr.bf16.mxu0 %v17907_v59  ;;  %v9997_v7 = vsel %vm1978_vm2, %v9897_v46, %v9898_v63  ;;  %v9902_v19 = vrot.slane %v14481_v11, 1 }
 0x4ea   : > { %17904 = vst [vmem:[#allocation29_spill] sm:$0xff] %v17258_v9  ;;  %v9147_v27 = vpop.f32.mrf.mxu1  ;;  %v9693_v37 = vpop.f32.mrf.mxu0  ;;  %v17267_v31 = vadd.f32 %v9997_v7, %v9415_v15 }
 0x4ec   : > { %v14402_v57 = vpop.f32.mrf.mxu1  ;;  %v14482_v1 = vpop.f32.mrf.mxu0 }
 0x4ed   : > { %v9903_v4 = vrot.slane %v14482_v1, 1 }
 0x4ee   : > { %v9150_v61 = vpop.f32.mrf.mxu1  ;;  %v9696_v26 = vpop.f32.mrf.mxu0 }
 0x4ef   : > { %v9992_v39 = vsel %vm1978_vm2, %v9902_v19, %v9903_v4  ;;  %v9419_v48 = vadd.f32 %v9150_v61, %v17011_v33  ;;  %v9901_v9 = vrot.slane %v9696_v26, 1 }
 0x4f0   : > { %v17272_v59 = vadd.f32 %v9992_v39, %v9420_v0  ;;  %v14405_v42 = vpop.f32.mrf.mxu1  ;;  %v14485_v63 = vpop.f32.mrf.mxu0  ;;  %14596 = vmatmul.mubr.bf16.gmra.mxu1 %v16658_v21  ;;  %14676 = vmatmul.mubr.bf16.gmra.mxu0 %v16658_v21 }
 0x4f1   : > { %v9993_v15 = vsel %vm1978_vm2, %v9901_v9, %v9902_v19  ;;  %v9424_v46 = vadd.f32 %v14405_v42, %v17024_v54  ;;  %14599 = vmatprep.mubr.bf16.mxu1 %v16777_v50  ;;  %14679 = vmatprep.mubr.bf16.mxu0 %v16777_v50  ;;  %v9906_v37 = vrot.slane %v14485_v63, 1  ;;  %v17908_v63 = vmov 0.0|0.0  }
 0x4f2   : > { %v9163_v11 = vpop.f32.mrf.mxu1  ;;  %v9709_v33 = vpop.f32.mrf.mxu0  ;;  %v17281_v7 = vadd.f32 %v9993_v15, %v9419_v48 }
 0x4f4   : > { %v14406_v0 = vpop.f32.mrf.mxu1  ;;  %v14486_v27 = vpop.f32.mrf.mxu0 }
 0x4f5   : > { %v9907_v57 = vrot.slane %v14486_v27, 1 }
 0x4f6   : > { %v9166_v1 = vpop.f32.mrf.mxu1  ;;  %v9712_v4 = vpop.f32.mrf.mxu0 }
 0x4f7   : > { %v9988_v61 = vsel %vm1978_vm2, %v9906_v37, %v9907_v57  ;;  %v9423_v9 = vadd.f32 %v9166_v1, %v17029_v22  ;;  %v9905_v54 = vrot.slane %v9712_v4, 1 }
 0x4f8   : > { %v17286_v42 = vadd.f32 %v9988_v61, %v9424_v46  ;;  %v14409_v19 = vpop.f32.mrf.mxu1  ;;  %v14489_v26 = vpop.f32.mrf.mxu0  ;;  %14600 = vmatmul.mubr.bf16.gmra.mxu1 %v17885_v13  ;;  %14680 = vmatmul.mubr.bf16.gmra.mxu0 %v17885_v13 }
 0x4f9   : > { %v9989_v39 = vsel %vm1978_vm2, %v9905_v54, %v9906_v37  ;;  %v9428_v48 = vadd.f32 %v14409_v19, %v17042_v16  ;;  %14603 = vmatprep.mubr.bf16.mxu1 %v17908_v63  ;;  %14683 = vmatprep.mubr.bf16.mxu0 %v17908_v63  ;;  %v9910_v0 = vrot.slane %v14489_v26, 1 }
 0x4fa   : > { %v9179_v15 = vpop.f32.mrf.mxu1  ;;  %v9725_v22 = vpop.f32.mrf.mxu0  ;;  %v17295_v11 = vadd.f32 %v9989_v39, %v9423_v9  ;;  %v17910_v39 = vld [vmem:[#allocation13_spill] sm:$0xff] }
 0x4fc   : > { %v14410_v46 = vpop.f32.mrf.mxu1  ;;  %v14490_v33 = vpop.f32.mrf.mxu0 }
 0x4fd   : > { %v9911_v27 = vrot.slane %v14490_v33, 1 }
 0x4fe   : > { %v9182_v57 = vpop.f32.mrf.mxu1  ;;  %v9728_v1 = vpop.f32.mrf.mxu0 }
 0x4ff   : > { %v9984_v4 = vsel %vm1978_vm2, %v9910_v0, %v9911_v27  ;;  %v9427_v37 = vadd.f32 %v9182_v57, %v17047_v44  ;;  %v9909_v16 = vrot.slane %v9728_v1, 1 }
 0x500   : > { %v17300_v61 = vadd.f32 %v9984_v4, %v9428_v48  ;;  %v14413_v54 = vpop.f32.mrf.mxu1  ;;  %v14493_v19 = vpop.f32.mrf.mxu0  ;;  %14604 = vmatmul.mubr.bf16.gmra.mxu1 %v17908_v63  ;;  %14684 = vmatmul.mubr.bf16.gmra.mxu0 %v17908_v63 }
 0x501   : > { %v9985_v9 = vsel %vm1978_vm2, %v9909_v16, %v9910_v0  ;;  %v9432_v26 = vadd.f32 %v14413_v54, %v17061_v23  ;;  %14703 = vmatprep.mubr.bf16.mxu1 %v17910_v39  ;;  %v9914_v33 = vrot.slane %v14493_v19, 1 }
 0x502   : > { %17909 = vst [vmem:[#allocation30_spill] sm:$0xff] %v17300_v61  ;;  %v9195_v15 = vpop.f32.mrf.mxu1  ;;  %v9741_v22 = vpop.f32.mrf.mxu0  ;;  %v17308_v46 = vadd.f32 %v9985_v9, %v9427_v37 }
 0x504   : > { %v14414_v44 = vpop.f32.mrf.mxu1  ;;  %v14494_v48 = vpop.f32.mrf.mxu0 }
 0x505   : > { %v9915_v27 = vrot.slane %v14494_v48, 1 }
 0x506   : > { %v9198_v57 = vpop.f32.mrf.mxu1  ;;  %v9744_v1 = vpop.f32.mrf.mxu0 }
 0x507   : > { %v9980_v4 = vsel %vm1978_vm2, %v9914_v33, %v9915_v27  ;;  %v9431_v61 = vadd.f32 %v9198_v57, %v17066_v24  ;;  %v9913_v0 = vrot.slane %v9744_v1, 1 }
 0x508   : > { %v17313_v16 = vadd.f32 %v9980_v4, %v9432_v26  ;;  %v14417_v23 = vpop.f32.mrf.mxu1  ;;  %v14497_v54 = vpop.f32.mrf.mxu0  ;;  %14704 = vmatmul.mubr.bf16.vlgmr.msra.gmra.mxu1 %v16392_v10  ;;  %v17911_v4 = vld [vmem:[#allocation14_spill] sm:$0xff] }
 0x509   : > { %v9981_v37 = vsel %vm1978_vm2, %v9913_v0, %v9914_v33  ;;  %v9436_v19 = vadd.f32 %v14417_v23, %v17079_v34  ;;  %14707 = vmatprep.mubr.bf16.mxu1 %v16407_v51  ;;  %v9918_v44 = vrot.slane %v14497_v54, 1  ;;  %v17912_v23 = vld [vmem:[#allocation15_spill] sm:$0xff] }
 0x50a   : > { %v9211_v9 = vpop.f32.mrf.mxu1  ;;  %v9757_v39 = vpop.f32.mrf.mxu0  ;;  %v17320_v15 = vadd.f32 %v9981_v37, %v9431_v61 }
 0x50c   : > { %v14418_v22 = vpop.f32.mrf.mxu1  ;;  %v14498_v24 = vpop.f32.mrf.mxu0 }
 0x50d   : > { %v9919_v26 = vrot.slane %v14498_v24, 1 }
 0x50e   : > { %v9214_v48 = vpop.f32.mrf.mxu1  ;;  %v9760_v27 = vpop.f32.mrf.mxu0 }
 0x50f   : > { %v9976_v10 = vsel %vm1978_vm2, %v9918_v44, %v9919_v26  ;;  %v9435_v57 = vadd.f32 %v9214_v48, %v17084_v62  ;;  %v9917_v33 = vrot.slane %v9760_v27, 1 }
 0x510   : > { %v17325_v1 = vadd.f32 %v9976_v10, %v9436_v19  ;;  %v14421_v34 = vpop.f32.mrf.mxu1  ;;  %v14501_v51 = vpop.f32.mrf.mxu0  ;;  %14708 = vmatmul.mubr.bf16.gmra.mxu1 %v17911_v4  ;;  %v17914_v4 = vld [vmem:[#allocation17_spill] sm:$0xff] }
 0x511   : > { %v9977_v61 = vsel %vm1978_vm2, %v9917_v33, %v9918_v44  ;;  %v9440_v0 = vadd.f32 %v14421_v34, %v17097_v47  ;;  %14711 = vmatprep.mubr.bf16.mxu1 %v17912_v23  ;;  %v9922_v22 = vrot.slane %v14501_v51, 1  ;;  %v17913_v34 = vld [vmem:[#allocation16_spill] sm:$0xff] }
 0x512   : > { %v9227_v54 = vpop.f32.mrf.mxu1  ;;  %v9773_v37 = vpop.f32.mrf.mxu0  ;;  %v17332_v9 = vadd.f32 %v9977_v61, %v9435_v57 }
 0x514   : > { %v14422_v39 = vpop.f32.mrf.mxu1  ;;  %v14502_v62 = vpop.f32.mrf.mxu0 }
 0x515   : > { %v9923_v19 = vrot.slane %v14502_v62, 1 }
 0x516   : > { %v9230_v24 = vpop.f32.mrf.mxu1  ;;  %v9776_v26 = vpop.f32.mrf.mxu0 }
 0x517   : > { %v9972_v48 = vsel %vm1978_vm2, %v9922_v22, %v9923_v19  ;;  %v9439_v27 = vadd.f32 %v9230_v24, %v17102_v25  ;;  %v9921_v44 = vrot.slane %v9776_v26, 1 }
 0x518   : > { %v17337_v10 = vadd.f32 %v9972_v48, %v9440_v0  ;;  %v14425_v47 = vpop.f32.mrf.mxu1  ;;  %v14505_v33 = vpop.f32.mrf.mxu0  ;;  %14712 = vmatmul.mubr.bf16.gmra.mxu1 %v17913_v34  ;;  %v17916_v34 = vld [vmem:[#allocation19_spill] sm:$0xff] }
 0x519   : > { %v9973_v57 = vsel %vm1978_vm2, %v9921_v44, %v9922_v22  ;;  %v9444_v51 = vadd.f32 %v14425_v47, %v17115_v18  ;;  %14715 = vmatprep.mubr.bf16.mxu1 %v17914_v4  ;;  %v9926_v39 = vrot.slane %v14505_v33, 1  ;;  %v17915_v47 = vld [vmem:[#allocation18_spill] sm:$0xff] }
 0x51a   : > { %v9243_v61 = vpop.f32.mrf.mxu1  ;;  %v9789_v23 = vpop.f32.mrf.mxu0  ;;  %v17344_v54 = vadd.f32 %v9973_v57, %v9439_v27 }
 0x51c   : > { %v14426_v37 = vpop.f32.mrf.mxu1  ;;  %v14506_v25 = vpop.f32.mrf.mxu0 }
 0x51d   : > { %v9927_v0 = vrot.slane %v14506_v25, 1 }
 0x51e   : > { %v9246_v62 = vpop.f32.mrf.mxu1  ;;  %v9792_v19 = vpop.f32.mrf.mxu0 }
 0x51f   : > { %v9968_v24 = vsel %vm1978_vm2, %v9926_v39, %v9927_v0  ;;  %v9443_v26 = vadd.f32 %v9246_v62, %v17120_v3  ;;  %v9925_v22 = vrot.slane %v9792_v19, 1 }
 0x520   : > { %v17349_v48 = vadd.f32 %v9968_v24, %v9444_v51  ;;  %v14429_v18 = vpop.f32.mrf.mxu1  ;;  %v14509_v44 = vpop.f32.mrf.mxu0  ;;  %14716 = vmatmul.mubr.bf16.gmra.mxu1 %v17915_v47  ;;  %v17918_v47 = vld [vmem:[#allocation21_spill] sm:$0xff] }
 0x521   : > { %v9969_v27 = vsel %vm1978_vm2, %v9925_v22, %v9926_v39  ;;  %v9448_v33 = vadd.f32 %v14429_v18, %v17133_v30  ;;  %14719 = vmatprep.mubr.bf16.mxu1 %v17916_v34  ;;  %v9930_v37 = vrot.slane %v14509_v44, 1  ;;  %v17917_v18 = vld [vmem:[#allocation20_spill] sm:$0xff] }
 0x522   : > { %v9259_v57 = vpop.f32.mrf.mxu1  ;;  %v9805_v4 = vpop.f32.mrf.mxu0  ;;  %v17356_v61 = vadd.f32 %v9969_v27, %v9443_v26 }
 0x524   : > { %v14430_v23 = vpop.f32.mrf.mxu1  ;;  %v14510_v3 = vpop.f32.mrf.mxu0 }
 0x525   : > { %v9931_v51 = vrot.slane %v14510_v3, 1 }
 0x526   : > { %v9262_v25 = vpop.f32.mrf.mxu1  ;;  %v9808_v0 = vpop.f32.mrf.mxu0 }
 0x527   : > { %v9964_v62 = vsel %vm1978_vm2, %v9930_v37, %v9931_v51  ;;  %v9447_v19 = vadd.f32 %v9262_v25, %v17138_v60  ;;  %v9929_v39 = vrot.slane %v9808_v0, 1 }
 0x528   : > { %v17361_v24 = vadd.f32 %v9964_v62, %v9448_v33  ;;  %v14433_v30 = vpop.f32.mrf.mxu1  ;;  %v14513_v22 = vpop.f32.mrf.mxu0  ;;  %14720 = vmatmul.mubr.bf16.gmra.mxu1 %v17917_v18  ;;  %v17920_v18 = vld [vmem:[#allocation23_spill] sm:$0xff] }
 0x529   : > { %v9965_v26 = vsel %vm1978_vm2, %v9929_v39, %v9930_v37  ;;  %v9452_v44 = vadd.f32 %v14433_v30, %v17151_v17  ;;  %14723 = vmatprep.mubr.bf16.mxu1 %v17918_v47  ;;  %v9934_v23 = vrot.slane %v14513_v22, 1  ;;  %v17919_v30 = vld [vmem:[#allocation22_spill] sm:$0xff] }
 0x52a   : > { %v9275_v27 = vpop.f32.mrf.mxu1  ;;  %v9821_v34 = vpop.f32.mrf.mxu0  ;;  %v17368_v57 = vadd.f32 %v9965_v26, %v9447_v19 }
 0x52c   : > { %v14434_v4 = vpop.f32.mrf.mxu1  ;;  %v14514_v60 = vpop.f32.mrf.mxu0 }
 0x52d   : > { %v9935_v33 = vrot.slane %v14514_v60, 1 }
 0x52e   : > { %v9278_v3 = vpop.f32.mrf.mxu1  ;;  %v9824_v51 = vpop.f32.mrf.mxu0 }
 0x52f   : > { %v9960_v25 = vsel %vm1978_vm2, %v9934_v23, %v9935_v33  ;;  %v9451_v0 = vadd.f32 %v9278_v3, %v17156_v52  ;;  %v9933_v37 = vrot.slane %v9824_v51, 1 }
 0x530   : > { %v17373_v62 = vadd.f32 %v9960_v25, %v9452_v44  ;;  %v14437_v17 = vpop.f32.mrf.mxu1  ;;  %v14517_v39 = vpop.f32.mrf.mxu0  ;;  %14724 = vmatmul.mubr.bf16.gmra.mxu1 %v17919_v30  ;;  %v17922_v30 = vld [vmem:[#allocation25_spill] sm:$0xff] }
 0x531   : > { %v9961_v19 = vsel %vm1978_vm2, %v9933_v37, %v9934_v23  ;;  %v9456_v22 = vadd.f32 %v14437_v17, %v17169_v53  ;;  %14727 = vmatprep.mubr.bf16.mxu1 %v17920_v18  ;;  %v9938_v4 = vrot.slane %v14517_v39, 1  ;;  %v17921_v17 = vld [vmem:[#allocation24_spill] sm:$0xff] }
 0x532   : > { %v9291_v26 = vpop.f32.mrf.mxu1  ;;  %v9837_v47 = vpop.f32.mrf.mxu0  ;;  %v17380_v27 = vadd.f32 %v9961_v19, %v9451_v0 }
 0x534   : > { %v14438_v34 = vpop.f32.mrf.mxu1  ;;  %v14518_v52 = vpop.f32.mrf.mxu0 }
 0x535   : > { %v9939_v44 = vrot.slane %v14518_v52, 1 }
 0x536   : > { %v9294_v60 = vpop.f32.mrf.mxu1  ;;  %v9840_v33 = vpop.f32.mrf.mxu0 }
 0x537   : > { %v9956_v3 = vsel %vm1978_vm2, %v9938_v4, %v9939_v44  ;;  %v9455_v51 = vadd.f32 %v9294_v60, %v17174_v5  ;;  %v9937_v23 = vrot.slane %v9840_v33, 1 }
 0x538   : > { %v17385_v25 = vadd.f32 %v9956_v3, %v9456_v22  ;;  %v14441_v53 = vpop.f32.mrf.mxu1  ;;  %v14521_v37 = vpop.f32.mrf.mxu0  ;;  %14728 = vmatmul.mubr.bf16.gmra.mxu1 %v17921_v17 }
 0x539   : > { %v9957_v0 = vsel %vm1978_vm2, %v9937_v23, %v9938_v4  ;;  %v9460_v39 = vadd.f32 %v14441_v53, %v17187_v45  ;;  %14731 = vmatprep.mubr.bf16.mxu1 %v17922_v30  ;;  %v9942_v34 = vrot.slane %v14521_v37, 1 }
 0x53a   : > { %v9307_v19 = vpop.f32.mrf.mxu1  ;;  %v9853_v18 = vpop.f32.mrf.mxu0  ;;  %v17392_v26 = vadd.f32 %v9957_v0, %v9455_v51 }
 0x53c   : > { %v14442_v47 = vpop.f32.mrf.mxu1  ;;  %v14522_v5 = vpop.f32.mrf.mxu0 }
 0x53d   : > { %v9943_v22 = vrot.slane %v14522_v5, 1 }
 0x53e   : > { %v9310_v52 = vpop.f32.mrf.mxu1  ;;  %v9856_v44 = vpop.f32.mrf.mxu0 }
 0x53f   : > { %v9952_v60 = vsel %vm1978_vm2, %v9942_v34, %v9943_v22  ;;  %v9459_v33 = vadd.f32 %v9310_v52, %v17192_v58  ;;  %v9941_v4 = vrot.slane %v9856_v44, 1 }
 0x540   : > { %v17397_v3 = vadd.f32 %v9952_v60, %v9460_v39  ;;  %v14445_v45 = vpop.f32.mrf.mxu1  ;;  %v14525_v23 = vpop.f32.mrf.mxu0  ;;  %14732 = vmatmul.mubr.bf16.gmra.mxu1 %v16531_v40 }
 0x541   : > { %v9953_v51 = vsel %vm1978_vm2, %v9941_v4, %v9942_v34  ;;  %v9464_v53 = vadd.f32 %v14445_v45, %v17206_v28  ;;  %14735 = vmatprep.mubr.bf16.mxu1 %v16546_v49  ;;  %v9946_v19 = vrot.slane %v14525_v23, 1 }
 0x542   : > { %v9323_v37 = vpop.f32.mrf.mxu1  ;;  %v9869_v17 = vpop.f32.mrf.mxu0  ;;  %v17404_v0 = vadd.f32 %v9953_v51, %v9459_v33 }
 0x544   : > { %v14446_v30 = vpop.f32.mrf.mxu1  ;;  %v14526_v58 = vpop.f32.mrf.mxu0 }
 0x545   : > { %v9947_v39 = vrot.slane %v14526_v58, 1 }
 0x546   : > { %v9326_v18 = vpop.f32.mrf.mxu1  ;;  %v9872_v47 = vpop.f32.mrf.mxu0 }
 0x547   : > { %v9948_v40 = vsel %vm1978_vm2, %v9946_v19, %v9947_v39  ;;  %v9463_v5 = vadd.f32 %v9326_v18, %v17211_v41  ;;  %v9945_v34 = vrot.slane %v9872_v47, 1 }
 0x548   : > { %v17409_v22 = vadd.f32 %v9948_v40, %v9464_v53  ;;  %v14545_v28 = vpop.f32.mrf.mxu1  ;;  %v14625_v49 = vpop.f32.mrf.mxu0  ;;  %14736 = vmatmul.mubr.bf16.gmra.mxu1 %v16550_v8 }
 0x549   : > { %v9949_v52 = vsel %vm1978_vm2, %v9945_v34, %v9946_v19  ;;  %14739 = vmatprep.mubr.bf16.mxu1 %v17899_v14  ;;  %v10657_v51 = vrot.slane %v14545_v28, 7 }
 0x54a   : > { %v10400_v44 = vpop.f32.mrf.mxu1  ;;  %v11074_v60 = vpop.f32.mrf.mxu0  ;;  %v17415_v33 = vadd.f32 %v9949_v52, %v9463_v5 }
 0x54b   : > { %v10655_v53 = vrot.slane %v10400_v44, 7 }
 0x54c   : > { %v14546_v4 = vpop.f32.mrf.mxu1  ;;  %v14626_v45 = vpop.f32.mrf.mxu0 }
 0x54e   : > { %v10403_v23 = vpop.f32.mrf.mxu1  ;;  %v11077_v41 = vpop.f32.mrf.mxu0 }
 0x54f   : > { %v10656_v37 = vrot.slane %v10403_v23, 7 }
 0x550   : > { %v14549_v17 = vpop.f32.mrf.mxu1  ;;  %v14629_v30 = vpop.f32.mrf.mxu0  ;;  %14740 = vmatmul.mubr.bf16.gmra.mxu1 %v16569_v55 }
 0x551   : > { %v10780_v8 = vsel %vm885_vm1, %v10656_v37, %v10657_v51  ;;  %v10781_v14 = vsel %vm885_vm1, %v10655_v53, %v10656_v37  ;;  %14743 = vmatprep.mubr.bf16.mxu1 %v16584_v38  ;;  %v10661_v52 = vrot.slane %v14549_v17, 7 }
 0x552   : > { %v10849_v58 = vadd.f32 %v10780_v8, %v17216_v2  ;;  %v10848_v19 = vadd.f32 %v10781_v14, %v17225_v20  ;;  %v10416_v39 = vpop.f32.mrf.mxu1  ;;  %v11090_v18 = vpop.f32.mrf.mxu0 }
 0x553   : > { %v10659_v44 = vrot.slane %v10416_v39, 7 }
 0x554   : > { %v17425_v47 = vadd.f32 %v11077_v41, %v10848_v19  ;;  %v14550_v40 = vpop.f32.mrf.mxu1  ;;  %v14630_v5 = vpop.f32.mrf.mxu0  ;;  %v17427_v34 = vadd.f32 %v14625_v49, %v10849_v58 }
 0x556   : > { %v10419_v55 = vpop.f32.mrf.mxu1  ;;  %v11093_v28 = vpop.f32.mrf.mxu0 }
 0x557   : > { %v10660_v60 = vrot.slane %v10419_v55, 7 }
 0x558   : > { %v14553_v4 = vpop.f32.mrf.mxu1  ;;  %v14633_v45 = vpop.f32.mrf.mxu0  ;;  %14744 = vmatmul.mubr.bf16.gmra.mxu1 %v16588_v29 }
 0x559   : > { %v10776_v38 = vsel %vm885_vm1, %v10660_v60, %v10661_v52  ;;  %v10777_v2 = vsel %vm885_vm1, %v10659_v44, %v10660_v60  ;;  %14747 = vmatprep.mubr.bf16.mxu1 %v17901_v56  ;;  %v10665_v14 = vrot.slane %v14553_v4, 7 }
 0x55a   : > { %v10853_v20 = vadd.f32 %v10776_v38, %v17230_v6  ;;  %v10852_v49 = vadd.f32 %v10777_v2, %v17239_v12  ;;  %v10432_v23 = vpop.f32.mrf.mxu1  ;;  %v11106_v41 = vpop.f32.mrf.mxu0  ;;  %v17923_v12 = vld [vmem:[#allocation27_spill] sm:$0xff] }
 0x55b   : > { %v10663_v58 = vrot.slane %v10432_v23, 7 }
 0x55c   : > { %v17437_v51 = vadd.f32 %v11093_v28, %v10852_v49  ;;  %v14554_v53 = vpop.f32.mrf.mxu1  ;;  %v14634_v37 = vpop.f32.mrf.mxu0  ;;  %v17439_v17 = vadd.f32 %v14629_v30, %v10853_v20 }
 0x55d   : > { %v17925_v53 = vld [vmem:[#allocation12_spill] sm:$0xff]  ;;  %v17926_v37 = vld [vmem:[#allocation29_spill] sm:$0xff] }
 0x55e   : > { %v10435_v29 = vpop.f32.mrf.mxu1  ;;  %v11109_v8 = vpop.f32.mrf.mxu0 }
 0x55f   : > { %v10664_v19 = vrot.slane %v10435_v29, 7 }
 0x560   : > { %v14557_v39 = vpop.f32.mrf.mxu1  ;;  %v14637_v18 = vpop.f32.mrf.mxu0  ;;  %14748 = vmatmul.mubr.bf16.gmra.mxu1 %v16610_v35 }
 0x561   : > { %v10772_v6 = vsel %vm885_vm1, %v10664_v19, %v10665_v14  ;;  %v10773_v56 = vsel %vm885_vm1, %v10663_v58, %v10664_v19  ;;  %14751 = vmatprep.mubr.bf16.mxu1 %v16627_v36  ;;  %v10669_v38 = vrot.slane %v14557_v39, 7  ;;  %v17924_v36 = vld [vmem:[#allocation11_spill] sm:$0xff] }
 0x562   : > { %v10857_v30 = vadd.f32 %v10772_v6, %v17923_v12  ;;  %v10856_v40 = vadd.f32 %v10773_v56, %v17253_v32  ;;  %v10448_v5 = vpop.f32.mrf.mxu1  ;;  %v11122_v55 = vpop.f32.mrf.mxu0 }
 0x563   : > { %v10667_v2 = vrot.slane %v10448_v5, 7 }
 0x564   : > { %v17449_v28 = vadd.f32 %v11109_v8, %v10856_v40  ;;  %v14558_v52 = vpop.f32.mrf.mxu1  ;;  %v14638_v44 = vpop.f32.mrf.mxu0  ;;  %v17451_v60 = vadd.f32 %v14633_v45, %v10857_v30 }
 0x566   : > { %v10451_v35 = vpop.f32.mrf.mxu1  ;;  %v11125_v4 = vpop.f32.mrf.mxu0 }
 0x567   : > { %v10668_v20 = vrot.slane %v10451_v35, 7 }
 0x568   : > { %v14561_v49 = vpop.f32.mrf.mxu1  ;;  %v14641_v23 = vpop.f32.mrf.mxu0  ;;  %14752 = vmatmul.mubr.bf16.gmra.mxu1 %v17924_v36 }
 0x569   : > { %v10768_v32 = vsel %vm885_vm1, %v10668_v20, %v10669_v38  ;;  %v10769_v41 = vsel %vm885_vm1, %v10667_v2, %v10668_v20  ;;  %14755 = vmatprep.mubr.bf16.mxu1 %v17925_v53  ;;  %v10673_v30 = vrot.slane %v14561_v49, 7 }
 0x56a   : > { %v10861_v45 = vadd.f32 %v10768_v32, %v17926_v37  ;;  %v10860_v29 = vadd.f32 %v10769_v41, %v17267_v31  ;;  %v10464_v8 = vpop.f32.mrf.mxu1  ;;  %v11138_v14 = vpop.f32.mrf.mxu0 }
 0x56b   : > { %v10671_v40 = vrot.slane %v10464_v8, 7 }
 0x56c   : > { %v17461_v58 = vadd.f32 %v11125_v4, %v10860_v29  ;;  %v14562_v19 = vpop.f32.mrf.mxu1  ;;  %v14642_v39 = vpop.f32.mrf.mxu0  ;;  %v17463_v6 = vadd.f32 %v14637_v18, %v10861_v45 }
 0x56e   : > { %v10467_v56 = vpop.f32.mrf.mxu1  ;;  %v11141_v12 = vpop.f32.mrf.mxu0 }
 0x56f   : > { %v10672_v5 = vrot.slane %v10467_v56, 7 }
 0x570   : > { %v14565_v55 = vpop.f32.mrf.mxu1  ;;  %v14645_v52 = vpop.f32.mrf.mxu0  ;;  %14756 = vmatmul.mubr.bf16.gmra.mxu1 %v16658_v21 }
 0x571   : > { %v10764_v31 = vsel %vm885_vm1, %v10672_v5, %v10673_v30  ;;  %v10765_v44 = vsel %vm885_vm1, %v10671_v40, %v10672_v5  ;;  %14759 = vmatprep.mubr.bf16.mxu1 %v16777_v50  ;;  %v10677_v41 = vrot.slane %v14565_v55, 7 }
 0x572   : > { %v10865_v18 = vadd.f32 %v10764_v31, %v17272_v59  ;;  %v10864_v35 = vadd.f32 %v10765_v44, %v17281_v7  ;;  %v10480_v4 = vpop.f32.mrf.mxu1  ;;  %v11154_v38 = vpop.f32.mrf.mxu0 }
 0x573   : > { %v10675_v53 = vrot.slane %v10480_v4, 7 }
 0x574   : > { %v17473_v2 = vadd.f32 %v11141_v12, %v10864_v35  ;;  %v14566_v20 = vpop.f32.mrf.mxu1  ;;  %v14646_v49 = vpop.f32.mrf.mxu0  ;;  %v17475_v36 = vadd.f32 %v14641_v23, %v10865_v18  ;;  %v17927_v18 = vld [vmem:[#allocation30_spill] sm:$0xff] }
 0x576   : > { %v10483_v21 = vpop.f32.mrf.mxu1  ;;  %v11157_v32 = vpop.f32.mrf.mxu0 }
 0x577   : > { %v10676_v37 = vrot.slane %v10483_v21, 7 }
 0x578   : > { %v14569_v45 = vpop.f32.mrf.mxu1  ;;  %v14649_v29 = vpop.f32.mrf.mxu0  ;;  %14760 = vmatmul.mubr.bf16.gmra.mxu1 %v17885_v13 }
 0x579   : > { %v10760_v50 = vsel %vm885_vm1, %v10676_v37, %v10677_v41  ;;  %v10761_v59 = vsel %vm885_vm1, %v10675_v53, %v10676_v37  ;;  %14763 = vmatprep.mubr.bf16.mxu1 %v17908_v63  ;;  %v10681_v40 = vrot.slane %v14569_v45, 7 }
 0x57a   : > { %v10869_v7 = vadd.f32 %v10760_v50, %v17286_v42  ;;  %v10868_v23 = vadd.f32 %v10761_v59, %v17295_v11  ;;  %v10496_v8 = vpop.f32.mrf.mxu1  ;;  %v11170_v14 = vpop.f32.mrf.mxu0 }
 0x57b   : > { %v10679_v5 = vrot.slane %v10496_v8, 7 }
 0x57c   : > { %v17485_v19 = vadd.f32 %v11157_v32, %v10868_v23  ;;  %v14570_v39 = vpop.f32.mrf.mxu1  ;;  %v14650_v56 = vpop.f32.mrf.mxu0  ;;  %v17487_v12 = vadd.f32 %v14645_v52, %v10869_v7 }
 0x57e   : > { %v10499_v13 = vpop.f32.mrf.mxu1  ;;  %v11173_v30 = vpop.f32.mrf.mxu0 }
 0x57f   : > { %v10680_v55 = vrot.slane %v10499_v13, 7 }
 0x580   : > { %v14573_v31 = vpop.f32.mrf.mxu1  ;;  %v14653_v44 = vpop.f32.mrf.mxu0  ;;  %14764 = vmatmul.mubr.bf16.gmra.mxu1 %v17908_v63 }
 0x581   : > { %v10756_v42 = vsel %vm885_vm1, %v10680_v55, %v10681_v40  ;;  %v10757_v11 = vsel %vm885_vm1, %v10679_v5, %v10680_v55  ;;  %v10685_v53 = vrot.slane %v14573_v31, 7 }
 0x582   : > { %v10873_v35 = vadd.f32 %v10756_v42, %v17927_v18  ;;  %v10872_v52 = vadd.f32 %v10757_v11, %v17308_v46  ;;  %v10512_v4 = vpop.f32.mrf.mxu1  ;;  %v11186_v38 = vpop.f32.mrf.mxu0 }
 0x583   : > { %v10683_v37 = vrot.slane %v10512_v4, 7 }
 0x584   : > { %v17496_v20 = vadd.f32 %v11173_v30, %v10872_v52  ;;  %v14574_v49 = vpop.f32.mrf.mxu1  ;;  %v14654_v21 = vpop.f32.mrf.mxu0  ;;  %v17498_v32 = vadd.f32 %v14649_v29, %v10873_v35 }
 0x586   : > { %v10515_v41 = vpop.f32.mrf.mxu1  ;;  %v11189_v63 = vpop.f32.mrf.mxu0 }
 0x587   : > { %v10684_v45 = vrot.slane %v10515_v41, 7 }
 0x588   : > { %v14577_v50 = vpop.f32.mrf.mxu1  ;;  %v14657_v59 = vpop.f32.mrf.mxu0 }
 0x589   : > { %v10752_v7 = vsel %vm885_vm1, %v10684_v45, %v10685_v53  ;;  %v10753_v46 = vsel %vm885_vm1, %v10683_v37, %v10684_v45  ;;  %v10689_v55 = vrot.slane %v14577_v50, 7 }
 0x58a   : > { %v10877_v23 = vadd.f32 %v10752_v7, %v17313_v16  ;;  %v10876_v8 = vadd.f32 %v10753_v46, %v17320_v15  ;;  %v10528_v14 = vpop.f32.mrf.mxu1  ;;  %v11202_v29 = vpop.f32.mrf.mxu0 }
 0x58b   : > { %v10687_v31 = vrot.slane %v10528_v14, 7 }
 0x58c   : > { %v17506_v39 = vadd.f32 %v11189_v63, %v10876_v8  ;;  %v14578_v56 = vpop.f32.mrf.mxu1  ;;  %v14658_v13 = vpop.f32.mrf.mxu0  ;;  %v17508_v30 = vadd.f32 %v14653_v44, %v10877_v23 }
 0x58e   : > { %v10531_v40 = vpop.f32.mrf.mxu1  ;;  %v11205_v5 = vpop.f32.mrf.mxu0 }
 0x58f   : > { %v10688_v42 = vrot.slane %v10531_v40, 7 }
 0x590   : > { %v14581_v11 = vpop.f32.mrf.mxu1  ;;  %v14661_v18 = vpop.f32.mrf.mxu0 }
 0x591   : > { %v10748_v16 = vsel %vm885_vm1, %v10688_v42, %v10689_v55  ;;  %v10749_v15 = vsel %vm885_vm1, %v10687_v31, %v10688_v42  ;;  %v10693_v37 = vrot.slane %v14581_v11, 7 }
 0x592   : > { %v10881_v35 = vadd.f32 %v10748_v16, %v17325_v1  ;;  %v10880_v52 = vadd.f32 %v10749_v15, %v17332_v9  ;;  %v10544_v4 = vpop.f32.mrf.mxu1  ;;  %v11218_v44 = vpop.f32.mrf.mxu0 }
 0x593   : > { %v10691_v45 = vrot.slane %v10544_v4, 7 }
 0x594   : > { %v17516_v38 = vadd.f32 %v11205_v5, %v10880_v52  ;;  %v14582_v49 = vpop.f32.mrf.mxu1  ;;  %v14662_v21 = vpop.f32.mrf.mxu0  ;;  %v17518_v41 = vadd.f32 %v14657_v59, %v10881_v35 }
 0x596   : > { %v10547_v63 = vpop.f32.mrf.mxu1  ;;  %v11221_v53 = vpop.f32.mrf.mxu0 }
 0x597   : > { %v10692_v50 = vrot.slane %v10547_v63, 7 }
 0x598   : > { %v14585_v7 = vpop.f32.mrf.mxu1  ;;  %v14665_v46 = vpop.f32.mrf.mxu0 }
 0x599   : > { %v10744_v1 = vsel %vm885_vm1, %v10692_v50, %v10693_v37  ;;  %v10745_v9 = vsel %vm885_vm1, %v10691_v45, %v10692_v50  ;;  %v10697_v31 = vrot.slane %v14585_v7, 7 }
 0x59a   : > { %v10885_v23 = vadd.f32 %v10744_v1, %v17337_v10  ;;  %v10884_v8 = vadd.f32 %v10745_v9, %v17344_v54  ;;  %v10560_v14 = vpop.f32.mrf.mxu1  ;;  %v11234_v59 = vpop.f32.mrf.mxu0 }
 0x59b   : > { %v10695_v42 = vrot.slane %v10560_v14, 7 }
 0x59c   : > { %v17526_v29 = vadd.f32 %v11221_v53, %v10884_v8  ;;  %v14586_v56 = vpop.f32.mrf.mxu1  ;;  %v14666_v13 = vpop.f32.mrf.mxu0  ;;  %v17528_v40 = vadd.f32 %v14661_v18, %v10885_v23 }
 0x59e   : > { %v10563_v5 = vpop.f32.mrf.mxu1  ;;  %v11237_v55 = vpop.f32.mrf.mxu0 }
 0x59f   : > { %v10696_v11 = vrot.slane %v10563_v5, 7 }
 0x5a0   : > { %v14589_v16 = vpop.f32.mrf.mxu1  ;;  %v14669_v15 = vpop.f32.mrf.mxu0 }
 0x5a1   : > { %v10740_v10 = vsel %vm885_vm1, %v10696_v11, %v10697_v31  ;;  %v10741_v54 = vsel %vm885_vm1, %v10695_v42, %v10696_v11  ;;  %v10701_v45 = vrot.slane %v14589_v16, 7 }
 0x5a2   : > { %v10889_v35 = vadd.f32 %v10740_v10, %v17349_v48  ;;  %v10888_v52 = vadd.f32 %v10741_v54, %v17356_v61  ;;  %v10576_v4 = vpop.f32.mrf.mxu1  ;;  %v11250_v18 = vpop.f32.mrf.mxu0 }
 0x5a3   : > { %v10699_v50 = vrot.slane %v10576_v4, 7 }
 0x5a4   : > { %v17536_v44 = vadd.f32 %v11237_v55, %v10888_v52  ;;  %v14590_v49 = vpop.f32.mrf.mxu1  ;;  %v14670_v21 = vpop.f32.mrf.mxu0  ;;  %v17538_v63 = vadd.f32 %v14665_v46, %v10889_v35 }
 0x5a6   : > { %v10579_v53 = vpop.f32.mrf.mxu1  ;;  %v11253_v37 = vpop.f32.mrf.mxu0 }
 0x5a7   : > { %v10700_v7 = vrot.slane %v10579_v53, 7 }
 0x5a8   : > { %v14593_v1 = vpop.f32.mrf.mxu1  ;;  %v14673_v9 = vpop.f32.mrf.mxu0 }
 0x5a9   : > { %v10736_v48 = vsel %vm885_vm1, %v10700_v7, %v10701_v45  ;;  %v10737_v61 = vsel %vm885_vm1, %v10699_v50, %v10700_v7  ;;  %v10705_v42 = vrot.slane %v14593_v1, 7 }
 0x5aa   : > { %v10893_v23 = vadd.f32 %v10736_v48, %v17361_v24  ;;  %v10892_v8 = vadd.f32 %v10737_v61, %v17368_v57  ;;  %v10592_v14 = vpop.f32.mrf.mxu1  ;;  %v11266_v46 = vpop.f32.mrf.mxu0 }
 0x5ab   : > { %v10703_v11 = vrot.slane %v10592_v14, 7 }
 0x5ac   : > { %v17546_v59 = vadd.f32 %v11253_v37, %v10892_v8  ;;  %v14594_v56 = vpop.f32.mrf.mxu1  ;;  %v14674_v13 = vpop.f32.mrf.mxu0  ;;  %v17548_v5 = vadd.f32 %v14669_v15, %v10893_v23 }
 0x5ae   : > { %v10595_v55 = vpop.f32.mrf.mxu1  ;;  %v11269_v31 = vpop.f32.mrf.mxu0 }
 0x5af   : > { %v10704_v16 = vrot.slane %v10595_v55, 7 }
 0x5b0   : > { %v14597_v10 = vpop.f32.mrf.mxu1  ;;  %v14677_v54 = vpop.f32.mrf.mxu0 }
 0x5b1   : > { %v10732_v24 = vsel %vm885_vm1, %v10704_v16, %v10705_v42  ;;  %v10733_v57 = vsel %vm885_vm1, %v10703_v11, %v10704_v16  ;;  %v10709_v50 = vrot.slane %v14597_v10, 7 }
 0x5b2   : > { %v10897_v35 = vadd.f32 %v10732_v24, %v17373_v62  ;;  %v10896_v52 = vadd.f32 %v10733_v57, %v17380_v27  ;;  %v10608_v4 = vpop.f32.mrf.mxu1  ;;  %v11282_v15 = vpop.f32.mrf.mxu0 }
 0x5b3   : > { %v10707_v7 = vrot.slane %v10608_v4, 7 }
 0x5b4   : > { %v17556_v18 = vadd.f32 %v11269_v31, %v10896_v52  ;;  %v14598_v49 = vpop.f32.mrf.mxu1  ;;  %v14678_v21 = vpop.f32.mrf.mxu0  ;;  %v17558_v53 = vadd.f32 %v14673_v9, %v10897_v35 }
 0x5b6   : > { %v10611_v37 = vpop.f32.mrf.mxu1  ;;  %v11285_v45 = vpop.f32.mrf.mxu0 }
 0x5b7   : > { %v10708_v1 = vrot.slane %v10611_v37, 7 }
 0x5b8   : > { %v14601_v48 = vpop.f32.mrf.mxu1  ;;  %v14681_v61 = vpop.f32.mrf.mxu0 }
 0x5b9   : > { %v10728_v62 = vsel %vm885_vm1, %v10708_v1, %v10709_v50  ;;  %v10729_v27 = vsel %vm885_vm1, %v10707_v7, %v10708_v1  ;;  %v10713_v11 = vrot.slane %v14601_v48, 7 }
 0x5ba   : > { %v10901_v23 = vadd.f32 %v10728_v62, %v17385_v25  ;;  %v10900_v8 = vadd.f32 %v10729_v27, %v17392_v26  ;;  %v10624_v14 = vpop.f32.mrf.mxu1  ;;  %v11298_v9 = vpop.f32.mrf.mxu0 }
 0x5bb   : > { %v10711_v16 = vrot.slane %v10624_v14, 7 }
 0x5bc   : > { %v17566_v46 = vadd.f32 %v11285_v45, %v10900_v8  ;;  %v14602_v56 = vpop.f32.mrf.mxu1  ;;  %v14682_v13 = vpop.f32.mrf.mxu0  ;;  %v17568_v55 = vadd.f32 %v14677_v54, %v10901_v23 }
 0x5be   : > { %v10627_v31 = vpop.f32.mrf.mxu1  ;;  %v11301_v42 = vpop.f32.mrf.mxu0 }
 0x5bf   : > { %v10712_v10 = vrot.slane %v10627_v31, 7 }
 0x5c0   : > { %v14605_v24 = vpop.f32.mrf.mxu1  ;;  %v14685_v57 = vpop.f32.mrf.mxu0 }
 0x5c1   : > { %v10724_v25 = vsel %vm885_vm1, %v10712_v10, %v10713_v11  ;;  %v10725_v26 = vsel %vm885_vm1, %v10711_v16, %v10712_v10  ;;  %v10717_v50 = vrot.slane %v14605_v24, 7 }
 0x5c2   : > { %v10905_v35 = vadd.f32 %v10724_v25, %v17397_v3  ;;  %v10904_v52 = vadd.f32 %v10725_v26, %v17404_v0  ;;  %v10640_v4 = vpop.f32.mrf.mxu1  ;;  %v11314_v54 = vpop.f32.mrf.mxu0 }
 0x5c3   : > { %v10715_v7 = vrot.slane %v10640_v4, 7 }
 0x5c4   : > { %v17576_v15 = vadd.f32 %v11301_v42, %v10904_v52  ;;  %v14606_v49 = vpop.f32.mrf.mxu1  ;;  %v14686_v21 = vpop.f32.mrf.mxu0  ;;  %v17578_v37 = vadd.f32 %v14681_v61, %v10905_v35 }
 0x5c6   : > { %v10643_v45 = vpop.f32.mrf.mxu1 }
 0x5c7   : > { %v10716_v1 = vrot.slane %v10643_v45, 7 }
 0x5c8   : > { %v14705_v48 = vpop.f32.mrf.mxu1 }
 0x5c9   : > { %v10720_v62 = vsel %vm885_vm1, %v10716_v1, %v10717_v50  ;;  %v10721_v3 = vsel %vm885_vm1, %v10715_v7, %v10716_v1  ;;  %v11877_v56 = vrot.slane %v14705_v48, 1 }
 0x5ca   : > { %v10909_v0 = vadd.f32 %v10720_v62, %v17409_v22  ;;  %v11620_v27 = vpop.f32.mrf.mxu1  ;;  %v17586_v23 = vadd.f32 %v10721_v3, %v17415_v33  ;;  %v17598_v33 = vld [vmem:[%s17742_s2 + $0x1] ss:$0 sm:$0xff] }
 0x5cc   : > { %v14706_v8 = vpop.f32.mrf.mxu1  ;;  %v17588_v61 = vadd.f32 %v14685_v57, %v10909_v0 }
 0x5cd   : > { %v11878_v14 = vrot.slane %v14706_v8, 1 }
 0x5ce   : > { %v11623_v9 = vpop.f32.mrf.mxu1 }
 0x5cf   : > { %v11876_v13 = vrot.slane %v11623_v9, 1  ;;  %v11999_v42 = vsel %vm1978_vm2, %v11877_v56, %v11878_v14 }
 0x5d0   : > { %v14709_v31 = vpop.f32.mrf.mxu1  ;;  %v12069_v22 = vadd.f32 %v11999_v42, %v17427_v34 }
 0x5d1   : > { %v12000_v16 = vsel %vm1978_vm2, %v11876_v13, %v11877_v56  ;;  %v11881_v24 = vrot.slane %v14709_v31, 1 }
 0x5d2   : > { %v11636_v11 = vpop.f32.mrf.mxu1  ;;  %v12068_v25 = vadd.f32 %v12000_v16, %v17425_v47  ;;  %v12236_v4 = vadd.f32 %v17598_v33, %v12069_v22 }
 0x5d4   : > { %v14710_v10 = vpop.f32.mrf.mxu1  ;;  %v12235_v21 = vadd.f32 %v17598_v33, %v12068_v25  ;;  %v12268_v7 = vmax.f32 %v12236_v4, 0.0 }
 0x5d5   : > { %v11882_v57 = vrot.slane %v14710_v10, 1 }
 0x5d6   : > { %v11639_v26 = vpop.f32.mrf.mxu1  ;;  %v12267_v0 = vmax.f32 %v12235_v21, 0.0 }
 0x5d7   : > { %v11995_v35 = vsel %vm1978_vm2, %v11881_v24, %v11882_v57  ;;  %v11880_v52 = vrot.slane %v11639_v26, 1 }
 0x5d8   : > { %v12073_v54 = vadd.f32 %v11995_v35, %v17439_v17  ;;  %v14713_v34 = vpop.f32.mrf.mxu1 }
 0x5d9   : > { %v11996_v49 = vsel %vm1978_vm2, %v11880_v52, %v11881_v24  ;;  %v11885_v14 = vrot.slane %v14713_v34, 1 }
 0x5da   : > { %v12238_v45 = vadd.f32 %v17598_v33, %v12073_v54  ;;  %v12072_v50 = vadd.f32 %v11996_v49, %v17437_v51  ;;  %v11652_v47 = vpop.f32.mrf.mxu1 }
 0x5dc   : > { %v12270_v1 = vmax.f32 %v12238_v45, 0.0  ;;  %v12237_v48 = vadd.f32 %v17598_v33, %v12072_v50  ;;  %v14714_v62 = vpop.f32.mrf.mxu1 }
 0x5dd   : > { %v11886_v3 = vrot.slane %v14714_v62, 1 }
 0x5de   : > { %v12300_v27 = vmax.f32 %v12268_v7, %v12270_v1  ;;  %v12269_v17 = vmax.f32 %v12237_v48, 0.0  ;;  %v11655_v8 = vpop.f32.mrf.mxu1 }
 0x5df   : > { %v11884_v9 = vrot.slane %v11655_v8, 1  ;;  %v11991_v51 = vsel %vm1978_vm2, %v11885_v14, %v11886_v3 }
 0x5e0   : > { %12316 = vst [vmem:[#allocation5 + $0x8] sm:$0xff] %v12300_v27  ;;  %v12299_v56 = vmax.f32 %v12267_v0, %v12269_v17  ;;  %v14717_v13 = vpop.f32.mrf.mxu1  ;;  %v12077_v11 = vadd.f32 %v11991_v51, %v17451_v60 }
 0x5e1   : > { %v11992_v42 = vsel %vm1978_vm2, %v11884_v9, %v11885_v14  ;;  %v11889_v22 = vrot.slane %v14717_v13, 1 }
 0x5e2   : > { %12315 = vst [vmem:[#allocation5] sm:$0xff] %v12299_v56  ;;  %v11668_v31 = vpop.f32.mrf.mxu1  ;;  %v12076_v24 = vadd.f32 %v11992_v42, %v17449_v28  ;;  %v12240_v35 = vadd.f32 %v17598_v33, %v12077_v11 }
 0x5e4   : > { %v14718_v16 = vpop.f32.mrf.mxu1  ;;  %v12239_v49 = vadd.f32 %v17598_v33, %v12076_v24  ;;  %v12272_v50 = vmax.f32 %v12240_v35, 0.0 }
 0x5e5   : > { %v11890_v10 = vrot.slane %v14718_v16, 1 }
 0x5e6   : > { %v11671_v57 = vpop.f32.mrf.mxu1  ;;  %v12271_v62 = vmax.f32 %v12239_v49, 0.0 }
 0x5e7   : > { %v11987_v25 = vsel %vm1978_vm2, %v11889_v22, %v11890_v10  ;;  %v11888_v26 = vrot.slane %v11671_v57, 1 }
 0x5e8   : > { %v12081_v52 = vadd.f32 %v11987_v25, %v17463_v6  ;;  %v14721_v4 = vpop.f32.mrf.mxu1 }
 0x5e9   : > { %v12331_v60 = vld [vmem:[#allocation5] ss:$2 sm:$0xff]  ;;  %v12347_v54 = vld [vmem:[#allocation5 + $0x1] ss:$2 sm:$0xff]  ;;  %v11988_v28 = vsel %vm1978_vm2, %v11888_v26, %v11889_v22  ;;  %v11893_v17 = vrot.slane %v14721_v4, 1 }
 0x5ea   : > { %v12362_v34 = vmax.f32 %v12331_v60, %v12347_v54  ;;  %v12242_v21 = vadd.f32 %v17598_v33, %v12081_v52  ;;  %v12080_v45 = vadd.f32 %v11988_v28, %v17461_v58  ;;  %v11684_v6 = vpop.f32.mrf.mxu1 }
 0x5ec   : > { %12370 = vst [vmem:[%s17625_s8] sm:$0xff] %v12362_v34  ;;  %v12274_v47 = vmax.f32 %v12242_v21, 0.0  ;;  %v12241_v7 = vadd.f32 %v17598_v33, %v12080_v45  ;;  %v14722_v1 = vpop.f32.mrf.mxu1 }
 0x5ed   : > { %v11894_v48 = vrot.slane %v14722_v1, 1 }
 0x5ee   : > { %v12302_v3 = vmax.f32 %v12272_v50, %v12274_v47  ;;  %v12273_v0 = vmax.f32 %v12241_v7, 0.0  ;;  %v11687_v27 = vpop.f32.mrf.mxu1 }
 0x5ef   : > { %v11892_v8 = vrot.slane %v11687_v27, 1  ;;  %v11983_v58 = vsel %vm1978_vm2, %v11893_v17, %v11894_v48 }
 0x5f0   : > { %12318 = vst [vmem:[#allocation5 + $0x18] sm:$0xff] %v12302_v3  ;;  %v12301_v14 = vmax.f32 %v12271_v62, %v12273_v0  ;;  %v14725_v9 = vpop.f32.mrf.mxu1  ;;  %v12085_v51 = vadd.f32 %v11983_v58, %v17475_v36 }
 0x5f1   : > { %v11984_v13 = vsel %vm1978_vm2, %v11892_v8, %v11893_v17  ;;  %v11897_v42 = vrot.slane %v14725_v9, 1 }
 0x5f2   : > { %12317 = vst [vmem:[#allocation5 + $0x10] sm:$0xff] %v12301_v14  ;;  %v11700_v56 = vpop.f32.mrf.mxu1  ;;  %v12084_v16 = vadd.f32 %v11984_v13, %v17473_v2  ;;  %v12244_v57 = vadd.f32 %v17598_v33, %v12085_v51 }
 0x5f4   : > { %v14726_v31 = vpop.f32.mrf.mxu1  ;;  %v12243_v60 = vadd.f32 %v17598_v33, %v12084_v16  ;;  %v12276_v34 = vmax.f32 %v12244_v57, 0.0 }
 0x5f5   : > { %v11898_v11 = vrot.slane %v14726_v31, 1 }
 0x5f6   : > { %v11703_v22 = vpop.f32.mrf.mxu1  ;;  %v12275_v6 = vmax.f32 %v12243_v60, 0.0 }
 0x5f7   : > { %v11979_v10 = vsel %vm1978_vm2, %v11897_v42, %v11898_v11  ;;  %v11896_v24 = vrot.slane %v11703_v22, 1 }
 0x5f8   : > { %v12089_v25 = vadd.f32 %v11979_v10, %v17487_v12  ;;  %v14729_v26 = vpop.f32.mrf.mxu1 }
 0x5f9   : > { %v12333_v35 = vld [vmem:[#allocation5 + $0x10] ss:$2 sm:$0xff]  ;;  %v12349_v52 = vld [vmem:[#allocation5 + $0x11] ss:$2 sm:$0xff]  ;;  %v11980_v36 = vsel %vm1978_vm2, %v11896_v24, %v11897_v42  ;;  %v11901_v1 = vrot.slane %v14729_v26, 1 }
 0x5fa   : > { %v12363_v4 = vmax.f32 %v12333_v35, %v12349_v52  ;;  %v12246_v2 = vadd.f32 %v17598_v33, %v12089_v25  ;;  %v12088_v54 = vadd.f32 %v11980_v36, %v17485_v19  ;;  %v11716_v28 = vpop.f32.mrf.mxu1 }
 0x5fc   : > { %12371 = vst [vmem:[%s17625_s8 + $0x8] sm:$0xff] %v12363_v4  ;;  %v12278_v49 = vmax.f32 %v12246_v2, 0.0  ;;  %v12245_v21 = vadd.f32 %v17598_v33, %v12088_v54  ;;  %v14730_v12 = vpop.f32.mrf.mxu1 }
 0x5fd   : > { %v11902_v45 = vrot.slane %v14730_v12, 1 }
 0x5fe   : > { %v12304_v50 = vmax.f32 %v12276_v34, %v12278_v49  ;;  %v12277_v47 = vmax.f32 %v12245_v21, 0.0  ;;  %v11719_v7 = vpop.f32.mrf.mxu1 }
 0x5ff   : > { %v11900_v48 = vrot.slane %v11719_v7, 1  ;;  %v11975_v19 = vsel %vm1978_vm2, %v11901_v1, %v11902_v45 }
 0x600   : > { %12320 = vst [vmem:[#allocation5 + $0x28] sm:$0xff] %v12304_v50  ;;  %v12303_v62 = vmax.f32 %v12275_v6, %v12277_v47  ;;  %v14733_v3 = vpop.f32.mrf.mxu1  ;;  %v12093_v17 = vadd.f32 %v11975_v19, %v17498_v32 }
 0x601   : > { %v11976_v27 = vsel %vm1978_vm2, %v11900_v48, %v11901_v1  ;;  %v11905_v14 = vrot.slane %v14733_v3, 1 }
 0x602   : > { %12319 = vst [vmem:[#allocation5 + $0x20] sm:$0xff] %v12303_v62  ;;  %v11732_v0 = vpop.f32.mrf.mxu1  ;;  %v12092_v58 = vadd.f32 %v11976_v27, %v17496_v20  ;;  %v12248_v31 = vadd.f32 %v17598_v33, %v12093_v17 }
 0x604   : > { %v14734_v8 = vpop.f32.mrf.mxu1  ;;  %v12247_v24 = vadd.f32 %v17598_v33, %v12092_v58  ;;  %v12280_v26 = vmax.f32 %v12248_v31, 0.0 }
 0x605   : > { %v11906_v9 = vrot.slane %v14734_v8, 1 }
 0x606   : > { %v11735_v56 = vpop.f32.mrf.mxu1  ;;  %v12279_v4 = vmax.f32 %v12247_v24, 0.0 }
 0x607   : > { %v11971_v13 = vsel %vm1978_vm2, %v11905_v14, %v11906_v9  ;;  %v11904_v51 = vrot.slane %v11735_v56, 1 }
 0x608   : > { %v12097_v42 = vadd.f32 %v11971_v13, %v17508_v30  ;;  %v14737_v11 = vpop.f32.mrf.mxu1 }
 0x609   : > { %v12335_v16 = vld [vmem:[#allocation5 + $0x20] ss:$2 sm:$0xff]  ;;  %v12351_v22 = vld [vmem:[#allocation5 + $0x21] ss:$2 sm:$0xff]  ;;  %v11972_v32 = vsel %vm1978_vm2, %v11904_v51, %v11905_v14  ;;  %v11909_v28 = vrot.slane %v14737_v11, 1 }
 0x60a   : > { %v12364_v10 = vmax.f32 %v12335_v16, %v12351_v22  ;;  %v12250_v20 = vadd.f32 %v17598_v33, %v12097_v42  ;;  %v12096_v57 = vadd.f32 %v11972_v32, %v17506_v39  ;;  %v11748_v25 = vpop.f32.mrf.mxu1 }
 0x60c   : > { %12372 = vst [vmem:[%s17625_s8 + $0x10] sm:$0xff] %v12364_v10  ;;  %v12282_v35 = vmax.f32 %v12250_v20, 0.0  ;;  %v12249_v52 = vadd.f32 %v17598_v33, %v12096_v57  ;;  %v14738_v30 = vpop.f32.mrf.mxu1 }
 0x60d   : > { %v11910_v36 = vrot.slane %v14738_v30, 1 }
 0x60e   : > { %v12306_v60 = vmax.f32 %v12280_v26, %v12282_v35  ;;  %v12281_v2 = vmax.f32 %v12249_v52, 0.0  ;;  %v11751_v54 = vpop.f32.mrf.mxu1 }
 0x60f   : > { %v11908_v34 = vrot.slane %v11751_v54, 1  ;;  %v11967_v39 = vsel %vm1978_vm2, %v11909_v28, %v11910_v36 }
 0x610   : > { %12322 = vst [vmem:[#allocation5 + $0x38] sm:$0xff] %v12306_v60  ;;  %v12305_v49 = vmax.f32 %v12279_v4, %v12281_v2  ;;  %v14741_v21 = vpop.f32.mrf.mxu1  ;;  %v12101_v6 = vadd.f32 %v11967_v39, %v17518_v41 }
 0x611   : > { %v11968_v45 = vsel %vm1978_vm2, %v11908_v34, %v11909_v28  ;;  %v11913_v47 = vrot.slane %v14741_v21, 1 }
 0x612   : > { %12321 = vst [vmem:[#allocation5 + $0x30] sm:$0xff] %v12305_v49  ;;  %v11764_v12 = vpop.f32.mrf.mxu1  ;;  %v12100_v1 = vadd.f32 %v11968_v45, %v17516_v38  ;;  %v12252_v19 = vadd.f32 %v17598_v33, %v12101_v6 }
 0x614   : > { %v14742_v50 = vpop.f32.mrf.mxu1  ;;  %v12251_v9 = vadd.f32 %v17598_v33, %v12100_v1  ;;  %v12284_v13 = vmax.f32 %v12252_v19, 0.0 }
 0x615   : > { %v11914_v7 = vrot.slane %v14742_v50, 1 }
 0x616   : > { %v11767_v48 = vpop.f32.mrf.mxu1  ;;  %v12283_v11 = vmax.f32 %v12251_v9, 0.0 }
 0x617   : > { %v11963_v62 = vsel %vm1978_vm2, %v11913_v47, %v11914_v7  ;;  %v11912_v3 = vrot.slane %v11767_v48, 1 }
 0x618   : > { %v12105_v0 = vadd.f32 %v11963_v62, %v17528_v40  ;;  %v14745_v27 = vpop.f32.mrf.mxu1 }
 0x619   : > { %v12337_v17 = vld [vmem:[#allocation5 + $0x30] ss:$2 sm:$0xff]  ;;  %v12353_v8 = vld [vmem:[#allocation5 + $0x31] ss:$2 sm:$0xff]  ;;  %v11964_v41 = vsel %vm1978_vm2, %v11912_v3, %v11913_v47  ;;  %v11917_v10 = vrot.slane %v14745_v27, 1 }
 0x61a   : > { %v12365_v14 = vmax.f32 %v12337_v17, %v12353_v8  ;;  %v12254_v38 = vadd.f32 %v17598_v33, %v12105_v0  ;;  %v12104_v58 = vadd.f32 %v11964_v41, %v17526_v29  ;;  %v11780_v56 = vpop.f32.mrf.mxu1 }
 0x61c   : > { %12373 = vst [vmem:[%s17625_s8 + $0x18] sm:$0xff] %v12365_v14  ;;  %v12286_v51 = vmax.f32 %v12254_v38, 0.0  ;;  %v12253_v31 = vadd.f32 %v17598_v33, %v12104_v58  ;;  %v14746_v40 = vpop.f32.mrf.mxu1 }
 0x61d   : > { %v11918_v42 = vrot.slane %v14746_v40, 1 }
 0x61e   : > { %v12308_v16 = vmax.f32 %v12284_v13, %v12286_v51  ;;  %v12285_v22 = vmax.f32 %v12253_v31, 0.0  ;;  %v11783_v32 = vpop.f32.mrf.mxu1 }
 0x61f   : > { %v11916_v24 = vrot.slane %v11783_v32, 1  ;;  %v11959_v29 = vsel %vm1978_vm2, %v11917_v10, %v11918_v42 }
 0x620   : > { %12324 = vst [vmem:[#allocation5 + $0x48] sm:$0xff] %v12308_v16  ;;  %v12307_v20 = vmax.f32 %v12283_v11, %v12285_v22  ;;  %v14749_v57 = vpop.f32.mrf.mxu1  ;;  %v12109_v35 = vadd.f32 %v11959_v29, %v17538_v63 }
 0x621   : > { %v11960_v26 = vsel %vm1978_vm2, %v11916_v24, %v11917_v10  ;;  %v11921_v30 = vrot.slane %v14749_v57, 1 }
 0x622   : > { %12323 = vst [vmem:[#allocation5 + $0x40] sm:$0xff] %v12307_v20  ;;  %v11796_v25 = vpop.f32.mrf.mxu1  ;;  %v12108_v4 = vadd.f32 %v11960_v26, %v17536_v44  ;;  %v12256_v28 = vadd.f32 %v17598_v33, %v12109_v35 }
 0x624   : > { %v14750_v52 = vpop.f32.mrf.mxu1  ;;  %v12255_v45 = vadd.f32 %v17598_v33, %v12108_v4  ;;  %v12288_v47 = vmax.f32 %v12256_v28, 0.0 }
 0x625   : > { %v11922_v36 = vrot.slane %v14750_v52, 1 }
 0x626   : > { %v11799_v60 = vpop.f32.mrf.mxu1  ;;  %v12287_v62 = vmax.f32 %v12255_v45, 0.0 }
 0x627   : > { %v11955_v2 = vsel %vm1978_vm2, %v11921_v30, %v11922_v36  ;;  %v11920_v54 = vrot.slane %v11799_v60, 1 }
 0x628   : > { %v12113_v34 = vadd.f32 %v11955_v2, %v17548_v5  ;;  %v14753_v49 = vpop.f32.mrf.mxu1 }
 0x629   : > { %v12339_v21 = vld [vmem:[#allocation5 + $0x40] ss:$2 sm:$0xff]  ;;  %v12355_v39 = vld [vmem:[#allocation5 + $0x41] ss:$2 sm:$0xff]  ;;  %v11956_v63 = vsel %vm1978_vm2, %v11920_v54, %v11921_v30  ;;  %v11925_v27 = vrot.slane %v14753_v49, 1 }
 0x62a   : > { %v12366_v12 = vmax.f32 %v12339_v21, %v12355_v39  ;;  %v12258_v44 = vadd.f32 %v17598_v33, %v12113_v34  ;;  %v12112_v6 = vadd.f32 %v11956_v63, %v17546_v59  ;;  %v11812_v50 = vpop.f32.mrf.mxu1 }
 0x62c   : > { %12374 = vst [vmem:[%s17625_s8 + $0x20] sm:$0xff] %v12366_v12  ;;  %v12290_v7 = vmax.f32 %v12258_v44, 0.0  ;;  %v12257_v1 = vadd.f32 %v17598_v33, %v12112_v6  ;;  %v14754_v5 = vpop.f32.mrf.mxu1  ;;  %v11317_v12 = vpop.f32.mrf.mxu0 }
 0x62d   : > { %v11926_v48 = vrot.slane %v14754_v5, 1 }
 0x62e   : > { %v12310_v3 = vmax.f32 %v12288_v47, %v12290_v7  ;;  %v12289_v19 = vmax.f32 %v12257_v1, 0.0  ;;  %v11815_v0 = vpop.f32.mrf.mxu1  ;;  %v11454_v1 = vadd.f32 %v11317_v12, %v17586_v23 }
 0x62f   : > { %v11924_v17 = vrot.slane %v11815_v0, 1  ;;  %v11951_v59 = vsel %vm1978_vm2, %v11925_v27, %v11926_v48 }
 0x630   : > { %12326 = vst [vmem:[#allocation5 + $0x58] sm:$0xff] %v12310_v3  ;;  %v12309_v8 = vmax.f32 %v12287_v62, %v12289_v19  ;;  %v14757_v41 = vpop.f32.mrf.mxu1  ;;  %v12117_v38 = vadd.f32 %v11951_v59, %v17558_v53 }
 0x631   : > { %v11952_v9 = vsel %vm1978_vm2, %v11924_v17, %v11925_v27  ;;  %v11929_v56 = vrot.slane %v14757_v41, 1 }
 0x632   : > { %12325 = vst [vmem:[#allocation5 + $0x50] sm:$0xff] %v12309_v8  ;;  %v11828_v14 = vpop.f32.mrf.mxu1  ;;  %v12116_v51 = vadd.f32 %v11952_v9, %v17556_v18  ;;  %v12260_v11 = vadd.f32 %v17598_v33, %v12117_v38 }
 0x634   : > { %v14758_v58 = vpop.f32.mrf.mxu1  ;;  %v12259_v20 = vadd.f32 %v17598_v33, %v12116_v51  ;;  %v12292_v25 = vmax.f32 %v12260_v11, 0.0 }
 0x635   : > { %v11930_v13 = vrot.slane %v14758_v58, 1 }
 0x636   : > { %v11831_v31 = vpop.f32.mrf.mxu1  ;;  %v12291_v30 = vmax.f32 %v12259_v20, 0.0 }
 0x637   : > { %v11947_v40 = vsel %vm1978_vm2, %v11929_v56, %v11930_v13  ;;  %v11928_v42 = vrot.slane %v11831_v31, 1 }
 0x638   : > { %v12121_v16 = vadd.f32 %v11947_v40, %v17568_v55  ;;  %v14761_v22 = vpop.f32.mrf.mxu1 }
 0x639   : > { %v12341_v32 = vld [vmem:[#allocation5 + $0x50] ss:$2 sm:$0xff]  ;;  %v12357_v10 = vld [vmem:[#allocation5 + $0x51] ss:$2 sm:$0xff]  ;;  %v11948_v53 = vsel %vm1978_vm2, %v11928_v42, %v11929_v56  ;;  %v11933_v2 = vrot.slane %v14761_v22, 1 }
 0x63a   : > { %v12367_v24 = vmax.f32 %v12341_v32, %v12357_v10  ;;  %v12262_v18 = vadd.f32 %v17598_v33, %v12121_v16  ;;  %v12120_v57 = vadd.f32 %v11948_v53, %v17566_v46  ;;  %v11844_v29 = vpop.f32.mrf.mxu1 }
 0x63c   : > { %12375 = vst [vmem:[%s17625_s8 + $0x28] sm:$0xff] %v12367_v24  ;;  %v12294_v26 = vmax.f32 %v12262_v18, 0.0  ;;  %v12261_v35 = vadd.f32 %v17598_v33, %v12120_v57  ;;  %v14762_v55 = vpop.f32.mrf.mxu1 }
 0x63d   : > { %v11934_v52 = vrot.slane %v14762_v55, 1 }
 0x63e   : > { %v12312_v36 = vmax.f32 %v12292_v25, %v12294_v26  ;;  %v12293_v4 = vmax.f32 %v12261_v35, 0.0  ;;  %v11847_v60 = vpop.f32.mrf.mxu1 }
 0x63f   : > { %v11932_v54 = vrot.slane %v11847_v60, 1  ;;  %v11943_v46 = vsel %vm1978_vm2, %v11933_v2, %v11934_v52 }
 0x640   : > { %12328 = vst [vmem:[#allocation5 + $0x68] sm:$0xff] %v12312_v36  ;;  %v12311_v28 = vmax.f32 %v12291_v30, %v12293_v4  ;;  %v14765_v34 = vpop.f32.mrf.mxu1  ;;  %v12125_v39 = vadd.f32 %v11943_v46, %v17578_v37 }
 0x641   : > { %v11944_v21 = vsel %vm1978_vm2, %v11932_v54, %v11933_v2  ;;  %v11937_v45 = vrot.slane %v14765_v34, 1 }
 0x642   : > { %12327 = vst [vmem:[#allocation5 + $0x60] sm:$0xff] %v12311_v28  ;;  %v11860_v49 = vpop.f32.mrf.mxu1  ;;  %v12124_v6 = vadd.f32 %v11944_v21, %v17576_v15  ;;  %v12264_v5 = vadd.f32 %v17598_v33, %v12125_v39 }
 0x644   : > { %v14766_v63 = vpop.f32.mrf.mxu1  ;;  %v12263_v0 = vadd.f32 %v17598_v33, %v12124_v6  ;;  %v12296_v17 = vmax.f32 %v12264_v5, 0.0 }
 0x645   : > { %v11938_v44 = vrot.slane %v14766_v63, 1 }
 0x646   : > { %v11863_v50 = vpop.f32.mrf.mxu1  ;;  %v12295_v41 = vmax.f32 %v12263_v0, 0.0 }
 0x647   : > { %v11939_v47 = vsel %vm1978_vm2, %v11937_v45, %v11938_v44  ;;  %v11936_v7 = vrot.slane %v11863_v50, 1 }
 0x648   : > { %v12129_v48 = vadd.f32 %v11939_v47, %v17588_v61 }
 0x649   : > { %v12343_v62 = vld [vmem:[#allocation5 + $0x60] ss:$2 sm:$0xff]  ;;  %v12359_v37 = vld [vmem:[#allocation5 + $0x61] ss:$2 sm:$0xff]  ;;  %v11940_v3 = vsel %vm1978_vm2, %v11936_v7, %v11937_v45 }
 0x64a   : > { %v12368_v19 = vmax.f32 %v12343_v62, %v12359_v37  ;;  %v12266_v15 = vadd.f32 %v17598_v33, %v12129_v48  ;;  %v12128_v27 = vadd.f32 %v11940_v3, %v11454_v1 }
 0x64c   : > { %12376 = vst [vmem:[%s17625_s8 + $0x30] sm:$0xff] %v12368_v19  ;;  %v12298_v8 = vmax.f32 %v12266_v15, 0.0  ;;  %v12265_v23 = vadd.f32 %v17598_v33, %v12128_v27 }
 0x64e   : > { %v12314_v59 = vmax.f32 %v12296_v17, %v12298_v8  ;;  %v12297_v61 = vmax.f32 %v12265_v23, 0.0 }
 0x650   : > { %12330 = vst [vmem:[#allocation5 + $0x78] sm:$0xff] %v12314_v59  ;;  %v12313_v14 = vmax.f32 %v12295_v41, %v12297_v61 }
 0x652   : > { %12329 = vst [vmem:[#allocation5 + $0x70] sm:$0xff] %v12313_v14 }
 0x659   : > { %v12345_v43 = vld [vmem:[#allocation5 + $0x70] ss:$2 sm:$0xff]  ;;  %v12361_v9 = vld [vmem:[#allocation5 + $0x71] ss:$2 sm:$0xff] }
 0x65a   : > { %v12369_v38 = vmax.f32 %v12345_v43, %v12361_v9 }
 0x65c   : > { %12377 = vst [vmem:[%s17625_s8 + $0x38] sm:$0xff] %v12369_v38 }
 0x65d PF: > { %s14_s12 = sadd.s32 1, %s14975_s12  }
 0x65e   : > { %p11_p1 = scmp.ge.s32.totalorder %s14_s12, 4  }
 0x660   :  { %13 = sbr.rel (!%p11_p1) target bundleno = 1 (0x1), region = 105 }
 0x665   :  { %12399 = vsyncpa [#allocation7], 1 }
 0x666   :  { %12401 = vsyncpa [#allocation7 + $0x1], 1 }

</bundles_post_ra>
